<compile_context>
chip_gen: v7x
topology: tpu7x:2x2x1
jax: 0.10.0
libtpu: 0.0.40
codegen_flags: <defaults>
</compile_context>

<pallas_src>
import functools

import jax
import jax.numpy as jnp
from jax import lax
from jax.experimental import pallas as pl
from jax.experimental.pallas import tpu as pltpu


def _round_up(x, m):
    return (x + m - 1) // m * m


# ----------------------------------------------------------------------------
# Kernel 1: per edge block -- gather projected node rows, edge features f',
#           LeakyReLU, and per-head attention logits e (VPU reduce, no MXU).
# ----------------------------------------------------------------------------
def edge_kernel(src_ref, dst_ref, efeat_ref, proj_ref, w_fij_ref, bias_ref, attn_ref,
                f_out_ref, e_ref):
    te = src_ref.shape[0]
    n_nodes = proj_ref.shape[0]
    hf = f_out_ref.shape[1]
    h = e_ref.shape[1]
    fout = hf // h

    # One-hot rows generated in-register from the int32 indices (no (E, N) HBM stream).
    node_iota = lax.broadcasted_iota(jnp.int32, (te, n_nodes), 1)
    src_oh = (src_ref[...] == node_iota).astype(jnp.float32)      # (te, N)
    dst_oh = (dst_ref[...] == node_iota).astype(jnp.float32)      # (te, N)

    proj = proj_ref[...]                                          # (N, 2*HF + HD), resident
    f_ni = jnp.dot(src_oh, proj[:, :hf], preferred_element_type=jnp.float32)
    f_nj = jnp.dot(dst_oh, proj[:, hf:2 * hf], preferred_element_type=jnp.float32)
    f_fij = jnp.dot(efeat_ref[...], w_fij_ref[...], preferred_element_type=jnp.float32)

    f_pre = f_ni + f_nj + f_fij + bias_ref[...]
    f_out = jnp.maximum(f_pre, 0.01 * f_pre)                      # LeakyReLU, slope 0.01
    f_out_ref[...] = f_out

    # Attention logits per head: VPU multiply + per-head lane reduction (no MXU op with
    # a 4-lane output).
    weighted = f_out * attn_ref[...]                              # (te, HF)
    e_cols = [jnp.sum(weighted[:, hh * fout:(hh + 1) * fout], axis=1, keepdims=True)
              for hh in range(h)]
    e_ref[...] = jnp.concatenate(e_cols, axis=1)                  # (te, H)


# ----------------------------------------------------------------------------
# Kernel 2: reduction over edge blocks -- gather src messages, scatter-add the
#           softmax numerators / denominators, normalise on the last step.
# ----------------------------------------------------------------------------
def aggregate_kernel(src_ref, dst_row_ref, p_ref, proj_ref, h_out_ref, denom_ref):
    k = pl.program_id(0)
    te = src_ref.shape[0]
    n_nodes = proj_ref.shape[0]
    hd = h_out_ref.shape[1]
    h = p_ref.shape[1]
    dout = hd // h
    hf = (proj_ref.shape[1] - hd) // 2

    @pl.when(k == 0)
    def _init():
        denom_ref[...] = jnp.zeros_like(denom_ref)
        h_out_ref[...] = jnp.zeros_like(h_out_ref)

    # Gather W_node h_src + b_node rows via in-register one-hot matmul.
    iota_e = lax.broadcasted_iota(jnp.int32, (te, n_nodes), 1)
    src_oh = (src_ref[...] == iota_e).astype(jnp.float32)          # (te, N)
    h_src = jnp.dot(src_oh, proj_ref[...][:, 2 * hf:],
                    preferred_element_type=jnp.float32)            # (te, HD)

    # Scatter one-hot generated directly transposed: dst_oh_t[n, e] = (dst[e] == n).
    iota_n = lax.broadcasted_iota(jnp.int32, (n_nodes, te), 0)
    dst_oh_t = (dst_row_ref[...] == iota_n).astype(jnp.float32)    # (N, te)

    p = p_ref[...]                                                 # (te, H), padded rows = 0
    denom_ref[...] += jnp.dot(dst_oh_t, p, preferred_element_type=jnp.float32)   # (N, H)

    # Per-head broadcast of p across the Dout lanes on the VPU (replaces the K=H matmul).
    p_rep = jnp.concatenate(
        [jnp.broadcast_to(p[:, hh:hh + 1], (te, dout)) for hh in range(h)], axis=1)
    m = h_src * p_rep                                              # (te, HD)
    h_out_ref[...] += jnp.dot(dst_oh_t, m, preferred_element_type=jnp.float32)    # (N, HD)

    @pl.when(k == pl.num_programs(0) - 1)
    def _finalize():
        denom = denom_ref[...]
        # Zero in-degree nodes: numerator is exactly 0, so dividing by 1 keeps them 0.
        # (pl.reciprocal(..., approx=True) is available if the tolerance budget allows.)
        inv = 1.0 / jnp.where(denom > 0.0, denom, 1.0)             # (N, H)
        inv_rep = jnp.concatenate(
            [jnp.broadcast_to(inv[:, hh:hh + 1], (n_nodes, dout)) for hh in range(h)],
            axis=1)
        h_out_ref[...] = h_out_ref[...] * inv_rep


@functools.partial(jax.jit,
                   static_argnames=("num_heads", "out_node_feats", "out_edge_feats"))
def egat_forward(nfeats, efeats, src, dst, params, *, num_heads, out_node_feats,
                 out_edge_feats):
    N, in_node = nfeats.shape
    E, in_edge = efeats.shape
    H, Dout, Fout = num_heads, out_node_feats, out_edge_feats
    HF, HD = H * Fout, H * Dout
    w_tot = 2 * HF + HD
    f32 = jnp.float32

    # --- fused node projection (plain XLA GEMM; Pallas launch not worth it here).
    w_cat = jnp.concatenate([params["w_ni"], params["w_nj"], params["w_node"]], axis=1)
    b_cat = jnp.concatenate([jnp.zeros((2 * HF,), f32), params["b_node"]])
    proj = nfeats @ w_cat + b_cat[None, :]                         # (N, 2*HF + HD)

    # --- edge tiling and padding (sentinel node index N -> all-zero one-hot rows).
    te = min(512, _round_up(E, 128))
    E_pad = _round_up(E, te)
    pad = E_pad - E
    sentinel = jnp.int32(N)
    src_p = jnp.concatenate([src.astype(jnp.int32),
                             jnp.full((pad,), sentinel, jnp.int32)])
    dst_p = jnp.concatenate([dst.astype(jnp.int32),
                             jnp.full((pad,), sentinel, jnp.int32)])
    efeats_p = jnp.pad(efeats.astype(f32), ((0, pad), (0, 0)))
    src_col = src_p.reshape(E_pad, 1)
    dst_col = dst_p.reshape(E_pad, 1)
    dst_row = dst_p.reshape(1, E_pad)

    grid_e = (E_pad // te,)
    cparams = lambda sem: pltpu.CompilerParams(dimension_semantics=sem,
                                               vmem_limit_bytes=64 * 1024 * 1024)

    # ---------------- kernel 1: edge features f' and attention logits e ----------------
    f_out_p, e_p = pl.pallas_call(
        edge_kernel,
        out_shape=(jax.ShapeDtypeStruct((E_pad, HF), f32),
                   jax.ShapeDtypeStruct((E_pad, H), f32)),
        grid=grid_e,
        in_specs=[
            pl.BlockSpec((te, 1), lambda i: (i, 0)),           # src indices
            pl.BlockSpec((te, 1), lambda i: (i, 0)),           # dst indices
            pl.BlockSpec((te, in_edge), lambda i: (i, 0)),     # edge features
            pl.BlockSpec((N, w_tot), lambda i: (0, 0)),        # proj (resident)
            pl.BlockSpec((in_edge, HF), lambda i: (0, 0)),     # W_fij
            pl.BlockSpec((1, HF), lambda i: (0, 0)),           # bias
            pl.BlockSpec((1, HF), lambda i: (0, 0)),           # attn (flattened)
        ],
        out_specs=[pl.BlockSpec((te, HF), lambda i: (i, 0)),
                   pl.BlockSpec((te, H), lambda i: (i, 0))],
        compiler_params=cparams(("parallel",)),
    )(src_col, dst_col, efeats_p, proj, params["w_fij"],
      params["bias"].reshape(1, HF), params["attn"].reshape(1, HF))

    # --- exact per-destination softmax max (matches the reference, no global-max underflow).
    e = e_p[:E]                                                    # (E, H)
    seg_max = jax.ops.segment_max(e, dst, num_segments=N)          # (N, H)
    p = jnp.exp(e - seg_max[dst])                                  # (E, H)
    p_pad = jnp.pad(p, ((0, pad), (0, 0)))                         # padded edges -> p = 0

    # ---------------- kernel 2: edge-softmax denominators + scatter-sum aggregation -----
    h_out = pl.pallas_call(
        aggregate_kernel,
        out_shape=jax.ShapeDtypeStruct((N, HD), f32),
        grid=grid_e,
        in_specs=[
            pl.BlockSpec((te, 1), lambda k: (k, 0)),           # src indices
            pl.BlockSpec((1, te), lambda k: (0, k)),           # dst indices (row layout)
            pl.BlockSpec((te, H), lambda k: (k, 0)),           # softmax numerators p
            pl.BlockSpec((N, w_tot), lambda k: (0, 0)),        # proj (resident)
        ],
        out_specs=pl.BlockSpec((N, HD), lambda k: (0, 0)),     # VMEM-resident accumulator
        scratch_shapes=[pltpu.VMEM((N, H), f32)],              # softmax denominators
        compiler_params=cparams(("arbitrary",)),
    )(src_col, dst_row, p_pad, proj)

    return h_out.reshape(N, H, Dout), f_out_p[:E].reshape(E, H, Fout)


# ----------------------------------------------------------------------------
# Pure-JAX reference mirroring the DGL EGATConv forward.
# ----------------------------------------------------------------------------
def egat_reference(nfeats, efeats, src, dst, params, *, num_heads, out_node_feats,
                   out_edge_feats):
    N = nfeats.shape[0]
    E = efeats.shape[0]
    H, Dout, Fout = num_heads, out_node_feats, out_edge_feats

    f_ni = (nfeats @ params["w_ni"])[src]
    f_nj = (nfeats @ params["w_nj"])[dst]
    f_fij = efeats @ params["w_fij"]
    f_pre = f_ni + f_nj + f_fij + params["bias"]
    f_out = jnp.where(f_pre > 0, f_pre, 0.01 * f_pre).reshape(E, H, Fout)

    e = (f_out * params["attn"][None]).sum(-1)                     # (E, H)
    seg_max = jax.ops.segment_max(e, dst, num_segments=N)
    p = jnp.exp(e - seg_max[dst])
    denom = jax.ops.segment_sum(p, dst, num_segments=N)
    a = p / denom[dst]

    h_nodes = (nfeats @ params["w_node"] + params["b_node"]).reshape(N, H, Dout)
    m = h_nodes[src] * a[:, :, None]
    h_out = jax.ops.segment_sum(m, dst, num_segments=N)
    return h_out, f_out


def init_params(key, in_node, in_edge, out_node, out_edge, num_heads):
    """Deterministic init matching the module's parameter shapes (xavier-normal-ish)."""
    gain = 2.0 ** 0.5  # calculate_gain('relu')
    ks = jax.random.split(key, 6)

    def xavier(k, fan_in, fan_out):
        std = gain * (2.0 / (fan_in + fan_out)) ** 0.5
        return std * jax.random.normal(k, (fan_in, fan_out), dtype=jnp.float32)

    H, Dout, Fout = num_heads, out_node, out_edge
    return {
        "w_node": xavier(ks[0], in_node, H * Dout),
        "b_node": 0.01 * jax.random.normal(ks[1], (H * Dout,), dtype=jnp.float32),
        "w_ni":   xavier(ks[2], in_node, H * Fout),
        "w_nj":   xavier(ks[3], in_node, H * Fout),
        "w_fij":  xavier(ks[4], in_edge, H * Fout),
        "attn":   xavier(ks[5], H, Fout),
        "bias":   jnp.zeros((H * Fout,), dtype=jnp.float32),
    }


if __name__ == "__main__":
    # Small synthetic graph; E chosen so the edge axis actually tiles (2 blocks of 512).
    N, E = 32, 1024
    IN_NODE, IN_EDGE = 16, 8
    OUT_NODE, OUT_EDGE, HEADS = 8, 8, 4

    key = jax.random.PRNGKey(0)
    k_n, k_e, k_s, k_d, k_p = jax.random.split(key, 5)

    nfeats = jax.random.normal(k_n, (N, IN_NODE), dtype=jnp.float32)
    efeats = jax.random.normal(k_e, (E, IN_EDGE), dtype=jnp.float32)
    src = jax.random.randint(k_s, (E,), 0, N)
    dst = jax.random.randint(k_d, (E,), 0, N)

    params = init_params(k_p, IN_NODE, IN_EDGE, OUT_NODE, OUT_EDGE, HEADS)

    kw = dict(num_heads=HEADS, out_node_feats=OUT_NODE, out_edge_feats=OUT_EDGE)
    h_out, f_out = egat_forward(nfeats, efeats, src, dst, params, **kw)
    jax.block_until_ready((h_out, f_out))

    h_ref, f_ref = egat_reference(nfeats, efeats, src, dst, params, **kw)

    assert h_out.shape == (N, HEADS, OUT_NODE)
    assert f_out.shape == (E, HEADS, OUT_EDGE)
    assert jnp.allclose(f_out, f_ref, rtol=1e-4, atol=1e-4), \
        float(jnp.max(jnp.abs(f_out - f_ref)))
    assert jnp.allclose(h_out, h_ref, rtol=1e-4, atol=1e-4), \
        float(jnp.max(jnp.abs(h_out - h_ref)))

    print("KERNEL_OK")
</pallas_src>

<mosaic_0001>
module attributes {stable_mosaic.version = 11 : i64} {
  func.func @edge_kernel(%arg0: i32, %arg1: memref<512x1xi32, #tpu.memory_space<vmem>>, %arg2: memref<512x1xi32, #tpu.memory_space<vmem>>, %arg3: memref<512x8xf32, #tpu.memory_space<vmem>>, %arg4: memref<32x96xf32, #tpu.memory_space<vmem>>, %arg5: memref<8x32xf32, #tpu.memory_space<vmem>>, %arg6: memref<1x32xf32, #tpu.memory_space<vmem>>, %arg7: memref<1x32xf32, #tpu.memory_space<vmem>>, %arg8: memref<512x32xf32, #tpu.memory_space<vmem>>, %arg9: memref<512x4xf32, #tpu.memory_space<vmem>>) attributes {dimension_semantics = [#tpu.dimension_semantics<parallel>], iteration_bounds = array<i64: 2>, scalar_prefetch = 0 : i64, scratch_operands = 0 : i64, tpu.core_type = #tpu.core_type<tc>, window_params = [{transform_indices = @transform_0, window_bounds = array<i64: 512, 1>}, {transform_indices = @transform_1, window_bounds = array<i64: 512, 1>}, {transform_indices = @transform_2, window_bounds = array<i64: 512, 8>}, {pipeline_mode = #tpu.pipeline_mode<synchronous>, transform_indices = @transform_3, window_bounds = array<i64: 32, 96>}, {pipeline_mode = #tpu.pipeline_mode<synchronous>, transform_indices = @transform_4, window_bounds = array<i64: 8, 32>}, {pipeline_mode = #tpu.pipeline_mode<synchronous>, transform_indices = @transform_5, window_bounds = array<i64: 1, 32>}, {pipeline_mode = #tpu.pipeline_mode<synchronous>, transform_indices = @transform_6, window_bounds = array<i64: 1, 32>}, {transform_indices = @transform_7, window_bounds = array<i64: 512, 32>}, {transform_indices = @transform_8, window_bounds = array<i64: 512, 4>}]} {
    %0 = tpu.iota {dimensions = array<i32: 1>} : vector<512x32xi32>
    %c0 = arith.constant 0 : index
    %c0_0 = arith.constant 0 : index
    %1 = vector.load %arg1[%c0, %c0_0] : memref<512x1xi32, #tpu.memory_space<vmem>>, vector<512x1xi32>
    %2 = vector.broadcast %1 : vector<512x1xi32> to vector<512x32xi32>
    %3 = arith.cmpi eq, %2, %0 : vector<512x32xi32>
    %4 = arith.extui %3 : vector<512x32xi1> to vector<512x32xi32>
    %5 = arith.sitofp %4 : vector<512x32xi32> to vector<512x32xf32>
    %c0_1 = arith.constant 0 : index
    %c0_2 = arith.constant 0 : index
    %6 = vector.load %arg2[%c0_1, %c0_2] : memref<512x1xi32, #tpu.memory_space<vmem>>, vector<512x1xi32>
    %7 = vector.broadcast %6 : vector<512x1xi32> to vector<512x32xi32>
    %8 = arith.cmpi eq, %7, %0 : vector<512x32xi32>
    %9 = arith.extui %8 : vector<512x32xi1> to vector<512x32xi32>
    %10 = arith.sitofp %9 : vector<512x32xi32> to vector<512x32xf32>
    %c0_3 = arith.constant 0 : index
    %c0_4 = arith.constant 0 : index
    %11 = vector.load %arg4[%c0_3, %c0_4] : memref<32x96xf32, #tpu.memory_space<vmem>>, vector<32x96xf32>
    %12 = vector.extract_strided_slice %11 {offsets = [0, 0], sizes = [32, 32], strides = [1, 1]} : vector<32x96xf32> to vector<32x32xf32>
    %cst = arith.constant dense<0.000000e+00> : vector<512x32xf32>
    %13 = tpu.matmul %5, %12, %cst {dimension_numbers = #tpu.dot_dimension_numbers<[1], [0], [0], [1], [0, 0, 1, 1], [], []>} : vector<512x32xf32>, vector<32x32xf32>, vector<512x32xf32> -> vector<512x32xf32>
    %14 = vector.extract_strided_slice %11 {offsets = [0, 32], sizes = [32, 32], strides = [1, 1]} : vector<32x96xf32> to vector<32x32xf32>
    %cst_5 = arith.constant dense<0.000000e+00> : vector<512x32xf32>
    %15 = tpu.matmul %10, %14, %cst_5 {dimension_numbers = #tpu.dot_dimension_numbers<[1], [0], [0], [1], [0, 0, 1, 1], [], []>} : vector<512x32xf32>, vector<32x32xf32>, vector<512x32xf32> -> vector<512x32xf32>
    %c0_6 = arith.constant 0 : index
    %c0_7 = arith.constant 0 : index
    %16 = vector.load %arg3[%c0_6, %c0_7] : memref<512x8xf32, #tpu.memory_space<vmem>>, vector<512x8xf32>
    %c0_8 = arith.constant 0 : index
    %c0_9 = arith.constant 0 : index
    %17 = vector.load %arg5[%c0_8, %c0_9] : memref<8x32xf32, #tpu.memory_space<vmem>>, vector<8x32xf32>
    %cst_10 = arith.constant dense<0.000000e+00> : vector<512x32xf32>
    %18 = tpu.matmul %16, %17, %cst_10 {dimension_numbers = #tpu.dot_dimension_numbers<[1], [0], [0], [1], [0, 0, 1, 1], [], []>} : vector<512x8xf32>, vector<8x32xf32>, vector<512x32xf32> -> vector<512x32xf32>
    %19 = arith.addf %13, %15 : vector<512x32xf32>
    %20 = arith.addf %19, %18 : vector<512x32xf32>
    %c0_11 = arith.constant 0 : index
    %c0_12 = arith.constant 0 : index
    %21 = vector.load %arg6[%c0_11, %c0_12] : memref<1x32xf32, #tpu.memory_space<vmem>>, vector<1x32xf32>
    %22 = vector.broadcast %21 : vector<1x32xf32> to vector<512x32xf32>
    %23 = arith.addf %20, %22 : vector<512x32xf32>
    %cst_13 = arith.constant 0.00999999977 : f32
    %24 = vector.broadcast %cst_13 : f32 to vector<512x32xf32>
    %25 = arith.mulf %24, %23 : vector<512x32xf32>
    %26 = arith.maximumf %23, %25 : vector<512x32xf32>
    %c0_14 = arith.constant 0 : index
    %c0_15 = arith.constant 0 : index
    %27 = vector.load %arg8[%c0_14, %c0_15] : memref<512x32xf32, #tpu.memory_space<vmem>>, vector<512x32xf32>
    tpu.vector_store %arg8[%c0_14, %c0_15], %26 {strides = array<i32>} : memref<512x32xf32, #tpu.memory_space<vmem>>, vector<512x32xf32>,
    %c0_16 = arith.constant 0 : index
    %c0_17 = arith.constant 0 : index
    %28 = vector.load %arg7[%c0_16, %c0_17] : memref<1x32xf32, #tpu.memory_space<vmem>>, vector<1x32xf32>
    %29 = vector.broadcast %28 : vector<1x32xf32> to vector<512x32xf32>
    %30 = arith.mulf %26, %29 : vector<512x32xf32>
    %31 = vector.extract_strided_slice %30 {offsets = [0, 0], sizes = [512, 8], strides = [1, 1]} : vector<512x32xf32> to vector<512x8xf32>
    %cst_18 = arith.constant dense<0.000000e+00> : vector<512xf32>
    %32 = vector.multi_reduction <add>, %31, %cst_18 [1] : vector<512x8xf32> to vector<512xf32>
    %33 = vector.shape_cast %32 : vector<512xf32> to vector<512x1xf32>
    %34 = vector.extract_strided_slice %30 {offsets = [0, 8], sizes = [512, 8], strides = [1, 1]} : vector<512x32xf32> to vector<512x8xf32>
    %cst_19 = arith.constant dense<0.000000e+00> : vector<512xf32>
    %35 = vector.multi_reduction <add>, %34, %cst_19 [1] : vector<512x8xf32> to vector<512xf32>
    %36 = vector.shape_cast %35 : vector<512xf32> to vector<512x1xf32>
    %37 = vector.extract_strided_slice %30 {offsets = [0, 16], sizes = [512, 8], strides = [1, 1]} : vector<512x32xf32> to vector<512x8xf32>
    %cst_20 = arith.constant dense<0.000000e+00> : vector<512xf32>
    %38 = vector.multi_reduction <add>, %37, %cst_20 [1] : vector<512x8xf32> to vector<512xf32>
    %39 = vector.shape_cast %38 : vector<512xf32> to vector<512x1xf32>
    %40 = vector.extract_strided_slice %30 {offsets = [0, 24], sizes = [512, 8], strides = [1, 1]} : vector<512x32xf32> to vector<512x8xf32>
    %cst_21 = arith.constant dense<0.000000e+00> : vector<512xf32>
    %41 = vector.multi_reduction <add>, %40, %cst_21 [1] : vector<512x8xf32> to vector<512xf32>
    %42 = vector.shape_cast %41 : vector<512xf32> to vector<512x1xf32>
    %43 = tpu.concatenate %33, %36, %39, %42 in 1 : vector<512x1xf32>, vector<512x1xf32>, vector<512x1xf32>, vector<512x1xf32> -> vector<512x4xf32>
    %c0_22 = arith.constant 0 : index
    %c0_23 = arith.constant 0 : index
    %44 = vector.load %arg9[%c0_22, %c0_23] : memref<512x4xf32, #tpu.memory_space<vmem>>, vector<512x4xf32>
    tpu.vector_store %arg9[%c0_22, %c0_23], %43 {strides = array<i32>} : memref<512x4xf32, #tpu.memory_space<vmem>>, vector<512x4xf32>,
    return
  }
  func.func @transform_0(%arg0: i32) -> (i32, i32) {
    %c0_i32 = arith.constant 0 : i32
    %c0_i32_0 = arith.constant 0 : i32
    return %arg0, %c0_i32 : i32, i32
  }
  func.func @transform_1(%arg0: i32) -> (i32, i32) {
    %c0_i32 = arith.constant 0 : i32
    %c0_i32_0 = arith.constant 0 : i32
    return %arg0, %c0_i32 : i32, i32
  }
  func.func @transform_2(%arg0: i32) -> (i32, i32) {
    %c0_i32 = arith.constant 0 : i32
    %c0_i32_0 = arith.constant 0 : i32
    return %arg0, %c0_i32 : i32, i32
  }
  func.func @transform_3(%arg0: i32) -> (i32, i32) {
    %c0_i32 = arith.constant 0 : i32
    %c0_i32_0 = arith.constant 0 : i32
    %c0_i32_1 = arith.constant 0 : i32
    return %c0_i32, %c0_i32_0 : i32, i32
  }
  func.func @transform_4(%arg0: i32) -> (i32, i32) {
    %c0_i32 = arith.constant 0 : i32
    %c0_i32_0 = arith.constant 0 : i32
    %c0_i32_1 = arith.constant 0 : i32
    return %c0_i32, %c0_i32_0 : i32, i32
  }
  func.func @transform_5(%arg0: i32) -> (i32, i32) {
    %c0_i32 = arith.constant 0 : i32
    %c0_i32_0 = arith.constant 0 : i32
    %c0_i32_1 = arith.constant 0 : i32
    return %c0_i32, %c0_i32_0 : i32, i32
  }
  func.func @transform_6(%arg0: i32) -> (i32, i32) {
    %c0_i32 = arith.constant 0 : i32
    %c0_i32_0 = arith.constant 0 : i32
    %c0_i32_1 = arith.constant 0 : i32
    return %c0_i32, %c0_i32_0 : i32, i32
  }
  func.func @transform_7(%arg0: i32) -> (i32, i32) {
    %c0_i32 = arith.constant 0 : i32
    %c0_i32_0 = arith.constant 0 : i32
    return %arg0, %c0_i32 : i32, i32
  }
  func.func @transform_8(%arg0: i32) -> (i32, i32) {
    %c0_i32 = arith.constant 0 : i32
    %c0_i32_0 = arith.constant 0 : i32
    return %arg0, %c0_i32 : i32, i32
  }
}

module attributes {stable_mosaic.version = 11 : i64} {
  func.func @aggregate_kernel(%arg0: i32, %arg1: memref<512x1xi32, #tpu.memory_space<vmem>>, %arg2: memref<1x512xi32, #tpu.memory_space<vmem>>, %arg3: memref<512x4xf32, #tpu.memory_space<vmem>>, %arg4: memref<32x96xf32, #tpu.memory_space<vmem>>, %arg5: memref<32x32xf32, #tpu.memory_space<vmem>>, %arg6: memref<32x4xf32, #tpu.memory_space<vmem>>) attributes {dimension_semantics = [#tpu.dimension_semantics<arbitrary>], iteration_bounds = array<i64: 2>, scalar_prefetch = 0 : i64, scratch_operands = 1 : i64, tpu.core_type = #tpu.core_type<tc>, window_params = [{transform_indices = @transform_0, window_bounds = array<i64: 512, 1>}, {transform_indices = @transform_1, window_bounds = array<i64: 1, 512>}, {transform_indices = @transform_2, window_bounds = array<i64: 512, 4>}, {pipeline_mode = #tpu.pipeline_mode<synchronous>, transform_indices = @transform_3, window_bounds = array<i64: 32, 96>}, {pipeline_mode = #tpu.pipeline_mode<synchronous>, transform_indices = @transform_4, window_bounds = array<i64: 32, 32>}]} {
    %c0_i32 = arith.constant 0 : i32
    %0 = arith.cmpi eq, %arg0, %c0_i32 : i32
    %1 = arith.extui %0 : i1 to i32
    %c0_i32_0 = arith.constant 0 : i32
    %2 = arith.cmpi ne, %1, %c0_i32_0 : i32
    scf.if %2 {
      %cst_19 = arith.constant 0.000000e+00 : f32
      %44 = vector.broadcast %cst_19 : f32 to vector<32x4xf32>
      %c0_20 = arith.constant 0 : index
      %c0_21 = arith.constant 0 : index
      %45 = vector.load %arg6[%c0_20, %c0_21] : memref<32x4xf32, #tpu.memory_space<vmem>>, vector<32x4xf32>
      tpu.vector_store %arg6[%c0_20, %c0_21], %44 {strides = array<i32>} : memref<32x4xf32, #tpu.memory_space<vmem>>, vector<32x4xf32>,
      %cst_22 = arith.constant 0.000000e+00 : f32
      %46 = vector.broadcast %cst_22 : f32 to vector<32x32xf32>
      %c0_23 = arith.constant 0 : index
      %c0_24 = arith.constant 0 : index
      %47 = vector.load %arg5[%c0_23, %c0_24] : memref<32x32xf32, #tpu.memory_space<vmem>>, vector<32x32xf32>
      tpu.vector_store %arg5[%c0_23, %c0_24], %46 {strides = array<i32>} : memref<32x32xf32, #tpu.memory_space<vmem>>, vector<32x32xf32>,
    } else {
    }
    %3 = tpu.iota {dimensions = array<i32: 1>} : vector<512x32xi32>
    %c0 = arith.constant 0 : index
    %c0_1 = arith.constant 0 : index
    %4 = vector.load %arg1[%c0, %c0_1] : memref<512x1xi32, #tpu.memory_space<vmem>>, vector<512x1xi32>
    %5 = vector.broadcast %4 : vector<512x1xi32> to vector<512x32xi32>
    %6 = arith.cmpi eq, %5, %3 : vector<512x32xi32>
    %7 = arith.extui %6 : vector<512x32xi1> to vector<512x32xi32>
    %8 = arith.sitofp %7 : vector<512x32xi32> to vector<512x32xf32>
    %c0_2 = arith.constant 0 : index
    %c0_3 = arith.constant 0 : index
    %9 = vector.load %arg4[%c0_2, %c0_3] : memref<32x96xf32, #tpu.memory_space<vmem>>, vector<32x96xf32>
    %10 = vector.extract_strided_slice %9 {offsets = [0, 64], sizes = [32, 32], strides = [1, 1]} : vector<32x96xf32> to vector<32x32xf32>
    %cst = arith.constant dense<0.000000e+00> : vector<512x32xf32>
    %11 = tpu.matmul %8, %10, %cst {dimension_numbers = #tpu.dot_dimension_numbers<[1], [0], [0], [1], [0, 0, 1, 1], [], []>} : vector<512x32xf32>, vector<32x32xf32>, vector<512x32xf32> -> vector<512x32xf32>
    %12 = tpu.iota {dimensions = array<i32: 0>} : vector<32x512xi32>
    %c0_4 = arith.constant 0 : index
    %c0_5 = arith.constant 0 : index
    %13 = vector.load %arg2[%c0_4, %c0_5] : memref<1x512xi32, #tpu.memory_space<vmem>>, vector<1x512xi32>
    %14 = vector.broadcast %13 : vector<1x512xi32> to vector<32x512xi32>
    %15 = arith.cmpi eq, %14, %12 : vector<32x512xi32>
    %16 = arith.extui %15 : vector<32x512xi1> to vector<32x512xi32>
    %17 = arith.sitofp %16 : vector<32x512xi32> to vector<32x512xf32>
    %c0_6 = arith.constant 0 : index
    %c0_7 = arith.constant 0 : index
    %18 = vector.load %arg3[%c0_6, %c0_7] : memref<512x4xf32, #tpu.memory_space<vmem>>, vector<512x4xf32>
    %c0_8 = arith.constant 0 : index
    %c0_9 = arith.constant 0 : index
    %19 = vector.load %arg6[%c0_8, %c0_9] : memref<32x4xf32, #tpu.memory_space<vmem>>, vector<32x4xf32>
    %cst_10 = arith.constant dense<0.000000e+00> : vector<32x4xf32>
    %20 = tpu.matmul %17, %18, %cst_10 {dimension_numbers = #tpu.dot_dimension_numbers<[1], [0], [0], [1], [0, 0, 1, 1], [], []>} : vector<32x512xf32>, vector<512x4xf32>, vector<32x4xf32> -> vector<32x4xf32>
    %21 = arith.addf %19, %20 : vector<32x4xf32>
    %c0_11 = arith.constant 0 : index
    %c0_12 = arith.constant 0 : index
    %22 = vector.load %arg6[%c0_11, %c0_12] : memref<32x4xf32, #tpu.memory_space<vmem>>, vector<32x4xf32>
    tpu.vector_store %arg6[%c0_11, %c0_12], %21 {strides = array<i32>} : memref<32x4xf32, #tpu.memory_space<vmem>>, vector<32x4xf32>,
    %23 = vector.extract_strided_slice %18 {offsets = [0, 0], sizes = [512, 1], strides = [1, 1]} : vector<512x4xf32> to vector<512x1xf32>
    %24 = vector.shape_cast %23 : vector<512x1xf32> to vector<512x1xf32>
    %25 = vector.broadcast %24 : vector<512x1xf32> to vector<512x8xf32>
    %26 = vector.extract_strided_slice %18 {offsets = [0, 1], sizes = [512, 1], strides = [1, 1]} : vector<512x4xf32> to vector<512x1xf32>
    %27 = vector.shape_cast %26 : vector<512x1xf32> to vector<512x1xf32>
    %28 = vector.broadcast %27 : vector<512x1xf32> to vector<512x8xf32>
    %29 = vector.extract_strided_slice %18 {offsets = [0, 2], sizes = [512, 1], strides = [1, 1]} : vector<512x4xf32> to vector<512x1xf32>
    %30 = vector.shape_cast %29 : vector<512x1xf32> to vector<512x1xf32>
    %31 = vector.broadcast %30 : vector<512x1xf32> to vector<512x8xf32>
    %32 = vector.extract_strided_slice %18 {offsets = [0, 3], sizes = [512, 1], strides = [1, 1]} : vector<512x4xf32> to vector<512x1xf32>
    %33 = vector.shape_cast %32 : vector<512x1xf32> to vector<512x1xf32>
    %34 = vector.broadcast %33 : vector<512x1xf32> to vector<512x8xf32>
    %35 = tpu.concatenate %25, %28, %31, %34 in 1 : vector<512x8xf32>, vector<512x8xf32>, vector<512x8xf32>, vector<512x8xf32> -> vector<512x32xf32>
    %36 = arith.mulf %11, %35 : vector<512x32xf32>
    %c0_13 = arith.constant 0 : index
    %c0_14 = arith.constant 0 : index
    %37 = vector.load %arg5[%c0_13, %c0_14] : memref<32x32xf32, #tpu.memory_space<vmem>>, vector<32x32xf32>
    %cst_15 = arith.constant dense<0.000000e+00> : vector<32x32xf32>
    %38 = tpu.matmul %17, %36, %cst_15 {dimension_numbers = #tpu.dot_dimension_numbers<[1], [0], [0], [1], [0, 0, 1, 1], [], []>} : vector<32x512xf32>, vector<512x32xf32>, vector<32x32xf32> -> vector<32x32xf32>
    %39 = arith.addf %37, %38 : vector<32x32xf32>
    %c0_16 = arith.constant 0 : index
    %c0_17 = arith.constant 0 : index
    %40 = vector.load %arg5[%c0_16, %c0_17] : memref<32x32xf32, #tpu.memory_space<vmem>>, vector<32x32xf32>
    tpu.vector_store %arg5[%c0_16, %c0_17], %39 {strides = array<i32>} : memref<32x32xf32, #tpu.memory_space<vmem>>, vector<32x32xf32>,
    %c1_i32 = arith.constant 1 : i32
    %41 = arith.cmpi eq, %arg0, %c1_i32 : i32
    %42 = arith.extui %41 : i1 to i32
    %c0_i32_18 = arith.constant 0 : i32
    %43 = arith.cmpi ne, %42, %c0_i32_18 : i32
    scf.if %43 {
      %c0_19 = arith.constant 0 : index
      %c0_20 = arith.constant 0 : index
      %44 = vector.load %arg6[%c0_19, %c0_20] : memref<32x4xf32, #tpu.memory_space<vmem>>, vector<32x4xf32>
      %cst_21 = arith.constant 0.000000e+00 : f32
      %45 = vector.broadcast %cst_21 : f32 to vector<32x4xf32>
      %46 = arith.cmpf ogt, %44, %45 : vector<32x4xf32>
      %cst_22 = arith.constant 1.000000e+00 : f32
      %47 = vector.broadcast %cst_22 : f32 to vector<32x4xf32>
      %48 = arith.select %46, %44, %47 : vector<32x4xi1>, vector<32x4xf32>
      %cst_23 = arith.constant 1.000000e+00 : f32
      %49 = vector.broadcast %cst_23 : f32 to vector<32x4xf32>
      %50 = arith.divf %49, %48 : vector<32x4xf32>
      %51 = vector.extract_strided_slice %50 {offsets = [0, 0], sizes = [32, 1], strides = [1, 1]} : vector<32x4xf32> to vector<32x1xf32>
      %52 = vector.shape_cast %51 : vector<32x1xf32> to vector<32x1xf32>
      %53 = vector.broadcast %52 : vector<32x1xf32> to vector<32x8xf32>
      %54 = vector.extract_strided_slice %50 {offsets = [0, 1], sizes = [32, 1], strides = [1, 1]} : vector<32x4xf32> to vector<32x1xf32>
      %55 = vector.shape_cast %54 : vector<32x1xf32> to vector<32x1xf32>
      %56 = vector.broadcast %55 : vector<32x1xf32> to vector<32x8xf32>
      %57 = vector.extract_strided_slice %50 {offsets = [0, 2], sizes = [32, 1], strides = [1, 1]} : vector<32x4xf32> to vector<32x1xf32>
      %58 = vector.shape_cast %57 : vector<32x1xf32> to vector<32x1xf32>
      %59 = vector.broadcast %58 : vector<32x1xf32> to vector<32x8xf32>
      %60 = vector.extract_strided_slice %50 {offsets = [0, 3], sizes = [32, 1], strides = [1, 1]} : vector<32x4xf32> to vector<32x1xf32>
      %61 = vector.shape_cast %60 : vector<32x1xf32> to vector<32x1xf32>
      %62 = vector.broadcast %61 : vector<32x1xf32> to vector<32x8xf32>
      %63 = tpu.concatenate %53, %56, %59, %62 in 1 : vector<32x8xf32>, vector<32x8xf32>, vector<32x8xf32>, vector<32x8xf32> -> vector<32x32xf32>
      %c0_24 = arith.constant 0 : index
      %c0_25 = arith.constant 0 : index
      %64 = vector.load %arg5[%c0_24, %c0_25] : memref<32x32xf32, #tpu.memory_space<vmem>>, vector<32x32xf32>
      %65 = arith.mulf %64, %63 : vector<32x32xf32>
      %c0_26 = arith.constant 0 : index
      %c0_27 = arith.constant 0 : index
      %66 = vector.load %arg5[%c0_26, %c0_27] : memref<32x32xf32, #tpu.memory_space<vmem>>, vector<32x32xf32>
      tpu.vector_store %arg5[%c0_26, %c0_27], %65 {strides = array<i32>} : memref<32x32xf32, #tpu.memory_space<vmem>>, vector<32x32xf32>,
    } else {
    }
    return
  }
  func.func @transform_0(%arg0: i32) -> (i32, i32) {
    %c0_i32 = arith.constant 0 : i32
    %c0_i32_0 = arith.constant 0 : i32
    return %arg0, %c0_i32 : i32, i32
  }
  func.func @transform_1(%arg0: i32) -> (i32, i32) {
    %c0_i32 = arith.constant 0 : i32
    %c0_i32_0 = arith.constant 0 : i32
    return %c0_i32, %arg0 : i32, i32
  }
  func.func @transform_2(%arg0: i32) -> (i32, i32) {
    %c0_i32 = arith.constant 0 : i32
    %c0_i32_0 = arith.constant 0 : i32
    return %arg0, %c0_i32 : i32, i32
  }
  func.func @transform_3(%arg0: i32) -> (i32, i32) {
    %c0_i32 = arith.constant 0 : i32
    %c0_i32_0 = arith.constant 0 : i32
    %c0_i32_1 = arith.constant 0 : i32
    return %c0_i32, %c0_i32_0 : i32, i32
  }
  func.func @transform_4(%arg0: i32) -> (i32, i32) {
    %c0_i32 = arith.constant 0 : i32
    %c0_i32_0 = arith.constant 0 : i32
    %c0_i32_1 = arith.constant 0 : i32
    return %c0_i32, %c0_i32_0 : i32, i32
  }
}

</mosaic_0001>

<bundles_post_ra>
// kernel: egat_forward.3
= control target key start
LH: loop header
LB: loop body
LE: loop exit
PB: predicated region body
PF: predicated region fallthrough
CT: control target
= control target key end

     0   :  { %s7155_s0 = inlined_call_operand.hbm [shape: s32[1024,1], index: 0, kind: input, shape index: {}]   ;;  %s7156_s1 = inlined_call_operand.hbm [shape: s32[1,1024], index: 1, kind: input, shape index: {}]   ;;  %s7157_s2 = inlined_call_operand.hbm [shape: f32[1024,4], index: 2, kind: input, shape index: {}]   ;;  %s7158_s3 = inlined_call_operand.hbm [shape: f32[32,96], index: 3, kind: input, shape index: {}]   ;;  %s7159_s4 = inlined_call_operand.hbm [shape: f32[32,32], index: 4, kind: output, shape index: {}]  }
   0x1   :  { %7261 = sst [smem:[#allocation227_spill]] %s7156_s1 }
   0x2   :  { %9 = vsyncpa [#allocation4], 0 }
   0x3   :  { %11 = vsyncpa [#allocation4 + $0x1], 0 }
   0x4   :  { %12 = vsyncpa [#allocation7], 0 }
   0x5   :  { %14 = vsyncpa [#allocation7 + $0x1], 0 }
   0x6   :  { %15 = vsyncpa [#allocation10], 0 }
   0x7   :  { %16 = vsyncpa [#allocation5], 0  ;;  %s4571_s15 = smov 0   ;;  %s4573_s16 = smov 0  }
   0x8   :  { %s4575_s17 = smov 0   ;;  %s4577_s18 = smov 0  }
   0x9 LB: > { %s4592_s19 = sadd.s32 1, %s4523_s18   ;;  %s29_s20 = sadd.s32 1, %s4519_s17  ;;  %s4523_s18 = sphi %s4577_s18, %s7870_s18   ;;  %s4519_s17 = sphi %s4575_s17, %s7869_s17   ;;  %s4515_s16 = sphi %s4573_s16, %s7868_s16   ;;  %s4511_s15 = sphi %s4571_s15, %s7867_s15  }
   0xa   : > { %s26_s21 = ssub.s32 %s4523_s18, %s4592_s19  ;;  %p36_p0 = scmp.ne.s32.totalorder %s4519_s17, %s4515_s16 }
   0xb   : > { %p27_p1 = scmp.eq.s32.totalorder %s26_s21, 0  ;;  %p37_p2 = scmp.eq.s32.totalorder %s4523_s18, 0 }
   0xc   : > { %p4165_p3 = scmp.lt.s32.totalorder %s4523_s18, 2  ;;  %s4605_s23 = sand.u32 1, %s4519_s17  }
   0xd   : > { %s4602_s22 = scalar_select %p27_p1, %s4519_s17, %s29_s20  }
   0xe   : > { %p38_p4 = por %p37_p2, %p36_p0  ;;  %s3437_s24 = sshll.u32 %s4605_s23, 9 }
   0xf   : > { %7262 = sst [smem:[#allocation16_spill]] %s4602_s22  ;;  %s194_s25 = sand.u32 1, %s4523_s18  }
  0x10   : > { %p4609_p5 = pnand %p4165_p3, %p38_p4  ;;  %s3440_s27 = sshll.u32 %s4605_s23, 2 }
  0x11   : > { %s3634_s28 = sshll.u32 %s4523_s18, 6  ;;  %s7264_s1 = sld [smem:[#allocation227_spill]] }
  0x12   : > { %s7263_s26 = scalar_select %p4609_p5, 1, 0 }
  0x13   : > { %s198_s6 = scalar_lea.vmem [#allocation6], %s3440_s27  ;;  %s4622_s8 = scalar_lea.sflag [#allocation7], %s194_s25 }
  0x14   : > { %s206_s7 = sshll.u32 %s198_s6, 4  ;;  %p4628_p7 = pneg %p4609_p5  ;;  %s4620_s7 = int_to_ptr.vmem [resolvable:$true] %s206_s7 }
  0x16   : > { %s7265_s10 = scalar_select %p4628_p7, 1, 0 }
  0x17   : > { %s4618_s5 = scalar_lea.hbm %s7264_s1, %s3634_s28  ;;  %s4338_s13 = scalar_lea.hbm %s7264_s1, 128 }
  0x18   : > { %s4333_s9 = scalar_lea.hbm %s4618_s5, 64  ;;  %p4339_p10 = scmp.lt.u32.totalorder %s4618_s5, %s7264_s1 }
  0x19   : > { %p4334_p6 = scmp.ne.s32.totalorder %s4618_s5, %s4333_s9  ;;  %p4340_p11 = scmp.lt.u32.totalorder %s4338_s13, %s4333_s9 }
  0x1a   : > { %p4342_p13 = scmp.lt.u32.totalorder %s4333_s9, %s4618_s5 }
  0x1b   : > { %p4336_p8 = pnand %p4628_p7, %p4334_p6  ;;  %p4341_p12 = por %p4340_p11, %p4339_p10 }
  0x1d   : > { %p4337_p9 = pneg %p4336_p8  ;;  %p4343_p0 = por %p4342_p13, %p4341_p12 }
  0x1f   : > { %p4344_p1 = pnand %p4343_p0, %p4337_p9 }
  0x21   : > { %4347 = shalt.err (!%p4344_p1)
}
  0x22   : > { %s4348_s21 = scalar_lea.vmem %s4620_s7, 64  ;;  %s4525_s25 = smov [#allocation6]  }
  0x23   : > { %p4349_p2 = scmp.ne.s32.totalorder %s4620_s7, %s4348_s21  ;;  %s4353_s27 = sshll.u32 %s4525_s25, 4  ;;  %s4354_s27 = int_to_ptr.vmem [resolvable:$false] %s4353_s27 }
  0x24   : > { %s4355_s28 = scalar_lea.vmem %s4354_s27, 128  ;;  %p4356_p6 = scmp.lt.s32.totalorder %s4620_s7, %s4354_s27 }
  0x25   : > { %p4351_p3 = pnand %p4349_p2, %p4628_p7  ;;  %p4357_p8 = scmp.lt.s32.totalorder %s4355_s28, %s4348_s21 }
  0x27   : > { %p4352_p4 = pneg %p4351_p3  ;;  %p4358_p10 = por %p4357_p8, %p4356_p6 }
  0x29   : > { %p4359_p11 = pnand %p4358_p10, %p4352_p4 }
  0x2b   : > { %4362 = shalt.err (!%p4359_p11)
}
  0x2c   : > { %4160 = dma.hbm_to_vmem [thread:$0]  (!%p4609_p5), %s4618_s5, 64, %s4620_s7, %s4622_s8  }
  0x2d   : > { %s217_s29 = scalar_lea.vmem [#allocation8], %s3437_s24  ;;  %s4657_s6 = sadd.s32 4294967295, %s4523_s18  }
  0x2e   : > { %s224_s30 = sshll.u32 %s217_s29, 4  ;;  %p42_p9 = scmp.ne.s32.totalorder %s4515_s16, %s4511_s15  ;;  %s4654_s30 = int_to_ptr.vmem [resolvable:$true] %s224_s30 }
  0x2f   : > { %p7160_p12 = scmp.eq.s32.totalorder %s4657_s6, 0  ;;  %p3434_p13 = scmp.ge.s32.totalorder %s4523_s18, 1 }
  0x30   : > { %p147_p0 = scmp.lt.s32.totalorder %s4523_s18, 3  ;;  %s4526_s9 = smov [#allocation9]  }
  0x31   : > { %p4667_p2 = por %p7160_p12, %p42_p9  ;;  %s159_s11 = sshll.u32 %s4526_s9, 4  ;;  %s4675_s11 = int_to_ptr.vmem [resolvable:$true] %s159_s11 }
  0x32   : > { %p4671_p3 = pnand %p3434_p13, %p147_p0  ;;  %s7167_s12 = sshll.u32 %s4523_s18, 13 }
  0x33   : > { %s7266_s5 = scalar_select %p4667_p2, 1, 0 }
  0x34   : > { %s7267_s7 = scalar_select %p4671_p3, 1, 0 }
  0x35   : > { %p4150_p4 = pneg %p4671_p3  ;;  %s4691_s20 = scalar_lea.hbm %s7155_s0, %s7167_s12 }
  0x36   : > { %s177_s21 = scalar_lea.vmem [#allocation3], %s3437_s24  ;;  %s4363_s29 = scalar_lea.hbm %s7158_s3, 512 }
  0x37   : > { %p4681_p6 = pnand %p4150_p4, %p7160_p12  ;;  %s184_s25 = sshll.u32 %s177_s21, 4  ;;  %s4695_s25 = int_to_ptr.vmem [resolvable:$true] %s184_s25 }
  0x38   : > { %p4364_p8 = scmp.ne.s32.totalorder %s7158_s3, %s4363_s29  ;;  %p4370_p13 = scmp.lt.u32.totalorder %s4363_s29, %s7158_s3 }
  0x39   : > { %p4365_p10 = pneg %p4681_p6 }
  0x3b   : > { %p4366_p11 = pnand %p4365_p10, %p4364_p8 }
  0x3d   : > { %p4367_p9 = pneg %p4366_p11 }
  0x3f   : > { %p4372_p0 = pnand %p4370_p13, %p4367_p9 }
  0x41   : > { %4375 = shalt.err (!%p4372_p0)
}
  0x42   : > { %s4376_s24 = scalar_lea.vmem %s4675_s11, 512  ;;  %p4384_p2 = scmp.lt.s32.totalorder %s4675_s11, %s4675_s11 }
  0x43   : > { %p4377_p4 = scmp.ne.s32.totalorder %s4675_s11, %s4376_s24  ;;  %p4385_p3 = scmp.lt.s32.totalorder %s4376_s24, %s4376_s24 }
  0x45   : > { %p4379_p1 = pnand %p4377_p4, %p4365_p10  ;;  %p4386_p5 = por %p4385_p3, %p4384_p2 }
  0x47   : > { %p4380_p12 = pneg %p4379_p1 }
  0x49   : > { %p4387_p7 = pnand %p4386_p5, %p4380_p12 }
  0x4b   : > { %4390 = shalt.err (!%p4387_p7)
}
  0x4c   : > { %s4527_s1 = smov 128   ;;  %s4528_s21 = smov 8  }
  0x4d   : > { %4153 = dma.hbm_to_vmem [thread:$0]  (!%p4681_p6), %s7158_s3, 512, %s4675_s11, [#allocation10], %s4527_s1, %s4527_s1, %s4528_s21  }
  0x4e   : > { %s174_s29 = scalar_lea.sflag [#allocation4], %s4605_s23  ;;  %s4391_s9 = scalar_lea.hbm %s4691_s20, 8192 }
  0x4f   : > { %p4392_p5 = scmp.ne.s32.totalorder %s4691_s20, %s4391_s9  ;;  %p7269_p7 = scmp.ne.s32.totalorder %s7265_s10, 0 }
  0x50   : > { %s4396_s24 = scalar_lea.hbm %s7155_s0, 16384  ;;  %p4397_p2 = scmp.lt.u32.totalorder %s4691_s20, %s7155_s0 }
  0x51   : > { %p4394_p12 = pnand %p4392_p5, %p7269_p7  ;;  %p4398_p3 = scmp.lt.u32.totalorder %s4396_s24, %s4391_s9 }
  0x52   : > { %p4400_p10 = scmp.lt.u32.totalorder %s4391_s9, %s4691_s20 }
  0x53   : > { %p4395_p1 = pneg %p4394_p12  ;;  %p4399_p8 = por %p4398_p3, %p4397_p2 }
  0x55   : > { %p4401_p11 = por %p4400_p10, %p4399_p8 }
  0x57   : > { %p4402_p9 = pnand %p4401_p11, %p4395_p1 }
  0x59   : > { %4405 = shalt.err (!%p4402_p9)
}
  0x5a   : > { %s4406_s11 = scalar_lea.vmem %s4695_s25, 8192  ;;  %s4529_s15 = smov [#allocation3]  }
  0x5b   : > { %p4407_p6 = scmp.ne.s32.totalorder %s4695_s25, %s4406_s11  ;;  %s4411_s27 = sshll.u32 %s4529_s15, 4  ;;  %s4412_s27 = int_to_ptr.vmem [resolvable:$false] %s4411_s27 }
  0x5c   : > { %s4413_s22 = scalar_lea.vmem %s4412_s27, 16384  ;;  %p4414_p4 = scmp.lt.s32.totalorder %s4695_s25, %s4412_s27 }
  0x5d   : > { %p4409_p13 = pnand %p4407_p6, %p7269_p7  ;;  %p4415_p5 = scmp.lt.s32.totalorder %s4413_s22, %s4406_s11 }
  0x5f   : > { %p4410_p0 = pneg %p4409_p13  ;;  %p4416_p12 = por %p4415_p5, %p4414_p4 }
  0x61   : > { %p4417_p2 = pnand %p4416_p12, %p4410_p0 }
  0x63   : > { %4420 = shalt.err (!%p4417_p2)
}
  0x64   : > { %p7270_p1 = scmp.ne.s32.totalorder %s7263_s26, 0  ;;  %s7271_s12 = sshll.u32 %s4523_s18, 13 }
  0x65   : > { %s4753_s13 = scalar_lea.hbm %s7157_s2, %s7271_s12  ;;  %s4426_s11 = scalar_lea.hbm %s7157_s2, 16384 }
  0x66   : > { %4157 = dma.hbm_to_vmem [thread:$0]  (!%p7270_p1), %s4691_s20, 8192, %s4695_s25, %s174_s29, %s4527_s1, %s4527_s1, %s4528_s21  }
  0x67   : > { %s4421_s14 = scalar_lea.hbm %s4753_s13, 8192  ;;  %p4427_p11 = scmp.lt.u32.totalorder %s4753_s13, %s7157_s2 }
  0x68   : > { %p4422_p3 = scmp.ne.s32.totalorder %s4753_s13, %s4421_s14  ;;  %p4428_p9 = scmp.lt.u32.totalorder %s4426_s11, %s4421_s14 }
  0x69   : > { %p4430_p13 = scmp.lt.u32.totalorder %s4421_s14, %s4753_s13 }
  0x6a   : > { %p4424_p8 = pnand %p4422_p3, %p7269_p7  ;;  %p4429_p6 = por %p4428_p9, %p4427_p11 }
  0x6c   : > { %p4425_p10 = pneg %p4424_p8  ;;  %p4431_p0 = por %p4430_p13, %p4429_p6 }
  0x6e   : > { %p4432_p4 = pnand %p4431_p0, %p4425_p10 }
  0x70   : > { %4435 = shalt.err (!%p4432_p4)
}
  0x71   : > { %s4436_s25 = scalar_lea.vmem %s4654_s30, 8192  ;;  %s4530_s29 = smov [#allocation8]  }
  0x72   : > { %p4437_p5 = scmp.ne.s32.totalorder %s4654_s30, %s4436_s25  ;;  %s4441_s15 = sshll.u32 %s4530_s29, 4  ;;  %s4442_s15 = int_to_ptr.vmem [resolvable:$false] %s4441_s15 }
  0x73   : > { %s4443_s27 = scalar_lea.vmem %s4442_s15, 16384  ;;  %p4444_p3 = scmp.lt.s32.totalorder %s4654_s30, %s4442_s15 }
  0x74   : > { %p4439_p12 = pnand %p4437_p5, %p7269_p7  ;;  %p4445_p8 = scmp.lt.s32.totalorder %s4443_s27, %s4436_s25 }
  0x76   : > { %p4440_p2 = pneg %p4439_p12  ;;  %p4446_p11 = por %p4445_p8, %p4444_p3 }
  0x78   : > { %p4447_p9 = pnand %p4446_p11, %p4440_p2 }
  0x7a   : > { %4450 = shalt.err (!%p4447_p9)
}
  0x7b   : > { %4163 = dma.hbm_to_vmem [thread:$0]  (!%p7270_p1), %s4753_s13, 8192, %s4654_s30, %s4622_s8, %s4527_s1, %s4527_s1, %s4528_s21  }
  0x7c   : > { %p7272_p7 = scmp.ne.s32.totalorder %s7267_s7, 0 }
  0x7e   : > { %236 = sbr.rel (%p7272_p7) target bundleno = 1250 (0x4e2), region = 36 }
  0x85   : > { %s238_s10 = sand.u32 1, %s4515_s16   ;;  %p7273_p10 = scmp.ne.s32.totalorder %s7266_s5, 0 }
  0x86   : > { %s3447_s22 = sshll.u32 %s238_s10, 9  ;;  %s239_s12 = scalar_lea.sflag [#allocation4], %s238_s10 }
  0x87   : > { %s4783_s28 = scalar_lea.vmem [#allocation3], %s3447_s22 }
  0x88   : > { %4494 = dma.done.wait (%p7273_p10), %s239_s12, 8192  }
  0x89   : > { %4496 = vsyncadd (%p7273_p10), %s239_s12, 4294959104  ;;  %s247_s26 = sand.u32 1, %s4657_s6   ;;  %s3448_s9 = sshll.u32 %s238_s10, 2 }
  0x8a   : > { %s248_s8 = scalar_lea.sflag [#allocation7], %s247_s26  ;;  %s4790_s30 = scalar_lea.vmem [#allocation6], %s3448_s9 }
  0x8b   : > { %4498 = dma.done.wait (%p7273_p10), %s248_s8, 8256  }
  0x8c   : > { %4500 = vsyncadd (%p7273_p10), %s248_s8, 4294959040  ;;  %s4796_s7 = scalar_lea.vmem [#allocation8], %s3447_s22  ;;  %p7274_p1 = scmp.eq.s32.totalorder %s4657_s6, 0 }
  0x8e   : > { %4502 = dma.done.wait (%p7274_p1), [#allocation10], 512   ;;  %p7275_p6 = pmov %p7274_p1 }
  0x8f   : > { %p7276_p13 = scmp.ne.s32.totalorder %s4657_s6, 0 }
  0x90   : > { %4504 = vsyncadd (%p7275_p6), [#allocation10], 4294966784  ;;  %vm301_vm0 = vcmask (!%p7276_p13), 31744   ;;  %vm306_vm1 = vcmask (!%p7276_p13), 261120   ;;  %v4531_v0 = vmov (!%p7276_p13), 0.0  }
  0x91   : > { %300 = sbr.rel (%p7276_p13) target bundleno = 152 (0x98), region = 56  ;;  %302 = vst.msk [vmem:[#allocation2] sm:$0xff] (!%p7276_p13), %vm301_vm0, %v4531_v0  ;;  %303 = vst.msk [vmem:[#allocation2 + $0x8] sm:$0xff] (!%p7276_p13), %vm301_vm0, %v4531_v0 }
  0x92   : > { %304 = vst.msk [vmem:[#allocation2 + $0x10] sm:$0xff] (!%p7276_p13), %vm301_vm0, %v4531_v0  ;;  %305 = vst.msk [vmem:[#allocation2 + $0x18] sm:$0xff] (!%p7276_p13), %vm301_vm0, %v4531_v0 }
  0x93   : > { %307 = vst.msk [vmem:[#allocation11] sm:$0xff] (!%p7276_p13), %vm306_vm1, %v4531_v0  ;;  %308 = vst.msk [vmem:[#allocation11 + $0x8] sm:$0xff] (!%p7276_p13), %vm306_vm1, %v4531_v0 }
  0x94   : > { %309 = vst.msk [vmem:[#allocation11 + $0x10] sm:$0xff] (!%p7276_p13), %vm306_vm1, %v4531_v0  ;;  %310 = vst.msk [vmem:[#allocation11 + $0x18] sm:$0xff] (!%p7276_p13), %vm306_vm1, %v4531_v0 }
  0x98 PF: > { %v315_v1 = vld [vmem:[%s4783_s28 + $0x10] sm:$0xff]  ;;  %v313_v2 = vld [vmem:[%s4783_s28] sm:$0xff]  ;;  %v4532_v3 = vmov 0   ;;  %v316_v4 = vld [vmem:[%s4783_s28 + $0x18] sm:$0xff]  ;;  %vm7259_vm2 = vcmask 261120   ;;  %s4533_s5 = smov 64  }
  0x99   : > { %4220 = vset.pattern.permute.xlu1 %v4532_v3  ;;  %4219 = vset.pattern.permute.xlu0 %v4532_v3  ;;  %v314_v5 = vld [vmem:[%s4783_s28 + $0x8] sm:$0xff]  ;;  %v317_v7 = vld [vmem:[%s4783_s28 + $0x20] sm:$0xff]  ;;  %v320_v8 = vld [vmem:[%s4783_s28 + $0x38] sm:$0xff]  ;;  %p3628_p0 = scmp.ne.s32.totalorder %s4657_s6, 1 }
  0x9a   : > { %384 = vperm.xlu1 %4220, %v315_v1   ;;  %378 = vperm.xlu0 %4219, %v313_v2   ;;  %v318_v6 = vld [vmem:[%s4783_s28 + $0x28] sm:$0xff]  ;;  %v319_v9 = vld [vmem:[%s4783_s28 + $0x30] sm:$0xff]  ;;  %v321_v11 = vld [vmem:[%s4783_s28 + $0x40] sm:$0xff] }
  0x9b   : > { %v322_v10 = vld [vmem:[%s4783_s28 + $0x48] sm:$0xff]  ;;  %v324_v12 = vld [vmem:[%s4783_s28 + $0x58] sm:$0xff]  ;;  %v323_v13 = vld [vmem:[%s4783_s28 + $0x50] sm:$0xff] }
  0x9c   : > { %v326_v14 = vld [vmem:[%s4783_s28 + $0x68] sm:$0xff]  ;;  %v325_v15 = vld [vmem:[%s4783_s28 + $0x60] sm:$0xff]  ;;  %v328_v16 = vld [vmem:[%s4783_s28 + $0x78] sm:$0xff] }
  0x9d   : > { %v327_v17 = vld [vmem:[%s4783_s28 + $0x70] sm:$0xff]  ;;  %v330_v18 = vld [vmem:[%s4783_s28 + $0x88] sm:$0xff]  ;;  %v329_v19 = vld [vmem:[%s4783_s28 + $0x80] sm:$0xff] }
  0x9e   : > { %387 = vperm.xlu1 %4220, %v316_v4   ;;  %381 = vperm.xlu0 %4219, %v314_v5   ;;  %v332_v20 = vld [vmem:[%s4783_s28 + $0x98] sm:$0xff]  ;;  %v331_v21 = vld [vmem:[%s4783_s28 + $0x90] sm:$0xff]  ;;  %v334_v22 = vld [vmem:[%s4783_s28 + $0xa8] sm:$0xff] }
  0x9f   : > { %v333_v23 = vld [vmem:[%s4783_s28 + $0xa0] sm:$0xff]  ;;  %v336_v24 = vld [vmem:[%s4783_s28 + $0xb8] sm:$0xff]  ;;  %v335_v25 = vld [vmem:[%s4783_s28 + $0xb0] sm:$0xff] }
  0xa0   : > { %v338_v26 = vld [vmem:[%s4783_s28 + $0xc8] sm:$0xff]  ;;  %v337_v27 = vld [vmem:[%s4783_s28 + $0xc0] sm:$0xff]  ;;  %v340_v28 = vld [vmem:[%s4783_s28 + $0xd8] sm:$0xff] }
  0xa1   : > { %v339_v29 = vld [vmem:[%s4783_s28 + $0xd0] sm:$0xff]  ;;  %v342_v30 = vld [vmem:[%s4783_s28 + $0xe8] sm:$0xff]  ;;  %v341_v31 = vld [vmem:[%s4783_s28 + $0xe0] sm:$0xff] }
  0xa2   : > { %393 = vperm.xlu1 %4220, %v318_v6   ;;  %390 = vperm.xlu0 %4219, %v317_v7   ;;  %v344_v32 = vld [vmem:[%s4783_s28 + $0xf8] sm:$0xff]  ;;  %v343_v33 = vld [vmem:[%s4783_s28 + $0xf0] sm:$0xff]  ;;  %v346_v34 = vld [vmem:[%s4783_s28 + $0x108] sm:$0xff]  ;;  %v7168_v6 = vlaneseq }
  0xa3   : > { %v345_v35 = vld [vmem:[%s4783_s28 + $0x100] sm:$0xff]  ;;  %v348_v36 = vld [vmem:[%s4783_s28 + $0x118] sm:$0xff]  ;;  %v347_v37 = vld [vmem:[%s4783_s28 + $0x110] sm:$0xff] }
  0xa4   : > { %v350_v38 = vld [vmem:[%s4783_s28 + $0x128] sm:$0xff]  ;;  %v349_v39 = vld [vmem:[%s4783_s28 + $0x120] sm:$0xff]  ;;  %v352_v40 = vld [vmem:[%s4783_s28 + $0x138] sm:$0xff] }
  0xa5   : > { %v351_v41 = vld [vmem:[%s4783_s28 + $0x130] sm:$0xff]  ;;  %v354_v42 = vld [vmem:[%s4783_s28 + $0x148] sm:$0xff]  ;;  %v353_v43 = vld [vmem:[%s4783_s28 + $0x140] sm:$0xff] }
  0xa6   : > { %399 = vperm.xlu1 %4220, %v320_v8   ;;  %396 = vperm.xlu0 %4219, %v319_v9   ;;  %v356_v44 = vld [vmem:[%s4783_s28 + $0x158] sm:$0xff]  ;;  %v355_v45 = vld [vmem:[%s4783_s28 + $0x150] sm:$0xff]  ;;  %v358_v46 = vld [vmem:[%s4783_s28 + $0x168] sm:$0xff]  ;;  %v4869_v9 = vand.u32 127, %v7168_v6 }
  0xa7   : > { %v357_v47 = vld [vmem:[%s4783_s28 + $0x160] sm:$0xff]  ;;  %v360_v48 = vld [vmem:[%s4783_s28 + $0x178] sm:$0xff]  ;;  %v359_v49 = vld [vmem:[%s4783_s28 + $0x170] sm:$0xff] }
  0xa8   : > { %v362_v50 = vld [vmem:[%s4783_s28 + $0x188] sm:$0xff]  ;;  %v361_v51 = vld [vmem:[%s4783_s28 + $0x180] sm:$0xff]  ;;  %v364_v52 = vld [vmem:[%s4783_s28 + $0x198] sm:$0xff] }
  0xa9   : > { %v363_v53 = vld [vmem:[%s4783_s28 + $0x190] sm:$0xff]  ;;  %v366_v54 = vld [vmem:[%s4783_s28 + $0x1a8] sm:$0xff]  ;;  %v365_v55 = vld [vmem:[%s4783_s28 + $0x1a0] sm:$0xff] }
  0xaa   : > { %405 = vperm.xlu1 %4220, %v322_v10   ;;  %402 = vperm.xlu0 %4219, %v321_v11   ;;  %v368_v56 = vld [vmem:[%s4783_s28 + $0x1b8] sm:$0xff]  ;;  %v367_v57 = vld [vmem:[%s4783_s28 + $0x1b0] sm:$0xff]  ;;  %v370_v58 = vld [vmem:[%s4783_s28 + $0x1c8] sm:$0xff] }
  0xab   : > { %v369_v59 = vld [vmem:[%s4783_s28 + $0x1c0] sm:$0xff]  ;;  %v372_v60 = vld [vmem:[%s4783_s28 + $0x1d8] sm:$0xff]  ;;  %v371_v61 = vld [vmem:[%s4783_s28 + $0x1d0] sm:$0xff] }
  0xac   : > { %v374_v62 = vld [vmem:[%s4783_s28 + $0x1e8] sm:$0xff]  ;;  %v373_v63 = vld [vmem:[%s4783_s28 + $0x1e0] sm:$0xff]  ;;  %v376_v0 = vld [vmem:[%s4783_s28 + $0x1f8] sm:$0xff] }
  0xad   : > { %v375_v1 = vld [vmem:[%s4783_s28 + $0x1f0] sm:$0xff]  ;;  %v763_v2 = vld [vmem:[#allocation9 + $0x10] sm:$0xff]  ;;  %v764_v3 = vld [vmem:[#allocation9 + $0x18] sm:$0xff] }
  0xae   : > { %411 = vperm.xlu1 %4220, %v324_v12   ;;  %408 = vperm.xlu0 %4219, %v323_v13   ;;  %v761_v4 = vld [vmem:[#allocation9] sm:$0xff]  ;;  %v762_v5 = vld [vmem:[#allocation9 + $0x8] sm:$0xff]  ;;  %v4226_v7 = vpack.i.bf16 %v764_v3, %v763_v2  ;;  %v5033_v2 = vld [vmem:[%s4796_s7 + $0xd8] sm:$0xff] }
  0xaf   : > { %v4221_v8 = vpack.i.bf16 %v762_v5, %v761_v4  ;;  %v4875_v12 = vld [vmem:[%s4796_s7 + $0x8] sm:$0xff]  ;;  %v4878_v13 = vld [vmem:[%s4796_s7] sm:$0xff]  ;;  %7280 = vst [vmem:[#allocation20_spill] sm:$0xff] %v5033_v2  ;;  %v5036_v3 = vld [vmem:[%s4796_s7 + $0xd0] sm:$0xff] }
  0xb0   : > { %7281 = vst [vmem:[#allocation21_spill] sm:$0xff] %v5036_v3  ;;  %v5057_v6 = vld [vmem:[%s4796_s7 + $0xf8] sm:$0xff] }
  0xb1   : > { %7288 = vst [vmem:[#allocation28_spill] sm:$0xff] %v5057_v6 }
  0xb2   : > { %417 = vperm.xlu1 %4220, %v326_v14   ;;  %414 = vperm.xlu0 %4219, %v325_v15   ;;  %v7169_v14 = vmov 0.0  }
  0xb6   : > { %423 = vperm.xlu1 %4220, %v328_v16   ;;  %420 = vperm.xlu0 %4219, %v327_v17  }
  0xba   : > { %429 = vperm.xlu1 %4220, %v330_v18   ;;  %426 = vperm.xlu0 %4219, %v329_v19   ;;  %v4889_v18 = vld [vmem:[%s4796_s7 + $0x18] sm:$0xff]  ;;  %v4892_v19 = vld [vmem:[%s4796_s7 + $0x10] sm:$0xff] }
  0xbe   : > { %435 = vperm.xlu1 %4220, %v332_v20   ;;  %432 = vperm.xlu0 %4219, %v331_v21  }
  0xc2   : > { %441 = vperm.xlu1 %4220, %v334_v22   ;;  %438 = vperm.xlu0 %4219, %v333_v23   ;;  %v4901_v22 = vld [vmem:[%s4796_s7 + $0x28] sm:$0xff]  ;;  %v4904_v23 = vld [vmem:[%s4796_s7 + $0x20] sm:$0xff] }
  0xc6   : > { %447 = vperm.xlu1 %4220, %v336_v24   ;;  %444 = vperm.xlu0 %4219, %v335_v25  }
  0xca   : > { %453 = vperm.xlu1 %4220, %v338_v26   ;;  %450 = vperm.xlu0 %4219, %v337_v27   ;;  %v4913_v26 = vld [vmem:[%s4796_s7 + $0x38] sm:$0xff]  ;;  %v4916_v27 = vld [vmem:[%s4796_s7 + $0x30] sm:$0xff] }
  0xce   : > { %459 = vperm.xlu1 %4220, %v340_v28   ;;  %456 = vperm.xlu0 %4219, %v339_v29  }
  0xd2   : > { %465 = vperm.xlu1 %4220, %v342_v30   ;;  %462 = vperm.xlu0 %4219, %v341_v31   ;;  %v4925_v30 = vld [vmem:[%s4796_s7 + $0x48] sm:$0xff]  ;;  %v4928_v31 = vld [vmem:[%s4796_s7 + $0x40] sm:$0xff] }
  0xd6   : > { %471 = vperm.xlu1 %4220, %v344_v32   ;;  %468 = vperm.xlu0 %4219, %v343_v33  }
  0xda   : > { %477 = vperm.xlu1 %4220, %v346_v34   ;;  %474 = vperm.xlu0 %4219, %v345_v35   ;;  %v4937_v34 = vld [vmem:[%s4796_s7 + $0x58] sm:$0xff]  ;;  %v4940_v35 = vld [vmem:[%s4796_s7 + $0x50] sm:$0xff] }
  0xde   : > { %483 = vperm.xlu1 %4220, %v348_v36   ;;  %480 = vperm.xlu0 %4219, %v347_v37  }
  0xe2   : > { %489 = vperm.xlu1 %4220, %v350_v38   ;;  %486 = vperm.xlu0 %4219, %v349_v39   ;;  %v4949_v38 = vld [vmem:[%s4796_s7 + $0x68] sm:$0xff]  ;;  %v4952_v39 = vld [vmem:[%s4796_s7 + $0x60] sm:$0xff] }
  0xe6   : > { %495 = vperm.xlu1 %4220, %v352_v40   ;;  %492 = vperm.xlu0 %4219, %v351_v41  }
  0xea   : > { %501 = vperm.xlu1 %4220, %v354_v42   ;;  %498 = vperm.xlu0 %4219, %v353_v43   ;;  %v4961_v42 = vld [vmem:[%s4796_s7 + $0x78] sm:$0xff]  ;;  %v4964_v43 = vld [vmem:[%s4796_s7 + $0x70] sm:$0xff] }
  0xee   : > { %507 = vperm.xlu1 %4220, %v356_v44   ;;  %504 = vperm.xlu0 %4219, %v355_v45  }
  0xf2   : > { %513 = vperm.xlu1 %4220, %v358_v46   ;;  %510 = vperm.xlu0 %4219, %v357_v47   ;;  %v4973_v46 = vld [vmem:[%s4796_s7 + $0x88] sm:$0xff]  ;;  %v4976_v47 = vld [vmem:[%s4796_s7 + $0x80] sm:$0xff] }
  0xf6   : > { %519 = vperm.xlu1 %4220, %v360_v48   ;;  %516 = vperm.xlu0 %4219, %v359_v49  }
  0xfa   : > { %525 = vperm.xlu1 %4220, %v362_v50   ;;  %522 = vperm.xlu0 %4219, %v361_v51   ;;  %v4985_v50 = vld [vmem:[%s4796_s7 + $0x98] sm:$0xff]  ;;  %v4988_v51 = vld [vmem:[%s4796_s7 + $0x90] sm:$0xff] }
  0xfe   : > { %531 = vperm.xlu1 %4220, %v364_v52   ;;  %528 = vperm.xlu0 %4219, %v363_v53  }
 0x102   : > { %537 = vperm.xlu1 %4220, %v366_v54   ;;  %534 = vperm.xlu0 %4219, %v365_v55   ;;  %v4997_v54 = vld [vmem:[%s4796_s7 + $0xa8] sm:$0xff]  ;;  %v5000_v55 = vld [vmem:[%s4796_s7 + $0xa0] sm:$0xff] }
 0x106   : > { %543 = vperm.xlu1 %4220, %v368_v56   ;;  %540 = vperm.xlu0 %4219, %v367_v57  }
 0x10a   : > { %549 = vperm.xlu1 %4220, %v370_v58   ;;  %546 = vperm.xlu0 %4219, %v369_v59   ;;  %v5009_v58 = vld [vmem:[%s4796_s7 + $0xb8] sm:$0xff]  ;;  %v5012_v59 = vld [vmem:[%s4796_s7 + $0xb0] sm:$0xff] }
 0x10e   : > { %555 = vperm.xlu1 %4220, %v372_v60   ;;  %552 = vperm.xlu0 %4219, %v371_v61  }
 0x112   : > { %561 = vperm.xlu1 %4220, %v374_v62   ;;  %558 = vperm.xlu0 %4219, %v373_v63   ;;  %v5021_v62 = vld [vmem:[%s4796_s7 + $0xc8] sm:$0xff]  ;;  %v5024_v63 = vld [vmem:[%s4796_s7 + $0xc0] sm:$0xff] }
 0x116   : > { %567 = vperm.xlu1 %4220, %v376_v0   ;;  %564 = vperm.xlu0 %4219, %v375_v1  }
 0x119   : > { %v4871_v10 = vpop.permute.xlu1 %384  ;;  %v379_v11 = vpop.permute.xlu0 %378 }
 0x11a   : > { %4227 = vrot.lane.b32.xlu1 %v4226_v7, %s4533_s5  ;;  %4222 = vrot.lane.b32.xlu0 %v4221_v8, %s4533_s5  ;;  %vm569_vm3 = vcmp.eq.s32.totalorder %v379_v11, %v4869_v9  ;;  %v5045_v7 = vld [vmem:[%s4796_s7 + $0xe8] sm:$0xff]  ;;  %v5048_v8 = vld [vmem:[%s4796_s7 + $0xe0] sm:$0xff]  ;;  %vm571_vm5 = vcmp.eq.s32.totalorder %v4871_v10, %v4869_v9 }
 0x11b   : > { %v3452_v15 = vsel %vm569_vm3, 1.0, %v7169_v14  ;;  %7284 = vst [vmem:[#allocation24_spill] sm:$0xff] %v5045_v7  ;;  %7285 = vst [vmem:[#allocation25_spill] sm:$0xff] %v5048_v8  ;;  %v5060_v14 = vld [vmem:[%s4796_s7 + $0xf0] sm:$0xff] }
 0x11c   : > { %3888 = vmatprep.mubr.msk.f32.mxu0 %vm7259_vm2, %v3452_v15  ;;  %7289 = vst [vmem:[#allocation29_spill] sm:$0xff] %v5060_v14 }
 0x11d   : > { %v4882_v16 = vpop.permute.xlu1 %387  ;;  %v4884_v17 = vpop.permute.xlu0 %381 }
 0x11e   : > { %1683 = vperm.xlu1 %4220, %v4875_v12   ;;  %1678 = vperm.xlu0 %4219, %v4878_v13   ;;  %vm570_vm4 = vcmp.eq.s32.totalorder %v4884_v17, %v4869_v9  ;;  %vm572_vm6 = vcmp.eq.s32.totalorder %v4882_v16, %v4869_v9 }
 0x121   : > { %v4894_v20 = vpop.permute.xlu1 %393  ;;  %v4896_v21 = vpop.permute.xlu0 %390 }
 0x122   : > { %1693 = vperm.xlu1 %4220, %v4889_v18   ;;  %1688 = vperm.xlu0 %4219, %v4892_v19   ;;  %vm573_vm7 = vcmp.eq.s32.totalorder %v4896_v21, %v4869_v9  ;;  %vm574_vm8 = vcmp.eq.s32.totalorder %v4894_v20, %v4869_v9 }
 0x125   : > { %v4906_v24 = vpop.permute.xlu1 %399  ;;  %v4908_v25 = vpop.permute.xlu0 %396 }
 0x126   : > { %1703 = vperm.xlu1 %4220, %v4901_v22   ;;  %1698 = vperm.xlu0 %4219, %v4904_v23   ;;  %vm575_vm9 = vcmp.eq.s32.totalorder %v4908_v25, %v4869_v9  ;;  %vm576_vm10 = vcmp.eq.s32.totalorder %v4906_v24, %v4869_v9 }
 0x129   : > { %v4918_v28 = vpop.permute.xlu1 %405  ;;  %v4920_v29 = vpop.permute.xlu0 %402 }
 0x12a   : > { %1713 = vperm.xlu1 %4220, %v4913_v26   ;;  %1708 = vperm.xlu0 %4219, %v4916_v27   ;;  %vm577_vm11 = vcmp.eq.s32.totalorder %v4920_v29, %v4869_v9  ;;  %vm578_vm12 = vcmp.eq.s32.totalorder %v4918_v28, %v4869_v9 }
 0x12d   : > { %v4930_v32 = vpop.permute.xlu1 %411  ;;  %v4932_v33 = vpop.permute.xlu0 %408 }
 0x12e   : > { %1723 = vperm.xlu1 %4220, %v4925_v30   ;;  %1718 = vperm.xlu0 %4219, %v4928_v31   ;;  %vm579_vm13 = vcmp.eq.s32.totalorder %v4932_v33, %v4869_v9  ;;  %vm580_vm14 = vcmp.eq.s32.totalorder %v4930_v32, %v4869_v9 }
 0x131   : > { %v4942_v36 = vpop.permute.xlu1 %417  ;;  %v4944_v37 = vpop.permute.xlu0 %414 }
 0x132   : > { %1733 = vperm.xlu1 %4220, %v4937_v34   ;;  %1728 = vperm.xlu0 %4219, %v4940_v35   ;;  %vm581_vm15 = vcmp.eq.s32.totalorder %v4944_v37, %v4869_v9  ;;  %vm582_vm0 = vcmp.eq.s32.totalorder %v4942_v36, %v4869_v9 }
 0x135   : > { %v4954_v40 = vpop.permute.xlu1 %423  ;;  %v4956_v41 = vpop.permute.xlu0 %420 }
 0x136   : > { %1743 = vperm.xlu1 %4220, %v4949_v38   ;;  %1738 = vperm.xlu0 %4219, %v4952_v39   ;;  %vm583_vm1 = vcmp.eq.s32.totalorder %v4956_v41, %v4869_v9  ;;  %vm584_vm3 = vcmp.eq.s32.totalorder %v4954_v40, %v4869_v9 }
 0x139   : > { %v4966_v44 = vpop.permute.xlu1 %429  ;;  %v4968_v45 = vpop.permute.xlu0 %426 }
 0x13a   : > { %1753 = vperm.xlu1 %4220, %v4961_v42   ;;  %1748 = vperm.xlu0 %4219, %v4964_v43  }
 0x13d   : > { %v4978_v48 = vpop.permute.xlu1 %435  ;;  %v4980_v49 = vpop.permute.xlu0 %432 }
 0x13e   : > { %1763 = vperm.xlu1 %4220, %v4973_v46   ;;  %1758 = vperm.xlu0 %4219, %v4976_v47  }
 0x141   : > { %v4990_v52 = vpop.permute.xlu1 %441  ;;  %v4992_v53 = vpop.permute.xlu0 %438 }
 0x142   : > { %1773 = vperm.xlu1 %4220, %v4985_v50   ;;  %1768 = vperm.xlu0 %4219, %v4988_v51  }
 0x145   : > { %v5002_v56 = vpop.permute.xlu1 %447  ;;  %v5004_v57 = vpop.permute.xlu0 %444 }
 0x146   : > { %1783 = vperm.xlu1 %4220, %v4997_v54   ;;  %1778 = vperm.xlu0 %4219, %v5000_v55  }
 0x149   : > { %v5014_v60 = vpop.permute.xlu1 %453  ;;  %v5016_v61 = vpop.permute.xlu0 %450 }
 0x14a   : > { %7277 = vst [vmem:[#allocation17_spill] sm:$0xff] %v5014_v60  ;;  %1793 = vperm.xlu1 %4220, %v5009_v58   ;;  %1788 = vperm.xlu0 %4219, %v5012_v59  }
 0x14d   : > { %v5026_v0 = vpop.permute.xlu1 %459  ;;  %v5028_v1 = vpop.permute.xlu0 %456 }
 0x14e   : > { %7278 = vst [vmem:[#allocation18_spill] sm:$0xff] %v5026_v0  ;;  %7279 = vst [vmem:[#allocation19_spill] sm:$0xff] %v5028_v1  ;;  %1803 = vperm.xlu1 %4220, %v5021_v62   ;;  %1798 = vperm.xlu0 %4219, %v5024_v63  }
 0x151   : > { %v5038_v4 = vpop.permute.xlu1 %465  ;;  %v5040_v5 = vpop.permute.xlu0 %462 }
 0x152   : > { %7282 = vst [vmem:[#allocation22_spill] sm:$0xff] %v5038_v4  ;;  %7283 = vst [vmem:[#allocation23_spill] sm:$0xff] %v5040_v5  ;;  %1813 = vperm.xlu1 %4220, %v5033_v2   ;;  %1808 = vperm.xlu0 %4219, %v5036_v3  }
 0x155   : > { %v5050_v11 = vpop.permute.xlu1 %471  ;;  %v5052_v15 = vpop.permute.xlu0 %468 }
 0x156   : > { %7286 = vst [vmem:[#allocation26_spill] sm:$0xff] %v5050_v11  ;;  %7287 = vst [vmem:[#allocation27_spill] sm:$0xff] %v5052_v15  ;;  %1823 = vperm.xlu1 %4220, %v5045_v7   ;;  %1818 = vperm.xlu0 %4219, %v5048_v8   ;;  %v5069_v11 = vld [vmem:[%s4796_s7 + $0x108] sm:$0xff]  ;;  %v5072_v15 = vld [vmem:[%s4796_s7 + $0x100] sm:$0xff] }
 0x157   : > { %7292 = vst [vmem:[#allocation32_spill] sm:$0xff] %v5069_v11  ;;  %7293 = vst [vmem:[#allocation33_spill] sm:$0xff] %v5072_v15 }
 0x159   : > { %v5062_v4 = vpop.permute.xlu1 %477  ;;  %v5064_v5 = vpop.permute.xlu0 %474 }
 0x15a   : > { %7290 = vst [vmem:[#allocation30_spill] sm:$0xff] %v5062_v4  ;;  %7291 = vst [vmem:[#allocation31_spill] sm:$0xff] %v5064_v5  ;;  %1833 = vperm.xlu1 %4220, %v5057_v6   ;;  %1828 = vperm.xlu0 %4219, %v5060_v14   ;;  %v5081_v4 = vld [vmem:[%s4796_s7 + $0x118] sm:$0xff]  ;;  %v5084_v5 = vld [vmem:[%s4796_s7 + $0x110] sm:$0xff] }
 0x15b   : > { %7296 = vst [vmem:[#allocation36_spill] sm:$0xff] %v5081_v4  ;;  %7297 = vst [vmem:[#allocation37_spill] sm:$0xff] %v5084_v5 }
 0x15d   : > { %v5074_v7 = vpop.permute.xlu1 %483  ;;  %v5076_v8 = vpop.permute.xlu0 %480 }
 0x15e   : > { %7294 = vst [vmem:[#allocation34_spill] sm:$0xff] %v5074_v7  ;;  %7295 = vst [vmem:[#allocation35_spill] sm:$0xff] %v5076_v8  ;;  %1843 = vperm.xlu1 %4220, %v5069_v11   ;;  %1838 = vperm.xlu0 %4219, %v5072_v15   ;;  %v5093_v7 = vld [vmem:[%s4796_s7 + $0x128] sm:$0xff]  ;;  %v5096_v8 = vld [vmem:[%s4796_s7 + $0x120] sm:$0xff] }
 0x15f   : > { %7300 = vst [vmem:[#allocation40_spill] sm:$0xff] %v5093_v7  ;;  %7301 = vst [vmem:[#allocation41_spill] sm:$0xff] %v5096_v8 }
 0x161   : > { %v5086_v6 = vpop.permute.xlu1 %489  ;;  %v5088_v14 = vpop.permute.xlu0 %486 }
 0x162   : > { %7298 = vst [vmem:[#allocation38_spill] sm:$0xff] %v5086_v6  ;;  %7299 = vst [vmem:[#allocation39_spill] sm:$0xff] %v5088_v14  ;;  %1853 = vperm.xlu1 %4220, %v5081_v4   ;;  %1848 = vperm.xlu0 %4219, %v5084_v5   ;;  %v5105_v6 = vld [vmem:[%s4796_s7 + $0x138] sm:$0xff]  ;;  %v5108_v14 = vld [vmem:[%s4796_s7 + $0x130] sm:$0xff] }
 0x163   : > { %7304 = vst [vmem:[#allocation44_spill] sm:$0xff] %v5105_v6  ;;  %7305 = vst [vmem:[#allocation45_spill] sm:$0xff] %v5108_v14 }
 0x165   : > { %v5098_v11 = vpop.permute.xlu1 %495  ;;  %v5100_v15 = vpop.permute.xlu0 %492 }
 0x166   : > { %7302 = vst [vmem:[#allocation42_spill] sm:$0xff] %v5098_v11  ;;  %7303 = vst [vmem:[#allocation43_spill] sm:$0xff] %v5100_v15  ;;  %1863 = vperm.xlu1 %4220, %v5093_v7   ;;  %1858 = vperm.xlu0 %4219, %v5096_v8   ;;  %v5117_v11 = vld [vmem:[%s4796_s7 + $0x148] sm:$0xff]  ;;  %v5120_v15 = vld [vmem:[%s4796_s7 + $0x140] sm:$0xff] }
 0x167   : > { %7308 = vst [vmem:[#allocation48_spill] sm:$0xff] %v5117_v11  ;;  %7309 = vst [vmem:[#allocation49_spill] sm:$0xff] %v5120_v15 }
 0x169   : > { %v5110_v4 = vpop.permute.xlu1 %501  ;;  %v5112_v5 = vpop.permute.xlu0 %498 }
 0x16a   : > { %7306 = vst [vmem:[#allocation46_spill] sm:$0xff] %v5110_v4  ;;  %7307 = vst [vmem:[#allocation47_spill] sm:$0xff] %v5112_v5  ;;  %1873 = vperm.xlu1 %4220, %v5105_v6   ;;  %1868 = vperm.xlu0 %4219, %v5108_v14   ;;  %v5129_v4 = vld [vmem:[%s4796_s7 + $0x158] sm:$0xff]  ;;  %v5132_v5 = vld [vmem:[%s4796_s7 + $0x150] sm:$0xff] }
 0x16b   : > { %7312 = vst [vmem:[#allocation52_spill] sm:$0xff] %v5129_v4  ;;  %7313 = vst [vmem:[#allocation53_spill] sm:$0xff] %v5132_v5 }
 0x16d   : > { %v5122_v7 = vpop.permute.xlu1 %507  ;;  %v5124_v8 = vpop.permute.xlu0 %504 }
 0x16e   : > { %7310 = vst [vmem:[#allocation50_spill] sm:$0xff] %v5122_v7  ;;  %7311 = vst [vmem:[#allocation51_spill] sm:$0xff] %v5124_v8  ;;  %1883 = vperm.xlu1 %4220, %v5117_v11   ;;  %1878 = vperm.xlu0 %4219, %v5120_v15   ;;  %v5141_v7 = vld [vmem:[%s4796_s7 + $0x168] sm:$0xff]  ;;  %v5144_v8 = vld [vmem:[%s4796_s7 + $0x160] sm:$0xff] }
 0x16f   : > { %7316 = vst [vmem:[#allocation56_spill] sm:$0xff] %v5141_v7  ;;  %7317 = vst [vmem:[#allocation57_spill] sm:$0xff] %v5144_v8 }
 0x171   : > { %v5134_v6 = vpop.permute.xlu1 %513  ;;  %v5136_v14 = vpop.permute.xlu0 %510 }
 0x172   : > { %7314 = vst [vmem:[#allocation54_spill] sm:$0xff] %v5134_v6  ;;  %7315 = vst [vmem:[#allocation55_spill] sm:$0xff] %v5136_v14  ;;  %1893 = vperm.xlu1 %4220, %v5129_v4   ;;  %1888 = vperm.xlu0 %4219, %v5132_v5   ;;  %v5153_v6 = vld [vmem:[%s4796_s7 + $0x178] sm:$0xff]  ;;  %v5156_v14 = vld [vmem:[%s4796_s7 + $0x170] sm:$0xff] }
 0x173   : > { %7320 = vst [vmem:[#allocation60_spill] sm:$0xff] %v5153_v6  ;;  %7321 = vst [vmem:[#allocation61_spill] sm:$0xff] %v5156_v14 }
 0x175   : > { %v5146_v11 = vpop.permute.xlu1 %519  ;;  %v5148_v15 = vpop.permute.xlu0 %516 }
 0x176   : > { %7318 = vst [vmem:[#allocation58_spill] sm:$0xff] %v5146_v11  ;;  %7319 = vst [vmem:[#allocation59_spill] sm:$0xff] %v5148_v15  ;;  %1903 = vperm.xlu1 %4220, %v5141_v7   ;;  %1898 = vperm.xlu0 %4219, %v5144_v8   ;;  %v5165_v11 = vld [vmem:[%s4796_s7 + $0x188] sm:$0xff]  ;;  %v5168_v15 = vld [vmem:[%s4796_s7 + $0x180] sm:$0xff] }
 0x177   : > { %7324 = vst [vmem:[#allocation64_spill] sm:$0xff] %v5165_v11  ;;  %7325 = vst [vmem:[#allocation65_spill] sm:$0xff] %v5168_v15 }
 0x179   : > { %v5158_v4 = vpop.permute.xlu1 %525  ;;  %v5160_v5 = vpop.permute.xlu0 %522 }
 0x17a   : > { %7322 = vst [vmem:[#allocation62_spill] sm:$0xff] %v5158_v4  ;;  %7323 = vst [vmem:[#allocation63_spill] sm:$0xff] %v5160_v5  ;;  %1913 = vperm.xlu1 %4220, %v5153_v6   ;;  %1908 = vperm.xlu0 %4219, %v5156_v14   ;;  %v5177_v4 = vld [vmem:[%s4796_s7 + $0x198] sm:$0xff]  ;;  %v5180_v5 = vld [vmem:[%s4796_s7 + $0x190] sm:$0xff] }
 0x17b   : > { %7328 = vst [vmem:[#allocation68_spill] sm:$0xff] %v5177_v4  ;;  %7329 = vst [vmem:[#allocation69_spill] sm:$0xff] %v5180_v5 }
 0x17d   : > { %v5170_v7 = vpop.permute.xlu1 %531  ;;  %v5172_v8 = vpop.permute.xlu0 %528 }
 0x17e   : > { %7326 = vst [vmem:[#allocation66_spill] sm:$0xff] %v5170_v7  ;;  %7327 = vst [vmem:[#allocation67_spill] sm:$0xff] %v5172_v8  ;;  %1923 = vperm.xlu1 %4220, %v5165_v11   ;;  %1918 = vperm.xlu0 %4219, %v5168_v15   ;;  %v5189_v7 = vld [vmem:[%s4796_s7 + $0x1a8] sm:$0xff]  ;;  %v5192_v8 = vld [vmem:[%s4796_s7 + $0x1a0] sm:$0xff] }
 0x17f   : > { %7332 = vst [vmem:[#allocation72_spill] sm:$0xff] %v5189_v7  ;;  %7333 = vst [vmem:[#allocation73_spill] sm:$0xff] %v5192_v8 }
 0x181   : > { %v5182_v6 = vpop.permute.xlu1 %537  ;;  %v5184_v14 = vpop.permute.xlu0 %534 }
 0x182   : > { %7330 = vst [vmem:[#allocation70_spill] sm:$0xff] %v5182_v6  ;;  %7331 = vst [vmem:[#allocation71_spill] sm:$0xff] %v5184_v14  ;;  %1933 = vperm.xlu1 %4220, %v5177_v4   ;;  %1928 = vperm.xlu0 %4219, %v5180_v5   ;;  %v5201_v6 = vld [vmem:[%s4796_s7 + $0x1b8] sm:$0xff]  ;;  %v5204_v14 = vld [vmem:[%s4796_s7 + $0x1b0] sm:$0xff] }
 0x183   : > { %7336 = vst [vmem:[#allocation76_spill] sm:$0xff] %v5201_v6  ;;  %7337 = vst [vmem:[#allocation77_spill] sm:$0xff] %v5204_v14 }
 0x185   : > { %v5194_v11 = vpop.permute.xlu1 %543  ;;  %v5196_v15 = vpop.permute.xlu0 %540 }
 0x186   : > { %7334 = vst [vmem:[#allocation74_spill] sm:$0xff] %v5194_v11  ;;  %7335 = vst [vmem:[#allocation75_spill] sm:$0xff] %v5196_v15  ;;  %1943 = vperm.xlu1 %4220, %v5189_v7   ;;  %1938 = vperm.xlu0 %4219, %v5192_v8   ;;  %v5213_v11 = vld [vmem:[%s4796_s7 + $0x1c8] sm:$0xff]  ;;  %v5216_v15 = vld [vmem:[%s4796_s7 + $0x1c0] sm:$0xff] }
 0x187   : > { %7340 = vst [vmem:[#allocation80_spill] sm:$0xff] %v5213_v11  ;;  %7341 = vst [vmem:[#allocation81_spill] sm:$0xff] %v5216_v15 }
 0x189   : > { %v5206_v4 = vpop.permute.xlu1 %549  ;;  %v5208_v5 = vpop.permute.xlu0 %546 }
 0x18a   : > { %7338 = vst [vmem:[#allocation78_spill] sm:$0xff] %v5206_v4  ;;  %7339 = vst [vmem:[#allocation79_spill] sm:$0xff] %v5208_v5  ;;  %1953 = vperm.xlu1 %4220, %v5201_v6   ;;  %1948 = vperm.xlu0 %4219, %v5204_v14   ;;  %v5225_v4 = vld [vmem:[%s4796_s7 + $0x1d8] sm:$0xff]  ;;  %v5228_v5 = vld [vmem:[%s4796_s7 + $0x1d0] sm:$0xff] }
 0x18b   : > { %7344 = vst [vmem:[#allocation84_spill] sm:$0xff] %v5225_v4  ;;  %7345 = vst [vmem:[#allocation85_spill] sm:$0xff] %v5228_v5 }
 0x18d   : > { %v5218_v7 = vpop.permute.xlu1 %555  ;;  %v5220_v8 = vpop.permute.xlu0 %552 }
 0x18e   : > { %7342 = vst [vmem:[#allocation82_spill] sm:$0xff] %v5218_v7  ;;  %7343 = vst [vmem:[#allocation83_spill] sm:$0xff] %v5220_v8  ;;  %1963 = vperm.xlu1 %4220, %v5213_v11   ;;  %1958 = vperm.xlu0 %4219, %v5216_v15   ;;  %v5237_v7 = vld [vmem:[%s4796_s7 + $0x1e8] sm:$0xff]  ;;  %v5240_v8 = vld [vmem:[%s4796_s7 + $0x1e0] sm:$0xff] }
 0x18f   : > { %7348 = vst [vmem:[#allocation88_spill] sm:$0xff] %v5237_v7  ;;  %7349 = vst [vmem:[#allocation89_spill] sm:$0xff] %v5240_v8  ;;  %v5249_v15 = vld [vmem:[%s4796_s7 + $0x1f8] sm:$0xff] }
 0x190   : > { %7352 = vst [vmem:[#allocation92_spill] sm:$0xff] %v5249_v15 }
 0x191   : > { %v5230_v6 = vpop.permute.xlu1 %561  ;;  %v5232_v14 = vpop.permute.xlu0 %558 }
 0x192   : > { %7346 = vst [vmem:[#allocation86_spill] sm:$0xff] %v5230_v6  ;;  %7347 = vst [vmem:[#allocation87_spill] sm:$0xff] %v5232_v14  ;;  %1973 = vperm.xlu1 %4220, %v5225_v4   ;;  %1968 = vperm.xlu0 %4219, %v5228_v5   ;;  %v5252_v6 = vld [vmem:[%s4796_s7 + $0x1f0] sm:$0xff] }
 0x195   : > { %v5242_v0 = vpop.permute.xlu1 %567  ;;  %v5244_v11 = vpop.permute.xlu0 %564 }
 0x196   : > { %7350 = vst [vmem:[#allocation90_spill] sm:$0xff] %v5242_v0  ;;  %7351 = vst [vmem:[#allocation91_spill] sm:$0xff] %v5244_v11  ;;  %1983 = vperm.xlu1 %4220, %v5237_v7   ;;  %1978 = vperm.xlu0 %4219, %v5240_v8   ;;  %v4535_v8 = vmov 1  }
 0x199   : > { %v4228_v14 = vpop.permute.xlu1 %4227  ;;  %v4223_v4 = vpop.permute.xlu0 %4222 }
 0x19a   : > { %1993 = vperm.xlu1 %4220, %v5249_v15   ;;  %1988 = vperm.xlu0 %4219, %v5252_v6   ;;  %v4225_v5 = vunpack.i.h.bf16 %v4223_v4  ;;  %v4224_v2 = vunpack.i.l.bf16 %v4223_v4  ;;  %v4230_v1 = vunpack.i.h.bf16 %v4228_v14  ;;  %v4229_v0 = vunpack.i.l.bf16 %v4228_v14 }
 0x19b   : > { %v7359_v14 = vmov 0.0  }
 0x19c   : > { %v3984_v3 = vpack.c.bf16 %v4225_v5, %v4224_v2  ;;  %v3988_v60 = vpack.c.bf16 %v4230_v1, %v4229_v0  ;;  %v3453_v0 = vsel %vm570_vm4, 1.0, %v7359_v14  ;;  %v3454_v1 = vsel %vm571_vm5, 1.0, %v7359_v14 }
 0x19d   : > { %v5256_v11 = vpop.permute.xlu1 %1683  ;;  %v5258_v7 = vpop.permute.xlu0 %1678  ;;  %v3456_v16 = vsel %vm573_vm7, 1.0, %v7359_v14  ;;  %v3458_v20 = vsel %vm575_vm9, 1.0, %v7359_v14  ;;  %v3460_v24 = vsel %vm577_vm11, 1.0, %v7359_v14  ;;  %v3462_v28 = vsel %vm579_vm13, 1.0, %v7359_v14 }
 0x19e   : > { %7353 = vst [vmem:[#allocation93_spill] sm:$0xff] %v5256_v11  ;;  %7354 = vst [vmem:[#allocation94_spill] sm:$0xff] %v5258_v7  ;;  %4232 = vset.pattern.permute.xlu1 %v4535_v8  ;;  %4231 = vset.pattern.permute.xlu0 %v4535_v8  ;;  %v3464_v32 = vsel %vm581_vm15, 1.0, %v7359_v14  ;;  %v3466_v36 = vsel %vm583_vm1, 1.0, %v7359_v14  ;;  %vm585_vm4 = vcmp.eq.s32.totalorder %v4968_v45, %v4869_v9  ;;  %v5953_v11 = vld [vmem:[%s4796_s7 + $0x70] sm:$0xff] }
 0x19f   : > { %3985 = vmatprep.subr.bf16.mxu0 %v3984_v3  ;;  %2001 = vperm.xlu1 %4232, %v4875_v12   ;;  %vm586_vm5 = vcmp.eq.s32.totalorder %v4966_v44, %v4869_v9  ;;  %v3468_v40 = vsel %vm585_vm4, 1.0, %v7359_v14  ;;  %vm588_vm7 = vcmp.eq.s32.totalorder %v4978_v48, %v4869_v9  ;;  %vm590_vm9 = vcmp.eq.s32.totalorder %v4990_v52, %v4869_v9 }
 0x1a0   : > { %1997 = vperm.xlu0 %4231, %v4878_v13   ;;  %3987 = vmatpush3.bf16.msra.mxu0 %v3984_v3  ;;  %v3469_v2 = vsel %vm586_vm5, 1.0, %v7359_v14  ;;  %v3471_v3 = vsel %vm588_vm7, 1.0, %v7359_v14  ;;  %v3473_v8 = vsel %vm590_vm9, 1.0, %v7359_v14  ;;  %vm592_vm11 = vcmp.eq.s32.totalorder %v5002_v56, %v4869_v9  ;;  %v7380_v56 = vld [vmem:[#allocation17_spill] sm:$0xff] }
 0x1a1   : > { %3989 = vmatprep.subr.bf16.mxu0 %v3988_v60  ;;  %v5262_v15 = vpop.permute.xlu1 %1693  ;;  %v5264_v4 = vpop.permute.xlu0 %1688  ;;  %vm594_vm13 = vcmp.eq.s32.totalorder %v7380_v56, %v4869_v9  ;;  %v7398_v56 = vld [vmem:[#allocation26_spill] sm:$0xff] }
 0x1a2   : > { %7355 = vst [vmem:[#allocation95_spill] sm:$0xff] %v5262_v15  ;;  %7356 = vst [vmem:[#allocation96_spill] sm:$0xff] %v5264_v4  ;;  %vm600_vm4 = vcmp.eq.s32.totalorder %v7398_v56, %v4869_v9  ;;  %v5885_v4 = vld [vmem:[%s4796_s7 + $0xe8] sm:$0xff] }
 0x1a3   : > { %2005 = vperm.xlu1 %4232, %v4892_v19  }
 0x1a4   : > { %2009 = vperm.xlu0 %4231, %v4889_v18   ;;  %3991 = vmatpush3.bf16.msra.mxu0 %v3988_v60  ;;  %v3455_v18 = vsel %vm572_vm6, 1.0, %v7359_v14  ;;  %v3467_v60 = vsel %vm584_vm3, 1.0, %v7359_v14  ;;  %vm587_vm6 = vcmp.eq.s32.totalorder %v4980_v49, %v4869_v9 }
 0x1a5   : > { %v5272_v12 = vpop.permute.xlu1 %1703  ;;  %v5274_v13 = vpop.permute.xlu0 %1698  ;;  %v3470_v44 = vsel %vm587_vm6, 1.0, %v7359_v14 }
 0x1a6   : > { %7357 = vst [vmem:[#allocation97_spill] sm:$0xff] %v5272_v12  ;;  %7358 = vst [vmem:[#allocation98_spill] sm:$0xff] %v5274_v13  ;;  %v5812_v12 = vld [vmem:[%s4796_s7 + $0x98] sm:$0xff] }
 0x1a7   : > { %3889 = vmatmul.mubr.msk.f32.vlgmr.msra.gmra.mrb[0].mxu0 %vm7259_vm2, %v3453_v0  ;;  %2013 = vperm.xlu1 %4232, %v4904_v23  }
 0x1a8   : > { %2017 = vperm.xlu0 %4231, %v4901_v22   ;;  %3891 = vmatprep.mubr.msk.f32.mxu0 %vm7259_vm2, %v3454_v1  ;;  %v3457_v22 = vsel %vm574_vm8, 1.0, %v7359_v14  ;;  %vm589_vm8 = vcmp.eq.s32.totalorder %v4992_v53, %v4869_v9  ;;  %v3475_v1 = vsel %vm592_vm11, 1.0, %v7359_v14 }
 0x1a9   : > { %v5286_v10 = vpop.permute.xlu1 %1713  ;;  %v5288_v17 = vpop.permute.xlu0 %1708  ;;  %v3472_v48 = vsel %vm589_vm8, 1.0, %v7359_v14 }
 0x1aa   : > { %7360 = vst [vmem:[#allocation99_spill] sm:$0xff] %v5286_v10  ;;  %7361 = vst [vmem:[#allocation100_spill] sm:$0xff] %v5288_v17  ;;  %v5767_v17 = vld [vmem:[%s4796_s7 + $0x48] sm:$0xff] }
 0x1ab   : > { %3892 = vmatmul.mubr.msk.f32.gmra.mrb[2].mxu0 %vm7259_vm2, %v3455_v18  ;;  %2021 = vperm.xlu1 %4232, %v4916_v27  }
 0x1ac   : > { %2025 = vperm.xlu0 %4231, %v4913_v26   ;;  %3894 = vmatprep.mubr.msk.f32.mxu0 %vm7259_vm2, %v3456_v16  ;;  %v3459_v26 = vsel %vm576_vm10, 1.0, %v7359_v14  ;;  %vm591_vm10 = vcmp.eq.s32.totalorder %v5004_v57, %v4869_v9  ;;  %v7381_v16 = vld [vmem:[#allocation21_spill] sm:$0xff] }
 0x1ad   : > { %v5300_v19 = vpop.permute.xlu1 %1723  ;;  %v5302_v21 = vpop.permute.xlu0 %1718  ;;  %v3474_v52 = vsel %vm591_vm10, 1.0, %v7359_v14 }
 0x1ae   : > { %7362 = vst [vmem:[#allocation101_spill] sm:$0xff] %v5300_v19  ;;  %7363 = vst [vmem:[#allocation102_spill] sm:$0xff] %v5302_v21 }
 0x1af   : > { %3895 = vmatmul.mubr.msk.f32.gmra.mrb[4].mxu0 %vm7259_vm2, %v3457_v22  ;;  %2029 = vperm.xlu1 %4232, %v4928_v31  }
 0x1b0   : > { %2033 = vperm.xlu0 %4231, %v4925_v30   ;;  %3897 = vmatprep.mubr.msk.f32.mxu0 %vm7259_vm2, %v3458_v20  ;;  %v3461_v30 = vsel %vm578_vm12, 1.0, %v7359_v14  ;;  %vm593_vm12 = vcmp.eq.s32.totalorder %v5016_v61, %v4869_v9  ;;  %v7382_v61 = vld [vmem:[#allocation19_spill] sm:$0xff] }
 0x1b1   : > { %v5314_v23 = vpop.permute.xlu1 %1733  ;;  %v5316_v25 = vpop.permute.xlu0 %1728  ;;  %v3476_v18 = vsel %vm593_vm12, 1.0, %v7359_v14 }
 0x1b2   : > { %7364 = vst [vmem:[#allocation103_spill] sm:$0xff] %v5314_v23  ;;  %7365 = vst [vmem:[#allocation104_spill] sm:$0xff] %v5316_v25  ;;  %v5735_v23 = vld [vmem:[%s4796_s7 + $0x30] sm:$0xff] }
 0x1b3   : > { %3898 = vmatmul.mubr.msk.f32.gmra.mrb[6].mxu0 %vm7259_vm2, %v3459_v26  ;;  %2037 = vperm.xlu1 %4232, %v4940_v35   ;;  %v3477_v26 = vsel %vm594_vm13, 1.0, %v7359_v14 }
 0x1b4   : > { %2041 = vperm.xlu0 %4231, %v4937_v34   ;;  %3900 = vmatprep.mubr.msk.f32.mxu0 %vm7259_vm2, %v3460_v24  ;;  %v3463_v34 = vsel %vm580_vm14, 1.0, %v7359_v14  ;;  %vm595_vm14 = vcmp.eq.s32.totalorder %v7382_v61, %v4869_v9  ;;  %v7386_v24 = vld [vmem:[#allocation18_spill] sm:$0xff]  ;;  %v7399_v61 = vld [vmem:[#allocation33_spill] sm:$0xff] }
 0x1b5   : > { %v5328_v27 = vpop.permute.xlu1 %1743  ;;  %v5330_v29 = vpop.permute.xlu0 %1738  ;;  %vm596_vm15 = vcmp.eq.s32.totalorder %v7386_v24, %v4869_v9 }
 0x1b6   : > { %7366 = vst [vmem:[#allocation105_spill] sm:$0xff] %v5328_v27  ;;  %7367 = vst [vmem:[#allocation106_spill] sm:$0xff] %v5330_v29  ;;  %v7467_v27 = vld [vmem:[#allocation76_spill] sm:$0xff] }
 0x1b7   : > { %3901 = vmatmul.mubr.msk.f32.gmra.mrb[8].mxu0 %vm7259_vm2, %v3461_v30  ;;  %2045 = vperm.xlu1 %4232, %v4952_v39   ;;  %v3478_v30 = vsel %vm595_vm14, 1.0, %v7359_v14  ;;  %v7479_v29 = vld [vmem:[#allocation84_spill] sm:$0xff] }
 0x1b8   : > { %2049 = vperm.xlu0 %4231, %v4949_v38   ;;  %3903 = vmatprep.mubr.msk.f32.mxu0 %vm7259_vm2, %v3462_v28  ;;  %v3465_v38 = vsel %vm582_vm0, 1.0, %v7359_v14  ;;  %v7387_v28 = vld [vmem:[#allocation25_spill] sm:$0xff] }
 0x1b9   : > { %v5342_v31 = vpop.permute.xlu1 %1753  ;;  %v5344_v33 = vpop.permute.xlu0 %1748 }
 0x1ba   : > { %7368 = vst [vmem:[#allocation107_spill] sm:$0xff] %v5342_v31  ;;  %7369 = vst [vmem:[#allocation108_spill] sm:$0xff] %v5344_v33  ;;  %v7461_v31 = vld [vmem:[#allocation72_spill] sm:$0xff]  ;;  %v5747_v33 = vld [vmem:[%s4796_s7 + $0x40] sm:$0xff] }
 0x1bb   : > { %3904 = vmatmul.mubr.msk.f32.gmra.mrb[10].mxu0 %vm7259_vm2, %v3463_v34  ;;  %2053 = vperm.xlu1 %4232, %v4964_v43   ;;  %v7388_v34 = vld [vmem:[#allocation23_spill] sm:$0xff] }
 0x1bc   : > { %2057 = vperm.xlu0 %4231, %v4961_v42   ;;  %3906 = vmatprep.mubr.msk.f32.mxu0 %vm7259_vm2, %v3464_v32  ;;  %vm597_vm0 = vcmp.eq.s32.totalorder %v7388_v34, %v4869_v9  ;;  %v7389_v32 = vld [vmem:[#allocation24_spill] sm:$0xff]  ;;  %v3483_v34 = vsel %vm600_vm4, 1.0, %v7359_v14 }
 0x1bd   : > { %v5356_v35 = vpop.permute.xlu1 %1763  ;;  %v5358_v37 = vpop.permute.xlu0 %1758 }
 0x1be   : > { %7370 = vst [vmem:[#allocation109_spill] sm:$0xff] %v5356_v35  ;;  %7371 = vst [vmem:[#allocation110_spill] sm:$0xff] %v5358_v37  ;;  %v7226_v37 = vmov 3  }
 0x1bf   : > { %3907 = vmatmul.mubr.msk.f32.gmra.mrb[12].mxu0 %vm7259_vm2, %v3465_v38  ;;  %2061 = vperm.xlu1 %4232, %v4976_v47  }
 0x1c0   : > { %2065 = vperm.xlu0 %4231, %v4973_v46   ;;  %3909 = vmatprep.mubr.msk.f32.mxu0 %vm7259_vm2, %v3466_v36 }
 0x1c1   : > { %v5370_v41 = vpop.permute.xlu1 %1773  ;;  %v5372_v42 = vpop.permute.xlu0 %1768 }
 0x1c2   : > { %7372 = vst [vmem:[#allocation111_spill] sm:$0xff] %v5370_v41  ;;  %v5948_v41 = vld [vmem:[%s4796_s7 + $0xf0] sm:$0xff] }
 0x1c3   : > { %3910 = vmatmul.mubr.msk.f32.gmra.mrb[14].mxu0 %vm7259_vm2, %v3467_v60  ;;  %2069 = vperm.xlu1 %4232, %v4988_v51   ;;  %v3479_v60 = vsel %vm596_vm15, 1.0, %v7359_v14 }
 0x1c4   : > { %2073 = vperm.xlu0 %4231, %v4985_v50   ;;  %3912 = vmatprep.mubr.msk.f32.mxu0 %vm7259_vm2, %v3468_v40  ;;  %v7392_v40 = vld [vmem:[#allocation22_spill] sm:$0xff] }
 0x1c5   : > { %v5384_v45 = vpop.permute.xlu1 %1783  ;;  %v5386_v46 = vpop.permute.xlu0 %1778  ;;  %vm598_vm1 = vcmp.eq.s32.totalorder %v7392_v40, %v4869_v9  ;;  %v7405_v40 = vld [vmem:[#allocation37_spill] sm:$0xff] }
 0x1c6   : > { %7373 = vst [vmem:[#allocation112_spill] sm:$0xff] %v5384_v45 }
 0x1c7   : > { %3913 = vmatmul.mubr.msk.f32.gmra.mrb[16].mxu0 %vm7259_vm2, %v3469_v2  ;;  %2077 = vperm.xlu1 %4232, %v5000_v55   ;;  %v3480_v2 = vsel %vm597_vm0, 1.0, %v7359_v14 }
 0x1c8   : > { %2081 = vperm.xlu0 %4231, %v4997_v54   ;;  %3915 = vmatprep.mubr.msk.f32.mxu0 %vm7259_vm2, %v3470_v44  ;;  %v7393_v44 = vld [vmem:[#allocation29_spill] sm:$0xff] }
 0x1c9   : > { %v5398_v49 = vpop.permute.xlu1 %1793  ;;  %v5400_v50 = vpop.permute.xlu0 %1788 }
 0x1ca   : > { %7374 = vst [vmem:[#allocation113_spill] sm:$0xff] %v5398_v49  ;;  %7375 = vst [vmem:[#allocation114_spill] sm:$0xff] %v5400_v50 }
 0x1cb   : > { %3916 = vmatmul.mubr.msk.f32.gmra.mrb[18].mxu0 %vm7259_vm2, %v3471_v3  ;;  %2085 = vperm.xlu1 %4232, %v5012_v59   ;;  %v7394_v3 = vld [vmem:[#allocation27_spill] sm:$0xff] }
 0x1cc   : > { %2089 = vperm.xlu0 %4231, %v5009_v58   ;;  %3918 = vmatprep.mubr.msk.f32.mxu0 %vm7259_vm2, %v3472_v48  ;;  %vm599_vm3 = vcmp.eq.s32.totalorder %v7394_v3, %v4869_v9  ;;  %v7395_v48 = vld [vmem:[#allocation28_spill] sm:$0xff] }
 0x1cd   : > { %v5412_v53 = vpop.permute.xlu1 %1803  ;;  %v5414_v5 = vpop.permute.xlu0 %1798  ;;  %v7407_v3 = vld [vmem:[#allocation36_spill] sm:$0xff] }
 0x1ce   : > { %7376 = vst [vmem:[#allocation115_spill] sm:$0xff] %v5412_v53  ;;  %7377 = vst [vmem:[#allocation116_spill] sm:$0xff] %v5414_v5  ;;  %v5759_v53 = vld [vmem:[%s4796_s7 + $0x50] sm:$0xff]  ;;  %v5917_v5 = vld [vmem:[%s4796_s7 + $0x108] sm:$0xff] }
 0x1cf   : > { %3919 = vmatmul.mubr.msk.f32.gmra.mrb[20].mxu0 %vm7259_vm2, %v3473_v8  ;;  %2093 = vperm.xlu1 %4232, %v5024_v63  }
 0x1d0   : > { %2097 = vperm.xlu0 %4231, %v5021_v62   ;;  %3921 = vmatprep.mubr.msk.f32.mxu0 %vm7259_vm2, %v3474_v52  ;;  %v7383_v62 = vld [vmem:[#allocation20_spill] sm:$0xff] }
 0x1d1   : > { %v5426_v57 = vpop.permute.xlu1 %1813  ;;  %v5428_v0 = vpop.permute.xlu0 %1808 }
 0x1d2   : > { %7378 = vst [vmem:[#allocation117_spill] sm:$0xff] %v5426_v57  ;;  %7379 = vst [vmem:[#allocation118_spill] sm:$0xff] %v5428_v0  ;;  %v5743_v57 = vld [vmem:[%s4796_s7 + $0x28] sm:$0xff] }
 0x1d3   : > { %3922 = vmatmul.mubr.msk.f32.gmra.mrb[22].mxu0 %vm7259_vm2, %v3475_v1  ;;  %2101 = vperm.xlu1 %4232, %v7381_v16   ;;  %v3481_v1 = vsel %vm598_vm1, 1.0, %v7359_v14 }
 0x1d4   : > { %2105 = vperm.xlu0 %4231, %v7383_v62   ;;  %3924 = vmatprep.mubr.msk.f32.mxu0 %vm7259_vm2, %v3476_v18  ;;  %v3482_v18 = vsel %vm599_vm3, 1.0, %v7359_v14  ;;  %v7400_v62 = vld [vmem:[#allocation31_spill] sm:$0xff] }
 0x1d5   : > { %v5440_v22 = vpop.permute.xlu1 %1823  ;;  %v5442_v20 = vpop.permute.xlu0 %1818  ;;  %vm601_vm5 = vcmp.eq.s32.totalorder %v7400_v62, %v4869_v9 }
 0x1d6   : > { %7384 = vst [vmem:[#allocation17_spill] sm:$0xff] %v5440_v22  ;;  %7385 = vst [vmem:[#allocation21_spill] sm:$0xff] %v5442_v20  ;;  %v5731_v22 = vld [vmem:[%s4796_s7 + $0x18] sm:$0xff]  ;;  %v5785_v20 = vld [vmem:[%s4796_s7 + $0x68] sm:$0xff] }
 0x1d7   : > { %3925 = vmatmul.mubr.msk.f32.gmra.mrb[24].mxu0 %vm7259_vm2, %v3477_v26  ;;  %2109 = vperm.xlu1 %4232, %v7387_v28   ;;  %v7401_v26 = vld [vmem:[#allocation32_spill] sm:$0xff] }
 0x1d8   : > { %2113 = vperm.xlu0 %4231, %v7389_v32   ;;  %3927 = vmatprep.mubr.msk.f32.mxu0 %vm7259_vm2, %v3478_v30  ;;  %v7404_v32 = vld [vmem:[#allocation30_spill] sm:$0xff] }
 0x1d9   : > { %v5454_v38 = vpop.permute.xlu1 %1833  ;;  %v5456_v36 = vpop.permute.xlu0 %1828  ;;  %vm602_vm6 = vcmp.eq.s32.totalorder %v7404_v32, %v4869_v9  ;;  %v7413_v32 = vld [vmem:[#allocation40_spill] sm:$0xff] }
 0x1da   : > { %7390 = vst [vmem:[#allocation19_spill] sm:$0xff] %v5454_v38  ;;  %7391 = vst [vmem:[#allocation20_spill] sm:$0xff] %v5456_v36  ;;  %v3485_v56 = vsel %vm602_vm6, 1.0, %v7359_v14  ;;  %v7465_v38 = vld [vmem:[#allocation77_spill] sm:$0xff]  ;;  %v5755_v36 = vld [vmem:[%s4796_s7 + $0x38] sm:$0xff] }
 0x1db   : > { %3928 = vmatmul.mubr.msk.f32.gmra.mrb[26].mxu0 %vm7259_vm2, %v3479_v60  ;;  %2117 = vperm.xlu1 %4232, %v7393_v44   ;;  %v3484_v60 = vsel %vm601_vm5, 1.0, %v7359_v14 }
 0x1dc   : > { %2121 = vperm.xlu0 %4231, %v7395_v48   ;;  %3930 = vmatprep.mubr.msk.f32.mxu0 %vm7259_vm2, %v3480_v2  ;;  %v7406_v2 = vld [vmem:[#allocation35_spill] sm:$0xff] }
 0x1dd   : > { %v5468_v8 = vpop.permute.xlu1 %1843  ;;  %v5470_v52 = vpop.permute.xlu0 %1838  ;;  %vm603_vm7 = vcmp.eq.s32.totalorder %v7406_v2, %v4869_v9 }
 0x1de   : > { %7396 = vst [vmem:[#allocation18_spill] sm:$0xff] %v5468_v8  ;;  %7397 = vst [vmem:[#allocation25_spill] sm:$0xff] %v5470_v52  ;;  %v3486_v62 = vsel %vm603_vm7, 1.0, %v7359_v14  ;;  %v7455_v52 = vld [vmem:[#allocation68_spill] sm:$0xff]  ;;  %v7459_v8 = vld [vmem:[#allocation73_spill] sm:$0xff] }
 0x1df   : > { %3931 = vmatmul.mubr.msk.f32.gmra.mrb[28].mxu0 %vm7259_vm2, %v3481_v1  ;;  %2125 = vperm.xlu1 %4232, %v7399_v61  }
 0x1e0   : > { %2129 = vperm.xlu0 %4231, %v7401_v26   ;;  %3933 = vmatprep.mubr.msk.f32.mxu0 %vm7259_vm2, %v3482_v18  ;;  %v7410_v18 = vld [vmem:[#allocation34_spill] sm:$0xff]  ;;  %v7411_v26 = vld [vmem:[#allocation41_spill] sm:$0xff] }
 0x1e1   : > { %v5482_v24 = vpop.permute.xlu1 %1853  ;;  %v5484_v30 = vpop.permute.xlu0 %1848  ;;  %vm604_vm8 = vcmp.eq.s32.totalorder %v7410_v18, %v4869_v9  ;;  %v7416_v18 = vld [vmem:[#allocation38_spill] sm:$0xff] }
 0x1e2   : > { %7402 = vst [vmem:[#allocation23_spill] sm:$0xff] %v5482_v24  ;;  %7403 = vst [vmem:[#allocation24_spill] sm:$0xff] %v5484_v30  ;;  %vm606_vm10 = vcmp.eq.s32.totalorder %v7416_v18, %v4869_v9  ;;  %v7422_v18 = vld [vmem:[#allocation42_spill] sm:$0xff]  ;;  %v7453_v30 = vld [vmem:[#allocation69_spill] sm:$0xff] }
 0x1e3   : > { %3934 = vmatmul.mubr.msk.f32.gmra.mrb[30].mxu0 %vm7259_vm2, %v3483_v34  ;;  %2133 = vperm.xlu1 %4232, %v7405_v40   ;;  %v7412_v34 = vld [vmem:[#allocation39_spill] sm:$0xff]  ;;  %vm608_vm12 = vcmp.eq.s32.totalorder %v7422_v18, %v4869_v9  ;;  %v7428_v18 = vld [vmem:[#allocation46_spill] sm:$0xff] }
 0x1e4   : > { %2137 = vperm.xlu0 %4231, %v7407_v3   ;;  %3936 = vmatprep.mubr.msk.f32.mxu0 %vm7259_vm2, %v3484_v60  ;;  %vm605_vm9 = vcmp.eq.s32.totalorder %v7412_v34, %v4869_v9  ;;  %v3487_v3 = vsel %vm604_vm8, 1.0, %v7359_v14  ;;  %v7418_v34 = vld [vmem:[#allocation43_spill] sm:$0xff]  ;;  %vm610_vm14 = vcmp.eq.s32.totalorder %v7428_v18, %v4869_v9  ;;  %v7434_v18 = vld [vmem:[#allocation50_spill] sm:$0xff] }
 0x1e5   : > { %v5496_v48 = vpop.permute.xlu1 %1863  ;;  %v5498_v1 = vpop.permute.xlu0 %1858  ;;  %vm607_vm11 = vcmp.eq.s32.totalorder %v7418_v34, %v4869_v9  ;;  %v7424_v34 = vld [vmem:[#allocation47_spill] sm:$0xff]  ;;  %vm612_vm0 = vcmp.eq.s32.totalorder %v7434_v18, %v4869_v9  ;;  %v7440_v18 = vld [vmem:[#allocation54_spill] sm:$0xff] }
 0x1e6   : > { %7408 = vst [vmem:[#allocation22_spill] sm:$0xff] %v5496_v48  ;;  %7409 = vst [vmem:[#allocation29_spill] sm:$0xff] %v5498_v1  ;;  %v7417_v48 = vld [vmem:[#allocation45_spill] sm:$0xff]  ;;  %vm609_vm13 = vcmp.eq.s32.totalorder %v7424_v34, %v4869_v9  ;;  %v7430_v34 = vld [vmem:[#allocation51_spill] sm:$0xff]  ;;  %vm614_vm3 = vcmp.eq.s32.totalorder %v7440_v18, %v4869_v9 }
 0x1e7   : > { %3937 = vmatmul.mubr.msk.f32.gmra.mrb[32].mxu0 %vm7259_vm2, %v3485_v56  ;;  %2141 = vperm.xlu1 %4232, %v7411_v26   ;;  %v3488_v56 = vsel %vm605_vm9, 1.0, %v7359_v14  ;;  %vm611_vm15 = vcmp.eq.s32.totalorder %v7430_v34, %v4869_v9  ;;  %v7436_v34 = vld [vmem:[#allocation55_spill] sm:$0xff]  ;;  %v7446_v18 = vld [vmem:[#allocation58_spill] sm:$0xff] }
 0x1e8   : > { %2145 = vperm.xlu0 %4231, %v7413_v32   ;;  %3939 = vmatprep.mubr.msk.f32.mxu0 %vm7259_vm2, %v3486_v62  ;;  %v7419_v32 = vld [vmem:[#allocation44_spill] sm:$0xff]  ;;  %vm613_vm1 = vcmp.eq.s32.totalorder %v7436_v34, %v4869_v9  ;;  %v7442_v34 = vld [vmem:[#allocation59_spill] sm:$0xff]  ;;  %vm616_vm5 = vcmp.eq.s32.totalorder %v7446_v18, %v4869_v9  ;;  %v7452_v18 = vld [vmem:[#allocation62_spill] sm:$0xff] }
 0x1e9   : > { %v5510_v60 = vpop.permute.xlu1 %1873  ;;  %v5512_v2 = vpop.permute.xlu0 %1868  ;;  %vm615_vm4 = vcmp.eq.s32.totalorder %v7442_v34, %v4869_v9  ;;  %v7448_v34 = vld [vmem:[#allocation63_spill] sm:$0xff]  ;;  %v3499_v24 = vsel %vm616_vm5, 1.0, %v7359_v14  ;;  %vm618_vm7 = vcmp.eq.s32.totalorder %v7452_v18, %v4869_v9  ;;  %v7458_v18 = vld [vmem:[#allocation66_spill] sm:$0xff] }
 0x1ea   : > { %7414 = vst [vmem:[#allocation27_spill] sm:$0xff] %v5510_v60  ;;  %7415 = vst [vmem:[#allocation28_spill] sm:$0xff] %v5512_v2  ;;  %v3489_v60 = vsel %vm606_vm10, 1.0, %v7359_v14  ;;  %vm617_vm6 = vcmp.eq.s32.totalorder %v7448_v34, %v4869_v9  ;;  %v7454_v34 = vld [vmem:[#allocation67_spill] sm:$0xff]  ;;  %vm620_vm9 = vcmp.eq.s32.totalorder %v7458_v18, %v4869_v9  ;;  %v7464_v18 = vld [vmem:[#allocation70_spill] sm:$0xff] }
 0x1eb   : > { %3940 = vmatmul.mubr.msk.f32.gmra.mrb[34].mxu0 %vm7259_vm2, %v3487_v3  ;;  %2149 = vperm.xlu1 %4232, %v7417_v48   ;;  %v3490_v3 = vsel %vm607_vm11, 1.0, %v7359_v14  ;;  %v7423_v48 = vld [vmem:[#allocation49_spill] sm:$0xff]  ;;  %vm619_vm8 = vcmp.eq.s32.totalorder %v7454_v34, %v4869_v9  ;;  %v7460_v34 = vld [vmem:[#allocation71_spill] sm:$0xff]  ;;  %vm622_vm11 = vcmp.eq.s32.totalorder %v7464_v18, %v4869_v9  ;;  %v7470_v18 = vld [vmem:[#allocation74_spill] sm:$0xff] }
 0x1ec   : > { %2153 = vperm.xlu0 %4231, %v7419_v32   ;;  %3942 = vmatprep.mubr.msk.f32.mxu0 %vm7259_vm2, %v3488_v56  ;;  %v7425_v32 = vld [vmem:[#allocation48_spill] sm:$0xff]  ;;  %vm621_vm10 = vcmp.eq.s32.totalorder %v7460_v34, %v4869_v9  ;;  %v7466_v34 = vld [vmem:[#allocation75_spill] sm:$0xff] }
 0x1ed   : > { %v5524_v62 = vpop.permute.xlu1 %1883  ;;  %v5526_v2 = vpop.permute.xlu0 %1878 }
 0x1ee   : > { %7420 = vst [vmem:[#allocation26_spill] sm:$0xff] %v5524_v62  ;;  %7421 = vst [vmem:[#allocation33_spill] sm:$0xff] %v5526_v2  ;;  %v3491_v62 = vsel %vm608_vm12, 1.0, %v7359_v14  ;;  %vm623_vm12 = vcmp.eq.s32.totalorder %v7466_v34, %v4869_v9  ;;  %v7472_v34 = vld [vmem:[#allocation79_spill] sm:$0xff] }
 0x1ef   : > { %3943 = vmatmul.mubr.msk.f32.gmra.mrb[36].mxu0 %vm7259_vm2, %v3489_v60  ;;  %2157 = vperm.xlu1 %4232, %v7423_v48   ;;  %v3492_v60 = vsel %vm609_vm13, 1.0, %v7359_v14  ;;  %v7429_v48 = vld [vmem:[#allocation53_spill] sm:$0xff]  ;;  %vm624_vm13 = vcmp.eq.s32.totalorder %v7470_v18, %v4869_v9  ;;  %v7476_v18 = vld [vmem:[#allocation78_spill] sm:$0xff] }
 0x1f0   : > { %2161 = vperm.xlu0 %4231, %v7425_v32   ;;  %3945 = vmatprep.mubr.msk.f32.mxu0 %vm7259_vm2, %v3490_v3  ;;  %v7431_v32 = vld [vmem:[#allocation52_spill] sm:$0xff] }
 0x1f1   : > { %v5538_v56 = vpop.permute.xlu1 %1893  ;;  %v5540_v2 = vpop.permute.xlu0 %1888 }
 0x1f2   : > { %7426 = vst [vmem:[#allocation31_spill] sm:$0xff] %v5538_v56  ;;  %7427 = vst [vmem:[#allocation32_spill] sm:$0xff] %v5540_v2  ;;  %v3493_v56 = vsel %vm610_vm14, 1.0, %v7359_v14  ;;  %vm625_vm14 = vcmp.eq.s32.totalorder %v7472_v34, %v4869_v9  ;;  %v7478_v34 = vld [vmem:[#allocation83_spill] sm:$0xff] }
 0x1f3   : > { %3946 = vmatmul.mubr.msk.f32.gmra.mrb[38].mxu0 %vm7259_vm2, %v3491_v62  ;;  %2165 = vperm.xlu1 %4232, %v7429_v48   ;;  %v3494_v62 = vsel %vm611_vm15, 1.0, %v7359_v14  ;;  %v7435_v48 = vld [vmem:[#allocation57_spill] sm:$0xff]  ;;  %vm626_vm15 = vcmp.eq.s32.totalorder %v7476_v18, %v4869_v9  ;;  %v7482_v18 = vld [vmem:[#allocation82_spill] sm:$0xff] }
 0x1f4   : > { %2169 = vperm.xlu0 %4231, %v7431_v32   ;;  %3948 = vmatprep.mubr.msk.f32.mxu0 %vm7259_vm2, %v3492_v60  ;;  %v7437_v32 = vld [vmem:[#allocation56_spill] sm:$0xff] }
 0x1f5   : > { %v5552_v3 = vpop.permute.xlu1 %1903  ;;  %v5554_v2 = vpop.permute.xlu0 %1898 }
 0x1f6   : > { %7432 = vst [vmem:[#allocation30_spill] sm:$0xff] %v5552_v3  ;;  %7433 = vst [vmem:[#allocation37_spill] sm:$0xff] %v5554_v2  ;;  %v3495_v3 = vsel %vm612_vm0, 1.0, %v7359_v14  ;;  %vm627_vm0 = vcmp.eq.s32.totalorder %v7478_v34, %v4869_v9  ;;  %v7484_v34 = vld [vmem:[#allocation87_spill] sm:$0xff] }
 0x1f7   : > { %3949 = vmatmul.mubr.msk.f32.gmra.mrb[40].mxu0 %vm7259_vm2, %v3493_v56  ;;  %2173 = vperm.xlu1 %4232, %v7435_v48   ;;  %v3496_v56 = vsel %vm613_vm1, 1.0, %v7359_v14  ;;  %v7441_v48 = vld [vmem:[#allocation61_spill] sm:$0xff]  ;;  %vm628_vm1 = vcmp.eq.s32.totalorder %v7482_v18, %v4869_v9  ;;  %v7488_v18 = vld [vmem:[#allocation86_spill] sm:$0xff] }
 0x1f8   : > { %2177 = vperm.xlu0 %4231, %v7437_v32   ;;  %3951 = vmatprep.mubr.msk.f32.mxu0 %vm7259_vm2, %v3494_v62  ;;  %v7443_v32 = vld [vmem:[#allocation60_spill] sm:$0xff] }
 0x1f9   : > { %v5566_v60 = vpop.permute.xlu1 %1913  ;;  %v5568_v2 = vpop.permute.xlu0 %1908 }
 0x1fa   : > { %7438 = vst [vmem:[#allocation35_spill] sm:$0xff] %v5566_v60  ;;  %7439 = vst [vmem:[#allocation36_spill] sm:$0xff] %v5568_v2  ;;  %v3497_v60 = vsel %vm614_vm3, 1.0, %v7359_v14  ;;  %vm629_vm3 = vcmp.eq.s32.totalorder %v7484_v34, %v4869_v9 }
 0x1fb   : > { %3952 = vmatmul.mubr.msk.f32.gmra.mrb[42].mxu0 %vm7259_vm2, %v3495_v3  ;;  %2181 = vperm.xlu1 %4232, %v7441_v48   ;;  %v3498_v3 = vsel %vm615_vm4, 1.0, %v7359_v14  ;;  %v7447_v48 = vld [vmem:[#allocation65_spill] sm:$0xff]  ;;  %vm630_vm4 = vcmp.eq.s32.totalorder %v7488_v18, %v4869_v9  ;;  %v7492_v18 = vld [vmem:[#allocation90_spill] sm:$0xff] }
 0x1fc   : > { %2185 = vperm.xlu0 %4231, %v7443_v32   ;;  %3954 = vmatprep.mubr.msk.f32.mxu0 %vm7259_vm2, %v3496_v56  ;;  %v7449_v32 = vld [vmem:[#allocation64_spill] sm:$0xff]  ;;  %v3513_v34 = vsel %vm630_vm4, 1.0, %v7359_v14 }
 0x1fd   : > { %v5580_v62 = vpop.permute.xlu1 %1923  ;;  %v5582_v2 = vpop.permute.xlu0 %1918  ;;  %v4024_v50 = vpack.c.bf16 %v7449_v32, %v7447_v48 }
 0x1fe   : > { %7444 = vst [vmem:[#allocation34_spill] sm:$0xff] %v5580_v62  ;;  %7445 = vst [vmem:[#allocation41_spill] sm:$0xff] %v5582_v2  ;;  %v7473_v62 = vld [vmem:[#allocation80_spill] sm:$0xff] }
 0x1ff   : > { %3955 = vmatmul.mubr.msk.f32.gmra.mrb[44].mxu0 %vm7259_vm2, %v3497_v60  ;;  %2189 = vperm.xlu1 %4232, %v7447_v48   ;;  %v3500_v60 = vsel %vm617_vm6, 1.0, %v7359_v14  ;;  %v7485_v2 = vld [vmem:[#allocation88_spill] sm:$0xff]  ;;  %vm632_vm6 = vcmp.eq.s32.totalorder %v7492_v18, %v4869_v9  ;;  %v5719_v18 = vld [vmem:[%s4796_s7 + $0x10] sm:$0xff] }
 0x200   : > { %2193 = vperm.xlu0 %4231, %v7449_v32   ;;  %3957 = vmatprep.mubr.msk.f32.mxu0 %vm7259_vm2, %v3498_v3  ;;  %v3998_v45 = vpack.c.bf16 %v5731_v22, %v5719_v18 }
 0x201   : > { %v5594_v56 = vpop.permute.xlu1 %1933  ;;  %v5596_v1 = vpop.permute.xlu0 %1928 }
 0x202   : > { %7450 = vst [vmem:[#allocation39_spill] sm:$0xff] %v5594_v56  ;;  %7451 = vst [vmem:[#allocation40_spill] sm:$0xff] %v5596_v1  ;;  %v3501_v1 = vsel %vm618_vm7, 1.0, %v7359_v14 }
 0x203   : > { %3958 = vmatmul.mubr.msk.f32.gmra.mrb[46].mxu0 %vm7259_vm2, %v3499_v24  ;;  %2197 = vperm.xlu1 %4232, %v7453_v30   ;;  %v3502_v24 = vsel %vm619_vm8, 1.0, %v7359_v14 }
 0x204   : > { %2201 = vperm.xlu0 %4231, %v7455_v52   ;;  %3960 = vmatprep.mubr.msk.f32.mxu0 %vm7259_vm2, %v3500_v60 }
 0x205   : > { %v5608_v3 = vpop.permute.xlu1 %1943  ;;  %v5610_v56 = vpop.permute.xlu0 %1938 }
 0x206   : > { %7456 = vst [vmem:[#allocation38_spill] sm:$0xff] %v5608_v3  ;;  %7457 = vst [vmem:[#allocation45_spill] sm:$0xff] %v5610_v56  ;;  %v3503_v56 = vsel %vm620_vm9, 1.0, %v7359_v14 }
 0x207   : > { %3961 = vmatmul.mubr.msk.f32.gmra.mrb[48].mxu0 %vm7259_vm2, %v3501_v1  ;;  %2205 = vperm.xlu1 %4232, %v7459_v8   ;;  %v3504_v1 = vsel %vm621_vm10, 1.0, %v7359_v14 }
 0x208   : > { %2209 = vperm.xlu0 %4231, %v7461_v31   ;;  %3963 = vmatprep.mubr.msk.f32.mxu0 %vm7259_vm2, %v3502_v24 }
 0x209   : > { %v5622_v60 = vpop.permute.xlu1 %1953  ;;  %v5624_v3 = vpop.permute.xlu0 %1948 }
 0x20a   : > { %7462 = vst [vmem:[#allocation43_spill] sm:$0xff] %v5622_v60  ;;  %7463 = vst [vmem:[#allocation44_spill] sm:$0xff] %v5624_v3  ;;  %v3505_v3 = vsel %vm622_vm11, 1.0, %v7359_v14 }
 0x20b   : > { %3964 = vmatmul.mubr.msk.f32.gmra.mrb[50].mxu0 %vm7259_vm2, %v3503_v56  ;;  %2213 = vperm.xlu1 %4232, %v7465_v38   ;;  %v3506_v56 = vsel %vm623_vm12, 1.0, %v7359_v14  ;;  %v7471_v38 = vld [vmem:[#allocation81_spill] sm:$0xff] }
 0x20c   : > { %2217 = vperm.xlu0 %4231, %v7467_v27   ;;  %3966 = vmatprep.mubr.msk.f32.mxu0 %vm7259_vm2, %v3504_v1 }
 0x20d   : > { %v5636_v24 = vpop.permute.xlu1 %1963  ;;  %v5638_v60 = vpop.permute.xlu0 %1958 }
 0x20e   : > { %7468 = vst [vmem:[#allocation42_spill] sm:$0xff] %v5636_v24  ;;  %7469 = vst [vmem:[#allocation49_spill] sm:$0xff] %v5638_v60  ;;  %v3507_v60 = vsel %vm624_vm13, 1.0, %v7359_v14 }
 0x20f   : > { %3967 = vmatmul.mubr.msk.f32.gmra.mrb[52].mxu0 %vm7259_vm2, %v3505_v3  ;;  %2221 = vperm.xlu1 %4232, %v7471_v38   ;;  %v3508_v3 = vsel %vm625_vm14, 1.0, %v7359_v14  ;;  %v7477_v38 = vld [vmem:[#allocation85_spill] sm:$0xff] }
 0x210   : > { %2225 = vperm.xlu0 %4231, %v7473_v62   ;;  %3969 = vmatprep.mubr.msk.f32.mxu0 %vm7259_vm2, %v3506_v56 }
 0x211   : > { %v5650_v1 = vpop.permute.xlu1 %1973  ;;  %v5652_v24 = vpop.permute.xlu0 %1968 }
 0x212   : > { %7474 = vst [vmem:[#allocation47_spill] sm:$0xff] %v5650_v1  ;;  %7475 = vst [vmem:[#allocation48_spill] sm:$0xff] %v5652_v24  ;;  %v3509_v24 = vsel %vm626_vm15, 1.0, %v7359_v14 }
 0x213   : > { %3970 = vmatmul.mubr.msk.f32.gmra.mrb[54].mxu0 %vm7259_vm2, %v3507_v60  ;;  %2229 = vperm.xlu1 %4232, %v7477_v38   ;;  %v3510_v60 = vsel %vm627_vm0, 1.0, %v7359_v14  ;;  %v7483_v38 = vld [vmem:[#allocation89_spill] sm:$0xff] }
 0x214   : > { %2233 = vperm.xlu0 %4231, %v7479_v29   ;;  %3972 = vmatprep.mubr.msk.f32.mxu0 %vm7259_vm2, %v3508_v3 }
 0x215   : > { %v5664_v56 = vpop.permute.xlu1 %1983  ;;  %v5666_v1 = vpop.permute.xlu0 %1978 }
 0x216   : > { %7480 = vst [vmem:[#allocation46_spill] sm:$0xff] %v5664_v56  ;;  %7481 = vst [vmem:[#allocation53_spill] sm:$0xff] %v5666_v1  ;;  %v3511_v1 = vsel %vm628_vm1, 1.0, %v7359_v14 }
 0x217   : > { %3973 = vmatmul.mubr.msk.f32.gmra.mrb[56].mxu0 %vm7259_vm2, %v3509_v24  ;;  %2237 = vperm.xlu1 %4232, %v7483_v38   ;;  %v3512_v24 = vsel %vm629_vm3, 1.0, %v7359_v14  ;;  %v7489_v38 = vld [vmem:[#allocation91_spill] sm:$0xff] }
 0x218   : > { %2241 = vperm.xlu0 %4231, %v7485_v2   ;;  %3975 = vmatprep.mubr.msk.f32.mxu0 %vm7259_vm2, %v3510_v60  ;;  %vm631_vm5 = vcmp.eq.s32.totalorder %v7489_v38, %v4869_v9  ;;  %v7490_v60 = vld [vmem:[#allocation92_spill] sm:$0xff]  ;;  %v5709_v9 = vld [vmem:[%s4796_s7 + $0x8] sm:$0xff]  ;;  %v3515_v38 = vsel %vm632_vm6, 1.0, %v7359_v14 }
 0x219   : > { %v5678_v3 = vpop.permute.xlu1 %1993  ;;  %v5680_v56 = vpop.permute.xlu0 %1988 }
 0x21a   : > { %7486 = vst [vmem:[#allocation51_spill] sm:$0xff] %v5678_v3  ;;  %7487 = vst [vmem:[#allocation52_spill] sm:$0xff] %v5680_v56 }
 0x21b   : > { %3976 = vmatmul.mubr.msk.f32.gmra.mrb[58].mxu0 %vm7259_vm2, %v3511_v1  ;;  %2245 = vperm.xlu1 %4232, %v5252_v6   ;;  %v3514_v1 = vsel %vm631_vm5, 1.0, %v7359_v14  ;;  %v7224_v6 = vmov 2  }
 0x21c   : > { %2249 = vperm.xlu0 %4231, %v7490_v60   ;;  %3978 = vmatprep.mubr.msk.f32.mxu0 %vm7259_vm2, %v3512_v24  ;;  %v5705_v24 = vld [vmem:[%s4796_s7] sm:$0xff] }
 0x21e   : > { %v5693_v3 = vpop.permute.xlu1 %2001 }
 0x21f   : > { %7491 = vst [vmem:[#allocation50_spill] sm:$0xff] %v5693_v3  ;;  %v5698_v56 = vpop.permute.xlu0 %1997  ;;  %3979 = vmatmul.mubr.msk.f32.gmra.mrb[60].mxu0 %vm7259_vm2, %v3513_v34  ;;  %4233 = vset.pattern.permute.xlu1 %v7224_v6 }
 0x220   : > { %7493 = vst [vmem:[#allocation57_spill] sm:$0xff] %v5698_v56  ;;  %4234 = vset.pattern.permute.xlu0 %v7224_v6  ;;  %3981 = vmatprep.mubr.msk.f32.mxu0 %vm7259_vm2, %v3514_v1  ;;  %v5723_v1 = vld [vmem:[%s4796_s7 + $0x20] sm:$0xff] }
 0x221   : > { %2253 = vperm.xlu1 %4233, %v5705_v24   ;;  %2257 = vperm.xlu0 %4234, %v5709_v9  }
 0x222   : > { %v5713_v60 = vpop.permute.xlu1 %2005 }
 0x223   : > { %7494 = vst [vmem:[#allocation55_spill] sm:$0xff] %v5713_v60  ;;  %v5715_v34 = vpop.permute.xlu0 %2009  ;;  %3982 = vmatmul.mubr.msk.f32.gmra.mrb[62].mxu0 %vm7259_vm2, %v3515_v38  ;;  %v5901_v60 = vld [vmem:[%s4796_s7 + $0xf8] sm:$0xff]  ;;  %vm2829_vm2 = vcmask 130048  }
 0x224   : > { %7495 = vst [vmem:[#allocation56_spill] sm:$0xff] %v5715_v34  ;;  %v4006_v34 = vpack.c.bf16 %v5755_v36, %v5735_v23 }
 0x225   : > { %2261 = vperm.xlu1 %4233, %v5719_v18   ;;  %2269 = vperm.xlu0 %4234, %v5723_v1  }
 0x226   : > { %v5726_v6 = vpop.permute.xlu1 %2013 }
 0x227   : > { %7496 = vst [vmem:[#allocation54_spill] sm:$0xff] %v5726_v6  ;;  %v5728_v14 = vpop.permute.xlu0 %2017  ;;  %v5827_v6 = vld [vmem:[%s4796_s7 + $0x80] sm:$0xff] }
 0x228   : > { %7497 = vst [vmem:[#allocation61_spill] sm:$0xff] %v5728_v14 }
 0x229   : > { %2265 = vperm.xlu1 %4233, %v5731_v22   ;;  %2277 = vperm.xlu0 %4234, %v5735_v23  }
 0x22a   : > { %v5738_v38 = vpop.permute.xlu1 %2021 }
 0x22b   : > { %7498 = vst [vmem:[#allocation59_spill] sm:$0xff] %v5738_v38  ;;  %v5740_v25 = vpop.permute.xlu0 %2025  ;;  %v5776_v38 = vld [vmem:[%s4796_s7 + $0x58] sm:$0xff] }
 0x22c   : > { %7499 = vst [vmem:[#allocation60_spill] sm:$0xff] %v5740_v25 }
 0x22d   : > { %2273 = vperm.xlu1 %4233, %v5743_v57   ;;  %2285 = vperm.xlu0 %4234, %v5747_v33  }
 0x22e   : > { %v5750_v19 = vpop.permute.xlu1 %2029 }
 0x22f   : > { %7500 = vst [vmem:[#allocation58_spill] sm:$0xff] %v5750_v19  ;;  %v5752_v21 = vpop.permute.xlu0 %2033 }
 0x230   : > { %7501 = vst [vmem:[#allocation65_spill] sm:$0xff] %v5752_v21 }
 0x231   : > { %2281 = vperm.xlu1 %4233, %v5755_v36   ;;  %2293 = vperm.xlu0 %4234, %v5759_v53  }
 0x232   : > { %v5762_v10 = vpop.permute.xlu1 %2037 }
 0x233   : > { %7502 = vst [vmem:[#allocation63_spill] sm:$0xff] %v5762_v10  ;;  %v5764_v25 = vpop.permute.xlu0 %2041 }
 0x234   : > { %7503 = vst [vmem:[#allocation64_spill] sm:$0xff] %v5764_v25 }
 0x235   : > { %2289 = vperm.xlu1 %4233, %v5767_v17   ;;  %2301 = vperm.xlu0 %4234, %v4952_v39  }
 0x236   : > { %v5771_v21 = vpop.permute.xlu1 %2045 }
 0x237   : > { %7504 = vst [vmem:[#allocation62_spill] sm:$0xff] %v5771_v21  ;;  %v5773_v19 = vpop.permute.xlu0 %2049  ;;  %v5794_v21 = vld [vmem:[%s4796_s7 + $0x78] sm:$0xff] }
 0x238   : > { %7505 = vst [vmem:[#allocation69_spill] sm:$0xff] %v5773_v19  ;;  %v4022_v3 = vpack.c.bf16 %v5794_v21, %v5953_v11 }
 0x239   : > { %2297 = vperm.xlu1 %4233, %v5776_v38   ;;  %2309 = vperm.xlu0 %4234, %v4964_v43  }
 0x23a   : > { %v5780_v10 = vpop.permute.xlu1 %2053 }
 0x23b   : > { %7506 = vst [vmem:[#allocation67_spill] sm:$0xff] %v5780_v10  ;;  %v5782_v25 = vpop.permute.xlu0 %2057  ;;  %v5803_v10 = vld [vmem:[%s4796_s7 + $0x88] sm:$0xff] }
 0x23c   : > { %7507 = vst [vmem:[#allocation68_spill] sm:$0xff] %v5782_v25  ;;  %v3992_v0 = vpack.c.bf16 %v5803_v10, %v5827_v6 }
 0x23d   : > { %2305 = vperm.xlu1 %4233, %v5785_v20   ;;  %2317 = vperm.xlu0 %4234, %v4976_v47  }
 0x23e   : > { %v5789_v39 = vpop.permute.xlu1 %2061  ;;  %3993 = vmatprep.subr.bf16.mxu1 %v3992_v0 }
 0x23f   : > { %7508 = vst [vmem:[#allocation66_spill] sm:$0xff] %v5789_v39  ;;  %v5791_v19 = vpop.permute.xlu0 %2065 }
 0x240   : > { %7509 = vst [vmem:[#allocation73_spill] sm:$0xff] %v5791_v19 }
 0x241   : > { %2313 = vperm.xlu1 %4233, %v5794_v21   ;;  %2325 = vperm.xlu0 %4234, %v4988_v51  }
 0x242   : > { %v5798_v43 = vpop.permute.xlu1 %2069 }
 0x243   : > { %v5800_v25 = vpop.permute.xlu0 %2073 }
 0x244   : > { %7510 = vst [vmem:[#allocation71_spill] sm:$0xff] %v5800_v25  ;;  %v4020_v25 = vpack.c.bf16 %v5901_v60, %v5948_v41 }
 0x245   : > { %2321 = vperm.xlu1 %4233, %v5803_v10   ;;  %2333 = vperm.xlu0 %4234, %v5000_v55  }
 0x246   : > { %v5807_v47 = vpop.permute.xlu1 %2077 }
 0x247   : > { %v5809_v49 = vpop.permute.xlu0 %2081 }
 0x248   : > { %7511 = vst [vmem:[#allocation72_spill] sm:$0xff] %v5809_v49  ;;  %v4002_v49 = vpack.c.bf16 %v5743_v57, %v5723_v1 }
 0x249   : > { %2329 = vperm.xlu1 %4233, %v5812_v12   ;;  %2341 = vperm.xlu0 %4234, %v5012_v59   ;;  %v3994_v59 = vpack.c.bf16 %v5709_v9, %v5705_v24 }
 0x24a   : > { %v5816_v51 = vpop.permute.xlu1 %2085 }
 0x24b   : > { %7512 = vst [vmem:[#allocation70_spill] sm:$0xff] %v5816_v51  ;;  %v5818_v14 = vpop.permute.xlu0 %2089  ;;  %3995 = vmatpush3.bf16.msra.mxu1 %v3994_v59  ;;  %v5856_v59 = vld [vmem:[%s4796_s7 + $0xa8] sm:$0xff] }
 0x24c   : > { %7513 = vst [vmem:[#allocation77_spill] sm:$0xff] %v5818_v14 }
 0x24d   : > { %2337 = vperm.xlu1 %4233, %v4997_v54   ;;  %2349 = vperm.xlu0 %4234, %v5024_v63  }
 0x24e   : > { %v5822_v55 = vpop.permute.xlu1 %2093 }
 0x24f   : > { %7514 = vst [vmem:[#allocation75_spill] sm:$0xff] %v5822_v55  ;;  %v5824_v13 = vpop.permute.xlu0 %2097 }
 0x250   : > { %7515 = vst [vmem:[#allocation76_spill] sm:$0xff] %v5824_v13  ;;  %v5840_v13 = vld [vmem:[%s4796_s7 + $0x90] sm:$0xff] }
 0x251   : > { %2345 = vperm.xlu1 %4233, %v5009_v58   ;;  %2357 = vperm.xlu0 %4234, %v7381_v16   ;;  %v3996_v14 = vpack.c.bf16 %v5812_v12, %v5840_v13  ;;  %v5847_v58 = vld [vmem:[%s4796_s7 + $0xc8] sm:$0xff] }
 0x252   : > { %v5835_v54 = vpop.permute.xlu1 %2101 }
 0x253   : > { %7516 = vst [vmem:[#allocation74_spill] sm:$0xff] %v5835_v54  ;;  %v5837_v63 = vpop.permute.xlu0 %2105  ;;  %3997 = vmatprep.subr.bf16.mxu1 %v3996_v14 }
 0x254   : > { %7517 = vst [vmem:[#allocation81_spill] sm:$0xff] %v5837_v63  ;;  %3999 = vmatpush3.bf16.msra.mxu1 %v3998_v45  ;;  %v5859_v63 = vld [vmem:[%s4796_s7 + $0xa0] sm:$0xff] }
 0x255   : > { %2353 = vperm.xlu1 %4233, %v5847_v58   ;;  %2365 = vperm.xlu0 %4234, %v7387_v28   ;;  %v4000_v54 = vpack.c.bf16 %v5856_v59, %v5859_v63  ;;  %v5866_v28 = vld [vmem:[%s4796_s7 + $0xd8] sm:$0xff] }
 0x256   : > { %v5851_v0 = vpop.permute.xlu1 %2109 }
 0x257   : > { %7518 = vst [vmem:[#allocation79_spill] sm:$0xff] %v5851_v0  ;;  %v5853_v16 = vpop.permute.xlu0 %2113  ;;  %4001 = vmatprep.subr.bf16.mxu1 %v4000_v54  ;;  %v5878_v0 = vld [vmem:[%s4796_s7 + $0xb0] sm:$0xff]  ;;  %v5894_v54 = vld [vmem:[%s4796_s7 + $0xc0] sm:$0xff] }
 0x258   : > { %7519 = vst [vmem:[#allocation80_spill] sm:$0xff] %v5853_v16  ;;  %4003 = vmatpush3.bf16.msra.mxu1 %v4002_v49  ;;  %v5875_v16 = vld [vmem:[%s4796_s7 + $0xb8] sm:$0xff] }
 0x259   : > { %2361 = vperm.xlu1 %4233, %v5866_v28   ;;  %2373 = vperm.xlu0 %4234, %v7393_v44   ;;  %v4004_v15 = vpack.c.bf16 %v5875_v16, %v5878_v0 }
 0x25a   : > { %v5870_v14 = vpop.permute.xlu1 %2117 }
 0x25b   : > { %7520 = vst [vmem:[#allocation78_spill] sm:$0xff] %v5870_v14  ;;  %v5872_v45 = vpop.permute.xlu0 %2121  ;;  %4005 = vmatprep.subr.bf16.mxu1 %v4004_v15  ;;  %v4010_v14 = vpack.c.bf16 %v5767_v17, %v5747_v33 }
 0x25c   : > { %7521 = vst [vmem:[#allocation85_spill] sm:$0xff] %v5872_v45  ;;  %4007 = vmatpush3.bf16.msra.mxu1 %v4006_v34  ;;  %v4008_v45 = vpack.c.bf16 %v5847_v58, %v5894_v54  ;;  %v5910_v34 = vld [vmem:[%s4796_s7 + $0xd0] sm:$0xff] }
 0x25d   : > { %2369 = vperm.xlu1 %4233, %v5885_v4   ;;  %2381 = vperm.xlu0 %4234, %v7399_v61  }
 0x25e   : > { %v5889_v44 = vpop.permute.xlu1 %2125  ;;  %4009 = vmatprep.subr.bf16.mxu1 %v4008_v45 }
 0x25f   : > { %7522 = vst [vmem:[#allocation83_spill] sm:$0xff] %v5889_v44  ;;  %v5891_v49 = vpop.permute.xlu0 %2129  ;;  %v4012_v44 = vpack.c.bf16 %v5866_v28, %v5910_v34 }
 0x260   : > { %7523 = vst [vmem:[#allocation84_spill] sm:$0xff] %v5891_v49  ;;  %4011 = vmatpush3.bf16.msra.mxu1 %v4010_v14  ;;  %v4014_v49 = vpack.c.bf16 %v5776_v38, %v5759_v53  ;;  %v5926_v14 = vld [vmem:[%s4796_s7 + $0xe0] sm:$0xff] }
 0x261   : > { %2377 = vperm.xlu1 %4233, %v5901_v60   ;;  %2389 = vperm.xlu0 %4234, %v7405_v40  }
 0x262   : > { %v5905_v15 = vpop.permute.xlu1 %2133  ;;  %4013 = vmatprep.subr.bf16.mxu1 %v4012_v44 }
 0x263   : > { %7524 = vst [vmem:[#allocation82_spill] sm:$0xff] %v5905_v15  ;;  %v5907_v61 = vpop.permute.xlu0 %2137  ;;  %v5931_v15 = vld [vmem:[%s4796_s7 + $0x60] sm:$0xff] }
 0x264   : > { %7525 = vst [vmem:[#allocation89_spill] sm:$0xff] %v5907_v61  ;;  %4015 = vmatpush3.bf16.msra.mxu1 %v4014_v49  ;;  %v4016_v61 = vpack.c.bf16 %v5885_v4, %v5926_v14  ;;  %v4018_v55 = vpack.c.bf16 %v5785_v20, %v5931_v15  ;;  %v7529_v49 = vlaneseq }
 0x265   : > { %2385 = vperm.xlu1 %4233, %v5917_v5   ;;  %2397 = vperm.xlu0 %4234, %v7411_v26   ;;  %v5936_v26 = vld [vmem:[%s4796_s7 + $0x118] sm:$0xff] }
 0x266   : > { %v5921_v40 = vpop.permute.xlu1 %2141  ;;  %4017 = vmatprep.subr.bf16.mxu1 %v4016_v61 }
 0x267   : > { %7526 = vst [vmem:[#allocation87_spill] sm:$0xff] %v5921_v40  ;;  %v5923_v45 = vpop.permute.xlu0 %2145 }
 0x268   : > { %7527 = vst [vmem:[#allocation88_spill] sm:$0xff] %v5923_v45  ;;  %v5943_v45 = vshrl.u32 %v7529_v49, 7  ;;  %4019 = vmatpush3.bf16.msra.mxu1 %v4018_v55  ;;  %v5964_v55 = vld [vmem:[%s4790_s30] sm:$0xf] }
 0x269   : > { %2393 = vperm.xlu1 %4233, %v5936_v26   ;;  %2449 = vperm.xlu0 %4234, %v7449_v32  }
 0x26a   : > { %v5940_v44 = vpop.permute.xlu1 %2149  ;;  %7530 = vst [vmem:[#allocation91_spill] sm:$0xff] %v5943_v45  ;;  %v1371_v7 = vsub.s32 1, %v5943_v45  ;;  %v1367_v61 = vsub.s32 0, %v5943_v45  ;;  %4021 = vmatprep.subr.bf16.mxu1 %v4020_v25 }
 0x26b   : > { %7528 = vst [vmem:[#allocation86_spill] sm:$0xff] %v5940_v44  ;;  %v5945_v40 = vpop.permute.xlu0 %2153  ;;  %v5959_v44 = vld [vmem:[%s4796_s7 + $0x128] sm:$0xff] }
 0x26c   : > { %7531 = vst [vmem:[#allocation92_spill] sm:$0xff] %v5945_v40  ;;  %v5970_v40 = vrot.slane %v5964_v55, %v1371_v7  ;;  %4023 = vmatpush3.bf16.msra.mxu1 %v4022_v3  ;;  %v5977_v51 = vrot.slane %v5964_v55, %v1367_v61  ;;  %v5986_v7 = vld [vmem:[%s4796_s7 + $0x100] sm:$0xff]  ;;  %v7228_v3 = vmov 1.0   ;;  %v4028_v61 = vpack.c.bf16 %v7455_v52, %v7453_v30 }
 0x26d   : > { %2401 = vperm.xlu1 %4233, %v5959_v44   ;;  %2457 = vperm.xlu0 %4234, %v7455_v52   ;;  %v4026_v25 = vpack.c.bf16 %v5917_v5, %v5986_v7  ;;  %v4032_v30 = vpack.c.bf16 %v7461_v31, %v7459_v8  ;;  %v6034_v8 = vld [vmem:[%s4796_s7 + $0x1b8] sm:$0xff] }
 0x26e   : > { %v5967_v49 = vpop.permute.xlu1 %2157  ;;  %7533 = vst [vmem:[#allocation119_spill] sm:$0xff] %v5970_v40  ;;  %7535 = vst [vmem:[#allocation121_spill] sm:$0xff] %v5977_v51  ;;  %vm1382_vm7 = vcmp.eq.s32.totalorder %v5970_v40, %v5943_v45  ;;  %vm1381_vm8 = vcmp.eq.s32.totalorder %v5977_v51, %v5943_v45  ;;  %4025 = vmatprep.subr.bf16.mxu1 %v4024_v50 }
 0x26f   : > { %7532 = vst [vmem:[#allocation90_spill] sm:$0xff] %v5967_v49  ;;  %v5972_v56 = vpop.permute.xlu0 %2161  ;;  %3596 = vmatprep.mubr.msk.f32.mxu1 %vm1382_vm7, %v7228_v3 }
 0x270   : > { %7534 = vst [vmem:[#allocation120_spill] sm:$0xff] %v5972_v56  ;;  %3597 = vmatmul.mubr.msk.f32.vlgmr.msra.gmra.mrb[0].mxu1 %vm1381_vm8, %v7228_v3 }
 0x271   : > { %4235 = vset.pattern.permute.xlu1 %v7226_v37  ;;  %2465 = vperm.xlu0 %4234, %v7461_v31  }
 0x272   : > { %2577 = vperm.xlu1 %4235, %v5803_v10   ;;  %v5991_v48 = vpop.permute.xlu1 %2165  ;;  %4027 = vmatpush3.bf16.msra.mxu1 %v4026_v25  ;;  %v6007_v10 = vld [vmem:[%s4796_s7 + $0x110] sm:$0xff] }
 0x273   : > { %7536 = vst [vmem:[#allocation122_spill] sm:$0xff] %v5991_v48  ;;  %v5993_v32 = vpop.permute.xlu0 %2169  ;;  %v4030_v50 = vpack.c.bf16 %v5936_v26, %v6007_v10  ;;  %4029 = vmatprep.subr.bf16.mxu1 %v4028_v61  ;;  %v6063_v48 = vld [vmem:[%s4796_s7 + $0x1c0] sm:$0xff] }
 0x274   : > { %7537 = vst [vmem:[#allocation123_spill] sm:$0xff] %v5993_v32 }
 0x275   : > { %2473 = vperm.xlu0 %4234, %v7467_v27   ;;  %v6020_v27 = vld [vmem:[%s4796_s7 + $0x120] sm:$0xff] }
 0x276   : > { %2509 = vperm.xlu1 %4235, %v5705_v24   ;;  %v6012_v37 = vpop.permute.xlu1 %2173  ;;  %4031 = vmatpush3.bf16.msra.mxu1 %v4030_v50  ;;  %v4034_v25 = vpack.c.bf16 %v5959_v44, %v6020_v27 }
 0x277   : > { %7538 = vst [vmem:[#allocation124_spill] sm:$0xff] %v6012_v37  ;;  %v6014_v52 = vpop.permute.xlu0 %2177  ;;  %4033 = vmatprep.subr.bf16.mxu1 %v4032_v30  ;;  %v6046_v30 = vld [vmem:[%s4796_s7 + $0x130] sm:$0xff] }
 0x278   : > { %7539 = vst [vmem:[#allocation125_spill] sm:$0xff] %v6014_v52 }
 0x279   : > { %2481 = vperm.xlu0 %4234, %v7473_v62   ;;  %v6037_v62 = vld [vmem:[%s4796_s7 + $0x1b0] sm:$0xff] }
 0x27a   : > { %2581 = vperm.xlu1 %4235, %v5840_v13   ;;  %v6025_v24 = vpop.f32.mrb[0].mxu0  ;;  %v6027_v61 = vpop.permute.xlu1 %2181  ;;  %v4036_v50 = vpack.c.bf16 %v6034_v8, %v6037_v62  ;;  %4035 = vmatpush3.bf16.msra.mxu1 %v4034_v25  ;;  %v6043_v13 = vld [vmem:[%s4796_s7 + $0x138] sm:$0xff]  ;;  %v6060_v25 = vld [vmem:[%s4796_s7 + $0x1c8] sm:$0xff] }
 0x27b   : > { %7540 = vst [vmem:[#allocation126_spill] sm:$0xff] %v6025_v24  ;;  %7541 = vst [vmem:[#allocation127_spill] sm:$0xff] %v6027_v61  ;;  %v6029_v3 = vpop.permute.xlu0 %2185  ;;  %v6031_v31 = vpop.f32.mrb[1].mxu0  ;;  %v4038_v61 = vpack.c.bf16 %v6043_v13, %v6046_v30  ;;  %v4040_v32 = vpack.c.bf16 %v6060_v25, %v6063_v48  ;;  %v6094_v24 = vadd.s32 8, %v5943_v45 }
 0x27c   : > { %7542 = vst [vmem:[#allocation128_spill] sm:$0xff] %v6029_v3  ;;  %7543 = vst [vmem:[#allocation129_spill] sm:$0xff] %v6031_v31  ;;  %4037 = vmatprep.subr.bf16.mxu1 %v4036_v50  ;;  %v6072_v50 = vld [vmem:[%s4796_s7 + $0x140] sm:$0xff]  ;;  %v7562_v31 = vmov 1.0  }
 0x27d   : > { %2489 = vperm.xlu0 %4234, %v7479_v29   ;;  %7548 = vst [vmem:[#allocation134_spill] sm:$0xff] %v6060_v25  ;;  %7549 = vst [vmem:[#allocation135_spill] sm:$0xff] %v6072_v50  ;;  %vm1386_vm9 = vcmp.eq.s32.totalorder %v5970_v40, %v6094_v24  ;;  %vm1385_vm10 = vcmp.eq.s32.totalorder %v5977_v51, %v6094_v24 }
 0x27e   : > { %2517 = vperm.xlu1 %4235, %v5719_v18   ;;  %v6051_v3 = vpop.f32.mrb[2].mxu0  ;;  %v6053_v37 = vpop.permute.xlu1 %2189  ;;  %4039 = vmatpush3.bf16.msra.mxu1 %v4038_v61  ;;  %v6069_v18 = vld [vmem:[%s4796_s7 + $0x148] sm:$0xff]  ;;  %v6086_v61 = vld [vmem:[%s4796_s7 + $0x1d8] sm:$0xff]  ;;  %7555 = vst [vmem:[#allocation141_spill] sm:$0xff] %v6094_v24 }
 0x27f   : > { %7544 = vst [vmem:[#allocation130_spill] sm:$0xff] %v6051_v3  ;;  %7545 = vst [vmem:[#allocation131_spill] sm:$0xff] %v6053_v37  ;;  %v6055_v52 = vpop.permute.xlu0 %2193  ;;  %v6057_v29 = vpop.f32.mrb[3].mxu0  ;;  %v4042_v49 = vpack.c.bf16 %v6069_v18, %v6072_v50  ;;  %4041 = vmatprep.subr.bf16.mxu1 %v4040_v32  ;;  %v6089_v3 = vld [vmem:[%s4796_s7 + $0x1d0] sm:$0xff]  ;;  %v6103_v32 = vld [vmem:[%s4796_s7 + $0x158] sm:$0xff]  ;;  %3598 = vmatprep.mubr.msk.f32.mxu1 %vm1386_vm9, %v7562_v31 }
 0x280   : > { %7546 = vst [vmem:[#allocation132_spill] sm:$0xff] %v6055_v52  ;;  %7547 = vst [vmem:[#allocation133_spill] sm:$0xff] %v6057_v29  ;;  %v4044_v29 = vpack.c.bf16 %v6086_v61, %v6089_v3  ;;  %3599 = vmatmul.mubr.msk.f32.gmra.mrb[2].mxu1 %vm1385_vm10, %v7562_v31 }
 0x281   : > { %2497 = vperm.xlu0 %4234, %v7485_v2   ;;  %7554 = vst [vmem:[#allocation140_spill] sm:$0xff] %v6086_v61 }
 0x282   : > { %2589 = vperm.xlu1 %4235, %v5859_v63   ;;  %v6077_v56 = vpop.f32.mrb[4].mxu0  ;;  %v6079_v52 = vpop.permute.xlu1 %2197  ;;  %v6097_v63 = vld [vmem:[%s4796_s7 + $0x1f8] sm:$0xff]  ;;  %4043 = vmatpush3.bf16.msra.mxu1 %v4042_v49 }
 0x283   : > { %7550 = vst [vmem:[#allocation136_spill] sm:$0xff] %v6077_v56  ;;  %7551 = vst [vmem:[#allocation137_spill] sm:$0xff] %v6079_v52  ;;  %v6081_v37 = vpop.permute.xlu0 %2201  ;;  %v6083_v2 = vpop.f32.mrb[5].mxu0  ;;  %4045 = vmatprep.subr.bf16.mxu1 %v4044_v29  ;;  %v6134_v29 = vadd.s32 16, %v5943_v45 }
 0x284   : > { %7552 = vst [vmem:[#allocation138_spill] sm:$0xff] %v6081_v37  ;;  %7553 = vst [vmem:[#allocation139_spill] sm:$0xff] %v6083_v2  ;;  %v6106_v37 = vld [vmem:[%s4796_s7 + $0x150] sm:$0xff] }
 0x285   : > { %7556 = vst [vmem:[#allocation142_spill] sm:$0xff] %v6097_v63  ;;  %2505 = vperm.xlu0 %4234, %v6097_v63   ;;  %7557 = vst [vmem:[#allocation143_spill] sm:$0xff] %v6106_v37  ;;  %v4046_v52 = vpack.c.bf16 %v6103_v32, %v6106_v37  ;;  %v6129_v37 = vld [vmem:[%s4796_s7 + $0x1e0] sm:$0xff]  ;;  %vm1390_vm11 = vcmp.eq.s32.totalorder %v5970_v40, %v6134_v29  ;;  %vm1389_vm12 = vcmp.eq.s32.totalorder %v5977_v51, %v6134_v29 }
 0x286   : > { %2525 = vperm.xlu1 %4235, %v5723_v1   ;;  %v6111_v61 = vpop.f32.mrb[6].mxu0  ;;  %v6113_v56 = vpop.permute.xlu1 %2205  ;;  %v6126_v1 = vld [vmem:[%s4796_s7 + $0x1e8] sm:$0xff]  ;;  %7564 = vst [vmem:[#allocation149_spill] sm:$0xff] %v6134_v29  ;;  %3600 = vmatprep.mubr.msk.f32.mxu1 %vm1390_vm11, %v7562_v31 }
 0x287   : > { %7558 = vst [vmem:[#allocation144_spill] sm:$0xff] %v6111_v61  ;;  %7559 = vst [vmem:[#allocation145_spill] sm:$0xff] %v6113_v56  ;;  %v6117_v49 = vpop.permute.xlu0 %2209  ;;  %v6119_v2 = vpop.f32.mrb[7].mxu0  ;;  %v4048_v56 = vpack.c.bf16 %v6126_v1, %v6129_v37  ;;  %4047 = vmatpush3.bf16.msra.mxu1 %v4046_v52  ;;  %v6144_v61 = vld [vmem:[%s4796_s7 + $0x168] sm:$0xff] }
 0x288   : > { %7560 = vst [vmem:[#allocation146_spill] sm:$0xff] %v6117_v49  ;;  %7561 = vst [vmem:[#allocation147_spill] sm:$0xff] %v6119_v2  ;;  %v7565_v49 = vmov 3   ;;  %v6147_v2 = vld [vmem:[%s4796_s7 + $0x160] sm:$0xff]  ;;  %3601 = vmatmul.mubr.msk.f32.gmra.mrb[4].mxu1 %vm1389_vm12, %v7562_v31 }
 0x289   : > { %7563 = vst [vmem:[#allocation148_spill] sm:$0xff] %v6126_v1  ;;  %4251 = vset.pattern.permute.xlu0 %v7565_v49  ;;  %7566 = vst [vmem:[#allocation150_spill] sm:$0xff] %v6147_v2  ;;  %v4050_v1 = vpack.c.bf16 %v6144_v61, %v6147_v2  ;;  %4049 = vmatprep.subr.bf16.mxu1 %v4048_v56  ;;  %v6182_v56 = vld [vmem:[%s4796_s7 + $0x178] sm:$0xff] }
 0x28a   : > { %2597 = vperm.xlu1 %4235, %v5878_v0   ;;  %2573 = vperm.xlu0 %4251, %v5827_v6   ;;  %v6153_v25 = vpop.f32.mrb[8].mxu0  ;;  %v6155_v39 = vpop.permute.xlu1 %2213  ;;  %v6168_v0 = vld [vmem:[%s4796_s7 + $0x1f0] sm:$0xff] }
 0x28b   : > { %7567 = vst [vmem:[#allocation151_spill] sm:$0xff] %v6153_v25  ;;  %7568 = vst [vmem:[#allocation152_spill] sm:$0xff] %v6155_v39  ;;  %v6159_v52 = vpop.permute.xlu0 %2217  ;;  %v6161_v35 = vpop.f32.mrb[9].mxu0  ;;  %v4052_v6 = vpack.c.bf16 %v6097_v63, %v6168_v0  ;;  %v6173_v39 = vadd.s32 24, %v5943_v45  ;;  %4051 = vmatpush3.bf16.msra.mxu1 %v4050_v1  ;;  %v1379_v63 = vsub.s32 3, %v5943_v45  ;;  %v1375_v1 = vsub.s32 2, %v5943_v45 }
 0x28c   : > { %7569 = vst [vmem:[#allocation153_spill] sm:$0xff] %v6159_v52  ;;  %7570 = vst [vmem:[#allocation154_spill] sm:$0xff] %v6161_v35  ;;  %v6185_v52 = vld [vmem:[%s4796_s7 + $0x170] sm:$0xff] }
 0x28d   : > { %7571 = vst [vmem:[#allocation155_spill] sm:$0xff] %v6173_v39  ;;  %vm1394_vm13 = vcmp.eq.s32.totalorder %v5970_v40, %v6173_v39  ;;  %7572 = vst [vmem:[#allocation156_spill] sm:$0xff] %v6185_v52  ;;  %v4054_v2 = vpack.c.bf16 %v6182_v56, %v6185_v52  ;;  %vm1393_vm14 = vcmp.eq.s32.totalorder %v5977_v51, %v6173_v39  ;;  %4053 = vmatprep.subr.bf16.mxu1 %v4052_v6 }
 0x28e   : > { %2533 = vperm.xlu1 %4235, %v5735_v23   ;;  %2513 = vperm.xlu0 %4251, %v5709_v9   ;;  %v6192_v25 = vpop.f32.mrb[10].mxu0  ;;  %v6194_v35 = vpop.permute.xlu1 %2221  ;;  %v6208_v23 = vrot.slane %v5964_v55, %v1379_v63  ;;  %v6215_v9 = vrot.slane %v5964_v55, %v1375_v1 }
 0x28f   : > { %7573 = vst [vmem:[#allocation157_spill] sm:$0xff] %v6192_v25  ;;  %7574 = vst [vmem:[#allocation158_spill] sm:$0xff] %v6194_v35  ;;  %v6199_v19 = vpop.permute.xlu0 %2225  ;;  %v6201_v50 = vpop.f32.mrb[11].mxu0  ;;  %3602 = vmatprep.mubr.msk.f32.mxu1 %vm1394_vm13, %v7562_v31  ;;  %4055 = vmatpush3.bf16.msra.mxu1 %v4054_v2 }
 0x290   : > { %7575 = vst [vmem:[#allocation159_spill] sm:$0xff] %v6199_v19  ;;  %7576 = vst [vmem:[#allocation160_spill] sm:$0xff] %v6201_v50  ;;  %3603 = vmatmul.mubr.msk.f32.gmra.mrb[6].mxu1 %vm1393_vm14, %v7562_v31  ;;  %vm1384_vm15 = vcmp.eq.s32.totalorder %v6208_v23, %v5943_v45  ;;  %vm1383_vm0 = vcmp.eq.s32.totalorder %v6215_v9, %v5943_v45  ;;  %vm1388_vm1 = vcmp.eq.s32.totalorder %v6208_v23, %v6094_v24 }
 0x291   : > { %7577 = vst [vmem:[#allocation161_spill] sm:$0xff] %v6208_v23  ;;  %7578 = vst [vmem:[#allocation162_spill] sm:$0xff] %v6215_v9  ;;  %3604 = vmatprep.mubr.msk.f32.mxu1 %vm1384_vm15, %v7562_v31  ;;  %3620 = vmatprep.mubr.msk.f32.mxu0 %vm1384_vm15, %v7562_v31  ;;  %vm1387_vm3 = vcmp.eq.s32.totalorder %v6215_v9, %v6094_v24  ;;  %vm1392_vm4 = vcmp.eq.s32.totalorder %v6208_v23, %v6134_v29 }
 0x292   : > { %2605 = vperm.xlu1 %4235, %v5894_v54   ;;  %2585 = vperm.xlu0 %4251, %v5812_v12   ;;  %v6221_v6 = vpop.f32.mrb[12].mxu0  ;;  %v6223_v63 = vpop.permute.xlu1 %2229  ;;  %vm1391_vm5 = vcmp.eq.s32.totalorder %v6215_v9, %v6134_v29  ;;  %vm1396_vm6 = vcmp.eq.s32.totalorder %v6208_v23, %v6173_v39  ;;  %vm7260_vm15 = vcmp.eq.s32.totalorder %v6215_v9, %v6173_v39 }
 0x293   : > { %7579 = vst [vmem:[#allocation163_spill] sm:$0xff] %v6221_v6  ;;  %7580 = vst [vmem:[#allocation164_spill] sm:$0xff] %v6223_v63  ;;  %v6227_v19 = vpop.permute.xlu0 %2233  ;;  %v6229_v35 = vpop.f32.mrb[13].mxu0 }
 0x294   : > { %7581 = vst [vmem:[#allocation165_spill] sm:$0xff] %v6227_v19  ;;  %7582 = vst [vmem:[#allocation166_spill] sm:$0xff] %v6229_v35  ;;  %3605 = vmatmul.mubr.msk.f32.vlgmr.msra.gmra.mrb[8].mxu1 %vm1383_vm0, %v7562_v31 }
 0x295   : > { %3606 = vmatprep.mubr.msk.f32.mxu1 %vm1388_vm1, %v7562_v31 }
 0x296   : > { %2541 = vperm.xlu1 %4235, %v5747_v33   ;;  %2521 = vperm.xlu0 %4251, %v5731_v22   ;;  %v6239_v12 = vpop.f32.mrb[14].mxu0  ;;  %v6241_v54 = vpop.permute.xlu1 %2237 }
 0x297   : > { %7583 = vst [vmem:[#allocation167_spill] sm:$0xff] %v6239_v12  ;;  %7584 = vst [vmem:[#allocation168_spill] sm:$0xff] %v6241_v54  ;;  %v6243_v55 = vpop.permute.xlu0 %2241  ;;  %v6245_v2 = vpop.f32.mrb[15].mxu0 }
 0x298   : > { %7585 = vst [vmem:[#allocation169_spill] sm:$0xff] %v6243_v55  ;;  %7586 = vst [vmem:[#allocation170_spill] sm:$0xff] %v6245_v2  ;;  %v4311_v2 = vld [vmem:[%s4796_s7 + $0x180] sm:$0xff]  ;;  %3607 = vmatmul.mubr.msk.f32.gmra.mrb[10].mxu1 %vm1387_vm3, %v7562_v31 }
 0x299   : > { %3608 = vmatprep.mubr.msk.f32.mxu1 %vm1392_vm4, %v7562_v31 }
 0x29a   : > { %2613 = vperm.xlu1 %4235, %v5910_v34   ;;  %2593 = vperm.xlu0 %4251, %v5856_v59   ;;  %v6249_v1 = vpop.f32.mrb[16].mxu0  ;;  %v6251_v19 = vpop.permute.xlu1 %2245 }
 0x29b   : > { %7587 = vst [vmem:[#allocation171_spill] sm:$0xff] %v6251_v19  ;;  %v6253_v63 = vpop.permute.xlu0 %2249  ;;  %v6255_v33 = vpop.f32.mrb[17].mxu0 }
 0x29c   : > { %7588 = vst [vmem:[#allocation172_spill] sm:$0xff] %v6253_v63  ;;  %3609 = vmatmul.mubr.msk.f32.gmra.mrb[12].mxu1 %vm1391_vm5, %v7562_v31 }
 0x29d   : > { %3610 = vmatprep.mubr.msk.f32.mxu1 %vm1396_vm6, %v7562_v31 }
 0x29e   : > { %2549 = vperm.xlu1 %4235, %v5759_v53   ;;  %2529 = vperm.xlu0 %4251, %v5743_v57   ;;  %v6259_v22 = vpop.f32.mrb[18].mxu0 }
 0x29f   : > { %v6261_v55 = vpop.f32.mrb[19].mxu0 }
 0x2a0   : > { %v6263_v54 = vpop.permute.xlu1 %2253  ;;  %v6265_v34 = vpop.permute.xlu0 %2257  ;;  %3611 = vmatmul.mubr.msk.f32.gmra.mrb[14].mxu1 %vm7260_vm15, %v7562_v31  ;;  %vm2894_vm15 = vcmask 195584  }
 0x2a1   : > { %3612 = vmatprep.mubr.msk.f32.mxu1 %vm1382_vm7, %v7562_v31  ;;  %vm2764_vm7 = vcmask 64512  }
 0x2a2   : > { %2621 = vperm.xlu1 %4235, %v5926_v14   ;;  %2601 = vperm.xlu0 %4251, %v5875_v16   ;;  %v6269_v59 = vpop.f32.mrb[20].mxu0 }
 0x2a3   : > { %v6271_v63 = vpop.f32.mrb[21].mxu0 }
 0x2a4   : > { %v6273_v19 = vpop.permute.xlu1 %2261  ;;  %v6275_v53 = vpop.permute.xlu0 %2269 }
 0x2a6   : > { %2557 = vperm.xlu1 %4235, %v5931_v15   ;;  %2537 = vperm.xlu0 %4251, %v5755_v36   ;;  %v6279_v57 = vpop.f32.mrb[22].mxu0 }
 0x2a7   : > { %v6281_v51 = vpop.f32.mrb[23].mxu0 }
 0x2a8   : > { %v6283_v12 = vpop.permute.xlu1 %2265  ;;  %v6285_v14 = vpop.permute.xlu0 %2277 }
 0x2aa   : > { %2629 = vperm.xlu1 %4235, %v5948_v41   ;;  %2609 = vperm.xlu0 %4251, %v5847_v58   ;;  %v6289_v16 = vpop.f32.mrb[24].mxu0  ;;  %v7593_v58 = vmov 2  }
 0x2ab   : > { %7589 = vst [vmem:[#allocation173_spill] sm:$0xff] %v6289_v16  ;;  %v6291_v52 = vpop.f32.mrb[25].mxu0 }
 0x2ac   : > { %v6293_v15 = vpop.permute.xlu1 %2273  ;;  %v6295_v36 = vpop.permute.xlu0 %2285 }
 0x2ad   : > { %7590 = vst [vmem:[#allocation174_spill] sm:$0xff] %v6295_v36 }
 0x2ae   : > { %2565 = vperm.xlu1 %4235, %v5953_v11   ;;  %2545 = vperm.xlu0 %4251, %v5767_v17   ;;  %v6299_v6 = vpop.f32.mrb[26].mxu0 }
 0x2af   : > { %7591 = vst [vmem:[#allocation175_spill] sm:$0xff] %v6299_v6  ;;  %v6301_v35 = vpop.f32.mrb[27].mxu0 }
 0x2b0   : > { %v6303_v25 = vpop.permute.xlu1 %2281  ;;  %v6305_v41 = vpop.permute.xlu0 %2293 }
 0x2b1   : > { %7592 = vst [vmem:[#allocation176_spill] sm:$0xff] %v6305_v41 }
 0x2b2   : > { %4236 = vset.pattern.permute.xlu1 %v7593_v58  ;;  %2617 = vperm.xlu0 %4251, %v5866_v28   ;;  %v6309_v50 = vpop.f32.mrb[28].mxu0 }
 0x2b3   : > { %7594 = vst [vmem:[#allocation177_spill] sm:$0xff] %v6309_v50  ;;  %2445 = vperm.xlu1 %4236, %v4311_v2   ;;  %v6312_v11 = vpop.f32.mrb[29].mxu0 }
 0x2b4   : > { %v6314_v17 = vpop.permute.xlu1 %2289  ;;  %v6316_v6 = vpop.permute.xlu0 %2301 }
 0x2b5   : > { %7595 = vst [vmem:[#allocation178_spill] sm:$0xff] %v6314_v17  ;;  %7596 = vst [vmem:[#allocation179_spill] sm:$0xff] %v6316_v6  ;;  %v4312_v6 = vld [vmem:[%s4796_s7 + $0x188] sm:$0xff] }
 0x2b6   : > { %2553 = vperm.xlu0 %4251, %v5776_v38   ;;  %v6319_v16 = vpop.f32.mrb[30].mxu0 }
 0x2b7   : > { %7597 = vst [vmem:[#allocation180_spill] sm:$0xff] %v6319_v16  ;;  %4237 = vset.pattern.permute.xlu1 %v7565_v49  ;;  %v6322_v41 = vpop.f32.mrb[31].mxu0 }
 0x2b8   : > { %2701 = vperm.xlu1 %4237, %v4311_v2   ;;  %v6324_v28 = vpop.permute.xlu1 %2297  ;;  %v6326_v50 = vpop.permute.xlu0 %2309 }
 0x2b9   : > { %7598 = vst [vmem:[#allocation181_spill] sm:$0xff] %v6324_v28 }
 0x2ba   : > { %2625 = vperm.xlu0 %4251, %v5885_v4   ;;  %v6329_v36 = vpop.f32.mrb[32].mxu0 }
 0x2bb   : > { %7599 = vst [vmem:[#allocation182_spill] sm:$0xff] %v6329_v36  ;;  %v6331_v17 = vpop.f32.mrb[33].mxu0 }
 0x2bc   : > { %7600 = vst [vmem:[#allocation183_spill] sm:$0xff] %v6331_v17  ;;  %2705 = vperm.xlu1 %4237, %v4312_v6   ;;  %v6334_v38 = vpop.permute.xlu1 %2305  ;;  %v6336_v16 = vpop.permute.xlu0 %2317  ;;  %v4316_v17 = vld [vmem:[%s4796_s7 + $0x1a8] sm:$0xff] }
 0x2bd   : > { %7601 = vst [vmem:[#allocation184_spill] sm:$0xff] %v6334_v38 }
 0x2be   : > { %2561 = vperm.xlu0 %4251, %v5785_v20   ;;  %v6339_v2 = vpop.f32.mrb[34].mxu0 }
 0x2bf   : > { %7602 = vst [vmem:[#allocation185_spill] sm:$0xff] %v6339_v2  ;;  %v6341_v28 = vpop.f32.mrb[35].mxu0 }
 0x2c0   : > { %7603 = vst [vmem:[#allocation186_spill] sm:$0xff] %v6341_v28  ;;  %2641 = vperm.xlu1 %4237, %v5917_v5   ;;  %v6344_v4 = vpop.permute.xlu1 %2313  ;;  %v6346_v36 = vpop.permute.xlu0 %2325 }
 0x2c1   : > { %7604 = vst [vmem:[#allocation187_spill] sm:$0xff] %v6344_v4 }
 0x2c2   : > { %2633 = vperm.xlu0 %4251, %v5901_v60   ;;  %v6351_v6 = vpop.f32.mrb[36].mxu0 }
 0x2c3   : > { %7605 = vst [vmem:[#allocation188_spill] sm:$0xff] %v6351_v6  ;;  %v6359_v5 = vpop.f32.mrb[37].mxu0  ;;  %v4313_v6 = vld [vmem:[%s4796_s7 + $0x190] sm:$0xff] }
 0x2c4   : > { %7606 = vst [vmem:[#allocation189_spill] sm:$0xff] %v6359_v5  ;;  %4238 = vset.pattern.permute.xlu1 %v7593_v58  ;;  %v6366_v20 = vpop.permute.xlu1 %2321  ;;  %v6368_v60 = vpop.permute.xlu0 %2333 }
 0x2c5   : > { %2453 = vperm.xlu1 %4238, %v4313_v6  }
 0x2c6   : > { %2569 = vperm.xlu0 %4251, %v5794_v21   ;;  %v6374_v2 = vpop.f32.mrb[38].mxu0 }
 0x2c7   : > { %7607 = vst [vmem:[#allocation190_spill] sm:$0xff] %v6374_v2  ;;  %v6382_v5 = vpop.f32.mrb[39].mxu0 }
 0x2c8   : > { %7608 = vst [vmem:[#allocation191_spill] sm:$0xff] %v6382_v5  ;;  %v6388_v24 = vpop.permute.xlu1 %2329  ;;  %v6390_v21 = vpop.permute.xlu0 %2341 }
 0x2c9   : > { %4239 = vset.pattern.permute.xlu1 %v7565_v49 }
 0x2ca   : > { %2709 = vperm.xlu1 %4239, %v4313_v6   ;;  %2637 = vperm.xlu0 %4251, %v5986_v7   ;;  %v6396_v2 = vpop.f32.mrb[40].mxu0  ;;  %v4314_v7 = vld [vmem:[%s4796_s7 + $0x198] sm:$0xff] }
 0x2cb   : > { %7609 = vst [vmem:[#allocation192_spill] sm:$0xff] %v6396_v2  ;;  %v6400_v5 = vpop.f32.mrb[41].mxu0 }
 0x2cc   : > { %7610 = vst [vmem:[#allocation193_spill] sm:$0xff] %v6400_v5  ;;  %v6406_v29 = vpop.permute.xlu1 %2337  ;;  %v6408_v28 = vpop.permute.xlu0 %2349 }
 0x2ce   : > { %2713 = vperm.xlu1 %4239, %v4314_v7   ;;  %2645 = vperm.xlu0 %4251, %v6007_v10   ;;  %v6420_v6 = vpop.f32.mrb[42].mxu0 }
 0x2cf   : > { %7611 = vst [vmem:[#allocation194_spill] sm:$0xff] %v6420_v6  ;;  %v6422_v5 = vpop.f32.mrb[43].mxu0 }
 0x2d0   : > { %7612 = vst [vmem:[#allocation195_spill] sm:$0xff] %v6422_v5  ;;  %v6424_v2 = vpop.permute.xlu1 %2345  ;;  %v6426_v23 = vpop.permute.xlu0 %2357  ;;  %v4315_v5 = vld [vmem:[%s4796_s7 + $0x1a0] sm:$0xff] }
 0x2d2   : > { %2649 = vperm.xlu1 %4239, %v5936_v26   ;;  %2653 = vperm.xlu0 %4251, %v6020_v27   ;;  %v6430_v9 = vpop.f32.mrb[44].mxu0 }
 0x2d3   : > { %7613 = vst [vmem:[#allocation196_spill] sm:$0xff] %v6430_v9  ;;  %v6432_v39 = vpop.f32.mrb[45].mxu0 }
 0x2d4   : > { %7614 = vst [vmem:[#allocation197_spill] sm:$0xff] %v6432_v39  ;;  %v6434_v40 = vpop.permute.xlu1 %2353  ;;  %v6436_v7 = vpop.permute.xlu0 %2365 }
 0x2d6   : > { %4240 = vset.pattern.permute.xlu1 %v7593_v58  ;;  %2725 = vperm.xlu0 %4251, %v6037_v62   ;;  %v6440_v10 = vpop.f32.mrb[46].mxu0 }
 0x2d7   : > { %7615 = vst [vmem:[#allocation198_spill] sm:$0xff] %v6440_v10  ;;  %2461 = vperm.xlu1 %4240, %v4315_v5   ;;  %v6443_v26 = vpop.f32.mrb[47].mxu0 }
 0x2d8   : > { %7616 = vst [vmem:[#allocation199_spill] sm:$0xff] %v6443_v26  ;;  %v6445_v27 = vpop.permute.xlu1 %2361  ;;  %v6447_v9 = vpop.permute.xlu0 %2373 }
 0x2da   : > { %2665 = vperm.xlu0 %4251, %v6043_v13   ;;  %v6450_v39 = vpop.f32.mrb[48].mxu0 }
 0x2db   : > { %7617 = vst [vmem:[#allocation200_spill] sm:$0xff] %v6450_v39  ;;  %4241 = vset.pattern.permute.xlu1 %v7565_v49  ;;  %v6453_v6 = vpop.f32.mrb[49].mxu0 }
 0x2dc   : > { %7618 = vst [vmem:[#allocation201_spill] sm:$0xff] %v6453_v6  ;;  %2717 = vperm.xlu1 %4241, %v4315_v5   ;;  %v6455_v45 = vpop.permute.xlu1 %2369  ;;  %v6457_v10 = vpop.permute.xlu0 %2381 }
 0x2dd   : > { %7619 = vst [vmem:[#allocation202_spill] sm:$0xff] %v6457_v10 }
 0x2de   : > { %2733 = vperm.xlu0 %4251, %v6063_v48   ;;  %v6460_v26 = vpop.f32.mrb[50].mxu0 }
 0x2df   : > { %7620 = vst [vmem:[#allocation203_spill] sm:$0xff] %v6460_v26  ;;  %v6462_v31 = vpop.f32.mrb[51].mxu0 }
 0x2e0   : > { %7621 = vst [vmem:[#allocation204_spill] sm:$0xff] %v6462_v31  ;;  %2721 = vperm.xlu1 %4241, %v4316_v17   ;;  %v6465_v4 = vpop.permute.xlu1 %2377  ;;  %v6467_v39 = vpop.permute.xlu0 %2389 }
 0x2e1   : > { %7622 = vst [vmem:[#allocation205_spill] sm:$0xff] %v6467_v39 }
 0x2e2   : > { %2673 = vperm.xlu0 %4251, %v6069_v18   ;;  %v6470_v6 = vpop.f32.mrb[52].mxu0 }
 0x2e3   : > { %7623 = vst [vmem:[#allocation206_spill] sm:$0xff] %v6470_v6  ;;  %v6472_v5 = vpop.f32.mrb[53].mxu0 }
 0x2e4   : > { %7624 = vst [vmem:[#allocation207_spill] sm:$0xff] %v6472_v5  ;;  %2657 = vperm.xlu1 %4241, %v5959_v44   ;;  %v6475_v10 = vpop.permute.xlu1 %2385  ;;  %v6477_v38 = vpop.permute.xlu0 %2397 }
 0x2e5   : > { %7625 = vst [vmem:[#allocation208_spill] sm:$0xff] %v6477_v38 }
 0x2e6   : > { %2741 = vperm.xlu0 %4251, %v6089_v3   ;;  %v6480_v26 = vpop.f32.mrb[54].mxu0 }
 0x2e7   : > { %7626 = vst [vmem:[#allocation209_spill] sm:$0xff] %v6480_v26  ;;  %v6482_v17 = vpop.f32.mrb[55].mxu0 }
 0x2e8   : > { %7627 = vst [vmem:[#allocation210_spill] sm:$0xff] %v6482_v17  ;;  %4242 = vset.pattern.permute.xlu1 %v7593_v58  ;;  %v6485_v31 = vpop.permute.xlu1 %2393  ;;  %v6487_v39 = vpop.permute.xlu0 %2449 }
 0x2e9   : > { %7628 = vst [vmem:[#allocation211_spill] sm:$0xff] %v6485_v31  ;;  %2469 = vperm.xlu1 %4242, %v6037_v62  }
 0x2ea   : > { %2681 = vperm.xlu0 %4251, %v6103_v32   ;;  %v6491_v44 = vpop.f32.mrb[56].mxu0 }
 0x2eb   : > { %7629 = vst [vmem:[#allocation212_spill] sm:$0xff] %v6491_v44  ;;  %v6493_v6 = vpop.f32.mrb[57].mxu0 }
 0x2ec   : > { %7630 = vst [vmem:[#allocation213_spill] sm:$0xff] %v6493_v6  ;;  %v6495_v5 = vpop.permute.xlu1 %2401  ;;  %v6497_v38 = vpop.permute.xlu0 %2457 }
 0x2ed   : > { %7631 = vst [vmem:[#allocation214_spill] sm:$0xff] %v6495_v5  ;;  %7632 = vst [vmem:[#allocation215_spill] sm:$0xff] %v6497_v38  ;;  %2405 = vperm.xlu1 %4242, %v6046_v30  }
 0x2ee   : > { %2749 = vperm.xlu0 %4251, %v6129_v37   ;;  %v6501_v26 = vpop.f32.mrb[58].mxu0 }
 0x2ef   : > { %7633 = vst [vmem:[#allocation216_spill] sm:$0xff] %v6501_v26  ;;  %v6503_v17 = vpop.f32.mrb[59].mxu0 }
 0x2f0   : > { %7634 = vst [vmem:[#allocation217_spill] sm:$0xff] %v6503_v17  ;;  %v6505_v31 = vpop.permute.xlu0 %2465 }
 0x2f1   : > { %7635 = vst [vmem:[#allocation218_spill] sm:$0xff] %v6505_v31  ;;  %2409 = vperm.xlu1 %4242, %v6043_v13   ;;  %v2578_v62 = vpop.permute.xlu1 %2577 }
 0x2f2   : > { %2689 = vperm.xlu0 %4251, %v6144_v61   ;;  %v6509_v44 = vpop.f32.mrb[60].mxu0 }
 0x2f3   : > { %7636 = vst [vmem:[#allocation219_spill] sm:$0xff] %v6509_v44  ;;  %v6511_v6 = vpop.f32.mrb[61].mxu0  ;;  %v2783_v44 = vsel %vm2764_vm7, %v5372_v42, %v5798_v43  ;;  %v2785_v43 = vsel %vm2764_vm7, %v5386_v46, %v5807_v47 }
 0x2f4   : > { %7637 = vst [vmem:[#allocation220_spill] sm:$0xff] %v6511_v6  ;;  %v6513_v5 = vpop.permute.xlu0 %2473  ;;  %v2848_v17 = vsel %vm2829_vm2, %v2783_v44, %v6346_v36  ;;  %v7644_v44 = vld [vmem:[#allocation135_spill] sm:$0xff] }
 0x2f5   : > { %7638 = vst [vmem:[#allocation221_spill] sm:$0xff] %v6513_v5  ;;  %4243 = vset.pattern.permute.xlu1 %v7565_v49  ;;  %v2510_v38 = vpop.permute.xlu1 %2509 }
 0x2f6   : > { %2729 = vperm.xlu1 %4243, %v6034_v8   ;;  %2757 = vperm.xlu0 %4251, %v6168_v0   ;;  %v6518_v26 = vpop.f32.mrb[62].mxu0 }
 0x2f7   : > { %7639 = vst [vmem:[#allocation222_spill] sm:$0xff] %v6518_v26  ;;  %v6520_v13 = vpop.f32.mrb[63].mxu0 }
 0x2f8   : > { %7640 = vst [vmem:[#allocation223_spill] sm:$0xff] %v6520_v13  ;;  %v6525_v6 = vpop.permute.xlu0 %2481 }
 0x2f9   : > { %7641 = vst [vmem:[#allocation224_spill] sm:$0xff] %v6525_v6  ;;  %v2582_v5 = vpop.permute.xlu1 %2581  ;;  %v7647_v6 = vld [vmem:[#allocation109_spill] sm:$0xff] }
 0x2fa   : > { %v2913_v8 = vsel %vm2894_vm15, %v2848_v17, %v2582_v5  ;;  %2661 = vperm.xlu1 %4243, %v6046_v30   ;;  %2697 = vperm.xlu0 %4251, %v6182_v56   ;;  %v2850_v30 = vsel %vm2829_vm2, %v2785_v43, %v6368_v60  ;;  %v7648_v60 = vld [vmem:[#allocation66_spill] sm:$0xff] }
 0x2fb   : > { %v6533_v26 = vmul.f32 %v2913_v8, %v6261_v55  ;;  %v7649_v43 = vld [vmem:[#allocation110_spill] sm:$0xff] }
 0x2fc   : > { %v6535_v13 = vpop.permute.xlu0 %2489 }
 0x2fd   : > { %7642 = vst [vmem:[#allocation225_spill] sm:$0xff] %v6535_v13  ;;  %v2518_v42 = vpop.permute.xlu1 %2517  ;;  %v7646_v13 = vld [vmem:[#allocation73_spill] sm:$0xff] }
 0x2fe   : > { %4244 = vset.pattern.permute.xlu1 %v7593_v58  ;;  %v2782_v46 = vsel %vm2764_vm7, %v7647_v6, %v7646_v13 }
 0x2ff   : > { %2477 = vperm.xlu1 %4244, %v6063_v48   ;;  %v2847_v47 = vsel %vm2829_vm2, %v2782_v46, %v6366_v20  ;;  %v7652_v46 = vld [vmem:[#allocation57_spill] sm:$0xff] }
 0x300   : > { %v6542_v36 = vpop.permute.xlu0 %2497 }
 0x301   : > { %7643 = vst [vmem:[#allocation226_spill] sm:$0xff] %v6542_v36  ;;  %v2590_v5 = vpop.permute.xlu1 %2589 }
 0x302   : > { %v2915_v55 = vsel %vm2894_vm15, %v2850_v30, %v2590_v5  ;;  %v7650_v30 = vld [vmem:[#allocation70_spill] sm:$0xff] }
 0x303   : > { %v6548_v17 = vmul.f32 %v2915_v55, %v6271_v63  ;;  %2413 = vperm.xlu1 %4244, %v7644_v44   ;;  %v2781_v63 = vsel %vm2764_vm7, %v7649_v43, %v7648_v60  ;;  %v7651_v5 = vld [vmem:[#allocation114_spill] sm:$0xff] }
 0x304   : > { %v6551_v8 = vpop.permute.xlu0 %2505  ;;  %v2787_v55 = vsel %vm2764_vm7, %v7651_v5, %v7650_v30  ;;  %v2846_v36 = vsel %vm2829_vm2, %v2781_v63, %v6336_v16  ;;  %v7655_v63 = vld [vmem:[#allocation93_spill] sm:$0xff] }
 0x305   : > { %7645 = vst [vmem:[#allocation135_spill] sm:$0xff] %v6551_v8  ;;  %v6553_v48 = vpop.permute.xlu1 %2525  ;;  %v2912_v8 = vsel %vm2894_vm15, %v2847_v47, %v2578_v62  ;;  %v2852_v6 = vsel %vm2829_vm2, %v2787_v55, %v6390_v21  ;;  %v7654_v47 = vld [vmem:[#allocation50_spill] sm:$0xff] }
 0x306   : > { %v2976_v62 = vmul.f32 %v6249_v1, %v2912_v8  ;;  %v2766_v5 = vsel %vm2764_vm7, %v7655_v63, %v7654_v47 }
 0x307   : > { %2417 = vperm.xlu1 %4244, %v6069_v18   ;;  %v7653_v18 = vld [vmem:[#allocation94_spill] sm:$0xff] }
 0x308   : > { %v2765_v31 = vsel %vm2764_vm7, %v7653_v18, %v7652_v46  ;;  %v7659_v46 = vld [vmem:[#allocation71_spill] sm:$0xff] }
 0x309   : > { %v2598_v13 = vpop.permute.xlu1 %2597  ;;  %v2574_v20 = vpop.permute.xlu0 %2573  ;;  %v2830_v30 = vsel %vm2829_vm2, %v2765_v31, %v6263_v54  ;;  %v2831_v31 = vsel %vm2829_vm2, %v2766_v5, %v6265_v34  ;;  %v7660_v18 = vld [vmem:[#allocation111_spill] sm:$0xff] }
 0x30a   : > { %v2917_v60 = vsel %vm2894_vm15, %v2852_v6, %v2598_v13  ;;  %v2911_v43 = vsel %vm2894_vm15, %v2846_v36, %v2574_v20  ;;  %v2895_v55 = vsel %vm2894_vm15, %v2830_v30, %v2510_v38  ;;  %v7656_v6 = vld [vmem:[#allocation134_spill] sm:$0xff]  ;;  %v2784_v38 = vsel %vm2764_vm7, %v7660_v18, %v7659_v46  ;;  %v7663_v5 = vld [vmem:[#allocation55_spill] sm:$0xff]  ;;  %v7667_v46 = vld [vmem:[#allocation133_spill] sm:$0xff] }
 0x30b   : > { %v6581_v16 = vmul.f32 %v2917_v60, %v6281_v51  ;;  %v2975_v21 = vmul.f32 %v2911_v43, %v6255_v33  ;;  %4245 = vset.pattern.permute.xlu1 %v7565_v49  ;;  %v7657_v33 = vld [vmem:[#allocation129_spill] sm:$0xff]  ;;  %v7658_v13 = vld [vmem:[#allocation126_spill] sm:$0xff]  ;;  %v7661_v60 = vld [vmem:[#allocation75_spill] sm:$0xff]  ;;  %v2849_v34 = vsel %vm2829_vm2, %v2784_v38, %v6388_v24 }
 0x30c   : > { %2737 = vperm.xlu1 %4245, %v7656_v6   ;;  %v2959_v8 = vmul.f32 %v2895_v55, %v7657_v33  ;;  %v7662_v43 = vld [vmem:[#allocation116_spill] sm:$0xff]  ;;  %v7668_v38 = vld [vmem:[#allocation130_spill] sm:$0xff] }
 0x30d   : > { %v6592_v54 = vpop.permute.xlu1 %2533  ;;  %v2514_v1 = vpop.permute.xlu0 %2513  ;;  %v4056_v51 = vpack.c.bf16 %v2976_v62, %v2975_v21  ;;  %v2789_v30 = vsel %vm2764_vm7, %v7662_v43, %v7661_v60  ;;  %v7664_v55 = vld [vmem:[#allocation96_spill] sm:$0xff] }
 0x30e   : > { %v2896_v36 = vsel %vm2894_vm15, %v2831_v31, %v2514_v1  ;;  %v2854_v62 = vsel %vm2829_vm2, %v2789_v30, %v6408_v28  ;;  %v2767_v6 = vsel %vm2764_vm7, %v7664_v55, %v7663_v5  ;;  %v7665_v28 = vld [vmem:[#allocation56_spill] sm:$0xff]  ;;  %v7674_v55 = vld [vmem:[#allocation54_spill] sm:$0xff] }
 0x30f   : > { %v2960_v20 = vmul.f32 %v7658_v13, %v2896_v36  ;;  %4057 = vmatprep.subr.bf16.mxu1 %v4056_v51  ;;  %v7666_v36 = vld [vmem:[#allocation95_spill] sm:$0xff]  ;;  %v7670_v43 = vld [vmem:[#allocation112_spill] sm:$0xff] }
 0x310   : > { %2669 = vperm.xlu1 %4245, %v7644_v44   ;;  %v2832_v44 = vsel %vm2829_vm2, %v2767_v6, %v6273_v19  ;;  %v2768_v33 = vsel %vm2764_vm7, %v7666_v36, %v7665_v28  ;;  %v7675_v6 = vld [vmem:[#allocation98_spill] sm:$0xff]  ;;  %v7676_v28 = vld [vmem:[#allocation61_spill] sm:$0xff] }
 0x311   : > { %v4058_v21 = vpack.c.bf16 %v2960_v20, %v2959_v8  ;;  %v2606_v47 = vpop.permute.xlu1 %2605  ;;  %v2586_v63 = vpop.permute.xlu0 %2585  ;;  %v2897_v8 = vsel %vm2894_vm15, %v2832_v44, %v2518_v42  ;;  %v2833_v13 = vsel %vm2829_vm2, %v2768_v33, %v6283_v12  ;;  %v7669_v42 = vld [vmem:[#allocation72_spill] sm:$0xff]  ;;  %v7672_v12 = vld [vmem:[#allocation118_spill] sm:$0xff]  ;;  %v7677_v36 = vld [vmem:[#allocation97_spill] sm:$0xff] }
 0x312   : > { %v2919_v31 = vsel %vm2894_vm15, %v2854_v62, %v2606_v47  ;;  %v2914_v1 = vsel %vm2894_vm15, %v2849_v34, %v2586_v63  ;;  %v2961_v18 = vmul.f32 %v2897_v8, %v7667_v46  ;;  %v2786_v30 = vsel %vm2764_vm7, %v7670_v43, %v7669_v42  ;;  %v7671_v34 = vld [vmem:[#allocation74_spill] sm:$0xff]  ;;  %v7673_v47 = vld [vmem:[#allocation143_spill] sm:$0xff]  ;;  %v7679_v46 = vld [vmem:[#allocation136_spill] sm:$0xff] }
 0x313   : > { %v6616_v51 = vmul.f32 %v2919_v31, %v6291_v52  ;;  %v2978_v24 = vmul.f32 %v6259_v22, %v2914_v1  ;;  %4059 = vmatpush3.bf16.msra.mxu1 %v4058_v21  ;;  %v2851_v62 = vsel %vm2829_vm2, %v2786_v30, %v6406_v29  ;;  %v2769_v31 = vsel %vm2764_vm7, %v7675_v6, %v7674_v55  ;;  %v7682_v42 = vld [vmem:[#allocation79_spill] sm:$0xff]  ;;  %v7687_v6 = vld [vmem:[#allocation60_spill] sm:$0xff] }
 0x314   : > { %4246 = vset.pattern.permute.xlu1 %v7593_v58  ;;  %v2770_v33 = vsel %vm2764_vm7, %v7677_v36, %v7676_v28 }
 0x315   : > { %2485 = vperm.xlu1 %4246, %v6089_v3   ;;  %v6627_v19 = vpop.permute.xlu1 %2541  ;;  %v2522_v52 = vpop.permute.xlu0 %2521  ;;  %v4060_v20 = vpack.c.bf16 %v2978_v24, %v6533_v26  ;;  %v2791_v3 = vsel %vm2764_vm7, %v7672_v12, %v7671_v34  ;;  %v2834_v24 = vsel %vm2829_vm2, %v2769_v31, %v6275_v53  ;;  %v7688_v31 = vld [vmem:[#allocation99_spill] sm:$0xff] }
 0x316   : > { %v2898_v22 = vsel %vm2894_vm15, %v2833_v13, %v2522_v52  ;;  %v2856_v26 = vsel %vm2829_vm2, %v2791_v3, %v6426_v23  ;;  %v2899_v8 = vsel %vm2894_vm15, %v2834_v24, %v6553_v48  ;;  %v2835_v13 = vsel %vm2829_vm2, %v2770_v33, %v6293_v15  ;;  %v7683_v15 = vld [vmem:[#allocation21_spill] sm:$0xff]  ;;  %v7684_v3 = vld [vmem:[#allocation59_spill] sm:$0xff]  ;;  %v7690_v33 = vld [vmem:[#allocation144_spill] sm:$0xff] }
 0x317   : > { %v2962_v60 = vmul.f32 %v7668_v38, %v2898_v22  ;;  %4061 = vmatprep.subr.bf16.mxu1 %v4060_v20  ;;  %v7678_v20 = vld [vmem:[#allocation139_spill] sm:$0xff]  ;;  %v7680_v38 = vld [vmem:[#allocation77_spill] sm:$0xff] }
 0x318   : > { %v2963_v22 = vmul.f32 %v2899_v8, %v7678_v20 }
 0x319   : > { %v4062_v21 = vpack.c.bf16 %v2962_v60, %v2961_v18  ;;  %2421 = vperm.xlu1 %4246, %v7673_v47   ;;  %v2614_v63 = vpop.permute.xlu1 %2613  ;;  %v2594_v5 = vpop.permute.xlu0 %2593  ;;  %v7681_v60 = vld [vmem:[#allocation113_spill] sm:$0xff] }
 0x31a   : > { %v2921_v1 = vsel %vm2894_vm15, %v2856_v26, %v2614_v63  ;;  %v2916_v44 = vsel %vm2894_vm15, %v2851_v62, %v2594_v5  ;;  %v2788_v48 = vsel %vm2764_vm7, %v7681_v60, %v7680_v38  ;;  %v7685_v62 = vld [vmem:[#allocation100_spill] sm:$0xff]  ;;  %v7696_v38 = vld [vmem:[#allocation102_spill] sm:$0xff] }
 0x31b   : > { %v6652_v29 = vmul.f32 %v2921_v1, %v6301_v35  ;;  %v2980_v23 = vmul.f32 %v6269_v59, %v2916_v44  ;;  %4063 = vmatpush3.bf16.msra.mxu1 %v4062_v21  ;;  %v2853_v43 = vsel %vm2829_vm2, %v2788_v48, %v6424_v2  ;;  %v2771_v26 = vsel %vm2764_vm7, %v7685_v62, %v7684_v3  ;;  %v7686_v5 = vld [vmem:[#allocation140_spill] sm:$0xff] }
 0x31c   : > { %v2836_v2 = vsel %vm2829_vm2, %v2771_v26, %v6285_v14  ;;  %v2772_v1 = vsel %vm2764_vm7, %v7688_v31, %v7687_v6  ;;  %v7702_v3 = vld [vmem:[#allocation108_spill] sm:$0xff]  ;;  %v7704_v31 = vld [vmem:[#allocation154_spill] sm:$0xff] }
 0x31d   : > { %2425 = vperm.xlu1 %4246, %v6103_v32   ;;  %v6663_v52 = vpop.permute.xlu1 %2549  ;;  %v2530_v53 = vpop.permute.xlu0 %2529  ;;  %v4064_v35 = vpack.c.bf16 %v2980_v23, %v6548_v17  ;;  %v2793_v32 = vsel %vm2764_vm7, %v7683_v15, %v7682_v42  ;;  %v2901_v44 = vsel %vm2894_vm15, %v2836_v2, %v6592_v54  ;;  %v2837_v24 = vsel %vm2829_vm2, %v2772_v1, %v6303_v25  ;;  %v7694_v25 = vld [vmem:[#allocation20_spill] sm:$0xff]  ;;  %v7697_v15 = vld [vmem:[#allocation174_spill] sm:$0xff] }
 0x31e   : > { %v2900_v59 = vsel %vm2894_vm15, %v2835_v13, %v2530_v53  ;;  %v2858_v17 = vsel %vm2829_vm2, %v2793_v32, %v6436_v7  ;;  %v7691_v13 = vld [vmem:[#allocation76_spill] sm:$0xff]  ;;  %v7692_v53 = vld [vmem:[#allocation115_spill] sm:$0xff] }
 0x31f   : > { %v2964_v18 = vmul.f32 %v7679_v46, %v2900_v59  ;;  %4065 = vmatprep.subr.bf16.mxu1 %v4064_v35  ;;  %v2790_v54 = vsel %vm2764_vm7, %v7692_v53, %v7691_v13  ;;  %v7693_v35 = vld [vmem:[#allocation78_spill] sm:$0xff]  ;;  %v7711_v13 = vld [vmem:[#allocation104_spill] sm:$0xff] }
 0x320   : > { %v2795_v59 = vsel %vm2764_vm7, %v7694_v25, %v7693_v35  ;;  %v7712_v25 = vld [vmem:[#allocation176_spill] sm:$0xff] }
 0x321   : > { %v4066_v30 = vpack.c.bf16 %v2964_v18, %v2963_v22  ;;  %4247 = vset.pattern.permute.xlu1 %v7565_v49  ;;  %v2622_v34 = vpop.permute.xlu1 %2621  ;;  %v2602_v12 = vpop.permute.xlu0 %2601  ;;  %v2860_v20 = vsel %vm2829_vm2, %v2795_v59, %v6447_v9  ;;  %v7695_v18 = vld [vmem:[#allocation58_spill] sm:$0xff]  ;;  %v7698_v9 = vld [vmem:[#allocation173_spill] sm:$0xff] }
 0x322   : > { %v2923_v21 = vsel %vm2894_vm15, %v2858_v17, %v2622_v34  ;;  %v2918_v63 = vsel %vm2894_vm15, %v2853_v43, %v2602_v12  ;;  %2745 = vperm.xlu1 %4247, %v7686_v5   ;;  %v2773_v60 = vsel %vm2764_vm7, %v7696_v38, %v7695_v18  ;;  %v7699_v17 = vld [vmem:[#allocation65_spill] sm:$0xff]  ;;  %v7701_v12 = vld [vmem:[#allocation67_spill] sm:$0xff] }
 0x323   : > { %v6689_v7 = vmul.f32 %v2923_v21, %v6312_v11  ;;  %v2982_v55 = vmul.f32 %v6279_v57, %v2918_v63  ;;  %4067 = vmatpush3.bf16.msra.mxu1 %v4066_v30  ;;  %v7689_v57 = vld [vmem:[#allocation147_spill] sm:$0xff]  ;;  %v2838_v32 = vsel %vm2829_vm2, %v2773_v60, %v7697_v15  ;;  %v7700_v30 = vld [vmem:[#allocation101_spill] sm:$0xff]  ;;  %v2779_v62 = vsel %vm2764_vm7, %v7702_v3, %v7701_v12  ;;  %v7703_v21 = vld [vmem:[#allocation178_spill] sm:$0xff] }
 0x324   : > { %v2965_v36 = vmul.f32 %v2901_v44, %v7689_v57  ;;  %v2774_v34 = vsel %vm2764_vm7, %v7700_v30, %v7699_v17  ;;  %v2903_v26 = vsel %vm2894_vm15, %v2838_v32, %v6627_v19  ;;  %v2844_v63 = vsel %vm2829_vm2, %v2779_v62, %v6326_v50  ;;  %v7705_v44 = vld [vmem:[#allocation170_spill] sm:$0xff]  ;;  %v7706_v19 = vld [vmem:[#allocation151_spill] sm:$0xff]  ;;  %v7709_v50 = vld [vmem:[#allocation117_spill] sm:$0xff] }
 0x325   : > { %v6699_v23 = vpop.permute.xlu1 %2557  ;;  %v2538_v28 = vpop.permute.xlu0 %2537  ;;  %v4068_v14 = vpack.c.bf16 %v2982_v55, %v6581_v16  ;;  %v2855_v16 = vsel %vm2829_vm2, %v2790_v54, %v6434_v40  ;;  %v2967_v1 = vmul.f32 %v2903_v26, %v7704_v31  ;;  %v7716_v18 = vld [vmem:[#allocation181_spill] sm:$0xff]  ;;  %v7717_v15 = vld [vmem:[#allocation160_spill] sm:$0xff] }
 0x326   : > { %v2902_v11 = vsel %vm2894_vm15, %v2837_v24, %v2538_v28  ;;  %2677 = vperm.xlu1 %4247, %v7673_v47   ;;  %v7719_v17 = vld [vmem:[#allocation80_spill] sm:$0xff]  ;;  %v7720_v30 = vld [vmem:[#allocation17_spill] sm:$0xff] }
 0x327   : > { %v2966_v8 = vmul.f32 %v7690_v33, %v2902_v11  ;;  %4069 = vmatprep.subr.bf16.mxu1 %v4068_v14  ;;  %v7707_v14 = vld [vmem:[#allocation150_spill] sm:$0xff]  ;;  %v7708_v11 = vld [vmem:[#allocation81_spill] sm:$0xff]  ;;  %v7723_v62 = vld [vmem:[#allocation148_spill] sm:$0xff] }
 0x328   : > { %v2792_v57 = vsel %vm2764_vm7, %v7709_v50, %v7708_v11  ;;  %v7722_v12 = vld [vmem:[#allocation41_spill] sm:$0xff] }
 0x329   : > { %v4070_v47 = vpack.c.bf16 %v2966_v8, %v2965_v36  ;;  %v2630_v22 = vpop.permute.xlu1 %2629  ;;  %v2610_v46 = vpop.permute.xlu0 %2609  ;;  %v7710_v8 = vld [vmem:[#allocation63_spill] sm:$0xff] }
 0x32a   : > { %v2925_v48 = vsel %vm2894_vm15, %v2860_v20, %v2630_v22  ;;  %v2920_v42 = vsel %vm2894_vm15, %v2855_v16, %v2610_v46  ;;  %4248 = vset.pattern.permute.xlu1 %v7593_v58  ;;  %v2775_v53 = vsel %vm2764_vm7, %v7711_v13, %v7710_v8  ;;  %v7713_v16 = vld [vmem:[#allocation175_spill] sm:$0xff]  ;;  %v7732_v13 = vld [vmem:[#allocation184_spill] sm:$0xff] }
 0x32b   : > { %v6725_v40 = vmul.f32 %v2925_v48, %v6322_v41  ;;  %v2984_v43 = vmul.f32 %v7698_v9, %v2920_v42  ;;  %2493 = vperm.xlu1 %4248, %v6129_v37   ;;  %4071 = vmatpush3.bf16.msra.mxu1 %v4070_v47  ;;  %v2839_v41 = vsel %vm2829_vm2, %v2774_v34, %v7703_v21  ;;  %v7714_v47 = vld [vmem:[#allocation64_spill] sm:$0xff]  ;;  %v7715_v22 = vld [vmem:[#allocation103_spill] sm:$0xff]  ;;  %v7718_v9 = vld [vmem:[#allocation157_spill] sm:$0xff] }
 0x32c   : > { %v2840_v59 = vsel %vm2829_vm2, %v2775_v53, %v7712_v25  ;;  %v7721_v34 = vld [vmem:[#allocation131_spill] sm:$0xff] }
 0x32d   : > { %v2566_v5 = vpop.permute.xlu1 %2565  ;;  %v2546_v37 = vpop.permute.xlu0 %2545  ;;  %v4072_v2 = vpack.c.bf16 %v2984_v43, %v6616_v51  ;;  %v2857_v51 = vsel %vm2829_vm2, %v2792_v57, %v6445_v27  ;;  %v2776_v27 = vsel %vm2764_vm7, %v7715_v22, %v7714_v47  ;;  %v2905_v46 = vsel %vm2894_vm15, %v2840_v59, %v6663_v52  ;;  %v7730_v57 = vld [vmem:[#allocation69_spill] sm:$0xff]  ;;  %v7735_v47 = vld [vmem:[#allocation166_spill] sm:$0xff] }
 0x32e   : > { %v2909_v55 = vsel %vm2894_vm15, %v2844_v63, %v2566_v5  ;;  %v2904_v6 = vsel %vm2894_vm15, %v2839_v41, %v2546_v37  ;;  %v2841_v38 = vsel %vm2829_vm2, %v2776_v27, %v7716_v18  ;;  %v2969_v32 = vmul.f32 %v2905_v46, %v7717_v15  ;;  %v7724_v63 = vld [vmem:[#allocation62_spill] sm:$0xff]  ;;  %v7736_v27 = vld [vmem:[#allocation163_spill] sm:$0xff] }
 0x32f   : > { %v6746_v24 = vmul.f32 %v2909_v55, %v7705_v44  ;;  %v2968_v28 = vmul.f32 %v7706_v19, %v2904_v6  ;;  %2429 = vperm.xlu1 %4248, %v7707_v14   ;;  %4073 = vmatprep.subr.bf16.mxu1 %v4072_v2  ;;  %v2794_v52 = vsel %vm2764_vm7, %v7720_v30, %v7719_v17  ;;  %v7725_v5 = vld [vmem:[#allocation106_spill] sm:$0xff]  ;;  %v7726_v2 = vld [vmem:[#allocation132_spill] sm:$0xff]  ;;  %v7728_v44 = vld [vmem:[#allocation179_spill] sm:$0xff] }
 0x330   : > { %v2813_v3 = vsel %vm2764_vm7, %v7722_v12, %v7721_v34  ;;  %v2777_v37 = vsel %vm2764_vm7, %v7725_v5, %v7724_v63  ;;  %v7727_v55 = vld [vmem:[#allocation34_spill] sm:$0xff]  ;;  %v7743_v34 = vld [vmem:[#allocation156_spill] sm:$0xff]  ;;  %v7747_v63 = vld [vmem:[#allocation83_spill] sm:$0xff] }
 0x331   : > { %v4074_v36 = vpack.c.bf16 %v2968_v28, %v2967_v1  ;;  %v2618_v33 = vpop.permute.xlu0 %2617  ;;  %v2814_v6 = vsel %vm2764_vm7, %v7727_v55, %v7726_v2  ;;  %v2842_v19 = vsel %vm2829_vm2, %v2777_v37, %v7728_v44  ;;  %v7729_v28 = vld [vmem:[#allocation177_spill] sm:$0xff]  ;;  %v7744_v12 = vld [vmem:[#allocation84_spill] sm:$0xff]  ;;  %v7749_v55 = vld [vmem:[#allocation202_spill] sm:$0xff] }
 0x332   : > { %v2922_v54 = vsel %vm2894_vm15, %v2857_v51, %v2618_v33  ;;  %v2446_v35 = vpop.permute.xlu1 %2445  ;;  %v7731_v51 = vld [vmem:[#allocation105_spill] sm:$0xff]  ;;  %v2907_v33 = vsel %vm2894_vm15, %v2842_v19, %v6699_v23 }
 0x333   : > { %v2986_v20 = vmul.f32 %v7713_v16, %v2922_v54  ;;  %2433 = vperm.xlu1 %4248, %v6144_v61   ;;  %4075 = vmatpush3.bf16.msra.mxu1 %v4074_v36  ;;  %v2878_v26 = vsel %vm2829_vm2, %v2813_v3, %v2446_v35  ;;  %v2778_v36 = vsel %vm2764_vm7, %v7731_v51, %v7730_v57  ;;  %v7733_v54 = vld [vmem:[#allocation201_spill] sm:$0xff]  ;;  %v7734_v35 = vld [vmem:[#allocation200_spill] sm:$0xff]  ;;  %v7745_v3 = vld [vmem:[#allocation18_spill] sm:$0xff] }
 0x334   : > { %v2843_v53 = vsel %vm2829_vm2, %v2778_v36, %v7732_v13  ;;  %v2971_v22 = vmul.f32 %v2907_v33, %v7735_v47  ;;  %v7748_v5 = vld [vmem:[#allocation25_spill] sm:$0xff]  ;;  %v7753_v57 = vld [vmem:[#allocation183_spill] sm:$0xff]  ;;  %v7754_v36 = vld [vmem:[#allocation82_spill] sm:$0xff] }
 0x335   : > { %v2554_v60 = vpop.permute.xlu0 %2553  ;;  %v4076_v48 = vpack.c.bf16 %v2986_v20, %v6652_v29  ;;  %v2859_v29 = vsel %vm2829_vm2, %v2794_v52, %v6455_v45  ;;  %v2879_v45 = vsel %vm2829_vm2, %v2814_v6, %v6487_v39  ;;  %v7742_v52 = vld [vmem:[#allocation187_spill] sm:$0xff]  ;;  %v2797_v37 = vsel %vm2764_vm7, %v7748_v5, %v7747_v63  ;;  %v7750_v44 = vld [vmem:[#allocation137_spill] sm:$0xff]  ;;  %v7755_v33 = vld [vmem:[#allocation24_spill] sm:$0xff] }
 0x336   : > { %v2906_v42 = vsel %vm2894_vm15, %v2841_v38, %v2554_v60  ;;  %v7738_v38 = vld [vmem:[#allocation19_spill] sm:$0xff]  ;;  %v7776_v63 = vld [vmem:[#allocation189_spill] sm:$0xff] }
 0x337   : > { %v2970_v61 = vmul.f32 %v7718_v9, %v2906_v42  ;;  %4249 = vset.pattern.permute.xlu1 %v7565_v49  ;;  %v2702_v43 = vpop.permute.xlu1 %2701  ;;  %4077 = vmatprep.subr.bf16.mxu1 %v4076_v48 }
 0x338   : > { %2753 = vperm.xlu1 %4249, %v7723_v62   ;;  %v2943_v31 = vsel %vm2894_vm15, %v2878_v26, %v2702_v43  ;;  %v7741_v43 = vld [vmem:[#allocation107_spill] sm:$0xff]  ;;  %v2798_v62 = vsel %vm2764_vm7, %v7745_v3, %v7744_v12 }
 0x339   : > { %v4078_v21 = vpack.c.bf16 %v2970_v61, %v2969_v32  ;;  %v2626_v41 = vpop.permute.xlu0 %2625  ;;  %v3007_v39 = vmul.f32 %v2943_v31, %v7733_v54  ;;  %v7739_v32 = vld [vmem:[#allocation180_spill] sm:$0xff]  ;;  %v2863_v26 = vsel %vm2829_vm2, %v2798_v62, %v6475_v10  ;;  %v7758_v54 = vld [vmem:[#allocation205_spill] sm:$0xff] }
 0x33a   : > { %v2924_v1 = vsel %vm2894_vm15, %v2859_v29, %v2626_v41  ;;  %v7740_v61 = vld [vmem:[#allocation68_spill] sm:$0xff] }
 0x33b   : > { %v2988_v11 = vmul.f32 %v7729_v28, %v2924_v1  ;;  %v2706_v50 = vpop.permute.xlu1 %2705  ;;  %4079 = vmatpush3.bf16.msra.mxu1 %v4078_v21  ;;  %v2780_v17 = vsel %vm2764_vm7, %v7741_v43, %v7740_v61  ;;  %v7746_v21 = vld [vmem:[#allocation167_spill] sm:$0xff]  ;;  %v7751_v10 = vld [vmem:[#allocation40_spill] sm:$0xff]  ;;  %v7752_v28 = vld [vmem:[#allocation182_spill] sm:$0xff] }
 0x33c   : > { %v2944_v8 = vsel %vm2894_vm15, %v2879_v45, %v2706_v50  ;;  %2685 = vperm.xlu1 %4249, %v7707_v14   ;;  %v7737_v14 = vld [vmem:[#allocation85_spill] sm:$0xff]  ;;  %v2815_v19 = vsel %vm2764_vm7, %v7751_v10, %v7750_v44 }
 0x33d   : > { %v3008_v25 = vmul.f32 %v7734_v35, %v2944_v8  ;;  %v2562_v59 = vpop.permute.xlu0 %2561  ;;  %v4080_v16 = vpack.c.bf16 %v2988_v11, %v6689_v7  ;;  %v2796_v60 = vsel %vm2764_vm7, %v7738_v38, %v7737_v14  ;;  %v7757_v8 = vld [vmem:[#allocation39_spill] sm:$0xff]  ;;  %v7764_v14 = vld [vmem:[#allocation204_spill] sm:$0xff]  ;;  %v7770_v61 = vld [vmem:[#allocation29_spill] sm:$0xff] }
 0x33e   : > { %v2908_v20 = vsel %vm2894_vm15, %v2843_v53, %v2562_v59  ;;  %v2861_v48 = vsel %vm2829_vm2, %v2796_v60, %v6465_v4  ;;  %v7759_v35 = vld [vmem:[#allocation215_spill] sm:$0xff] }
 0x33f   : > { %v2972_v23 = vmul.f32 %v7736_v27, %v2908_v20  ;;  %v2642_v46 = vpop.permute.xlu1 %2641  ;;  %4081 = vmatprep.subr.bf16.mxu1 %v4080_v16  ;;  %v4088_v18 = vpack.c.bf16 %v3008_v25, %v3007_v39  ;;  %v7760_v27 = vld [vmem:[#allocation142_spill] sm:$0xff]  ;;  %v7765_v60 = vld [vmem:[#allocation203_spill] sm:$0xff] }
 0x340   : > { %4250 = vset.pattern.permute.xlu1 %v7593_v58  ;;  %v2845_v58 = vsel %vm2829_vm2, %v2780_v17, %v7742_v52  ;;  %v2928_v2 = vsel %vm2894_vm15, %v2863_v26, %v2642_v46  ;;  %v7773_v52 = vld [vmem:[#allocation208_spill] sm:$0xff] }
 0x341   : > { %v4082_v42 = vpack.c.bf16 %v2972_v23, %v2971_v22  ;;  %2501 = vperm.xlu1 %4250, %v6168_v0   ;;  %v2634_v7 = vpop.permute.xlu0 %2633  ;;  %4089 = vmatprep.subr.bf16.mxu0 %v4088_v18  ;;  %v2992_v11 = vmul.f32 %v7752_v28, %v2928_v2  ;;  %v7761_v23 = vmov 1.0   ;;  %v7790_v46 = vld [vmem:[#allocation188_spill] sm:$0xff] }
 0x342   : > { %v2926_v15 = vsel %vm2894_vm15, %v2861_v48, %v2634_v7 }
 0x343   : > { %v2990_v9 = vmul.f32 %v7739_v32, %v2926_v15  ;;  %4083 = vmatpush3.bf16.msra.mxu1 %v4082_v42  ;;  %v7766_v42 = vld [vmem:[#allocation186_spill] sm:$0xff]  ;;  %v7768_v15 = vld [vmem:[#allocation23_spill] sm:$0xff] }
 0x344   : > { %v2454_v30 = vpop.permute.xlu1 %2453 }
 0x345   : > { %2437 = vperm.xlu1 %4250, %v7743_v34   ;;  %v2570_v4 = vpop.permute.xlu0 %2569  ;;  %v4084_v0 = vpack.c.bf16 %v2990_v9, %v6725_v40  ;;  %v2862_v40 = vsel %vm2829_vm2, %v2797_v37, %v7749_v55  ;;  %v2880_v50 = vsel %vm2829_vm2, %v2815_v19, %v2454_v30  ;;  %v7769_v9 = vld [vmem:[#allocation87_spill] sm:$0xff]  ;;  %v7782_v19 = vld [vmem:[#allocation146_spill] sm:$0xff] }
 0x346   : > { %v2910_v29 = vsel %vm2894_vm15, %v2845_v58, %v2570_v4  ;;  %v2801_v43 = vsel %vm2764_vm7, %v7770_v61, %v7769_v9  ;;  %v7774_v4 = vld [vmem:[#allocation211_spill] sm:$0xff] }
 0x347   : > { %v2974_v41 = vmul.f32 %v7746_v21, %v2910_v29  ;;  %4085 = vmatprep.subr.bf16.mxu1 %v4084_v0  ;;  %v2866_v58 = vsel %vm2829_vm2, %v2801_v43, %v7773_v52  ;;  %v7775_v21 = vld [vmem:[#allocation185_spill] sm:$0xff] }
 0x349   : > { %v4086_v6 = vpack.c.bf16 %v2974_v41, %v6746_v24  ;;  %2441 = vperm.xlu1 %4250, %v6182_v56   ;;  %v2710_v31 = vpop.permute.xlu1 %2709  ;;  %v2638_v1 = vpop.permute.xlu0 %2637  ;;  %v2799_v24 = vsel %vm2764_vm7, %v7755_v33, %v7754_v36  ;;  %v7756_v56 = vld [vmem:[#allocation138_spill] sm:$0xff]  ;;  %v7785_v33 = vld [vmem:[#allocation207_spill] sm:$0xff] }
 0x34a   : > { %v2927_v45 = vsel %vm2894_vm15, %v2862_v40, %v2638_v1  ;;  %v2816_v13 = vsel %vm2764_vm7, %v7757_v8, %v7756_v56  ;;  %v2945_v53 = vsel %vm2894_vm15, %v2880_v50, %v2710_v31  ;;  %v2864_v39 = vsel %vm2829_vm2, %v2799_v24, %v7758_v54  ;;  %v7780_v31 = vld [vmem:[#allocation145_spill] sm:$0xff]  ;;  %v7784_v50 = vld [vmem:[#allocation218_spill] sm:$0xff] }
 0x34b   : > { %v2991_v51 = vmul.f32 %v2927_v45, %v7753_v57  ;;  %4087 = vmatpush3.bf16.msra.mxu1 %v4086_v6  ;;  %v2881_v25 = vsel %vm2829_vm2, %v2816_v13, %v7759_v35  ;;  %v3009_v38 = vmul.f32 %v2945_v53, %v7764_v14  ;;  %v7781_v1 = vld [vmem:[#allocation45_spill] sm:$0xff]  ;;  %v7783_v45 = vld [vmem:[#allocation38_spill] sm:$0xff]  ;;  %v7787_v13 = vld [vmem:[#allocation88_spill] sm:$0xff] }
 0x34c   : > { %4120 = vmatprep.subr.bf16.mxu1 %v4088_v18  ;;  %v2817_v44 = vsel %vm2764_vm7, %v7781_v1, %v7780_v31  ;;  %v2818_v28 = vsel %vm2764_vm7, %v7783_v45, %v7782_v19  ;;  %v7786_v56 = vld [vmem:[#allocation206_spill] sm:$0xff] }
 0x34d   : > { %v4090_v59 = vpack.c.bf16 %v2992_v11, %v2991_v51  ;;  %4252 = vset.pattern.permute.xlu1 %v7565_v49  ;;  %v2714_v16 = vpop.permute.xlu1 %2713  ;;  %v2646_v20 = vpop.permute.xlu0 %2645  ;;  %v7767_v49 = vld [vmem:[#allocation89_spill] sm:$0xff]  ;;  %v2883_v57 = vsel %vm2829_vm2, %v2818_v28, %v7784_v50  ;;  %v7788_v53 = vld [vmem:[#allocation22_spill] sm:$0xff] }
 0x34e   : > { %v2946_v47 = vsel %vm2894_vm15, %v2881_v25, %v2714_v16  ;;  %v2929_v22 = vsel %vm2894_vm15, %v2864_v39, %v2646_v20  ;;  %2761 = vperm.xlu1 %4252, %v7760_v27   ;;  %3613 = vmatmul.mubr.msk.f32.vlgmr.msra.gmra.mrb[16].mxu1 %vm1381_vm8, %v7761_v23  ;;  %v2800_v32 = vsel %vm2764_vm7, %v7768_v15, %v7767_v49  ;;  %v3736_v39 = vpop.f32.mrb[0].mxu1  ;;  %v7789_v35 = vld [vmem:[#allocation214_spill] sm:$0xff]  ;;  %vm1671_vm8 = vcmask 31744  }
 0x34f   : > { %v3010_v48 = vmul.f32 %v7765_v60, %v2946_v47  ;;  %v2993_v7 = vmul.f32 %v2929_v22, %v7766_v42  ;;  %4091 = vmatpush3.bf16.msra.mxu0 %v4090_v59  ;;  %4128 = vmatpush3.bf16.msra.mxu1 %v4090_v59  ;;  %v2865_v0 = vsel %vm2829_vm2, %v2800_v32, %v7774_v4  ;;  %v3737_v20 = vpop.f32.mrb[1].mxu1  ;;  %v1493_v4 = vld [vmem:[#allocation2] sm:$0xff]  ;;  %v7798_v50 = vld [vmem:[#allocation210_spill] sm:$0xff] }
 0x350   : > { %3614 = vmatprep.mubr.msk.f32.mxu1 %vm1386_vm9, %v7761_v23  ;;  %v2802_v54 = vsel %vm2764_vm7, %v7788_v53, %v7787_v13  ;;  %v3738_v22 = vadd.f32 %v3737_v20, %v3736_v39 }
 0x351   : > { %v2650_v12 = vpop.permute.xlu1 %2649  ;;  %v2654_v3 = vpop.permute.xlu0 %2653  ;;  %v4092_v62 = vpack.c.bf16 %v3010_v48, %v3009_v38  ;;  %v2867_v25 = vsel %vm2829_vm2, %v2802_v54, %v7789_v35  ;;  %v7802_v35 = vld [vmem:[#allocation190_spill] sm:$0xff] }
 0x352   : > { %v2930_v29 = vsel %vm2894_vm15, %v2865_v0, %v2650_v12  ;;  %v2931_v26 = vsel %vm2894_vm15, %v2866_v58, %v2654_v3  ;;  %2693 = vperm.xlu1 %4252, %v7743_v34   ;;  %3615 = vmatmul.mubr.msk.f32.gmra.mrb[18].mxu1 %vm1385_vm10, %v7761_v23  ;;  %v7778_v34 = vld [vmem:[#allocation155_spill] sm:$0xff]  ;;  %v7791_v12 = vld [vmem:[#allocation152_spill] sm:$0xff]  ;;  %vm7858_vm10 = vcmask 261120  }
 0x353   : > { %v2994_v41 = vmul.f32 %v7775_v21, %v2930_v29  ;;  %v2995_v5 = vmul.f32 %v2931_v26, %v7776_v63  ;;  %4093 = vmatprep.subr.bf16.mxu0 %v4092_v62  ;;  %4121 = vmatprep.subr.bf16.mxu1 %v4092_v62  ;;  %v3739_v27 = vpop.f32.mrb[2].mxu1  ;;  %v7792_v3 = vld [vmem:[#allocation44_spill] sm:$0xff] }
 0x354   : > { %3616 = vmatprep.mubr.msk.f32.mxu1 %vm1390_vm11, %v7761_v23  ;;  %v3740_v38 = vpop.f32.mrb[3].mxu1  ;;  %v2819_v62 = vsel %vm2764_vm7, %v7792_v3, %v7791_v12  ;;  %v7793_v63 = vld [vmem:[#allocation92_spill] sm:$0xff]  ;;  %vm7859_vm11 = vmmov %vm7858_vm10 }
 0x355   : > { %v4094_v2 = vpack.c.bf16 %v2994_v41, %v2993_v7  ;;  %v6936_v60 = vadd.f32 %v3740_v38, %v3739_v27  ;;  %v2726_v21 = vpop.permute.xlu0 %2725  ;;  %v7804_v27 = vld [vmem:[#allocation158_spill] sm:$0xff] }
 0x356   : > { %v2462_v55 = vpop.permute.xlu1 %2461  ;;  %3617 = vmatmul.mubr.msk.f32.gmra.mrb[20].mxu1 %vm1389_vm12, %v7761_v23  ;;  %vm7860_vm12 = vmmov %vm7858_vm10 }
 0x357   : > { %4095 = vmatpush3.bf16.msra.mxu0 %v4094_v2  ;;  %4129 = vmatpush3.bf16.msra.mxu1 %v4094_v2  ;;  %v2882_v10 = vsel %vm2829_vm2, %v2817_v44, %v2462_v55  ;;  %v7795_v55 = vld [vmem:[#allocation153_spill] sm:$0xff] }
 0x358   : > { %3618 = vmatprep.mubr.msk.f32.mxu1 %vm1394_vm13, %v7761_v23  ;;  %v7797_v44 = vld [vmem:[#allocation221_spill] sm:$0xff]  ;;  %vm7861_vm13 = vmmov %vm7858_vm10 }
 0x35a   : > { %3619 = vmatmul.mubr.msk.f32.gmra.mrb[22].mxu1 %vm1393_vm14, %v7761_v23 }
 0x35b   : > { %v2718_v40 = vpop.permute.xlu1 %2717  ;;  %3622 = vmatprep.mubr.msk.f32.mxu1 %vm1388_vm1, %v7761_v23  ;;  %v3742_v48 = vpop.f32.mrb[4].mxu1 }
 0x35c   : > { %v2947_v11 = vsel %vm2894_vm15, %v2882_v10, %v2718_v40  ;;  %v3743_v7 = vpop.f32.mrb[5].mxu1  ;;  %v7796_v40 = vld [vmem:[#allocation43_spill] sm:$0xff] }
 0x35d   : > { %v3011_v24 = vmul.f32 %v2947_v11, %v7785_v33  ;;  %v6938_v15 = vadd.f32 %v3743_v7, %v3742_v48  ;;  %v2820_v31 = vsel %vm2764_vm7, %v7796_v40, %v7795_v55  ;;  %v2666_v11 = vpop.permute.xlu0 %2665  ;;  %v7800_v33 = vld [vmem:[#allocation86_spill] sm:$0xff]  ;;  %v7806_v7 = vld [vmem:[#allocation120_spill] sm:$0xff] }
 0x35e   : > { %v2885_v10 = vsel %vm2829_vm2, %v2820_v31, %v7797_v44 }
 0x35f   : > { %v2722_v51 = vpop.permute.xlu1 %2721 }
 0x360   : > { %v2948_v36 = vsel %vm2894_vm15, %v2883_v57, %v2722_v51  ;;  %v7799_v51 = vld [vmem:[#allocation209_spill] sm:$0xff] }
 0x361   : > { %v3012_v8 = vmul.f32 %v7786_v56, %v2948_v36  ;;  %v2734_v48 = vpop.permute.xlu0 %2733 }
 0x363   : > { %v2658_v59 = vpop.permute.xlu1 %2657  ;;  %v4096_v16 = vpack.c.bf16 %v3012_v8, %v3011_v24  ;;  %v3745_v32 = vpop.f32.mrb[6].mxu1  ;;  %v7801_v24 = vld [vmem:[#allocation28_spill] sm:$0xff] }
 0x364   : > { %v2932_v47 = vsel %vm2894_vm15, %v2867_v25, %v2658_v59  ;;  %v3746_v9 = vpop.f32.mrb[7].mxu1  ;;  %v2803_v56 = vsel %vm2764_vm7, %v7801_v24, %v7800_v33  ;;  %v7803_v59 = vld [vmem:[#allocation191_spill] sm:$0xff]  ;;  %v1494_v24 = vld [vmem:[#allocation2 + $0x8] sm:$0xff] }
 0x365   : > { %v2996_v14 = vmul.f32 %v7790_v46, %v2932_v47  ;;  %4097 = vmatprep.subr.bf16.mxu0 %v4096_v16  ;;  %4122 = vmatprep.subr.bf16.mxu1 %v4096_v16  ;;  %v6940_v61 = vadd.f32 %v3746_v9, %v3745_v32  ;;  %v7805_v46 = vld [vmem:[#allocation49_spill] sm:$0xff]  ;;  %v7808_v9 = vld [vmem:[#allocation159_spill] sm:$0xff] }
 0x367   : > { %v4098_v42 = vpack.c.bf16 %v2996_v14, %v2995_v5  ;;  %v3780_v43 = vpop.f32.mrb[8].mxu1  ;;  %v7794_v5 = vld [vmem:[#allocation27_spill] sm:$0xff]  ;;  %v2821_v14 = vsel %vm2764_vm7, %v7805_v46, %v7804_v27 }
 0x368   : > { %v2470_v49 = vpop.permute.xlu1 %2469  ;;  %v3781_v17 = vpop.f32.mrb[9].mxu1  ;;  %v2804_v2 = vsel %vm2764_vm7, %v7794_v5, %v7793_v63  ;;  %v7813_v63 = vld [vmem:[#allocation90_spill] sm:$0xff]  ;;  %v7814_v5 = vld [vmem:[#allocation33_spill] sm:$0xff]  ;;  %v7819_v46 = vld [vmem:[#allocation123_spill] sm:$0xff] }
 0x369   : > { %4099 = vmatpush3.bf16.msra.mxu0 %v4098_v42  ;;  %4130 = vmatpush3.bf16.msra.mxu1 %v4098_v42  ;;  %v3782_v58 = vadd.f32 %v3781_v17, %v3780_v43  ;;  %v2884_v41 = vsel %vm2829_vm2, %v2819_v62, %v2470_v49  ;;  %v7807_v49 = vld [vmem:[#allocation26_spill] sm:$0xff]  ;;  %v2674_v62 = vpop.permute.xlu0 %2673 }
 0x36a   : > { %v2949_v1 = vsel %vm2894_vm15, %v2884_v41, %v2726_v21  ;;  %v2806_v32 = vsel %vm2764_vm7, %v7807_v49, %v7806_v7  ;;  %v7809_v43 = vld [vmem:[#allocation42_spill] sm:$0xff]  ;;  %v7812_v21 = vld [vmem:[#allocation212_spill] sm:$0xff] }
 0x36b   : > { %v1649_v0 = vadd.f32 %v3782_v58, %v3738_v22  ;;  %v3013_v57 = vmul.f32 %v2949_v1, %v7798_v50  ;;  %v2822_v17 = vsel %vm2764_vm7, %v7809_v43, %v7808_v9  ;;  %v7810_v58 = vld [vmem:[#allocation224_spill] sm:$0xff]  ;;  %v7823_v9 = vld [vmem:[#allocation225_spill] sm:$0xff] }
 0x36c   : > { %v2406_v52 = vpop.permute.xlu1 %2405 }
 0x36d   : > { %v1667_v26 = vadd.f32 %v1649_v0, %v1493_v4  ;;  %v2868_v13 = vsel %vm2829_vm2, %v2803_v56, %v2406_v52  ;;  %v2887_v4 = vsel %vm2829_vm2, %v2822_v17, %v7810_v58 }
 0x36f   : > { %1672 = vst.msk [vmem:[#allocation2] sm:$0xff] %vm1671_vm8, %v1667_v26 }
 0x370   : > { %v2410_v29 = vpop.permute.xlu1 %2409 }
 0x371   : > { %v2869_v19 = vsel %vm2829_vm2, %v2804_v2, %v2410_v29  ;;  %v7811_v29 = vld [vmem:[#allocation213_spill] sm:$0xff]  ;;  %v2805_v2 = vsel %vm2764_vm7, %v7814_v5, %v7813_v63 }
 0x372   : > { %v2934_v8 = vsel %vm2894_vm15, %v2869_v19, %v2666_v11 }
 0x373   : > { %v2998_v25 = vmul.f32 %v7802_v35, %v2934_v8 }
 0x375   : > { %v2730_v45 = vpop.permute.xlu1 %2729 }
 0x376   : > { %v2950_v28 = vsel %vm2894_vm15, %v2885_v10, %v2730_v45  ;;  %v7815_v10 = vld [vmem:[#allocation192_spill] sm:$0xff]  ;;  %v7816_v45 = vld [vmem:[#allocation193_spill] sm:$0xff] }
 0x377   : > { %v3014_v36 = vmul.f32 %v7799_v51, %v2950_v28 }
 0x379   : > { %v2662_v53 = vpop.permute.xlu1 %2661  ;;  %v4100_v54 = vpack.c.bf16 %v3014_v36, %v3013_v57  ;;  %v3783_v57 = vpop.f32.mrb[10].mxu1 }
 0x37a   : > { %v2933_v39 = vsel %vm2894_vm15, %v2868_v13, %v2662_v53  ;;  %v3784_v51 = vpop.f32.mrb[11].mxu1  ;;  %v7817_v53 = vld [vmem:[#allocation164_spill] sm:$0xff] }
 0x37b   : > { %v2997_v16 = vmul.f32 %v2933_v39, %v7803_v59  ;;  %4101 = vmatprep.subr.bf16.mxu0 %v4100_v54  ;;  %4123 = vmatprep.subr.bf16.mxu1 %v4100_v54  ;;  %v3785_v33 = vadd.f32 %v3784_v51, %v3783_v57  ;;  %v3786_v8 = vpop.f32.mrb[12].mxu1  ;;  %v7818_v54 = vld [vmem:[#allocation48_spill] sm:$0xff]  ;;  %v7831_v57 = vld [vmem:[#allocation53_spill] sm:$0xff] }
 0x37c   : > { %v3787_v13 = vpop.f32.mrb[13].mxu1  ;;  %v2823_v39 = vsel %vm2764_vm7, %v7818_v54, %v7817_v53  ;;  %v7834_v53 = vld [vmem:[#allocation169_spill] sm:$0xff]  ;;  %v7835_v54 = vld [vmem:[#allocation46_spill] sm:$0xff] }
 0x37d   : > { %v4102_v20 = vpack.c.bf16 %v2998_v25, %v2997_v16  ;;  %v1654_v56 = vadd.f32 %v3785_v33, %v6936_v60  ;;  %v3788_v59 = vadd.f32 %v3787_v13, %v3786_v8  ;;  %v2742_v16 = vpop.permute.xlu0 %2741  ;;  %v3789_v27 = vpop.f32.mrb[14].mxu1  ;;  %v7820_v60 = vld [vmem:[#allocation31_spill] sm:$0xff]  ;;  %v7833_v8 = vld [vmem:[#allocation30_spill] sm:$0xff] }
 0x37e   : > { %v2478_v47 = vpop.permute.xlu1 %2477 }
 0x37f   : > { %4103 = vmatpush3.bf16.msra.mxu0 %v4102_v20  ;;  %4131 = vmatpush3.bf16.msra.mxu1 %v4102_v20  ;;  %v2886_v42 = vsel %vm2829_vm2, %v2821_v14, %v2478_v47  ;;  %v1668_v25 = vadd.f32 %v1654_v56, %v1494_v24  ;;  %v1495_v47 = vld [vmem:[#allocation2 + $0x10] sm:$0xff]  ;;  %v2808_v14 = vsel %vm2764_vm7, %v7820_v60, %v7819_v46  ;;  %v7832_v56 = vld [vmem:[#allocation125_spill] sm:$0xff]  ;;  %v7838_v60 = vld [vmem:[#allocation219_spill] sm:$0xff] }
 0x380   : > { %v2951_v52 = vsel %vm2894_vm15, %v2886_v42, %v2734_v48  ;;  %v7822_v48 = vld [vmem:[#allocation47_spill] sm:$0xff]  ;;  %v2810_v13 = vsel %vm2764_vm7, %v7833_v8, %v7832_v56 }
 0x381   : > { %v3015_v26 = vmul.f32 %v2951_v52, %v7811_v29  ;;  %1673 = vst.msk [vmem:[#allocation2 + $0x8] sm:$0xff] %vm1671_vm8, %v1668_v25  ;;  %v7836_v25 = vld [vmem:[#allocation226_spill] sm:$0xff] }
 0x382   : > { %v2414_v22 = vpop.permute.xlu1 %2413 }
 0x383   : > { %v2870_v40 = vsel %vm2829_vm2, %v2805_v2, %v2414_v22  ;;  %v1659_v22 = vadd.f32 %v3788_v59, %v6938_v15 }
 0x385   : > { %v1669_v49 = vadd.f32 %v1659_v22, %v1495_v47 }
 0x386   : > { %v2418_v38 = vpop.permute.xlu1 %2417 }
 0x387   : > { %v2871_v0 = vsel %vm2829_vm2, %v2806_v32, %v2418_v38  ;;  %v7821_v38 = vld [vmem:[#allocation165_spill] sm:$0xff]  ;;  %v3790_v32 = vpop.f32.mrb[15].mxu1  ;;  %1674 = vst.msk [vmem:[#allocation2 + $0x10] sm:$0xff] %vm1671_vm8, %v1669_v49 }
 0x388   : > { %v2936_v55 = vsel %vm2894_vm15, %v2871_v0, %v2674_v62  ;;  %v2824_v42 = vsel %vm2764_vm7, %v7822_v48, %v7821_v38  ;;  %v3791_v15 = vadd.f32 %v3790_v32, %v3789_v27  ;;  %v2682_v0 = vpop.permute.xlu0 %2681  ;;  %v7825_v62 = vld [vmem:[#allocation216_spill] sm:$0xff]  ;;  %v7840_v48 = vld [vmem:[#allocation37_spill] sm:$0xff] }
 0x389   : > { %v3000_v19 = vmul.f32 %v7815_v10, %v2936_v55  ;;  %v2889_v43 = vsel %vm2829_vm2, %v2824_v42, %v7823_v9  ;;  %v7837_v27 = vld [vmem:[#allocation220_spill] sm:$0xff] }
 0x38a   : > { %v7839_v38 = vld [vmem:[#allocation124_spill] sm:$0xff] }
 0x38b   : > { %v2738_v12 = vpop.permute.xlu1 %2737  ;;  %v2809_v42 = vsel %vm2764_vm7, %v7840_v48, %v7839_v38 }
 0x38c   : > { %v2952_v3 = vsel %vm2894_vm15, %v2887_v4, %v2738_v12  ;;  %v1496_v4 = vld [vmem:[#allocation2 + $0x18] sm:$0xff]  ;;  %v7824_v12 = vld [vmem:[#allocation217_spill] sm:$0xff]  ;;  %v2750_v33 = vpop.permute.xlu0 %2749 }
 0x38d   : > { %v3016_v41 = vmul.f32 %v7812_v21, %v2952_v3  ;;  %v7826_v21 = vld [vmem:[#allocation122_spill] sm:$0xff] }
 0x38f   : > { %v2670_v31 = vpop.permute.xlu1 %2669  ;;  %v4104_v1 = vpack.c.bf16 %v3016_v41, %v3015_v26  ;;  %v1664_v26 = vadd.f32 %v3791_v15, %v6940_v61  ;;  %v7827_v41 = vld [vmem:[#allocation32_spill] sm:$0xff]  ;;  %v7842_v15 = vld [vmem:[#allocation197_spill] sm:$0xff] }
 0x390   : > { %v2935_v44 = vsel %vm2894_vm15, %v2870_v40, %v2670_v31  ;;  %v2807_v63 = vsel %vm2764_vm7, %v7827_v41, %v7826_v21  ;;  %v2690_v22 = vpop.permute.xlu0 %2689 }
 0x391   : > { %v2999_v28 = vmul.f32 %v2935_v44, %v7816_v45  ;;  %4105 = vmatprep.subr.bf16.mxu0 %v4104_v1  ;;  %4124 = vmatprep.subr.bf16.mxu1 %v4104_v1  ;;  %v1670_v31 = vadd.f32 %v1664_v26, %v1496_v4  ;;  %v7828_v44 = vld [vmem:[#allocation194_spill] sm:$0xff] }
 0x393   : > { %v4106_v11 = vpack.c.bf16 %v3000_v19, %v2999_v28  ;;  %v7829_v19 = vld [vmem:[#allocation195_spill] sm:$0xff]  ;;  %1675 = vst.msk [vmem:[#allocation2 + $0x18] sm:$0xff] %vm1671_vm8, %v1670_v31 }
 0x394   : > { %v2486_v50 = vpop.permute.xlu1 %2485  ;;  %v2758_v21 = vpop.permute.xlu0 %2757 }
 0x395   : > { %4107 = vmatpush3.bf16.msra.mxu0 %v4106_v11  ;;  %4132 = vmatpush3.bf16.msra.mxu1 %v4106_v11  ;;  %v2888_v20 = vsel %vm2829_vm2, %v2823_v39, %v2486_v50  ;;  %v7830_v50 = vld [vmem:[#allocation168_spill] sm:$0xff]  ;;  %v2826_v39 = vsel %vm2764_vm7, %v7835_v54, %v7834_v53 }
 0x396   : > { %v2953_v7 = vsel %vm2894_vm15, %v2888_v20, %v2742_v16  ;;  %v2825_v51 = vsel %vm2764_vm7, %v7831_v57, %v7830_v50  ;;  %v2891_v59 = vsel %vm2829_vm2, %v2826_v39, %v7836_v25  ;;  %v7851_v57 = vld [vmem:[#allocation222_spill] sm:$0xff]  ;;  %v7855_v25 = vld [vmem:[#allocation199_spill] sm:$0xff] }
 0x397   : > { %v3017_v3 = vmul.f32 %v2953_v7, %v7824_v12  ;;  %v7854_v39 = vld [vmem:[#allocation198_spill] sm:$0xff] }
 0x398   : > { %v2422_v36 = vpop.permute.xlu1 %2421 }
 0x399   : > { %v2872_v2 = vsel %vm2829_vm2, %v2807_v63, %v2422_v36  ;;  %v7845_v63 = vld [vmem:[#allocation128_spill] sm:$0xff] }
 0x39c   : > { %v2426_v35 = vpop.permute.xlu1 %2425 }
 0x39d   : > { %v2873_v17 = vsel %vm2829_vm2, %v2808_v14, %v2426_v35 }
 0x39e   : > { %v2938_v5 = vsel %vm2894_vm15, %v2873_v17, %v2682_v0  ;;  %v7841_v17 = vld [vmem:[#allocation196_spill] sm:$0xff] }
 0x39f   : > { %v3002_v10 = vmul.f32 %v7828_v44, %v2938_v5  ;;  %v7846_v5 = vld [vmem:[#allocation35_spill] sm:$0xff] }
 0x3a0   : > { %v7849_v44 = vld [vmem:[#allocation135_spill] sm:$0xff] }
 0x3a1   : > { %v2746_v52 = vpop.permute.xlu1 %2745 }
 0x3a2   : > { %v2954_v58 = vsel %vm2894_vm15, %v2889_v43, %v2746_v52 }
 0x3a3   : > { %v3018_v29 = vmul.f32 %v7825_v62, %v2954_v58  ;;  %v7844_v62 = vld [vmem:[#allocation52_spill] sm:$0xff] }
 0x3a5   : > { %v2678_v55 = vpop.permute.xlu1 %2677  ;;  %v4108_v40 = vpack.c.bf16 %v3018_v29, %v3017_v3  ;;  %v7843_v3 = vld [vmem:[#allocation171_spill] sm:$0xff] }
 0x3a6   : > { %v2937_v1 = vsel %vm2894_vm15, %v2872_v2, %v2678_v55  ;;  %v2827_v29 = vsel %vm2764_vm7, %v7844_v62, %v7843_v3  ;;  %v2812_v2 = vsel %vm2764_vm7, %v7846_v5, %v7845_v63  ;;  %v7847_v55 = vld [vmem:[#allocation172_spill] sm:$0xff]  ;;  %v3025_v3 = vld [vmem:[#allocation11 + $0x10] sm:$0xff] }
 0x3a7   : > { %v3001_v45 = vmul.f32 %v2937_v1, %v7829_v19  ;;  %4109 = vmatprep.subr.bf16.mxu0 %v4108_v40  ;;  %4125 = vmatprep.subr.bf16.mxu1 %v4108_v40  ;;  %v7848_v40 = vld [vmem:[#allocation51_spill] sm:$0xff]  ;;  %v3026_v63 = vld [vmem:[#allocation11 + $0x18] sm:$0xff] }
 0x3a8   : > { %v2828_v31 = vsel %vm2764_vm7, %v7848_v40, %v7847_v55  ;;  %v3211_v55 = vld [vmem:[#allocation2 + $0x10] sm:$0xff] (!%p3628_p0)  ;;  %v3209_v40 = vld [vmem:[#allocation2] sm:$0xff] (!%p3628_p0) }
 0x3a9   : > { %v4110_v61 = vpack.c.bf16 %v3002_v10, %v3001_v45  ;;  %v2893_v10 = vsel %vm2829_vm2, %v2828_v31, %v7849_v44  ;;  %v3212_v31 = vld [vmem:[#allocation2 + $0x18] sm:$0xff] (!%p3628_p0)  ;;  %vm3215_vm14 = vcmp.gt.f32.partialorder (!%p3628_p0), %v3211_v55, 0.0  ;;  %v3210_v44 = vld [vmem:[#allocation2 + $0x8] sm:$0xff] (!%p3628_p0) }
 0x3aa   : > { %v2494_v28 = vpop.permute.xlu1 %2493  ;;  %vm3216_vm1 = vcmp.gt.f32.partialorder (!%p3628_p0), %v3212_v31, 0.0 }
 0x3ab   : > { %4111 = vmatpush3.bf16.msra.mxu0 %v4110_v61  ;;  %4133 = vmatpush3.bf16.msra.mxu1 %v4110_v61  ;;  %v2890_v24 = vsel %vm2829_vm2, %v2825_v51, %v2494_v28  ;;  %v2698_v28 = vpop.permute.xlu0 %2697 }
 0x3ac   : > { %v2955_v35 = vsel %vm2894_vm15, %v2890_v24, %v2750_v33  ;;  %v7853_v33 = vld [vmem:[#allocation36_spill] sm:$0xff] }
 0x3ad   : > { %v3019_v46 = vmul.f32 %v2955_v35, %v7837_v27 }
 0x3ae   : > { %v2430_v11 = vpop.permute.xlu1 %2429 }
 0x3af   : > { %v2874_v49 = vsel %vm2829_vm2, %v2809_v42, %v2430_v11  ;;  %v7850_v11 = vld [vmem:[#allocation223_spill] sm:$0xff] }
 0x3b2   : > { %v2434_v36 = vpop.permute.xlu1 %2433 }
 0x3b3   : > { %v2875_v16 = vsel %vm2829_vm2, %v2810_v13, %v2434_v36  ;;  %v7852_v36 = vld [vmem:[#allocation127_spill] sm:$0xff] }
 0x3b4   : > { %v2940_v7 = vsel %vm2894_vm15, %v2875_v16, %v2690_v22  ;;  %v2811_v24 = vsel %vm2764_vm7, %v7853_v33, %v7852_v36  ;;  %v4541_v36 = vmov (!%p3628_p0), 2   ;;  %v4542_v33 = vmov (!%p3628_p0), 3  }
 0x3b5   : > { %v3004_v52 = vmul.f32 %v7841_v17, %v2940_v7 }
 0x3b7   : > { %v2754_v20 = vpop.permute.xlu1 %2753 }
 0x3b8   : > { %v2956_v47 = vsel %vm2894_vm15, %v2891_v59, %v2754_v20  ;;  %v7856_v20 = vld [vmem:[#allocation162_spill] sm:$0xff] }
 0x3b9   : > { %v3020_v14 = vmul.f32 %v7838_v60, %v2956_v47  ;;  %vm7857_vm9 = vcmp.eq.s32.totalorder %v7856_v20, %v7778_v34  ;;  %v3023_v34 = vld [vmem:[#allocation11] sm:$0xff] }
 0x3bb   : > { %v2686_v32 = vpop.permute.xlu1 %2685  ;;  %v4112_v9 = vpack.c.bf16 %v3020_v14, %v3019_v46 }
 0x3bc   : > { %v2939_v43 = vsel %vm2894_vm15, %v2874_v49, %v2686_v32 }
 0x3bd   : > { %v3003_v58 = vmul.f32 %v2939_v43, %v7842_v15  ;;  %4113 = vmatprep.subr.bf16.mxu0 %v4112_v9  ;;  %4126 = vmatprep.subr.bf16.mxu1 %v4112_v9 }
 0x3bf   : > { %v4114_v4 = vpack.c.bf16 %v3004_v52, %v3003_v58 }
 0x3c0   : > { %v2502_v0 = vpop.permute.xlu1 %2501 }
 0x3c1   : > { %4115 = vmatpush3.bf16.msra.mxu0 %v4114_v4  ;;  %4134 = vmatpush3.bf16.msra.mxu1 %v4114_v4  ;;  %v2892_v41 = vsel %vm2829_vm2, %v2827_v29, %v2502_v0 }
 0x3c2   : > { %v2957_v1 = vsel %vm2894_vm15, %v2892_v41, %v2758_v21 }
 0x3c3   : > { %v3021_v50 = vmul.f32 %v2957_v1, %v7850_v11  ;;  %v4539_v1 = vmov (!%p3628_p0), 0  }
 0x3c4   : > { %v2438_v12 = vpop.permute.xlu1 %2437  ;;  %4318 = vset.pattern.permute.xlu1 (!%p3628_p0), %v4539_v1  ;;  %4317 = vset.pattern.permute.xlu0 (!%p3628_p0), %v4539_v1 }
 0x3c5   : > { %v2876_v8 = vsel %vm2829_vm2, %v2811_v24, %v2438_v12 }
 0x3c8   : > { %v2442_v26 = vpop.permute.xlu1 %2441 }
 0x3c9   : > { %v2877_v19 = vsel %vm2829_vm2, %v2812_v2, %v2442_v26 }
 0x3ca   : > { %v2942_v56 = vsel %vm2894_vm15, %v2877_v19, %v2698_v28 }
 0x3cb   : > { %v3006_v35 = vmul.f32 %v7854_v39, %v2942_v56 }
 0x3cd   : > { %v2762_v45 = vpop.permute.xlu1 %2761 }
 0x3ce   : > { %v2958_v61 = vsel %vm2894_vm15, %v2893_v10, %v2762_v45  ;;  %v3219_v10 = vsel (!%p3628_p0), %vm3215_vm14, %v3211_v55, 1.0  ;;  %v3220_v45 = vsel (!%p3628_p0), %vm3216_vm1, %v3212_v31, 1.0 }
 0x3cf   : > { %v3022_v51 = vmul.f32 %v7851_v57, %v2958_v61  ;;  %4325 = vrcp.f32 (!%p3628_p0), %v3219_v10 }
 0x3d1   : > { %v2694_v13 = vpop.permute.xlu1 %2693  ;;  %v4116_v53 = vpack.c.bf16 %v3022_v51, %v3021_v50  ;;  %v4540_v51 = vmov (!%p3628_p0), 1  }
 0x3d2   : > { %v2941_v54 = vsel %vm2894_vm15, %v2876_v8, %v2694_v13 }
 0x3d3   : > { %v3005_v59 = vmul.f32 %v2941_v54, %v7855_v25  ;;  %4117 = vmatprep.subr.bf16.mxu0 %v4116_v53  ;;  %4127 = vmatprep.subr.bf16.mxu1 %v4116_v53 }
 0x3d5   : > { %v4118_v16 = vpack.c.bf16 %v3006_v35, %v3005_v59 }
 0x3d7   : > { %4119 = vmatpush3.bf16.msra.mxu0 %v4118_v16  ;;  %4135 = vmatpush3.bf16.msra.mxu1 %v4118_v16 }
 0x3d9   : > { %v4326_v28 = vpop.eup (!%p3628_p0), %4325 }
 0x3da   : > { %3621 = vmatmul.mubr.msk.f32.vlgmr.msra.gmra.mrb[64].mxu0 %vm1383_vm0, %v7761_v23  ;;  %3623 = vmatmul.mubr.msk.f32.vlgmr.msra.gmra.mrb[24].mxu1 %vm1387_vm3, %v7761_v23  ;;  %vm3213_vm0 = vcmp.gt.f32.partialorder (!%p3628_p0), %v3209_v40, 0.0  ;;  %vm3214_vm3 = vcmp.gt.f32.partialorder (!%p3628_p0), %v3210_v44, 0.0 }
 0x3db   : > { %3624 = vmatprep.mubr.msk.f32.mxu1 %vm1392_vm4, %v7761_v23  ;;  %v3217_v19 = vsel (!%p3628_p0), %vm3213_vm0, %v3209_v40, 1.0  ;;  %v3218_v61 = vsel (!%p3628_p0), %vm3214_vm3, %v3210_v44, 1.0  ;;  %3241 = vperm.xlu1 (!%p3628_p0), %4318, %v4326_v28   ;;  %vm7862_vm4 = vcmask (!%p3628_p0), 261120  }
 0x3dc   : > { %4327 = vrcp.f32 (!%p3628_p0), %v3217_v19  ;;  %vm7865_vm8 = vmmov (!%p3628_p0), %vm7862_vm4 }
 0x3dd   : > { %4329 = vrcp.f32 (!%p3628_p0), %v3220_v45 }
 0x3de   : > { %3625 = vmatmul.mubr.msk.f32.gmra.mrb[26].mxu1 %vm1391_vm5, %v7761_v23  ;;  %4331 = vrcp.f32 (!%p3628_p0), %v3218_v61  ;;  %vm7863_vm5 = vmmov (!%p3628_p0), %vm7862_vm4 }
 0x3df   : > { %3626 = vmatprep.mubr.msk.f32.mxu1 %vm1396_vm6, %v7761_v23  ;;  %vm7864_vm6 = vmmov (!%p3628_p0), %vm7862_vm4 }
 0x3e2   : > { %3627 = vmatmul.mubr.msk.f32.gmra.mrb[28].mxu1 %vm7857_vm9, %v7761_v23  ;;  %v3024_v23 = vld [vmem:[#allocation11 + $0x8] sm:$0xff] }
 0x3e6   : > { %v4328_v11 = vpop.eup (!%p3628_p0), %4327 }
 0x3e7   : > { %v4330_v50 = vpop.eup (!%p3628_p0), %4329  ;;  %3231 = vperm.xlu0 (!%p3628_p0), %4317, %v4328_v11  }
 0x3e8   : > { %v4332_v57 = vpop.eup (!%p3628_p0), %4331  ;;  %3246 = vperm.xlu1 (!%p3628_p0), %4318, %v4330_v50  }
 0x3eb   : > { %3236 = vperm.xlu0 (!%p3628_p0), %4317, %v4332_v57  }
 0x3ec   : > { %4320 = vset.pattern.permute.xlu1 (!%p3628_p0), %v4540_v51 }
 0x3ed   : > { %3254 = vperm.xlu1 (!%p3628_p0), %4320, %v4332_v57  }
 0x3ef   : > { %4319 = vset.pattern.permute.xlu0 (!%p3628_p0), %v4540_v51 }
 0x3f0   : > { %3250 = vperm.xlu0 (!%p3628_p0), %4319, %v4328_v11  }
 0x3f1   : > { %3258 = vperm.xlu1 (!%p3628_p0), %4320, %v4326_v28  }
 0x3f4   : > { %3262 = vperm.xlu0 (!%p3628_p0), %4319, %v4330_v50  }
 0x3f5   : > { %4321 = vset.pattern.permute.xlu1 (!%p3628_p0), %v4541_v36 }
 0x3f6   : > { %3266 = vperm.xlu1 (!%p3628_p0), %4321, %v4328_v11  }
 0x3f8   : > { %4322 = vset.pattern.permute.xlu0 (!%p3628_p0), %v4541_v36 }
 0x3f9   : > { %3270 = vperm.xlu0 (!%p3628_p0), %4322, %v4332_v57  }
 0x3fa   : > { %3274 = vperm.xlu1 (!%p3628_p0), %4321, %v4326_v28  }
 0x3fd   : > { %4323 = vset.pattern.permute.xlu0 (!%p3628_p0), %v4542_v33 }
 0x3fe   : > { %3282 = vperm.xlu0 (!%p3628_p0), %4323, %v4328_v11   ;;  %3278 = vperm.xlu1 (!%p3628_p0), %4321, %v4330_v50  }
 0x402   : > { %3294 = vperm.xlu0 (!%p3628_p0), %4323, %v4330_v50   ;;  %4324 = vset.pattern.permute.xlu1 (!%p3628_p0), %v4542_v33 }
 0x403   : > { %3286 = vperm.xlu1 (!%p3628_p0), %4324, %v4332_v57  }
 0x407   : > { %3290 = vperm.xlu1 (!%p3628_p0), %4324, %v4326_v28  }
 0x421   : > { %v3824_v18 = vpop.f32.mrb[16].mxu1 }
 0x422   : > { %v3825_v30 = vpop.f32.mrb[17].mxu1 }
 0x423   : > { %v3826_v47 = vadd.f32 %v3825_v30, %v3824_v18 }
 0x425   : > { %v3827_v22 = vpop.f32.mrb[18].mxu1 }
 0x426   : > { %v3828_v27 = vpop.f32.mrb[19].mxu1 }
 0x427   : > { %v3829_v46 = vadd.f32 %v3828_v27, %v3827_v22 }
 0x429   : > { %v3830_v60 = vpop.f32.mrb[20].mxu1 }
 0x42a   : > { %v3831_v14 = vpop.f32.mrb[21].mxu1 }
 0x42b   : > { %v3832_v37 = vadd.f32 %v3831_v14, %v3830_v60 }
 0x42d   : > { %v3833_v38 = vpop.f32.mrb[22].mxu1 }
 0x42e   : > { %v3834_v48 = vpop.f32.mrb[23].mxu1 }
 0x42f   : > { %v3835_v42 = vadd.f32 %v3834_v48, %v3833_v38 }
 0x45a   : > { %v3242_v24 = vpop.permute.xlu1 (!%p3628_p0), %3241 }
 0x466   : > { %v3232_v56 = vpop.permute.xlu0 (!%p3628_p0), %3231 }
 0x467   : > { %v3247_v8 = vpop.permute.xlu1 (!%p3628_p0), %3246 }
 0x46a   : > { %v3237_v13 = vpop.permute.xlu0 (!%p3628_p0), %3236 }
 0x46c   : > { %v3255_v53 = vpop.permute.xlu1 (!%p3628_p0), %3254 }
 0x46f   : > { %v3251_v54 = vpop.permute.xlu0 (!%p3628_p0), %3250 }
 0x470   : > { %v3259_v39 = vpop.permute.xlu1 (!%p3628_p0), %3258  ;;  %v3297_v20 = vsel (!%p3628_p0), %vm2764_vm7, %v3232_v56, %v3251_v54 }
 0x473   : > { %v3263_v35 = vpop.permute.xlu0 (!%p3628_p0), %3262 }
 0x474   : > { %v3300_v27 = vsel (!%p3628_p0), %vm2764_vm7, %v3247_v8, %v3263_v35 }
 0x475   : > { %v3267_v25 = vpop.permute.xlu1 (!%p3628_p0), %3266 }
 0x476   : > { %v3301_v30 = vsel (!%p3628_p0), %vm2829_vm2, %v3297_v20, %v3267_v25 }
 0x478   : > { %v3271_v59 = vpop.permute.xlu0 (!%p3628_p0), %3270 }
 0x479   : > { %v3275_v16 = vpop.permute.xlu1 (!%p3628_p0), %3274 }
 0x47d   : > { %v3279_v60 = vpop.permute.xlu1 (!%p3628_p0), %3278 }
 0x47e   : > { %v3304_v14 = vsel (!%p3628_p0), %vm2829_vm2, %v3300_v27, %v3279_v60 }
 0x4ad   : > { %v3868_v7 = vpop.f32.mrb[64].mxu0  ;;  %v3871_v6 = vpop.f32.mrb[24].mxu1 }
 0x4ae   : > { %v3869_v49 = vpop.f32.mrb[65].mxu0  ;;  %v3872_v32 = vpop.f32.mrb[25].mxu1 }
 0x4af   : > { %v3870_v9 = vadd.f32 %v3869_v49, %v3868_v7  ;;  %v3873_v43 = vadd.f32 %v3872_v32, %v3871_v6  ;;  %v3287_v32 = vpop.permute.xlu1 (!%p3628_p0), %3286 }
 0x4b1   : > { %v3179_v17 = vadd.f32 %v3870_v9, %v3826_v47  ;;  %v3184_v52 = vadd.f32 %v3873_v43, %v3829_v46  ;;  %v3874_v15 = vpop.f32.mrb[26].mxu1  ;;  %v3283_v47 = vpop.permute.xlu0 (!%p3628_p0), %3282 }
 0x4b2   : > { %v3875_v58 = vpop.f32.mrb[27].mxu1  ;;  %v3305_v22 = vsel (!%p3628_p0), %vm2894_vm15, %v3301_v30, %v3283_v47 }
 0x4b3   : > { %v3197_v4 = vadd.f32 %v3179_v17, %v3023_v34  ;;  %v3198_v0 = vadd.f32 %v3184_v52, %v3024_v23  ;;  %v3876_v12 = vadd.f32 %v3875_v58, %v3874_v15  ;;  %v3299_v34 = vsel (!%p3628_p0), %vm2764_vm7, %v3242_v24, %v3259_v39  ;;  %v3291_v52 = vpop.permute.xlu1 (!%p3628_p0), %3290 }
 0x4b4   : > { %v3303_v17 = vsel (!%p3628_p0), %vm2829_vm2, %v3299_v34, %v3275_v16 }
 0x4b5   : > { %3201 = vst.msk [vmem:[#allocation11] sm:$0xff] %vm7858_vm10, %v3197_v4  ;;  %v3189_v62 = vadd.f32 %v3876_v12, %v3832_v37  ;;  %v3877_v29 = vpop.f32.mrb[28].mxu1  ;;  %v3295_v38 = vpop.permute.xlu0 (!%p3628_p0), %3294  ;;  %v3307_v15 = vsel (!%p3628_p0), %vm2894_vm15, %v3303_v17, %v3291_v52 }
 0x4b6   : > { %3202 = vst.msk [vmem:[#allocation11 + $0x8] sm:$0xff] %vm7859_vm11, %v3198_v0  ;;  %v3878_v26 = vpop.f32.mrb[29].mxu1  ;;  %v3308_v48 = vsel (!%p3628_p0), %vm2894_vm15, %v3304_v14, %v3295_v38 }
 0x4b7   : > { %v3199_v21 = vadd.f32 %v3189_v62, %v3025_v3  ;;  %v3879_v41 = vadd.f32 %v3878_v26, %v3877_v29  ;;  %3208 = sbr.rel (%p3628_p0) target bundleno = 1224 (0x4c8), region = 60 }
 0x4b9   : > { %3203 = vst.msk [vmem:[#allocation11 + $0x10] sm:$0xff] %vm7860_vm12, %v3199_v21  ;;  %v3194_v5 = vadd.f32 %v3879_v41, %v3835_v42  ;;  %v3298_v42 = vsel (!%p3628_p0), %vm2764_vm7, %v3237_v13, %v3255_v53 }
 0x4ba   : > { %v3302_v49 = vsel (!%p3628_p0), %vm2829_vm2, %v3298_v42, %v3271_v59 }
 0x4bb   : > { %v3200_v2 = vadd.f32 %v3194_v5, %v3026_v63  ;;  %v3306_v9 = vsel (!%p3628_p0), %vm2894_vm15, %v3302_v49, %v3287_v32 }
 0x4bc   : > { %v3309_v18 = vld [vmem:[#allocation11] sm:$0xff] (!%p3628_p0) }
 0x4bd   : > { %3204 = vst.msk [vmem:[#allocation11 + $0x18] sm:$0xff] %vm7861_vm13, %v3200_v2  ;;  %v3313_v46 = vmul.f32 (!%p3628_p0), %v3309_v18, %v3305_v22  ;;  %v3310_v6 = vld [vmem:[#allocation11 + $0x8] sm:$0xff] (!%p3628_p0) }
 0x4be   : > { %v3314_v43 = vmul.f32 %v3310_v6, %v3306_v9 }
 0x4bf   : > { %3317 = vst.msk [vmem:[#allocation11] sm:$0xff] %vm7862_vm4, %v3313_v46 }
 0x4c0   : > { %v3311_v23 = vld [vmem:[#allocation11 + $0x10] sm:$0xff]  ;;  %3318 = vst.msk [vmem:[#allocation11 + $0x8] sm:$0xff] %vm7864_vm6, %v3314_v43 }
 0x4c1   : > { %v3315_v58 = vmul.f32 %v3311_v23, %v3307_v15 }
 0x4c3   : > { %3319 = vst.msk [vmem:[#allocation11 + $0x10] sm:$0xff] %vm7865_vm8, %v3315_v58 }
 0x4c4   : > { %v3312_v37 = vld [vmem:[#allocation11 + $0x18] sm:$0xff] }
 0x4c5   : > { %v3316_v7 = vmul.f32 %v3312_v37, %v3308_v48 }
 0x4c7   : > { %3320 = vst.msk [vmem:[#allocation11 + $0x18] sm:$0xff] %vm7863_vm5, %v3316_v7 }
 0x4c8 PF: > { %p4167_p4 = scmp.eq.s32.totalorder %s4657_s6, 1  ;;  %s4543_s1 = smov [#allocation11]  }
 0x4c9   : > { %s3327_s21 = sshll.u32 %s4543_s1, 4  ;;  %s3328_s21 = int_to_ptr.vmem [resolvable:$true] %s3327_s21 }
 0x4ca   : > { %s4451_s13 = scalar_lea.vmem %s3328_s21, 512  ;;  %p4458_p3 = scmp.lt.s32.totalorder %s3328_s21, %s3328_s21 }
 0x4cb   : > { %p4452_p5 = scmp.ne.s32.totalorder %s3328_s21, %s4451_s13  ;;  %p4459_p8 = scmp.lt.s32.totalorder %s4451_s13, %s4451_s13 }
 0x4cd   : > { %p4453_p12 = pnand %p4452_p5, %p4167_p4  ;;  %p4460_p11 = por %p4459_p8, %p4458_p3 }
 0x4cf   : > { %p4454_p2 = pneg %p4453_p12 }
 0x4d1   : > { %p4461_p9 = pnand %p4460_p11, %p4454_p2 }
 0x4d3   : > { %4464 = shalt.err (!%p4461_p9)
}
 0x4d4   : > { %s4465_s24 = scalar_lea.hbm %s7159_s4, 512 }
 0x4d5   : > { %p4466_p7 = scmp.ne.s32.totalorder %s7159_s4, %s4465_s24  ;;  %p4471_p6 = scmp.lt.u32.totalorder %s4465_s24, %s7159_s4 }
 0x4d7   : > { %p4467_p10 = pnand %p4466_p7, %p4167_p4 }
 0x4d9   : > { %p4468_p1 = pneg %p4467_p10 }
 0x4db   : > { %p4473_p13 = pnand %p4471_p6, %p4468_p1 }
 0x4dd   : > { %4476 = shalt.err (!%p4473_p13)
}
 0x4de   : > { %s4544_s29 = smov 128   ;;  %s4545_s15 = smov 8  }
 0x4df   : > { %4147 = dma.vmem_to_hbm [thread:$0]  (%p4167_p4), %s3328_s21, 512, %s7159_s4, [#allocation5], %s4544_s29, %s4544_s29, %s4545_s15  }
 0x4e0   : > { %4506 = dma.done.wait (%p4167_p4), [#allocation5], 512  }
 0x4e1   : > { %4508 = vsyncadd (%p4167_p4), [#allocation5], 4294966784 }
 0x4e2 PF: > { %s7866_s22 = sld [smem:[#allocation16_spill]]  ;;  %p19_p0 = scmp.ge.s32.totalorder %s4592_s19, 4  }
 0x4e3   : > { %s7867_s15 = smov %s4515_s16  ;;  %s7868_s16 = smov %s4519_s17 }
 0x4e4   : > { %s7870_s18 = smov %s4592_s19  ;;  %21 = sbr.rel (!%p19_p0) target bundleno = 9 (0x9), region = 109 }
 0x4e8   : > { %s7869_s17 = smov %s7866_s22 }
 0x4eb   :  { %3343 = vsyncpa [#allocation4], 1 }
 0x4ec   :  { %3345 = vsyncpa [#allocation4 + $0x1], 1 }
 0x4ed   :  { %3346 = vsyncpa [#allocation7], 1 }
 0x4ee   :  { %3348 = vsyncpa [#allocation7 + $0x1], 1 }
 0x4ef   :  { %3349 = vsyncpa [#allocation10], 1 }
 0x4f0   :  { %3350 = vsyncpa [#allocation5], 1 }
 0x4f1   :  { %3352 = vsyncpa [#allocation5 + $0x1], 1 }

// kernel: egat_forward.2
= control target key start
LH: loop header
LB: loop body
LE: loop exit
PB: predicated region body
PF: predicated region fallthrough
CT: control target
= control target key end

     0   :  { %s10937_s0 = inlined_call_operand.hbm [shape: s32[1024,1], index: 0, kind: input, shape index: {}]   ;;  %s10938_s1 = inlined_call_operand.hbm [shape: s32[1024,1], index: 1, kind: input, shape index: {}]   ;;  %s10939_s2 = inlined_call_operand.hbm [shape: f32[1024,8], index: 2, kind: input, shape index: {}]   ;;  %s10940_s3 = inlined_call_operand.hbm [shape: f32[32,96], index: 3, kind: input, shape index: {}]   ;;  %s10941_s4 = inlined_call_operand.hbm [shape: f32[8,32], index: 4, kind: input, shape index: {}]   ;;  %s10942_s5 = inlined_call_operand.hbm [shape: f32[1,32], index: 5, kind: input, shape index: {}]   ;;  %s10943_s6 = inlined_call_operand.hbm [shape: f32[1,32], index: 6, kind: input, shape index: {}]   ;;  %s10944_s7 = inlined_call_operand.hbm [shape: f32[1024,32], index: 7, kind: output, shape index: {0}]   ;;  %s10945_s8 = inlined_call_operand.hbm [shape: f32[1024,4], index: 8, kind: output, shape index: {1}]  }
   0x1   :  { %11072 = sst [smem:[#allocation182_spill]] %s10938_s1 }
   0x2   :  { %11073 = sst [smem:[#allocation183_spill]] %s10940_s3 }
   0x3   :  { %11074 = sst [smem:[#allocation184_spill]] %s10942_s5 }
   0x4   :  { %11075 = sst [smem:[#allocation185_spill]] %s10944_s7 }
   0x5   :  { %11076 = sst [smem:[#allocation186_spill]] %s10945_s8 }
   0x6   :  { %14 = vsyncpa [#allocation3], 0 }
   0x7   :  { %16 = vsyncpa [#allocation3 + $0x1], 0 }
   0x8   :  { %17 = vsyncpa [#allocation6], 0 }
   0x9   :  { %19 = vsyncpa [#allocation6 + $0x1], 0 }
   0xa   :  { %20 = vsyncpa [#allocation9], 0 }
   0xb   :  { %21 = vsyncpa [#allocation12], 0 }
   0xc   :  { %22 = vsyncpa [#allocation4], 0 }
   0xd   :  { %24 = vsyncpa [#allocation4 + $0x1], 0 }
   0xe   :  { %25 = vsyncpa [#allocation16], 0 }
   0xf   :  { %27 = vsyncpa [#allocation16 + $0x1], 0  ;;  %s6990_s27 = smov 0   ;;  %s6992_s28 = smov 0  }
  0x10   :  { %s6994_s29 = smov 0   ;;  %s6996_s30 = smov 0  }
  0x11 LB: > { %11077 = sst [smem:[#allocation23_spill]] %s6912_s27  ;;  %s7011_s9 = sadd.s32 4294967295, %s6924_s30   ;;  %s6924_s30 = sphi %s6996_s30, %s11629_s30   ;;  %s6920_s29 = sphi %s6994_s29, %s11633_s29   ;;  %s6916_s28 = sphi %s6992_s28, %s11632_s28   ;;  %s6912_s27 = sphi %s6990_s27, %s11631_s27  }
  0x12   : > { %11078 = sst [smem:[#allocation24_spill]] %s6924_s30  ;;  %s5472_s10 = sadd.s32 4294967294, %s6924_s30  }
  0x13   : > { %p53_p0 = scmp.ne.s32.totalorder %s6916_s28, %s6912_s27  ;;  %p10946_p1 = scmp.eq.s32.totalorder %s7011_s9, 0 }
  0x14   : > { %p219_p3 = scmp.eq.s32.totalorder %s5472_s10, 1  ;;  %p5473_p5 = scmp.ge.s32.totalorder %s6924_s30, 1 }
  0x15   : > { %p7020_p4 = por %p10946_p1, %p53_p0  ;;  %p252_p7 = scmp.lt.s32.totalorder %s6924_s30, 3 }
  0x16   : > { %p7025_p6 = por %p219_p3, %p53_p0  ;;  %s6926_s14 = smov [#allocation8]  }
  0x17   : > { %s11079_s11 = scalar_select %p7020_p4, 1, 0 }
  0x18   : > { %s11080_s12 = scalar_select %p7025_p6, 1, 0 }
  0x19   : > { %p7030_p8 = pnand %p5473_p5, %p252_p7  ;;  %s264_s15 = sshll.u32 %s6926_s14, 4  ;;  %s7034_s15 = int_to_ptr.vmem [resolvable:$true] %s264_s15 }
  0x1a   : > { %11081 = sst [smem:[#allocation25_spill]] %s11080_s12  ;;  %s6927_s17 = smov [#allocation11]  }
  0x1b   : > { %s11082_s13 = scalar_select %p7030_p8, 1, 0 }
  0x1c   : > { %p6512_p9 = pneg %p7030_p8  ;;  %s289_s18 = sshll.u32 %s6927_s17, 4  ;;  %s7045_s18 = int_to_ptr.vmem [resolvable:$true] %s289_s18 }
  0x1d   : > { %s11084_s3 = sld [smem:[#allocation183_spill]] }
  0x1e   : > { %p7041_p11 = pnand %p6512_p9, %p10946_p1 }
  0x20   : > { %s11083_s16 = scalar_select %p7041_p11, 1, 0 }
  0x21   : > { %p7055_p13 = pneg %p7041_p11 }
  0x23   : > { %s6612_s21 = scalar_lea.hbm %s11084_s3, 512 }
  0x24   : > { %p6613_p12 = scmp.ne.s32.totalorder %s11084_s3, %s6612_s21  ;;  %p6619_p5 = scmp.lt.u32.totalorder %s6612_s21, %s11084_s3 }
  0x25   : > { %s11085_s24 = scalar_select %p7055_p13, 1, 0 }
  0x26   : > { %p6615_p0 = pnand %p7055_p13, %p6613_p12 }
  0x28   : > { %p6616_p3 = pneg %p6615_p0 }
  0x2a   : > { %p6621_p7 = pnand %p6619_p5, %p6616_p3 }
  0x2c   : > { %6624 = shalt.err (!%p6621_p7)
}
  0x2d   : > { %s6625_s10 = scalar_lea.vmem %s7034_s15, 512  ;;  %p6633_p2 = scmp.lt.s32.totalorder %s7034_s15, %s7034_s15 }
  0x2e   : > { %p6626_p9 = scmp.ne.s32.totalorder %s7034_s15, %s6625_s10  ;;  %p6634_p6 = scmp.lt.s32.totalorder %s6625_s10, %s6625_s10 }
  0x30   : > { %p6628_p10 = pnand %p6626_p9, %p7055_p13  ;;  %p6635_p12 = por %p6634_p6, %p6633_p2 }
  0x32   : > { %p6629_p1 = pneg %p6628_p10 }
  0x34   : > { %p6636_p0 = pnand %p6635_p12, %p6629_p1 }
  0x36   : > { %6639 = shalt.err (!%p6636_p0)
}
  0x37   : > { %s10949_s14 = smov 128   ;;  %s10951_s17 = smov 8  }
  0x38   : > { %6515 = dma.hbm_to_vmem [thread:$0]  (!%p7041_p11), %s11084_s3, 512, %s7034_s15, [#allocation9], %s10949_s14, %s10949_s14, %s10951_s17  }
  0x39   : > { %s11086_s5 = sld [smem:[#allocation184_spill]] }
  0x3f   : > { %s6640_s23 = scalar_lea.hbm %s11086_s5, 16 }
  0x40   : > { %p6641_p1 = scmp.ne.s32.totalorder %s11086_s5, %s6640_s23  ;;  %p6647_p10 = scmp.lt.u32.totalorder %s6640_s23, %s11086_s5 }
  0x42   : > { %p6643_p2 = pnand %p6641_p1, %p7055_p13 }
  0x44   : > { %p6644_p6 = pneg %p6643_p2 }
  0x46   : > { %p6649_p3 = pnand %p6647_p10, %p6644_p6 }
  0x48   : > { %6652 = shalt.err (!%p6649_p3)
}
  0x49   : > { %s6653_s15 = scalar_lea.vmem %s7045_s18, 16  ;;  %s6660_s19 = scalar_lea.vmem %s7045_s18, 32 }
  0x4a   : > { %p6654_p5 = scmp.ne.s32.totalorder %s7045_s18, %s6653_s15  ;;  %p6661_p12 = scmp.lt.s32.totalorder %s7045_s18, %s7045_s18 }
  0x4b   : > { %p6662_p0 = scmp.lt.s32.totalorder %s6660_s19, %s6653_s15 }
  0x4c   : > { %p6656_p7 = pnand %p6654_p5, %p7055_p13 }
  0x4d   : > { %p6663_p1 = por %p6662_p0, %p6661_p12 }
  0x4e   : > { %p6657_p9 = pneg %p6656_p7 }
  0x50   : > { %p6664_p2 = pnand %p6663_p1, %p6657_p9 }
  0x52   : > { %6667 = shalt.err (!%p6664_p2)
}
  0x53   : > { %6521 = dma.hbm_to_vmem [thread:$0]  (!%p7041_p11), %s11086_s5, 16, %s7045_s18, [#allocation12]  }
  0x54   : > { %s7104_s21 = sadd.s32 1, %s6924_s30   ;;  %s40_s22 = sadd.s32 1, %s6920_s29 }
  0x55   : > { %11087 = sst [smem:[#allocation26_spill]] %s7104_s21  ;;  %s37_s23 = ssub.s32 %s6924_s30, %s7104_s21 }
  0x56   : > { %p47_p6 = scmp.ne.s32.totalorder %s6920_s29, %s6916_s28  ;;  %p38_p10 = scmp.eq.s32.totalorder %s37_s23, 0 }
  0x57   : > { %p48_p3 = scmp.eq.s32.totalorder %s6924_s30, 0  ;;  %p11088_p5 = scmp.eq.s32.totalorder %s7011_s9, 1 }
  0x58   : > { %p6546_p9 = scmp.lt.s32.totalorder %s6924_s30, 2  ;;  %s10948_s10 = sand.u32 1, %s6920_s29  }
  0x59   : > { %p7114_p7 = por %p11088_p5, %p47_p6  ;;  %p49_p12 = por %p48_p3, %p47_p6 }
  0x5a   : > { %s7120_s26 = scalar_select %p38_p10, %s6920_s29, %s40_s22  }
  0x5b   : > { %s11089_s25 = scalar_select %p7114_p7, 1, 0 }
  0x5c   : > { %11090 = sst [smem:[#allocation27_spill]] %s7120_s26  ;;  %s7125_s18 = sshll.u32 %s10948_s10, 9 }
  0x5d   : > { %s7128_s15 = sshll.u32 %s6924_s30, 13  ;;  %p7130_p0 = pnand %p6546_p9, %p49_p12 }
  0x5e   : > { %s332_s12 = sand.u32 1, %s6924_s30   ;;  %s11092_s1 = sld [smem:[#allocation182_spill]] }
  0x5f   : > { %s11091_s19 = scalar_select %p7130_p0, 1, 0 }
  0x60   : > { %s336_s10 = scalar_lea.vmem [#allocation5], %s7125_s18  ;;  %s6930_s17 = smov [#allocation10]  }
  0x61   : > { %s343_s14 = sshll.u32 %s336_s10, 4  ;;  %s7144_s3 = sshll.u32 %s6930_s17, 4  ;;  %s7142_s14 = int_to_ptr.vmem [resolvable:$true] %s343_s14  ;;  %s279_s3 = int_to_ptr.vmem [resolvable:$true] %s7144_s3 }
  0x62   : > { %s7146_s5 = scalar_lea.sflag [#allocation6], %s332_s12  ;;  %p7152_p2 = pneg %p7130_p0 }
  0x64   : > { %s7139_s22 = scalar_lea.hbm %s11092_s1, %s7128_s15  ;;  %s6673_s21 = scalar_lea.hbm %s11092_s1, 16384 }
  0x65   : > { %s6668_s26 = scalar_lea.hbm %s7139_s22, 8192  ;;  %p6674_p3 = scmp.lt.u32.totalorder %s7139_s22, %s11092_s1 }
  0x66   : > { %p6669_p1 = scmp.ne.s32.totalorder %s7139_s22, %s6668_s26  ;;  %p6675_p5 = scmp.lt.u32.totalorder %s6673_s21, %s6668_s26 }
  0x67   : > { %s11093_s20 = scalar_select %p7152_p2, 1, 0 }
  0x68   : > { %p6671_p6 = pnand %p7152_p2, %p6669_p1  ;;  %p6676_p9 = por %p6675_p5, %p6674_p3 }
  0x69   : > { %p6677_p12 = scmp.lt.u32.totalorder %s6668_s26, %s7139_s22 }
  0x6a   : > { %p6672_p10 = pneg %p6671_p6 }
  0x6b   : > { %p6678_p7 = por %p6677_p12, %p6676_p9 }
  0x6d   : > { %p6679_p4 = pnand %p6678_p7, %p6672_p10 }
  0x6f   : > { %6682 = shalt.err (!%p6679_p4)
}
  0x70   : > { %s6683_s12 = scalar_lea.vmem %s7142_s14, 8192  ;;  %s6931_s23 = smov [#allocation5]  }
  0x71   : > { %p6684_p1 = scmp.ne.s32.totalorder %s7142_s14, %s6683_s12  ;;  %s6688_s10 = sshll.u32 %s6931_s23, 4  ;;  %s6689_s10 = int_to_ptr.vmem [resolvable:$false] %s6688_s10 }
  0x72   : > { %s6690_s30 = scalar_lea.vmem %s6689_s10, 16384  ;;  %p6691_p11 = scmp.lt.s32.totalorder %s7142_s14, %s6689_s10 }
  0x73   : > { %p6686_p6 = pnand %p6684_p1, %p7152_p2  ;;  %p6692_p13 = scmp.lt.s32.totalorder %s6690_s30, %s6683_s12 }
  0x75   : > { %p6687_p8 = pneg %p6686_p6  ;;  %p6693_p3 = por %p6692_p13, %p6691_p11 }
  0x77   : > { %p6694_p5 = pnand %p6693_p3, %p6687_p8 }
  0x79   : > { %6697 = shalt.err (!%p6694_p5)
}
  0x7a   : > { %s11094_s21 = smov 8   ;;  %s11095_s26 = smov 128  }
  0x7b   : > { %6531 = dma.hbm_to_vmem [thread:$0]  (!%p7130_p0), %s7139_s22, 8192, %s7142_s14, %s7146_s5, %s11095_s26, %s11095_s26, %s11094_s21  }
  0x7c   : > { %s6698_s10 = scalar_lea.hbm %s10941_s4, 128  ;;  %p11096_p8 = scmp.ne.s32.totalorder %s11085_s24, 0 }
  0x7d   : > { %p6699_p4 = scmp.ne.s32.totalorder %s10941_s4, %s6698_s10  ;;  %p6705_p7 = scmp.lt.u32.totalorder %s6698_s10, %s10941_s4 }
  0x7f   : > { %p6701_p11 = pnand %p6699_p4, %p11096_p8 }
  0x81   : > { %p6702_p13 = pneg %p6701_p11 }
  0x83   : > { %p6707_p10 = pnand %p6705_p7, %p6702_p13 }
  0x85   : > { %6710 = shalt.err (!%p6707_p10)
}
  0x86   : > { %s6711_s8 = scalar_lea.vmem %s279_s3, 128  ;;  %p6719_p6 = scmp.lt.s32.totalorder %s279_s3, %s279_s3 }
  0x87   : > { %p6712_p9 = scmp.ne.s32.totalorder %s279_s3, %s6711_s8  ;;  %p6720_p3 = scmp.lt.s32.totalorder %s6711_s8, %s6711_s8 }
  0x89   : > { %p6714_p12 = pnand %p6712_p9, %p11096_p8  ;;  %p6721_p5 = por %p6720_p3, %p6719_p6 }
  0x8b   : > { %p6715_p1 = pneg %p6714_p12 }
  0x8d   : > { %p6722_p0 = pnand %p6721_p5, %p6715_p1 }
  0x8f   : > { %6725 = shalt.err (!%p6722_p0)
}
  0x90   : > { %p11097_p4 = scmp.ne.s32.totalorder %s11083_s16, 0  ;;  %s6932_s1 = smov [#allocation13]  }
  0x91   : > { %s300_s27 = sshll.u32 %s6932_s1, 4  ;;  %s6726_s10 = scalar_lea.hbm %s10943_s6, 16  ;;  %s301_s27 = int_to_ptr.vmem [resolvable:$true] %s300_s27 }
  0x92   : > { %6518 = dma.hbm_to_vmem [thread:$0]  (!%p11097_p4), %s10941_s4, 128, %s279_s3, [#allocation9]  }
  0x93   : > { %p6727_p11 = scmp.ne.s32.totalorder %s10943_s6, %s6726_s10  ;;  %p6733_p7 = scmp.lt.u32.totalorder %s6726_s10, %s10943_s6 }
  0x95   : > { %p6729_p0 = pnand %p6727_p11, %p11096_p8 }
  0x97   : > { %p6730_p13 = pneg %p6729_p0 }
  0x99   : > { %p6735_p10 = pnand %p6733_p7, %p6730_p13 }
  0x9b   : > { %6738 = shalt.err (!%p6735_p10)
}
  0x9c   : > { %s6739_s3 = scalar_lea.vmem %s301_s27, 16  ;;  %s6746_s14 = scalar_lea.vmem %s301_s27, 32 }
  0x9d   : > { %p6740_p9 = scmp.ne.s32.totalorder %s301_s27, %s6739_s3  ;;  %p6747_p6 = scmp.lt.s32.totalorder %s301_s27, %s301_s27 }
  0x9e   : > { %p6748_p3 = scmp.lt.s32.totalorder %s6746_s14, %s6739_s3 }
  0x9f   : > { %p6742_p12 = pnand %p6740_p9, %p11096_p8 }
  0xa0   : > { %p6749_p5 = por %p6748_p3, %p6747_p6 }
  0xa1   : > { %p6743_p1 = pneg %p6742_p12 }
  0xa3   : > { %p6750_p2 = pnand %p6749_p5, %p6743_p1 }
  0xa5   : > { %6753 = shalt.err (!%p6750_p2)
}
  0xa6   : > { %6524 = dma.hbm_to_vmem [thread:$0]  (!%p11097_p4), %s10943_s6, 16, %s301_s27, [#allocation12]  }
  0xa7   : > { %s7220_s17 = scalar_lea.hbm %s10937_s0, %s7128_s15  ;;  %s315_s23 = scalar_lea.vmem [#allocation2], %s7125_s18 }
  0xa8   : > { %s322_s10 = sshll.u32 %s315_s23, 4  ;;  %s11098_s16 = sand.u32 1, %s6920_s29   ;;  %s7223_s10 = int_to_ptr.vmem [resolvable:$true] %s322_s10 }
  0xa9   : > { %s7227_s12 = scalar_lea.sflag [#allocation3], %s11098_s16  ;;  %s6754_s30 = scalar_lea.hbm %s7220_s17, 8192 }
  0xaa   : > { %p6755_p2 = scmp.ne.s32.totalorder %s7220_s17, %s6754_s30  ;;  %p11099_p8 = scmp.ne.s32.totalorder %s11093_s20, 0 }
  0xab   : > { %s6759_s3 = scalar_lea.hbm %s10937_s0, 16384  ;;  %p6760_p0 = scmp.lt.u32.totalorder %s7220_s17, %s10937_s0 }
  0xac   : > { %p6757_p4 = pnand %p6755_p2, %p11099_p8  ;;  %p6761_p13 = scmp.lt.u32.totalorder %s6759_s3, %s6754_s30 }
  0xad   : > { %p6763_p10 = scmp.lt.u32.totalorder %s6754_s30, %s7220_s17 }
  0xae   : > { %p6758_p11 = pneg %p6757_p4  ;;  %p6762_p7 = por %p6761_p13, %p6760_p0 }
  0xb0   : > { %p6764_p9 = por %p6763_p10, %p6762_p7 }
  0xb2   : > { %p6765_p12 = pnand %p6764_p9, %p6758_p11 }
  0xb4   : > { %6768 = shalt.err (!%p6765_p12)
}
  0xb5   : > { %s6769_s1 = scalar_lea.vmem %s7223_s10, 8192  ;;  %s6933_s7 = smov [#allocation2]  }
  0xb6   : > { %p6770_p1 = scmp.ne.s32.totalorder %s7223_s10, %s6769_s1  ;;  %s6774_s24 = sshll.u32 %s6933_s7, 4  ;;  %s6775_s24 = int_to_ptr.vmem [resolvable:$false] %s6774_s24 }
  0xb7   : > { %s6776_s23 = scalar_lea.vmem %s6775_s24, 16384  ;;  %p6777_p5 = scmp.lt.s32.totalorder %s7223_s10, %s6775_s24 }
  0xb8   : > { %p6772_p6 = pnand %p6770_p1, %p11099_p8  ;;  %p6778_p2 = scmp.lt.s32.totalorder %s6776_s23, %s6769_s1 }
  0xba   : > { %p6773_p3 = pneg %p6772_p6  ;;  %p6779_p4 = por %p6778_p2, %p6777_p5 }
  0xbc   : > { %p6780_p0 = pnand %p6779_p4, %p6773_p3 }
  0xbe   : > { %6783 = shalt.err (!%p6780_p0)
}
  0xbf   : > { %p11100_p11 = scmp.ne.s32.totalorder %s11091_s19, 0  ;;  %s7258_s27 = scalar_lea.hbm %s10939_s2, %s7128_s15 }
  0xc0   : > { %s357_s8 = scalar_lea.vmem [#allocation7], %s7125_s18  ;;  %s6784_s14 = scalar_lea.hbm %s7258_s27, 8192 }
  0xc1   : > { %6528 = dma.hbm_to_vmem [thread:$0]  (!%p11100_p11), %s7220_s17, 8192, %s7223_s10, %s7227_s12, %s11095_s26, %s11095_s26, %s11094_s21  }
  0xc2   : > { %s364_s3 = sshll.u32 %s357_s8, 4  ;;  %p6785_p13 = scmp.ne.s32.totalorder %s7258_s27, %s6784_s14  ;;  %s7261_s3 = int_to_ptr.vmem [resolvable:$true] %s364_s3 }
  0xc3   : > { %s6789_s10 = scalar_lea.hbm %s10939_s2, 16384  ;;  %p6790_p9 = scmp.lt.u32.totalorder %s7258_s27, %s10939_s2 }
  0xc4   : > { %p6787_p7 = pnand %p6785_p13, %p11099_p8  ;;  %p6791_p12 = scmp.lt.u32.totalorder %s6789_s10, %s6784_s14 }
  0xc5   : > { %p6793_p6 = scmp.lt.u32.totalorder %s6784_s14, %s7258_s27 }
  0xc6   : > { %p6788_p10 = pneg %p6787_p7  ;;  %p6792_p1 = por %p6791_p12, %p6790_p9 }
  0xc8   : > { %p6794_p3 = por %p6793_p6, %p6792_p1 }
  0xca   : > { %p6795_p5 = pnand %p6794_p3, %p6788_p10 }
  0xcc   : > { %6798 = shalt.err (!%p6795_p5)
}
  0xcd   : > { %s6799_s18 = scalar_lea.vmem %s7261_s3, 8192  ;;  %s6934_s1 = smov [#allocation7]  }
  0xce   : > { %p6800_p2 = scmp.ne.s32.totalorder %s7261_s3, %s6799_s18  ;;  %s6804_s7 = sshll.u32 %s6934_s1, 4  ;;  %s6805_s7 = int_to_ptr.vmem [resolvable:$false] %s6804_s7 }
  0xcf   : > { %s6806_s24 = scalar_lea.vmem %s6805_s7, 16384  ;;  %p6807_p13 = scmp.lt.s32.totalorder %s7261_s3, %s6805_s7 }
  0xd0   : > { %p6802_p4 = pnand %p6800_p2, %p11099_p8  ;;  %p6808_p7 = scmp.lt.s32.totalorder %s6806_s24, %s6799_s18 }
  0xd2   : > { %p6803_p0 = pneg %p6802_p4  ;;  %p6809_p9 = por %p6808_p7, %p6807_p13 }
  0xd4   : > { %p6810_p12 = pnand %p6809_p9, %p6803_p0 }
  0xd6   : > { %6813 = shalt.err (!%p6810_p12)
}
  0xd7   : > { %6534 = dma.hbm_to_vmem [thread:$0]  (!%p11100_p11), %s7258_s27, 8192, %s7261_s3, %s7146_s5, %s11095_s26, %s11095_s26, %s11094_s21  }
  0xd8   : > { %p11101_p8 = scmp.ne.s32.totalorder %s11082_s13, 0 }
  0xda   : > { %376 = sbr.rel (%p11101_p8) target bundleno = 3209 (0xc89), region = 48 }
  0xe1   : > { %s7291_s20 = sand.u32 1, %s6916_s28   ;;  %p11102_p10 = scmp.ne.s32.totalorder %s11079_s11, 0 }
  0xe2   : > { %s7294_s23 = sshll.u32 %s7291_s20, 9  ;;  %s379_s19 = scalar_lea.sflag [#allocation3], %s7291_s20 }
  0xe3   : > { %s7298_s16 = scalar_lea.vmem [#allocation2], %s7294_s23 }
  0xe4   : > { %6887 = dma.done.wait (%p11102_p10), %s379_s19, 8192  }
  0xe5   : > { %6889 = vsyncadd (%p11102_p10), %s379_s19, 4294959104  ;;  %s387_s5 = sand.u32 1, %s7011_s9   ;;  %s7306_s21 = scalar_lea.vmem [#allocation5], %s7294_s23 }
  0xe6   : > { %s388_s13 = scalar_lea.sflag [#allocation6], %s387_s5 }
  0xe7   : > { %6891 = dma.done.wait (%p11102_p10), %s388_s13, 16384  }
  0xe8   : > { %6893 = vsyncadd (%p11102_p10), %s388_s13, 4294950912  ;;  %s7313_s26 = scalar_lea.vmem [#allocation7], %s7294_s23  ;;  %p11103_p11 = scmp.eq.s32.totalorder %s7011_s9, 0 }
  0xea   : > { %6895 = dma.done.wait (%p11103_p11), [#allocation9], 640   ;;  %p11104_p1 = pmov %p11103_p11 }
  0xec   : > { %6897 = vsyncadd (%p11104_p1), [#allocation9], 4294966656  ;;  %p11105_p6 = pmov %p11104_p1 }
  0xed   : > { %p11106_p3 = pmov %p11104_p1 }
  0xee   : > { %6899 = dma.done.wait (%p11105_p6), [#allocation12], 32  }
  0xef   : > { %6901 = vsyncadd (%p11106_p3), [#allocation12], 4294967264  ;;  %v6935_v0 = vmov 0   ;;  %v473_v1 = vld [vmem:[%s7298_s16 + $0x10] sm:$0xff]  ;;  %v471_v2 = vld [vmem:[%s7298_s16] sm:$0xff]  ;;  %vm2030_vm0 = vcmask 64512  }
  0xf0   : > { %6599 = vset.pattern.permute.xlu1 %v6935_v0  ;;  %6598 = vset.pattern.permute.xlu0 %v6935_v0  ;;  %v474_v3 = vld [vmem:[%s7298_s16 + $0x18] sm:$0xff]  ;;  %v472_v4 = vld [vmem:[%s7298_s16 + $0x8] sm:$0xff]  ;;  %v475_v6 = vld [vmem:[%s7298_s16 + $0x20] sm:$0xff]  ;;  %vm1387_vm1 = vcmask 261120   ;;  %s6937_s11 = smov 96   ;;  %s8319_s30 = scalar_lea.vmem [#allocation14], %s7294_s23 }
  0xf1   : > { %542 = vperm.xlu1 %6599, %v473_v1   ;;  %536 = vperm.xlu0 %6598, %v471_v2   ;;  %v476_v5 = vld [vmem:[%s7298_s16 + $0x28] sm:$0xff]  ;;  %v478_v7 = vld [vmem:[%s7298_s16 + $0x38] sm:$0xff]  ;;  %v477_v8 = vld [vmem:[%s7298_s16 + $0x30] sm:$0xff]  ;;  %s6938_s27 = smov 120   ;;  %s6939_s8 = smov 112  }
  0xf2   : > { %v2029_v9 = vld [vmem:[#allocation10] sm:$0xff]  ;;  %v1966_v11 = vld [vmem:[%s7313_s26 + $0x8] sm:$0xff]  ;;  %v1967_v12 = vld [vmem:[%s7313_s26 + $0x10] sm:$0xff]  ;;  %s6940_s3 = smov 104   ;;  %s10333_s14 = scalar_lea.vmem [#allocation15], %s7294_s23 }
  0xf3   : > { %6138 = vmatprep.subr.mxu0 %v2029_v9  ;;  %v1965_v10 = vld [vmem:[%s7313_s26] sm:$0xff]  ;;  %v480_v13 = vld [vmem:[%s7298_s16 + $0x48] sm:$0xff]  ;;  %v1968_v15 = vld [vmem:[%s7313_s26 + $0x18] sm:$0xff]  ;;  %s5831_s22 = sshll.u32 %s7011_s9, 13  ;;  %s5270_s17 = sshll.u32 %s8319_s30, 4  ;;  %s10414_s17 = int_to_ptr.vmem [resolvable:$true] %s5270_s17 }
  0xf4   : > { %6139 = vmatpush3.msra.mxu0 %v2029_v9  ;;  %6140 = vmatprep.mubr.msk.f32.mxu0 %vm2030_vm0, %v1965_v10  ;;  %v479_v14 = vld [vmem:[%s7298_s16 + $0x40] sm:$0xff]  ;;  %v482_v17 = vld [vmem:[%s7298_s16 + $0x58] sm:$0xff]  ;;  %v481_v18 = vld [vmem:[%s7298_s16 + $0x50] sm:$0xff]  ;;  %s11487_s15 = sld [smem:[#allocation185_spill]]  ;;  %s5252_s1 = scalar_lea.sflag [#allocation4], %s7291_s20 }
  0xf5   : > { %545 = vperm.xlu1 %6599, %v474_v3   ;;  %539 = vperm.xlu0 %6598, %v472_v4   ;;  %v1969_v16 = vld [vmem:[%s7313_s26 + $0x20] sm:$0xff]  ;;  %v1970_v19 = vld [vmem:[%s7313_s26 + $0x28] sm:$0xff]  ;;  %v1971_v20 = vld [vmem:[%s7313_s26 + $0x30] sm:$0xff]  ;;  %s6814_s7 = scalar_lea.vmem %s10414_s17, 8192  ;;  %p11492_p2 = scmp.ne.s32.totalorder %s11089_s25, 0 }
  0xf6   : > { %6141 = vmatmul.mubr.msk.f32.vlgmr.msra.gmra.mrb[0].mxu0 %vm2030_vm0, %v1966_v11  ;;  %v484_v21 = vld [vmem:[%s7298_s16 + $0x68] sm:$0xff]  ;;  %v483_v22 = vld [vmem:[%s7298_s16 + $0x60] sm:$0xff]  ;;  %v1972_v23 = vld [vmem:[%s7313_s26 + $0x38] sm:$0xff]  ;;  %p6815_p5 = scmp.ne.s32.totalorder %s10414_s17, %s6814_s7  ;;  %s6941_s24 = smov [#allocation14]  }
  0xf7   : > { %6143 = vmatprep.mubr.msk.f32.mxu0 %vm2030_vm0, %v1967_v12  ;;  %v1973_v24 = vld [vmem:[%s7313_s26 + $0x40] sm:$0xff]  ;;  %v486_v25 = vld [vmem:[%s7298_s16 + $0x78] sm:$0xff]  ;;  %v485_v26 = vld [vmem:[%s7298_s16 + $0x70] sm:$0xff]  ;;  %s6818_s23 = sshll.u32 %s6941_s24, 4  ;;  %s6819_s23 = int_to_ptr.vmem [resolvable:$false] %s6818_s23 }
  0xf8   : > { %v1974_v27 = vld [vmem:[%s7313_s26 + $0x48] sm:$0xff]  ;;  %v1975_v28 = vld [vmem:[%s7313_s26 + $0x50] sm:$0xff]  ;;  %v487_v30 = vld [vmem:[%s7298_s16 + $0x80] sm:$0xff]  ;;  %p6816_p4 = pnand %p6815_p5, %p11492_p2  ;;  %s6820_s19 = scalar_lea.vmem %s6819_s23, 16384 }
  0xf9   : > { %551 = vperm.xlu1 %6599, %v476_v5   ;;  %548 = vperm.xlu0 %6598, %v475_v6   ;;  %v488_v29 = vld [vmem:[%s7298_s16 + $0x88] sm:$0xff]  ;;  %v1976_v31 = vld [vmem:[%s7313_s26 + $0x58] sm:$0xff]  ;;  %v1977_v32 = vld [vmem:[%s7313_s26 + $0x60] sm:$0xff]  ;;  %p6821_p13 = scmp.lt.s32.totalorder %s10414_s17, %s6819_s23  ;;  %p6822_p7 = scmp.lt.s32.totalorder %s6820_s19, %s6814_s7 }
  0xfa   : > { %6144 = vmatmul.mubr.msk.f32.gmra.mrb[2].mxu0 %vm2030_vm0, %v1968_v15  ;;  %v7365_v33 = vld [vmem:[#allocation8] sm:$0xff]  ;;  %v7367_v34 = vld [vmem:[#allocation8 + $0x8] sm:$0xff]  ;;  %v490_v35 = vld [vmem:[%s7298_s16 + $0x98] sm:$0xff]  ;;  %s10408_s18 = scalar_lea.hbm %s11487_s15, %s5831_s22  ;;  %p6817_p0 = pneg %p6816_p4 }
  0xfb   : > { %6146 = vmatprep.mubr.msk.f32.mxu0 %vm2030_vm0, %v1969_v16  ;;  %v6600_v36 = vpack.i.bf16 %v7367_v34, %v7365_v33  ;;  %v6348_v37 = vpack.c.bf16 %v7367_v34, %v7365_v33  ;;  %v489_v38 = vld [vmem:[%s7298_s16 + $0x90] sm:$0xff]  ;;  %v7378_v40 = vld [vmem:[#allocation8 + $0x18] sm:$0xff]  ;;  %v1978_v41 = vld [vmem:[%s7313_s26 + $0x68] sm:$0xff]  ;;  %p6823_p9 = por %p6822_p7, %p6821_p13 }
  0xfc   : > { %v7376_v39 = vld [vmem:[#allocation8 + $0x10] sm:$0xff]  ;;  %v492_v45 = vld [vmem:[%s7298_s16 + $0xa8] sm:$0xff]  ;;  %v491_v46 = vld [vmem:[%s7298_s16 + $0xa0] sm:$0xff] }
  0xfd   : > { %557 = vperm.xlu1 %6599, %v478_v7   ;;  %554 = vperm.xlu0 %6598, %v477_v8   ;;  %v6605_v42 = vpack.i.bf16 %v7378_v40, %v7376_v39  ;;  %v6352_v43 = vpack.c.bf16 %v7378_v40, %v7376_v39  ;;  %v1979_v44 = vld [vmem:[%s7313_s26 + $0x70] sm:$0xff]  ;;  %v1980_v47 = vld [vmem:[%s7313_s26 + $0x78] sm:$0xff]  ;;  %v1981_v48 = vld [vmem:[%s7313_s26 + $0x80] sm:$0xff]  ;;  %p6824_p12 = pnand %p6823_p9, %p6817_p0 }
  0xfe   : > { %6147 = vmatmul.mubr.msk.f32.gmra.mrb[4].mxu0 %vm2030_vm0, %v1970_v19  ;;  %6349 = vmatprep.subr.bf16.mxu0 %v6348_v37  ;;  %v494_v49 = vld [vmem:[%s7298_s16 + $0xb8] sm:$0xff]  ;;  %v493_v50 = vld [vmem:[%s7298_s16 + $0xb0] sm:$0xff]  ;;  %v1982_v51 = vld [vmem:[%s7313_s26 + $0x88] sm:$0xff] }
  0xff   : > { %6149 = vmatprep.mubr.msk.f32.mxu0 %vm2030_vm0, %v1971_v20  ;;  %6351 = vmatpush3.bf16.msra.mxu0 %v6348_v37  ;;  %v1983_v52 = vld [vmem:[%s7313_s26 + $0x90] sm:$0xff]  ;;  %v496_v53 = vld [vmem:[%s7298_s16 + $0xc8] sm:$0xff]  ;;  %v495_v54 = vld [vmem:[%s7298_s16 + $0xc0] sm:$0xff] }
 0x100   : > { %6353 = vmatprep.subr.bf16.mxu0 %v6352_v43  ;;  %v1984_v55 = vld [vmem:[%s7313_s26 + $0x98] sm:$0xff]  ;;  %v1985_v56 = vld [vmem:[%s7313_s26 + $0xa0] sm:$0xff]  ;;  %v497_v58 = vld [vmem:[%s7298_s16 + $0xd0] sm:$0xff] }
 0x101   : > { %563 = vperm.xlu1 %6599, %v480_v13   ;;  %560 = vperm.xlu0 %6598, %v479_v14   ;;  %v498_v57 = vld [vmem:[%s7298_s16 + $0xd8] sm:$0xff]  ;;  %v1986_v59 = vld [vmem:[%s7313_s26 + $0xa8] sm:$0xff]  ;;  %v1987_v60 = vld [vmem:[%s7313_s26 + $0xb0] sm:$0xff] }
 0x102   : > { %6150 = vmatmul.mubr.msk.f32.gmra.mrb[6].mxu0 %vm2030_vm0, %v1972_v23  ;;  %v500_v61 = vld [vmem:[%s7298_s16 + $0xe8] sm:$0xff]  ;;  %v499_v62 = vld [vmem:[%s7298_s16 + $0xe0] sm:$0xff]  ;;  %v1988_v63 = vld [vmem:[%s7313_s26 + $0xb8] sm:$0xff] }
 0x103   : > { %6152 = vmatprep.mubr.msk.f32.mxu0 %vm2030_vm0, %v1973_v24  ;;  %6355 = vmatpush3.bf16.msra.mxu0 %v6352_v43  ;;  %v1989_v0 = vld [vmem:[%s7313_s26 + $0xc0] sm:$0xff]  ;;  %v502_v1 = vld [vmem:[%s7298_s16 + $0xf8] sm:$0xff]  ;;  %v501_v2 = vld [vmem:[%s7298_s16 + $0xf0] sm:$0xff] }
 0x104   : > { %v1990_v3 = vld [vmem:[%s7313_s26 + $0xc8] sm:$0xff]  ;;  %v1991_v4 = vld [vmem:[%s7313_s26 + $0xd0] sm:$0xff]  ;;  %v503_v6 = vld [vmem:[%s7298_s16 + $0x100] sm:$0xff] }
 0x105   : > { %569 = vperm.xlu1 %6599, %v482_v17   ;;  %566 = vperm.xlu0 %6598, %v481_v18   ;;  %v504_v5 = vld [vmem:[%s7298_s16 + $0x108] sm:$0xff]  ;;  %v1992_v7 = vld [vmem:[%s7313_s26 + $0xd8] sm:$0xff]  ;;  %v1993_v8 = vld [vmem:[%s7313_s26 + $0xe0] sm:$0xff] }
 0x106   : > { %6153 = vmatmul.mubr.msk.f32.gmra.mrb[8].mxu0 %vm2030_vm0, %v1974_v27  ;;  %v506_v9 = vld [vmem:[%s7298_s16 + $0x118] sm:$0xff]  ;;  %v505_v10 = vld [vmem:[%s7298_s16 + $0x110] sm:$0xff]  ;;  %v1994_v11 = vld [vmem:[%s7313_s26 + $0xe8] sm:$0xff] }
 0x107   : > { %6155 = vmatprep.mubr.msk.f32.mxu0 %vm2030_vm0, %v1975_v28  ;;  %v1995_v12 = vld [vmem:[%s7313_s26 + $0xf0] sm:$0xff]  ;;  %v508_v13 = vld [vmem:[%s7298_s16 + $0x128] sm:$0xff]  ;;  %v507_v14 = vld [vmem:[%s7298_s16 + $0x120] sm:$0xff] }
 0x108   : > { %v1996_v15 = vld [vmem:[%s7313_s26 + $0xf8] sm:$0xff]  ;;  %v1997_v16 = vld [vmem:[%s7313_s26 + $0x100] sm:$0xff]  ;;  %v509_v18 = vld [vmem:[%s7298_s16 + $0x130] sm:$0xff] }
 0x109   : > { %575 = vperm.xlu1 %6599, %v484_v21   ;;  %572 = vperm.xlu0 %6598, %v483_v22   ;;  %v510_v17 = vld [vmem:[%s7298_s16 + $0x138] sm:$0xff]  ;;  %v1998_v19 = vld [vmem:[%s7313_s26 + $0x108] sm:$0xff]  ;;  %v511_v21 = vld [vmem:[%s7298_s16 + $0x140] sm:$0xff] }
 0x10a   : > { %6156 = vmatmul.mubr.msk.f32.gmra.mrb[10].mxu0 %vm2030_vm0, %v1976_v31  ;;  %v512_v20 = vld [vmem:[%s7298_s16 + $0x148] sm:$0xff]  ;;  %v514_v22 = vld [vmem:[%s7298_s16 + $0x158] sm:$0xff]  ;;  %v513_v23 = vld [vmem:[%s7298_s16 + $0x150] sm:$0xff] }
 0x10b   : > { %6158 = vmatprep.mubr.msk.f32.mxu0 %vm2030_vm0, %v1977_v32  ;;  %v516_v24 = vld [vmem:[%s7298_s16 + $0x168] sm:$0xff]  ;;  %v517_v27 = vld [vmem:[%s7298_s16 + $0x170] sm:$0xff]  ;;  %v526_v37 = vld [vmem:[%s7298_s16 + $0x1b8] sm:$0xff] }
 0x10c   : > { %v520_v28 = vld [vmem:[%s7298_s16 + $0x188] sm:$0xff]  ;;  %v521_v31 = vld [vmem:[%s7298_s16 + $0x190] sm:$0xff]  ;;  %v527_v43 = vld [vmem:[%s7298_s16 + $0x1c0] sm:$0xff] }
 0x10d   : > { %581 = vperm.xlu1 %6599, %v486_v25   ;;  %578 = vperm.xlu0 %6598, %v485_v26   ;;  %v515_v25 = vld [vmem:[%s7298_s16 + $0x160] sm:$0xff]  ;;  %v518_v26 = vld [vmem:[%s7298_s16 + $0x178] sm:$0xff]  ;;  %v524_v32 = vld [vmem:[%s7298_s16 + $0x1a8] sm:$0xff] }
 0x10e   : > { %6159 = vmatmul.mubr.msk.f32.gmra.mrb[12].mxu0 %vm2030_vm0, %v1978_v41  ;;  %v528_v41 = vld [vmem:[%s7298_s16 + $0x1c8] sm:$0xff] }
 0x10f   : > { %6161 = vmatprep.mubr.msk.f32.mxu0 %vm2030_vm0, %v1979_v44  ;;  %v530_v44 = vld [vmem:[%s7298_s16 + $0x1d8] sm:$0xff] }
 0x111   : > { %587 = vperm.xlu1 %6599, %v488_v29   ;;  %584 = vperm.xlu0 %6598, %v487_v30   ;;  %v519_v29 = vld [vmem:[%s7298_s16 + $0x180] sm:$0xff]  ;;  %v522_v30 = vld [vmem:[%s7298_s16 + $0x198] sm:$0xff] }
 0x112   : > { %6162 = vmatmul.mubr.msk.f32.gmra.mrb[14].mxu0 %vm2030_vm0, %v1980_v47  ;;  %v531_v47 = vld [vmem:[%s7298_s16 + $0x1e0] sm:$0xff] }
 0x113   : > { %6164 = vmatprep.mubr.msk.f32.mxu0 %vm2030_vm0, %v1981_v48  ;;  %v469_v48 = vlaneseq }
 0x115   : > { %593 = vperm.xlu1 %6599, %v490_v35   ;;  %590 = vperm.xlu0 %6598, %v489_v38   ;;  %v523_v35 = vld [vmem:[%s7298_s16 + $0x1a0] sm:$0xff]  ;;  %v525_v38 = vld [vmem:[%s7298_s16 + $0x1b0] sm:$0xff] }
 0x116   : > { %6165 = vmatmul.mubr.msk.f32.gmra.mrb[16].mxu0 %vm2030_vm0, %v1982_v51  ;;  %v7471_v51 = vand.u32 127, %v469_v48  ;;  %v938_v48 = vld [vmem:[%s7306_s21 + $0x98] sm:$0xff] }
 0x117   : > { %6167 = vmatprep.mubr.msk.f32.mxu0 %vm2030_vm0, %v1983_v52  ;;  %v920_v52 = vld [vmem:[%s7306_s21 + $0x8] sm:$0xff] }
 0x119   : > { %599 = vperm.xlu1 %6599, %v492_v45   ;;  %596 = vperm.xlu0 %6598, %v491_v46   ;;  %v529_v45 = vld [vmem:[%s7298_s16 + $0x1d0] sm:$0xff]  ;;  %v532_v46 = vld [vmem:[%s7298_s16 + $0x1e8] sm:$0xff] }
 0x11a   : > { %6168 = vmatmul.mubr.msk.f32.gmra.mrb[18].mxu0 %vm2030_vm0, %v1984_v55 }
 0x11b   : > { %6170 = vmatprep.mubr.msk.f32.mxu0 %vm2030_vm0, %v1985_v56  ;;  %v10970_v56 = vmov 0.0  }
 0x11d   : > { %605 = vperm.xlu1 %6599, %v494_v49   ;;  %602 = vperm.xlu0 %6598, %v493_v50   ;;  %v534_v49 = vld [vmem:[%s7298_s16 + $0x1f8] sm:$0xff]  ;;  %v533_v50 = vld [vmem:[%s7298_s16 + $0x1f0] sm:$0xff] }
 0x11e   : > { %6171 = vmatmul.mubr.msk.f32.gmra.mrb[20].mxu0 %vm2030_vm0, %v1986_v59  ;;  %v921_v59 = vld [vmem:[%s7306_s21 + $0x10] sm:$0xff] }
 0x11f   : > { %6173 = vmatprep.mubr.msk.f32.mxu0 %vm2030_vm0, %v1987_v60 }
 0x121   : > { %611 = vperm.xlu1 %6599, %v496_v53   ;;  %608 = vperm.xlu0 %6598, %v495_v54   ;;  %v919_v53 = vld [vmem:[%s7306_s21] sm:$0xff] }
 0x122   : > { %6174 = vmatmul.mubr.msk.f32.gmra.mrb[22].mxu0 %vm2030_vm0, %v1988_v63 }
 0x123   : > { %6176 = vmatprep.mubr.msk.f32.mxu0 %vm2030_vm0, %v1989_v0  ;;  %v924_v0 = vld [vmem:[%s7306_s21 + $0x28] sm:$0xff] }
 0x125   : > { %617 = vperm.xlu1 %6599, %v498_v57   ;;  %614 = vperm.xlu0 %6598, %v497_v58   ;;  %v922_v58 = vld [vmem:[%s7306_s21 + $0x18] sm:$0xff] }
 0x126   : > { %6177 = vmatmul.mubr.msk.f32.gmra.mrb[24].mxu0 %vm2030_vm0, %v1990_v3 }
 0x127   : > { %6179 = vmatprep.mubr.msk.f32.mxu0 %vm2030_vm0, %v1991_v4 }
 0x129   : > { %623 = vperm.xlu1 %6599, %v500_v61   ;;  %620 = vperm.xlu0 %6598, %v499_v62  }
 0x12a   : > { %6180 = vmatmul.mubr.msk.f32.gmra.mrb[26].mxu0 %vm2030_vm0, %v1992_v7  ;;  %v925_v7 = vld [vmem:[%s7306_s21 + $0x30] sm:$0xff] }
 0x12b   : > { %6182 = vmatprep.mubr.msk.f32.mxu0 %vm2030_vm0, %v1993_v8 }
 0x12d   : > { %629 = vperm.xlu1 %6599, %v502_v1   ;;  %626 = vperm.xlu0 %6598, %v501_v2   ;;  %v923_v1 = vld [vmem:[%s7306_s21 + $0x20] sm:$0xff] }
 0x12e   : > { %6183 = vmatmul.mubr.msk.f32.gmra.mrb[28].mxu0 %vm2030_vm0, %v1994_v11 }
 0x12f   : > { %6185 = vmatprep.mubr.msk.f32.mxu0 %vm2030_vm0, %v1995_v12  ;;  %v928_v12 = vld [vmem:[%s7306_s21 + $0x48] sm:$0xff] }
 0x131   : > { %635 = vperm.xlu1 %6599, %v504_v5   ;;  %632 = vperm.xlu0 %6598, %v503_v6   ;;  %v926_v6 = vld [vmem:[%s7306_s21 + $0x38] sm:$0xff] }
 0x132   : > { %6186 = vmatmul.mubr.msk.f32.gmra.mrb[30].mxu0 %vm2030_vm0, %v1996_v15 }
 0x133   : > { %6188 = vmatprep.mubr.msk.f32.mxu0 %vm2030_vm0, %v1997_v16 }
 0x135   : > { %641 = vperm.xlu1 %6599, %v506_v9   ;;  %638 = vperm.xlu0 %6598, %v505_v10  }
 0x136   : > { %6189 = vmatmul.mubr.msk.f32.gmra.mrb[32].mxu0 %vm2030_vm0, %v1998_v19  ;;  %v929_v19 = vld [vmem:[%s7306_s21 + $0x50] sm:$0xff] }
 0x139   : > { %647 = vperm.xlu1 %6599, %v508_v13   ;;  %644 = vperm.xlu0 %6598, %v507_v14   ;;  %v927_v13 = vld [vmem:[%s7306_s21 + $0x40] sm:$0xff] }
 0x13d   : > { %653 = vperm.xlu1 %6599, %v510_v17   ;;  %650 = vperm.xlu0 %6598, %v509_v18   ;;  %v930_v18 = vld [vmem:[%s7306_s21 + $0x58] sm:$0xff] }
 0x141   : > { %659 = vperm.xlu1 %6599, %v512_v20   ;;  %656 = vperm.xlu0 %6598, %v511_v21  }
 0x145   : > { %665 = vperm.xlu1 %6599, %v514_v22   ;;  %662 = vperm.xlu0 %6598, %v513_v23  }
 0x149   : > { %671 = vperm.xlu1 %6599, %v516_v24   ;;  %668 = vperm.xlu0 %6598, %v515_v25   ;;  %v932_v24 = vld [vmem:[%s7306_s21 + $0x68] sm:$0xff]  ;;  %v931_v25 = vld [vmem:[%s7306_s21 + $0x60] sm:$0xff] }
 0x14d   : > { %677 = vperm.xlu1 %6599, %v518_v26   ;;  %674 = vperm.xlu0 %6598, %v517_v27  }
 0x151   : > { %683 = vperm.xlu1 %6599, %v520_v28   ;;  %680 = vperm.xlu0 %6598, %v519_v29  }
 0x155   : > { %689 = vperm.xlu1 %6599, %v522_v30   ;;  %686 = vperm.xlu0 %6598, %v521_v31   ;;  %v934_v30 = vld [vmem:[%s7306_s21 + $0x78] sm:$0xff]  ;;  %v933_v31 = vld [vmem:[%s7306_s21 + $0x70] sm:$0xff] }
 0x159   : > { %695 = vperm.xlu1 %6599, %v524_v32   ;;  %692 = vperm.xlu0 %6598, %v523_v35  }
 0x15d   : > { %701 = vperm.xlu1 %6599, %v526_v37   ;;  %698 = vperm.xlu0 %6598, %v525_v38  }
 0x161   : > { %707 = vperm.xlu1 %6599, %v528_v41   ;;  %704 = vperm.xlu0 %6598, %v527_v43   ;;  %v936_v41 = vld [vmem:[%s7306_s21 + $0x88] sm:$0xff]  ;;  %v935_v43 = vld [vmem:[%s7306_s21 + $0x80] sm:$0xff] }
 0x165   : > { %713 = vperm.xlu1 %6599, %v530_v44   ;;  %710 = vperm.xlu0 %6598, %v529_v45  }
 0x169   : > { %719 = vperm.xlu1 %6599, %v532_v46   ;;  %716 = vperm.xlu0 %6598, %v531_v47  }
 0x16d   : > { %725 = vperm.xlu1 %6599, %v534_v49   ;;  %722 = vperm.xlu0 %6598, %v533_v50   ;;  %v937_v49 = vld [vmem:[%s7306_s21 + $0x90] sm:$0xff] }
 0x170   : > { %v543_v54 = vpop.permute.xlu1 %542  ;;  %v537_v55 = vpop.permute.xlu0 %536 }
 0x171   : > { %vm727_vm2 = vcmp.eq.s32.totalorder %v537_v55, %v7471_v51  ;;  %987 = vperm.xlu1 %6599, %v920_v52   ;;  %984 = vperm.xlu0 %6598, %v919_v53   ;;  %vm729_vm3 = vcmp.eq.s32.totalorder %v543_v54, %v7471_v51  ;;  %v940_v55 = vld [vmem:[%s7306_s21 + $0xa8] sm:$0xff] }
 0x172   : > { %v5498_v57 = vsel %vm727_vm2, 1.0, %v10970_v56  ;;  %v5500_v62 = vsel %vm729_vm3, 1.0, %v10970_v56 }
 0x173   : > { %6244 = vmatprep.mubr.msk.f32.mxu0 %vm1387_vm1, %v5498_v57  ;;  %v939_v57 = vld [vmem:[%s7306_s21 + $0xa0] sm:$0xff] }
 0x174   : > { %v546_v60 = vpop.permute.xlu1 %545  ;;  %v540_v61 = vpop.permute.xlu0 %539 }
 0x175   : > { %vm728_vm4 = vcmp.eq.s32.totalorder %v540_v61, %v7471_v51  ;;  %993 = vperm.xlu1 %6599, %v922_v58   ;;  %990 = vperm.xlu0 %6598, %v921_v59   ;;  %vm730_vm5 = vcmp.eq.s32.totalorder %v546_v60, %v7471_v51 }
 0x176   : > { %v5499_v63 = vsel %vm728_vm4, 1.0, %v10970_v56  ;;  %v5501_v4 = vsel %vm730_vm5, 1.0, %v10970_v56 }
 0x177   : > { %6245 = vmatmul.mubr.msk.f32.vlgmr.msra.gmra.mrb[0].mxu0 %vm1387_vm1, %v5499_v63  ;;  %v941_v63 = vld [vmem:[%s7306_s21 + $0xb0] sm:$0xff] }
 0x178   : > { %v552_v2 = vpop.permute.xlu1 %551  ;;  %6247 = vmatprep.mubr.msk.f32.mxu0 %vm1387_vm1, %v5500_v62  ;;  %v549_v3 = vpop.permute.xlu0 %548  ;;  %v942_v62 = vld [vmem:[%s7306_s21 + $0xb8] sm:$0xff] }
 0x179   : > { %vm731_vm6 = vcmp.eq.s32.totalorder %v549_v3, %v7471_v51  ;;  %999 = vperm.xlu1 %6599, %v924_v0   ;;  %996 = vperm.xlu0 %6598, %v923_v1   ;;  %vm732_vm7 = vcmp.eq.s32.totalorder %v552_v2, %v7471_v51 }
 0x17a   : > { %v5502_v5 = vsel %vm731_vm6, 1.0, %v10970_v56  ;;  %v5503_v10 = vsel %vm732_vm7, 1.0, %v10970_v56 }
 0x17b   : > { %6248 = vmatmul.mubr.msk.f32.gmra.mrb[2].mxu0 %vm1387_vm1, %v5501_v4  ;;  %v944_v4 = vld [vmem:[%s7306_s21 + $0xc8] sm:$0xff] }
 0x17c   : > { %v558_v8 = vpop.permute.xlu1 %557  ;;  %6250 = vmatprep.mubr.msk.f32.mxu0 %vm1387_vm1, %v5502_v5  ;;  %v555_v9 = vpop.permute.xlu0 %554  ;;  %v943_v5 = vld [vmem:[%s7306_s21 + $0xc0] sm:$0xff] }
 0x17d   : > { %vm733_vm8 = vcmp.eq.s32.totalorder %v555_v9, %v7471_v51  ;;  %1005 = vperm.xlu1 %6599, %v926_v6   ;;  %1002 = vperm.xlu0 %6598, %v925_v7   ;;  %vm734_vm9 = vcmp.eq.s32.totalorder %v558_v8, %v7471_v51 }
 0x17e   : > { %v5504_v11 = vsel %vm733_vm8, 1.0, %v10970_v56  ;;  %v5505_v16 = vsel %vm734_vm9, 1.0, %v10970_v56 }
 0x17f   : > { %6251 = vmatmul.mubr.msk.f32.gmra.mrb[4].mxu0 %vm1387_vm1, %v5503_v10  ;;  %v946_v10 = vld [vmem:[%s7306_s21 + $0xd8] sm:$0xff] }
 0x180   : > { %v564_v14 = vpop.permute.xlu1 %563  ;;  %6253 = vmatprep.mubr.msk.f32.mxu0 %vm1387_vm1, %v5504_v11  ;;  %v561_v15 = vpop.permute.xlu0 %560  ;;  %v945_v11 = vld [vmem:[%s7306_s21 + $0xd0] sm:$0xff] }
 0x181   : > { %vm735_vm10 = vcmp.eq.s32.totalorder %v561_v15, %v7471_v51  ;;  %1011 = vperm.xlu1 %6599, %v928_v12   ;;  %1008 = vperm.xlu0 %6598, %v927_v13   ;;  %vm736_vm11 = vcmp.eq.s32.totalorder %v564_v14, %v7471_v51 }
 0x182   : > { %v5506_v17 = vsel %vm735_vm10, 1.0, %v10970_v56  ;;  %v5507_v22 = vsel %vm736_vm11, 1.0, %v10970_v56 }
 0x183   : > { %6254 = vmatmul.mubr.msk.f32.gmra.mrb[6].mxu0 %vm1387_vm1, %v5505_v16  ;;  %v948_v16 = vld [vmem:[%s7306_s21 + $0xe8] sm:$0xff] }
 0x184   : > { %v570_v20 = vpop.permute.xlu1 %569  ;;  %6256 = vmatprep.mubr.msk.f32.mxu0 %vm1387_vm1, %v5506_v17  ;;  %v567_v21 = vpop.permute.xlu0 %566  ;;  %v947_v17 = vld [vmem:[%s7306_s21 + $0xe0] sm:$0xff] }
 0x185   : > { %vm737_vm12 = vcmp.eq.s32.totalorder %v567_v21, %v7471_v51  ;;  %1017 = vperm.xlu1 %6599, %v930_v18   ;;  %1014 = vperm.xlu0 %6598, %v929_v19   ;;  %vm738_vm13 = vcmp.eq.s32.totalorder %v570_v20, %v7471_v51 }
 0x186   : > { %v5508_v23 = vsel %vm737_vm12, 1.0, %v10970_v56  ;;  %v5509_v28 = vsel %vm738_vm13, 1.0, %v10970_v56 }
 0x187   : > { %6257 = vmatmul.mubr.msk.f32.gmra.mrb[8].mxu0 %vm1387_vm1, %v5507_v22  ;;  %v950_v22 = vld [vmem:[%s7306_s21 + $0xf8] sm:$0xff] }
 0x188   : > { %v576_v26 = vpop.permute.xlu1 %575  ;;  %6259 = vmatprep.mubr.msk.f32.mxu0 %vm1387_vm1, %v5508_v23  ;;  %v573_v27 = vpop.permute.xlu0 %572  ;;  %v949_v23 = vld [vmem:[%s7306_s21 + $0xf0] sm:$0xff] }
 0x189   : > { %vm739_vm14 = vcmp.eq.s32.totalorder %v573_v27, %v7471_v51  ;;  %1023 = vperm.xlu1 %6599, %v932_v24   ;;  %1020 = vperm.xlu0 %6598, %v931_v25   ;;  %vm740_vm15 = vcmp.eq.s32.totalorder %v576_v26, %v7471_v51 }
 0x18a   : > { %v5510_v29 = vsel %vm739_vm14, 1.0, %v10970_v56  ;;  %v5511_v37 = vsel %vm740_vm15, 1.0, %v10970_v56 }
 0x18b   : > { %6260 = vmatmul.mubr.msk.f32.gmra.mrb[10].mxu0 %vm1387_vm1, %v5509_v28  ;;  %v952_v28 = vld [vmem:[%s7306_s21 + $0x108] sm:$0xff] }
 0x18c   : > { %v582_v32 = vpop.permute.xlu1 %581  ;;  %6262 = vmatprep.mubr.msk.f32.mxu0 %vm1387_vm1, %v5510_v29  ;;  %v579_v35 = vpop.permute.xlu0 %578  ;;  %v951_v29 = vld [vmem:[%s7306_s21 + $0x100] sm:$0xff] }
 0x18d   : > { %vm741_vm2 = vcmp.eq.s32.totalorder %v579_v35, %v7471_v51  ;;  %1029 = vperm.xlu1 %6599, %v934_v30   ;;  %1026 = vperm.xlu0 %6598, %v933_v31   ;;  %vm742_vm3 = vcmp.eq.s32.totalorder %v582_v32, %v7471_v51 }
 0x18e   : > { %v5512_v38 = vsel %vm741_vm2, 1.0, %v10970_v56  ;;  %v5513_v46 = vsel %vm742_vm3, 1.0, %v10970_v56 }
 0x18f   : > { %6263 = vmatmul.mubr.msk.f32.gmra.mrb[12].mxu0 %vm1387_vm1, %v5511_v37  ;;  %v954_v37 = vld [vmem:[%s7306_s21 + $0x118] sm:$0xff] }
 0x190   : > { %v588_v44 = vpop.permute.xlu1 %587  ;;  %6265 = vmatprep.mubr.msk.f32.mxu0 %vm1387_vm1, %v5512_v38  ;;  %v585_v45 = vpop.permute.xlu0 %584  ;;  %v953_v38 = vld [vmem:[%s7306_s21 + $0x110] sm:$0xff] }
 0x191   : > { %vm743_vm4 = vcmp.eq.s32.totalorder %v585_v45, %v7471_v51  ;;  %1035 = vperm.xlu1 %6599, %v936_v41   ;;  %1032 = vperm.xlu0 %6598, %v935_v43   ;;  %vm744_vm5 = vcmp.eq.s32.totalorder %v588_v44, %v7471_v51 }
 0x192   : > { %v5514_v47 = vsel %vm743_vm4, 1.0, %v10970_v56  ;;  %v5515_v53 = vsel %vm744_vm5, 1.0, %v10970_v56 }
 0x193   : > { %6266 = vmatmul.mubr.msk.f32.gmra.mrb[14].mxu0 %vm1387_vm1, %v5513_v46  ;;  %v956_v46 = vld [vmem:[%s7306_s21 + $0x128] sm:$0xff] }
 0x194   : > { %v594_v50 = vpop.permute.xlu1 %593  ;;  %6268 = vmatprep.mubr.msk.f32.mxu0 %vm1387_vm1, %v5514_v47  ;;  %v591_v52 = vpop.permute.xlu0 %590  ;;  %v955_v47 = vld [vmem:[%s7306_s21 + $0x120] sm:$0xff] }
 0x195   : > { %vm745_vm6 = vcmp.eq.s32.totalorder %v591_v52, %v7471_v51  ;;  %1041 = vperm.xlu1 %6599, %v938_v48   ;;  %1038 = vperm.xlu0 %6598, %v937_v49   ;;  %vm746_vm7 = vcmp.eq.s32.totalorder %v594_v50, %v7471_v51 }
 0x196   : > { %v5516_v54 = vsel %vm745_vm6, 1.0, %v10970_v56  ;;  %v5517_v60 = vsel %vm746_vm7, 1.0, %v10970_v56 }
 0x197   : > { %6269 = vmatmul.mubr.msk.f32.gmra.mrb[16].mxu0 %vm1387_vm1, %v5515_v53  ;;  %v958_v53 = vld [vmem:[%s7306_s21 + $0x138] sm:$0xff] }
 0x198   : > { %v600_v58 = vpop.permute.xlu1 %599  ;;  %6271 = vmatprep.mubr.msk.f32.mxu0 %vm1387_vm1, %v5516_v54  ;;  %v597_v59 = vpop.permute.xlu0 %596  ;;  %v957_v54 = vld [vmem:[%s7306_s21 + $0x130] sm:$0xff] }
 0x199   : > { %vm747_vm8 = vcmp.eq.s32.totalorder %v597_v59, %v7471_v51  ;;  %1047 = vperm.xlu1 %6599, %v940_v55   ;;  %1044 = vperm.xlu0 %6598, %v939_v57   ;;  %vm748_vm9 = vcmp.eq.s32.totalorder %v600_v58, %v7471_v51 }
 0x19a   : > { %v5518_v61 = vsel %vm747_vm8, 1.0, %v10970_v56  ;;  %v5519_v2 = vsel %vm748_vm9, 1.0, %v10970_v56 }
 0x19b   : > { %6272 = vmatmul.mubr.msk.f32.gmra.mrb[18].mxu0 %vm1387_vm1, %v5517_v60  ;;  %v960_v60 = vld [vmem:[%s7306_s21 + $0x148] sm:$0xff] }
 0x19c   : > { %v606_v0 = vpop.permute.xlu1 %605  ;;  %6274 = vmatprep.mubr.msk.f32.mxu0 %vm1387_vm1, %v5518_v61  ;;  %v603_v1 = vpop.permute.xlu0 %602  ;;  %v959_v61 = vld [vmem:[%s7306_s21 + $0x140] sm:$0xff] }
 0x19d   : > { %vm749_vm10 = vcmp.eq.s32.totalorder %v603_v1, %v7471_v51  ;;  %1053 = vperm.xlu1 %6599, %v942_v62   ;;  %1050 = vperm.xlu0 %6598, %v941_v63   ;;  %vm750_vm11 = vcmp.eq.s32.totalorder %v606_v0, %v7471_v51 }
 0x19e   : > { %v5520_v3 = vsel %vm749_vm10, 1.0, %v10970_v56  ;;  %v5521_v8 = vsel %vm750_vm11, 1.0, %v10970_v56 }
 0x19f   : > { %6275 = vmatmul.mubr.msk.f32.gmra.mrb[20].mxu0 %vm1387_vm1, %v5519_v2  ;;  %v962_v2 = vld [vmem:[%s7306_s21 + $0x158] sm:$0xff] }
 0x1a0   : > { %v612_v6 = vpop.permute.xlu1 %611  ;;  %6277 = vmatprep.mubr.msk.f32.mxu0 %vm1387_vm1, %v5520_v3  ;;  %v609_v7 = vpop.permute.xlu0 %608  ;;  %v961_v3 = vld [vmem:[%s7306_s21 + $0x150] sm:$0xff] }
 0x1a1   : > { %vm751_vm12 = vcmp.eq.s32.totalorder %v609_v7, %v7471_v51  ;;  %1059 = vperm.xlu1 %6599, %v944_v4   ;;  %1056 = vperm.xlu0 %6598, %v943_v5   ;;  %vm752_vm13 = vcmp.eq.s32.totalorder %v612_v6, %v7471_v51 }
 0x1a2   : > { %v5522_v9 = vsel %vm751_vm12, 1.0, %v10970_v56  ;;  %v5523_v14 = vsel %vm752_vm13, 1.0, %v10970_v56 }
 0x1a3   : > { %6278 = vmatmul.mubr.msk.f32.gmra.mrb[22].mxu0 %vm1387_vm1, %v5521_v8  ;;  %v964_v8 = vld [vmem:[%s7306_s21 + $0x168] sm:$0xff] }
 0x1a4   : > { %v618_v12 = vpop.permute.xlu1 %617  ;;  %6280 = vmatprep.mubr.msk.f32.mxu0 %vm1387_vm1, %v5522_v9  ;;  %v615_v13 = vpop.permute.xlu0 %614  ;;  %v963_v9 = vld [vmem:[%s7306_s21 + $0x160] sm:$0xff] }
 0x1a5   : > { %vm753_vm14 = vcmp.eq.s32.totalorder %v615_v13, %v7471_v51  ;;  %1065 = vperm.xlu1 %6599, %v946_v10   ;;  %1062 = vperm.xlu0 %6598, %v945_v11   ;;  %vm754_vm15 = vcmp.eq.s32.totalorder %v618_v12, %v7471_v51 }
 0x1a6   : > { %v5524_v15 = vsel %vm753_vm14, 1.0, %v10970_v56  ;;  %v5525_v20 = vsel %vm754_vm15, 1.0, %v10970_v56 }
 0x1a7   : > { %6281 = vmatmul.mubr.msk.f32.gmra.mrb[24].mxu0 %vm1387_vm1, %v5523_v14  ;;  %v966_v14 = vld [vmem:[%s7306_s21 + $0x178] sm:$0xff] }
 0x1a8   : > { %v624_v18 = vpop.permute.xlu1 %623  ;;  %6283 = vmatprep.mubr.msk.f32.mxu0 %vm1387_vm1, %v5524_v15  ;;  %v621_v19 = vpop.permute.xlu0 %620  ;;  %v965_v15 = vld [vmem:[%s7306_s21 + $0x170] sm:$0xff] }
 0x1a9   : > { %vm755_vm2 = vcmp.eq.s32.totalorder %v621_v19, %v7471_v51  ;;  %1071 = vperm.xlu1 %6599, %v948_v16   ;;  %1068 = vperm.xlu0 %6598, %v947_v17   ;;  %vm756_vm3 = vcmp.eq.s32.totalorder %v624_v18, %v7471_v51 }
 0x1aa   : > { %v5526_v21 = vsel %vm755_vm2, 1.0, %v10970_v56  ;;  %v5527_v26 = vsel %vm756_vm3, 1.0, %v10970_v56 }
 0x1ab   : > { %6284 = vmatmul.mubr.msk.f32.gmra.mrb[26].mxu0 %vm1387_vm1, %v5525_v20  ;;  %v968_v20 = vld [vmem:[%s7306_s21 + $0x188] sm:$0xff] }
 0x1ac   : > { %v630_v24 = vpop.permute.xlu1 %629  ;;  %6286 = vmatprep.mubr.msk.f32.mxu0 %vm1387_vm1, %v5526_v21  ;;  %v627_v25 = vpop.permute.xlu0 %626  ;;  %v967_v21 = vld [vmem:[%s7306_s21 + $0x180] sm:$0xff] }
 0x1ad   : > { %vm757_vm4 = vcmp.eq.s32.totalorder %v627_v25, %v7471_v51  ;;  %1077 = vperm.xlu1 %6599, %v950_v22   ;;  %1074 = vperm.xlu0 %6598, %v949_v23   ;;  %vm758_vm5 = vcmp.eq.s32.totalorder %v630_v24, %v7471_v51 }
 0x1ae   : > { %v5528_v27 = vsel %vm757_vm4, 1.0, %v10970_v56  ;;  %v5529_v32 = vsel %vm758_vm5, 1.0, %v10970_v56 }
 0x1af   : > { %6287 = vmatmul.mubr.msk.f32.gmra.mrb[28].mxu0 %vm1387_vm1, %v5527_v26  ;;  %v970_v26 = vld [vmem:[%s7306_s21 + $0x198] sm:$0xff] }
 0x1b0   : > { %v636_v30 = vpop.permute.xlu1 %635  ;;  %6289 = vmatprep.mubr.msk.f32.mxu0 %vm1387_vm1, %v5528_v27  ;;  %v633_v31 = vpop.permute.xlu0 %632  ;;  %v969_v27 = vld [vmem:[%s7306_s21 + $0x190] sm:$0xff] }
 0x1b1   : > { %vm759_vm6 = vcmp.eq.s32.totalorder %v633_v31, %v7471_v51  ;;  %1083 = vperm.xlu1 %6599, %v952_v28   ;;  %1080 = vperm.xlu0 %6598, %v951_v29   ;;  %vm760_vm7 = vcmp.eq.s32.totalorder %v636_v30, %v7471_v51 }
 0x1b2   : > { %v5530_v35 = vsel %vm759_vm6, 1.0, %v10970_v56  ;;  %v5531_v44 = vsel %vm760_vm7, 1.0, %v10970_v56 }
 0x1b3   : > { %6290 = vmatmul.mubr.msk.f32.gmra.mrb[30].mxu0 %vm1387_vm1, %v5529_v32  ;;  %v972_v32 = vld [vmem:[%s7306_s21 + $0x1a8] sm:$0xff] }
 0x1b4   : > { %v642_v41 = vpop.permute.xlu1 %641  ;;  %6292 = vmatprep.mubr.msk.f32.mxu0 %vm1387_vm1, %v5530_v35  ;;  %v639_v43 = vpop.permute.xlu0 %638  ;;  %v971_v35 = vld [vmem:[%s7306_s21 + $0x1a0] sm:$0xff] }
 0x1b5   : > { %vm761_vm8 = vcmp.eq.s32.totalorder %v639_v43, %v7471_v51  ;;  %1089 = vperm.xlu1 %6599, %v954_v37   ;;  %1086 = vperm.xlu0 %6598, %v953_v38   ;;  %vm762_vm9 = vcmp.eq.s32.totalorder %v642_v41, %v7471_v51 }
 0x1b6   : > { %v5532_v45 = vsel %vm761_vm8, 1.0, %v10970_v56  ;;  %v5533_v50 = vsel %vm762_vm9, 1.0, %v10970_v56 }
 0x1b7   : > { %6293 = vmatmul.mubr.msk.f32.gmra.mrb[32].mxu0 %vm1387_vm1, %v5531_v44  ;;  %v974_v44 = vld [vmem:[%s7306_s21 + $0x1b8] sm:$0xff] }
 0x1b8   : > { %v648_v48 = vpop.permute.xlu1 %647  ;;  %6295 = vmatprep.mubr.msk.f32.mxu0 %vm1387_vm1, %v5532_v45  ;;  %v645_v49 = vpop.permute.xlu0 %644  ;;  %v973_v45 = vld [vmem:[%s7306_s21 + $0x1b0] sm:$0xff] }
 0x1b9   : > { %vm763_vm10 = vcmp.eq.s32.totalorder %v645_v49, %v7471_v51  ;;  %1095 = vperm.xlu1 %6599, %v956_v46   ;;  %1092 = vperm.xlu0 %6598, %v955_v47   ;;  %vm764_vm11 = vcmp.eq.s32.totalorder %v648_v48, %v7471_v51 }
 0x1ba   : > { %v5534_v52 = vsel %vm763_vm10, 1.0, %v10970_v56  ;;  %v5535_v58 = vsel %vm764_vm11, 1.0, %v10970_v56 }
 0x1bb   : > { %6296 = vmatmul.mubr.msk.f32.gmra.mrb[34].mxu0 %vm1387_vm1, %v5533_v50  ;;  %v976_v50 = vld [vmem:[%s7306_s21 + $0x1c8] sm:$0xff] }
 0x1bc   : > { %v654_v55 = vpop.permute.xlu1 %653  ;;  %6298 = vmatprep.mubr.msk.f32.mxu0 %vm1387_vm1, %v5534_v52  ;;  %v651_v57 = vpop.permute.xlu0 %650  ;;  %v975_v52 = vld [vmem:[%s7306_s21 + $0x1c0] sm:$0xff] }
 0x1bd   : > { %vm765_vm12 = vcmp.eq.s32.totalorder %v651_v57, %v7471_v51  ;;  %1101 = vperm.xlu1 %6599, %v958_v53   ;;  %1098 = vperm.xlu0 %6598, %v957_v54   ;;  %vm766_vm13 = vcmp.eq.s32.totalorder %v654_v55, %v7471_v51 }
 0x1be   : > { %v5536_v59 = vsel %vm765_vm12, 1.0, %v10970_v56  ;;  %v5537_v0 = vsel %vm766_vm13, 1.0, %v10970_v56 }
 0x1bf   : > { %6299 = vmatmul.mubr.msk.f32.gmra.mrb[36].mxu0 %vm1387_vm1, %v5535_v58  ;;  %v978_v58 = vld [vmem:[%s7306_s21 + $0x1d8] sm:$0xff] }
 0x1c0   : > { %v660_v62 = vpop.permute.xlu1 %659  ;;  %6301 = vmatprep.mubr.msk.f32.mxu0 %vm1387_vm1, %v5536_v59  ;;  %v657_v63 = vpop.permute.xlu0 %656  ;;  %v977_v59 = vld [vmem:[%s7306_s21 + $0x1d0] sm:$0xff] }
 0x1c1   : > { %vm767_vm14 = vcmp.eq.s32.totalorder %v657_v63, %v7471_v51  ;;  %1107 = vperm.xlu1 %6599, %v960_v60   ;;  %1104 = vperm.xlu0 %6598, %v959_v61   ;;  %vm768_vm15 = vcmp.eq.s32.totalorder %v660_v62, %v7471_v51 }
 0x1c2   : > { %v5538_v1 = vsel %vm767_vm14, 1.0, %v10970_v56  ;;  %v5539_v6 = vsel %vm768_vm15, 1.0, %v10970_v56 }
 0x1c3   : > { %6302 = vmatmul.mubr.msk.f32.gmra.mrb[38].mxu0 %vm1387_vm1, %v5537_v0  ;;  %v980_v0 = vld [vmem:[%s7306_s21 + $0x1e8] sm:$0xff] }
 0x1c4   : > { %v666_v4 = vpop.permute.xlu1 %665  ;;  %6304 = vmatprep.mubr.msk.f32.mxu0 %vm1387_vm1, %v5538_v1  ;;  %v663_v5 = vpop.permute.xlu0 %662  ;;  %v979_v1 = vld [vmem:[%s7306_s21 + $0x1e0] sm:$0xff] }
 0x1c5   : > { %vm769_vm2 = vcmp.eq.s32.totalorder %v663_v5, %v7471_v51  ;;  %1113 = vperm.xlu1 %6599, %v962_v2   ;;  %1110 = vperm.xlu0 %6598, %v961_v3   ;;  %vm770_vm3 = vcmp.eq.s32.totalorder %v666_v4, %v7471_v51 }
 0x1c6   : > { %v5540_v7 = vsel %vm769_vm2, 1.0, %v10970_v56  ;;  %v5541_v12 = vsel %vm770_vm3, 1.0, %v10970_v56 }
 0x1c7   : > { %6305 = vmatmul.mubr.msk.f32.gmra.mrb[40].mxu0 %vm1387_vm1, %v5539_v6  ;;  %v982_v6 = vld [vmem:[%s7306_s21 + $0x1f8] sm:$0xff] }
 0x1c8   : > { %v672_v10 = vpop.permute.xlu1 %671  ;;  %6307 = vmatprep.mubr.msk.f32.mxu0 %vm1387_vm1, %v5540_v7  ;;  %v669_v11 = vpop.permute.xlu0 %668  ;;  %v981_v7 = vld [vmem:[%s7306_s21 + $0x1f0] sm:$0xff] }
 0x1c9   : > { %vm771_vm4 = vcmp.eq.s32.totalorder %v669_v11, %v7471_v51  ;;  %1119 = vperm.xlu1 %6599, %v964_v8   ;;  %1116 = vperm.xlu0 %6598, %v963_v9   ;;  %vm772_vm5 = vcmp.eq.s32.totalorder %v672_v10, %v7471_v51 }
 0x1ca   : > { %v5542_v13 = vsel %vm771_vm4, 1.0, %v10970_v56  ;;  %v5543_v18 = vsel %vm772_vm5, 1.0, %v10970_v56 }
 0x1cb   : > { %6308 = vmatmul.mubr.msk.f32.gmra.mrb[42].mxu0 %vm1387_vm1, %v5541_v12 }
 0x1cc   : > { %v678_v16 = vpop.permute.xlu1 %677  ;;  %6310 = vmatprep.mubr.msk.f32.mxu0 %vm1387_vm1, %v5542_v13  ;;  %v675_v17 = vpop.permute.xlu0 %674 }
 0x1cd   : > { %vm773_vm6 = vcmp.eq.s32.totalorder %v675_v17, %v7471_v51  ;;  %1125 = vperm.xlu1 %6599, %v966_v14   ;;  %1122 = vperm.xlu0 %6598, %v965_v15   ;;  %vm774_vm7 = vcmp.eq.s32.totalorder %v678_v16, %v7471_v51 }
 0x1ce   : > { %v5544_v19 = vsel %vm773_vm6, 1.0, %v10970_v56  ;;  %v5545_v24 = vsel %vm774_vm7, 1.0, %v10970_v56 }
 0x1cf   : > { %6311 = vmatmul.mubr.msk.f32.gmra.mrb[44].mxu0 %vm1387_vm1, %v5543_v18 }
 0x1d0   : > { %v684_v22 = vpop.permute.xlu1 %683  ;;  %6313 = vmatprep.mubr.msk.f32.mxu0 %vm1387_vm1, %v5544_v19  ;;  %v681_v23 = vpop.permute.xlu0 %680 }
 0x1d1   : > { %vm775_vm8 = vcmp.eq.s32.totalorder %v681_v23, %v7471_v51  ;;  %1131 = vperm.xlu1 %6599, %v968_v20   ;;  %1128 = vperm.xlu0 %6598, %v967_v21   ;;  %vm776_vm9 = vcmp.eq.s32.totalorder %v684_v22, %v7471_v51 }
 0x1d2   : > { %v5546_v25 = vsel %vm775_vm8, 1.0, %v10970_v56  ;;  %v5547_v30 = vsel %vm776_vm9, 1.0, %v10970_v56 }
 0x1d3   : > { %6314 = vmatmul.mubr.msk.f32.gmra.mrb[46].mxu0 %vm1387_vm1, %v5545_v24 }
 0x1d4   : > { %v690_v28 = vpop.permute.xlu1 %689  ;;  %6316 = vmatprep.mubr.msk.f32.mxu0 %vm1387_vm1, %v5546_v25  ;;  %v687_v29 = vpop.permute.xlu0 %686 }
 0x1d5   : > { %vm777_vm10 = vcmp.eq.s32.totalorder %v687_v29, %v7471_v51  ;;  %1137 = vperm.xlu1 %6599, %v970_v26   ;;  %1134 = vperm.xlu0 %6598, %v969_v27   ;;  %vm778_vm11 = vcmp.eq.s32.totalorder %v690_v28, %v7471_v51 }
 0x1d6   : > { %v5548_v31 = vsel %vm777_vm10, 1.0, %v10970_v56  ;;  %v5549_v41 = vsel %vm778_vm11, 1.0, %v10970_v56 }
 0x1d7   : > { %6317 = vmatmul.mubr.msk.f32.gmra.mrb[48].mxu0 %vm1387_vm1, %v5547_v30 }
 0x1d8   : > { %v696_v37 = vpop.permute.xlu1 %695  ;;  %6319 = vmatprep.mubr.msk.f32.mxu0 %vm1387_vm1, %v5548_v31  ;;  %v693_v38 = vpop.permute.xlu0 %692 }
 0x1d9   : > { %vm779_vm12 = vcmp.eq.s32.totalorder %v693_v38, %v7471_v51  ;;  %1143 = vperm.xlu1 %6599, %v972_v32   ;;  %1140 = vperm.xlu0 %6598, %v971_v35   ;;  %vm780_vm13 = vcmp.eq.s32.totalorder %v696_v37, %v7471_v51 }
 0x1da   : > { %v5550_v43 = vsel %vm779_vm12, 1.0, %v10970_v56  ;;  %v5551_v48 = vsel %vm780_vm13, 1.0, %v10970_v56 }
 0x1db   : > { %6320 = vmatmul.mubr.msk.f32.gmra.mrb[50].mxu0 %vm1387_vm1, %v5549_v41 }
 0x1dc   : > { %v702_v46 = vpop.permute.xlu1 %701  ;;  %6322 = vmatprep.mubr.msk.f32.mxu0 %vm1387_vm1, %v5550_v43  ;;  %v699_v47 = vpop.permute.xlu0 %698 }
 0x1dd   : > { %vm781_vm14 = vcmp.eq.s32.totalorder %v699_v47, %v7471_v51  ;;  %1149 = vperm.xlu1 %6599, %v974_v44   ;;  %1146 = vperm.xlu0 %6598, %v973_v45   ;;  %vm782_vm15 = vcmp.eq.s32.totalorder %v702_v46, %v7471_v51 }
 0x1de   : > { %v5552_v49 = vsel %vm781_vm14, 1.0, %v10970_v56  ;;  %v5553_v55 = vsel %vm782_vm15, 1.0, %v10970_v56 }
 0x1df   : > { %6323 = vmatmul.mubr.msk.f32.gmra.mrb[52].mxu0 %vm1387_vm1, %v5551_v48 }
 0x1e0   : > { %v708_v53 = vpop.permute.xlu1 %707  ;;  %6325 = vmatprep.mubr.msk.f32.mxu0 %vm1387_vm1, %v5552_v49  ;;  %v705_v54 = vpop.permute.xlu0 %704 }
 0x1e1   : > { %vm783_vm2 = vcmp.eq.s32.totalorder %v705_v54, %v7471_v51  ;;  %1155 = vperm.xlu1 %6599, %v976_v50   ;;  %1152 = vperm.xlu0 %6598, %v975_v52   ;;  %vm784_vm3 = vcmp.eq.s32.totalorder %v708_v53, %v7471_v51 }
 0x1e2   : > { %v5554_v57 = vsel %vm783_vm2, 1.0, %v10970_v56  ;;  %v5555_v62 = vsel %vm784_vm3, 1.0, %v10970_v56 }
 0x1e3   : > { %6326 = vmatmul.mubr.msk.f32.gmra.mrb[54].mxu0 %vm1387_vm1, %v5553_v55 }
 0x1e4   : > { %v714_v60 = vpop.permute.xlu1 %713  ;;  %6328 = vmatprep.mubr.msk.f32.mxu0 %vm1387_vm1, %v5554_v57  ;;  %v711_v61 = vpop.permute.xlu0 %710 }
 0x1e5   : > { %vm785_vm4 = vcmp.eq.s32.totalorder %v711_v61, %v7471_v51  ;;  %1161 = vperm.xlu1 %6599, %v978_v58   ;;  %1158 = vperm.xlu0 %6598, %v977_v59   ;;  %vm786_vm5 = vcmp.eq.s32.totalorder %v714_v60, %v7471_v51 }
 0x1e6   : > { %v5556_v63 = vsel %vm785_vm4, 1.0, %v10970_v56  ;;  %v5557_v4 = vsel %vm786_vm5, 1.0, %v10970_v56 }
 0x1e7   : > { %6329 = vmatmul.mubr.msk.f32.gmra.mrb[56].mxu0 %vm1387_vm1, %v5555_v62 }
 0x1e8   : > { %v720_v2 = vpop.permute.xlu1 %719  ;;  %6331 = vmatprep.mubr.msk.f32.mxu0 %vm1387_vm1, %v5556_v63  ;;  %v717_v3 = vpop.permute.xlu0 %716 }
 0x1e9   : > { %vm787_vm6 = vcmp.eq.s32.totalorder %v717_v3, %v7471_v51  ;;  %1167 = vperm.xlu1 %6599, %v980_v0   ;;  %1164 = vperm.xlu0 %6598, %v979_v1   ;;  %vm788_vm7 = vcmp.eq.s32.totalorder %v720_v2, %v7471_v51 }
 0x1ea   : > { %v5558_v5 = vsel %vm787_vm6, 1.0, %v10970_v56  ;;  %v5559_v10 = vsel %vm788_vm7, 1.0, %v10970_v56 }
 0x1eb   : > { %6332 = vmatmul.mubr.msk.f32.gmra.mrb[58].mxu0 %vm1387_vm1, %v5557_v4 }
 0x1ec   : > { %v726_v8 = vpop.permute.xlu1 %725  ;;  %6334 = vmatprep.mubr.msk.f32.mxu0 %vm1387_vm1, %v5558_v5  ;;  %v723_v9 = vpop.permute.xlu0 %722 }
 0x1ed   : > { %vm789_vm8 = vcmp.eq.s32.totalorder %v723_v9, %v7471_v51  ;;  %1173 = vperm.xlu1 %6599, %v982_v6   ;;  %1170 = vperm.xlu0 %6598, %v981_v7   ;;  %vm790_vm9 = vcmp.eq.s32.totalorder %v726_v8, %v7471_v51 }
 0x1ee   : > { %v5560_v11 = vsel %vm789_vm8, 1.0, %v10970_v56  ;;  %v5561_v14 = vsel %vm790_vm9, 1.0, %v10970_v56 }
 0x1ef   : > { %6335 = vmatmul.mubr.msk.f32.gmra.mrb[60].mxu0 %vm1387_vm1, %v5559_v10 }
 0x1f0   : > { %v7726_v12 = vpop.permute.xlu1 %987  ;;  %6337 = vmatprep.mubr.msk.f32.mxu0 %vm1387_vm1, %v5560_v11  ;;  %v985_v13 = vpop.permute.xlu0 %984 }
 0x1f1   : > { %vm1175_vm10 = vcmp.eq.s32.totalorder %v985_v13, %v7471_v51  ;;  %6601 = vrot.lane.b32.xlu0 %v6600_v36, %s6937_s11  ;;  %6606 = vrot.lane.b32.xlu1 %v6605_v42, %s6937_s11  ;;  %vm1176_vm11 = vcmp.eq.s32.totalorder %v7726_v12, %v7471_v51 }
 0x1f2   : > { %v5562_v15 = vsel %vm1175_vm10, 1.0, %v10970_v56 }
 0x1f3   : > { %6042 = vmatprep.mubr.msk.f32.mxu1 %vm1387_vm1, %v5562_v15  ;;  %6338 = vmatmul.mubr.msk.f32.gmra.mrb[62].mxu0 %vm1387_vm1, %v5561_v14 }
 0x1f4   : > { %v7740_v16 = vpop.permute.xlu1 %993  ;;  %v7742_v17 = vpop.permute.xlu0 %990 }
 0x1f5   : > { %vm1177_vm12 = vcmp.eq.s32.totalorder %v7742_v17, %v7471_v51  ;;  %vm1178_vm13 = vcmp.eq.s32.totalorder %v7740_v16, %v7471_v51 }
 0x1f8   : > { %v7744_v18 = vpop.permute.xlu1 %999  ;;  %v7746_v33 = vpop.permute.xlu0 %996 }
 0x1f9   : > { %vm1179_vm14 = vcmp.eq.s32.totalorder %v7746_v33, %v7471_v51  ;;  %vm1180_vm15 = vcmp.eq.s32.totalorder %v7744_v18, %v7471_v51 }
 0x1fc   : > { %v7748_v34 = vpop.permute.xlu1 %1005  ;;  %v7750_v36 = vpop.permute.xlu0 %1002 }
 0x1fd   : > { %vm1181_vm2 = vcmp.eq.s32.totalorder %v7750_v36, %v7471_v51  ;;  %vm1182_vm3 = vcmp.eq.s32.totalorder %v7748_v34, %v7471_v51 }
 0x200   : > { %v7752_v39 = vpop.permute.xlu1 %1011  ;;  %v7754_v40 = vpop.permute.xlu0 %1008 }
 0x201   : > { %vm1183_vm4 = vcmp.eq.s32.totalorder %v7754_v40, %v7471_v51  ;;  %vm1184_vm5 = vcmp.eq.s32.totalorder %v7752_v39, %v7471_v51 }
 0x204   : > { %v7756_v42 = vpop.permute.xlu1 %1017  ;;  %v7758_v19 = vpop.permute.xlu0 %1014 }
 0x205   : > { %vm1185_vm6 = vcmp.eq.s32.totalorder %v7758_v19, %v7471_v51  ;;  %vm1186_vm7 = vcmp.eq.s32.totalorder %v7756_v42, %v7471_v51 }
 0x208   : > { %v7760_v20 = vpop.permute.xlu1 %1023  ;;  %v7762_v21 = vpop.permute.xlu0 %1020 }
 0x209   : > { %vm1187_vm8 = vcmp.eq.s32.totalorder %v7762_v21, %v7471_v51  ;;  %vm1188_vm9 = vcmp.eq.s32.totalorder %v7760_v20, %v7471_v51 }
 0x20c   : > { %v7764_v22 = vpop.permute.xlu1 %1029  ;;  %v7766_v23 = vpop.permute.xlu0 %1026 }
 0x20d   : > { %vm1189_vm10 = vcmp.eq.s32.totalorder %v7766_v23, %v7471_v51 }
 0x210   : > { %v7768_v24 = vpop.permute.xlu1 %1035  ;;  %v7770_v25 = vpop.permute.xlu0 %1032 }
 0x214   : > { %v7772_v26 = vpop.permute.xlu1 %1041  ;;  %v7774_v27 = vpop.permute.xlu0 %1038 }
 0x218   : > { %v7776_v28 = vpop.permute.xlu1 %1047  ;;  %v7778_v29 = vpop.permute.xlu0 %1044 }
 0x21c   : > { %v7780_v30 = vpop.permute.xlu1 %1053  ;;  %v7782_v31 = vpop.permute.xlu0 %1050 }
 0x220   : > { %v7784_v32 = vpop.permute.xlu1 %1059  ;;  %v7786_v35 = vpop.permute.xlu0 %1056 }
 0x224   : > { %v7788_v37 = vpop.permute.xlu1 %1065  ;;  %v7790_v38 = vpop.permute.xlu0 %1062 }
 0x228   : > { %v7792_v41 = vpop.permute.xlu1 %1071  ;;  %v7794_v43 = vpop.permute.xlu0 %1068 }
 0x22c   : > { %v7796_v44 = vpop.permute.xlu1 %1077  ;;  %v7798_v45 = vpop.permute.xlu0 %1074 }
 0x230   : > { %v7800_v46 = vpop.permute.xlu1 %1083  ;;  %v7802_v47 = vpop.permute.xlu0 %1080 }
 0x234   : > { %v7804_v48 = vpop.permute.xlu1 %1089  ;;  %v7806_v49 = vpop.permute.xlu0 %1086 }
 0x238   : > { %v7808_v50 = vpop.permute.xlu1 %1095  ;;  %v7810_v52 = vpop.permute.xlu0 %1092 }
 0x23c   : > { %v7812_v53 = vpop.permute.xlu1 %1101  ;;  %v7814_v54 = vpop.permute.xlu0 %1098 }
 0x240   : > { %v7816_v55 = vpop.permute.xlu1 %1107  ;;  %v7818_v57 = vpop.permute.xlu0 %1104 }
 0x244   : > { %v7820_v58 = vpop.permute.xlu1 %1113  ;;  %v7822_v59 = vpop.permute.xlu0 %1110 }
 0x248   : > { %v7824_v60 = vpop.permute.xlu1 %1119  ;;  %v7826_v61 = vpop.permute.xlu0 %1116 }
 0x24a   : > { %v7828_v62 = vpop.f32.mrb[0].mxu0 }
 0x24b   : > { %11107 = vst [vmem:[#allocation28_spill] sm:$0xff] %v7828_v62  ;;  %v7830_v63 = vpop.f32.mrb[1].mxu0 }
 0x24c   : > { %11108 = vst [vmem:[#allocation29_spill] sm:$0xff] %v7830_v63  ;;  %v7832_v0 = vpop.permute.xlu1 %1125  ;;  %v7834_v1 = vpop.permute.xlu0 %1122 }
 0x24e   : > { %v7836_v2 = vpop.f32.mrb[2].mxu0 }
 0x24f   : > { %11109 = vst [vmem:[#allocation30_spill] sm:$0xff] %v7836_v2  ;;  %v7838_v3 = vpop.f32.mrb[3].mxu0 }
 0x250   : > { %11110 = vst [vmem:[#allocation31_spill] sm:$0xff] %v7838_v3  ;;  %v7840_v4 = vpop.permute.xlu1 %1131  ;;  %v7842_v5 = vpop.permute.xlu0 %1128 }
 0x252   : > { %v7844_v6 = vpop.f32.mrb[4].mxu0 }
 0x253   : > { %11111 = vst [vmem:[#allocation32_spill] sm:$0xff] %v7844_v6  ;;  %v7846_v7 = vpop.f32.mrb[5].mxu0 }
 0x254   : > { %11112 = vst [vmem:[#allocation33_spill] sm:$0xff] %v7846_v7  ;;  %v7848_v8 = vpop.permute.xlu1 %1137  ;;  %v7850_v9 = vpop.permute.xlu0 %1134 }
 0x255   : > { %11113 = vst [vmem:[#allocation34_spill] sm:$0xff] %v7848_v8  ;;  %11114 = vst [vmem:[#allocation35_spill] sm:$0xff] %v7850_v9 }
 0x256   : > { %v7852_v10 = vpop.f32.mrb[6].mxu0 }
 0x257   : > { %11115 = vst [vmem:[#allocation36_spill] sm:$0xff] %v7852_v10  ;;  %v7854_v11 = vpop.f32.mrb[7].mxu0 }
 0x258   : > { %11116 = vst [vmem:[#allocation37_spill] sm:$0xff] %v7854_v11  ;;  %v7856_v13 = vpop.permute.xlu1 %1143  ;;  %v7858_v14 = vpop.permute.xlu0 %1140 }
 0x259   : > { %11117 = vst [vmem:[#allocation38_spill] sm:$0xff] %v7856_v13  ;;  %11118 = vst [vmem:[#allocation39_spill] sm:$0xff] %v7858_v14 }
 0x25a   : > { %v7860_v15 = vpop.f32.mrb[8].mxu0 }
 0x25b   : > { %11119 = vst [vmem:[#allocation40_spill] sm:$0xff] %v7860_v15  ;;  %v7862_v56 = vpop.f32.mrb[9].mxu0 }
 0x25c   : > { %11120 = vst [vmem:[#allocation41_spill] sm:$0xff] %v7862_v56  ;;  %v7864_v3 = vpop.permute.xlu1 %1149  ;;  %v7866_v6 = vpop.permute.xlu0 %1146 }
 0x25d   : > { %11121 = vst [vmem:[#allocation42_spill] sm:$0xff] %v7864_v3  ;;  %11122 = vst [vmem:[#allocation43_spill] sm:$0xff] %v7866_v6 }
 0x25e   : > { %v7868_v7 = vpop.f32.mrb[10].mxu0 }
 0x25f   : > { %11123 = vst [vmem:[#allocation44_spill] sm:$0xff] %v7868_v7  ;;  %v7870_v2 = vpop.f32.mrb[11].mxu0 }
 0x260   : > { %11124 = vst [vmem:[#allocation45_spill] sm:$0xff] %v7870_v2  ;;  %v7872_v63 = vpop.permute.xlu1 %1155  ;;  %v7874_v10 = vpop.permute.xlu0 %1152 }
 0x261   : > { %11125 = vst [vmem:[#allocation46_spill] sm:$0xff] %v7872_v63  ;;  %11126 = vst [vmem:[#allocation47_spill] sm:$0xff] %v7874_v10 }
 0x262   : > { %v7876_v11 = vpop.f32.mrb[12].mxu0 }
 0x263   : > { %11127 = vst [vmem:[#allocation48_spill] sm:$0xff] %v7876_v11  ;;  %v7878_v62 = vpop.f32.mrb[13].mxu0 }
 0x264   : > { %11128 = vst [vmem:[#allocation49_spill] sm:$0xff] %v7878_v62  ;;  %v7880_v13 = vpop.permute.xlu1 %1161  ;;  %v7882_v15 = vpop.permute.xlu0 %1158 }
 0x265   : > { %11129 = vst [vmem:[#allocation50_spill] sm:$0xff] %v7880_v13  ;;  %11130 = vst [vmem:[#allocation51_spill] sm:$0xff] %v7882_v15 }
 0x266   : > { %v7884_v56 = vpop.f32.mrb[14].mxu0 }
 0x267   : > { %11131 = vst [vmem:[#allocation52_spill] sm:$0xff] %v7884_v56  ;;  %v7886_v3 = vpop.f32.mrb[15].mxu0 }
 0x268   : > { %11132 = vst [vmem:[#allocation53_spill] sm:$0xff] %v7886_v3  ;;  %v7888_v6 = vpop.permute.xlu1 %1167  ;;  %v7890_v7 = vpop.permute.xlu0 %1164 }
 0x269   : > { %11133 = vst [vmem:[#allocation54_spill] sm:$0xff] %v7888_v6  ;;  %11134 = vst [vmem:[#allocation55_spill] sm:$0xff] %v7890_v7 }
 0x26a   : > { %v7892_v2 = vpop.f32.mrb[16].mxu0 }
 0x26b   : > { %11135 = vst [vmem:[#allocation56_spill] sm:$0xff] %v7892_v2  ;;  %v7894_v63 = vpop.f32.mrb[17].mxu0 }
 0x26c   : > { %11136 = vst [vmem:[#allocation57_spill] sm:$0xff] %v7894_v63  ;;  %v7896_v10 = vpop.permute.xlu1 %1173  ;;  %v7898_v11 = vpop.permute.xlu0 %1170 }
 0x26d   : > { %11137 = vst [vmem:[#allocation58_spill] sm:$0xff] %v7896_v10  ;;  %11138 = vst [vmem:[#allocation59_spill] sm:$0xff] %v7898_v11 }
 0x26e   : > { %v7900_v62 = vpop.f32.mrb[18].mxu0 }
 0x26f   : > { %v7902_v13 = vpop.f32.mrb[19].mxu0 }
 0x270   : > { %v6602_v15 = vpop.permute.xlu0 %6601  ;;  %v6607_v56 = vpop.permute.xlu1 %6606 }
 0x271   : > { %v6609_v14 = vunpack.i.h.bf16 %v6607_v56  ;;  %v6608_v3 = vunpack.i.l.bf16 %v6607_v56  ;;  %v6604_v8 = vunpack.i.h.bf16 %v6602_v15  ;;  %v6603_v6 = vunpack.i.l.bf16 %v6602_v15 }
 0x272   : > { %v7904_v9 = vpop.f32.mrb[20].mxu0 }
 0x273   : > { %v7906_v7 = vpop.f32.mrb[21].mxu0  ;;  %v6340_v2 = vpack.c.bf16 %v6604_v8, %v6603_v6  ;;  %v6344_v63 = vpack.c.bf16 %v6609_v14, %v6608_v3  ;;  %v6610_v6 = vld [vmem:[#allocation10] sm:$0xff]  ;;  %v11139_v3 = vmov 0.0  }
 0x274   : > { %v5564_v8 = vsel %vm1177_vm12, 1.0, %v11139_v3  ;;  %v5566_v16 = vsel %vm1179_vm14, 1.0, %v11139_v3  ;;  %v5568_v18 = vsel %vm1181_vm2, 1.0, %v11139_v3  ;;  %v5570_v34 = vsel %vm1183_vm4, 1.0, %v11139_v3 }
 0x275   : > { %6341 = vmatprep.subr.bf16.mxu1 %v6340_v2  ;;  %v5572_v39 = vsel %vm1185_vm6, 1.0, %v11139_v3  ;;  %v5574_v42 = vsel %vm1187_vm8, 1.0, %v11139_v3  ;;  %v5576_v20 = vsel %vm1189_vm10, 1.0, %v11139_v3  ;;  %vm1191_vm12 = vcmp.eq.s32.totalorder %v7770_v25, %v7471_v51 }
 0x276   : > { %6343 = vmatpush3.bf16.msra.mxu1 %v6340_v2  ;;  %v7908_v10 = vpop.f32.mrb[22].mxu0  ;;  %v5563_v2 = vsel %vm1176_vm11, 1.0, %v11139_v3  ;;  %vm1190_vm11 = vcmp.eq.s32.totalorder %v7764_v22, %v7471_v51  ;;  %v5578_v22 = vsel %vm1191_vm12, 1.0, %v11139_v3  ;;  %vm1193_vm14 = vcmp.eq.s32.totalorder %v7774_v27, %v7471_v51 }
 0x277   : > { %v7910_v11 = vpop.f32.mrb[23].mxu0  ;;  %6345 = vmatprep.subr.bf16.mxu1 %v6344_v63  ;;  %vm1195_vm2 = vcmp.eq.s32.totalorder %v7778_v29, %v7471_v51  ;;  %vm1197_vm4 = vcmp.eq.s32.totalorder %v7782_v31, %v7471_v51  ;;  %vm1199_vm6 = vcmp.eq.s32.totalorder %v7786_v35, %v7471_v51  ;;  %vm1201_vm8 = vcmp.eq.s32.totalorder %v7790_v38, %v7471_v51 }
 0x278   : > { %vm1203_vm10 = vcmp.eq.s32.totalorder %v7794_v43, %v7471_v51  ;;  %vm1205_vm12 = vcmp.eq.s32.totalorder %v7798_v45, %v7471_v51 }
 0x27a   : > { %6347 = vmatpush3.bf16.msra.mxu1 %v6344_v63  ;;  %v7916_v56 = vpop.f32.mrb[24].mxu0  ;;  %v5565_v63 = vsel %vm1178_vm13, 1.0, %v11139_v3  ;;  %vm1192_vm13 = vcmp.eq.s32.totalorder %v7768_v24, %v7471_v51  ;;  %v5580_v24 = vsel %vm1193_vm14, 1.0, %v11139_v3  ;;  %vm1207_vm14 = vcmp.eq.s32.totalorder %v7802_v47, %v7471_v51 }
 0x27b   : > { %v7918_v15 = vpop.f32.mrb[25].mxu0  ;;  %6356 = vmatprep.subr.mxu1 %v6610_v6 }
 0x27d   : > { %6043 = vmatmul.mubr.msk.f32.vlgmr.msra.gmra.mrb[0].mxu1 %vm1387_vm1, %v5563_v2 }
 0x27e   : > { %6045 = vmatprep.mubr.msk.f32.mxu1 %vm1387_vm1, %v5564_v8  ;;  %v7928_v12 = vpop.f32.mrb[26].mxu0  ;;  %6357 = vmatpush3.msra.mxu1 %v6610_v6  ;;  %v5567_v6 = vsel %vm1180_vm15, 1.0, %v11139_v3  ;;  %v5569_v8 = vsel %vm1182_vm3, 1.0, %v11139_v3  ;;  %vm1194_vm15 = vcmp.eq.s32.totalorder %v7772_v26, %v7471_v51  ;;  %vm1196_vm3 = vcmp.eq.s32.totalorder %v7776_v28, %v7471_v51 }
 0x27f   : > { %v7930_v17 = vpop.f32.mrb[27].mxu0  ;;  %v5582_v26 = vsel %vm1195_vm2, 1.0, %v11139_v3  ;;  %v5584_v28 = vsel %vm1197_vm4, 1.0, %v11139_v3  ;;  %vm1209_vm2 = vcmp.eq.s32.totalorder %v7806_v49, %v7471_v51  ;;  %vm1211_vm4 = vcmp.eq.s32.totalorder %v7810_v52, %v7471_v51 }
 0x281   : > { %6046 = vmatmul.mubr.msk.f32.gmra.mrb[2].mxu1 %vm1387_vm1, %v5565_v63 }
 0x282   : > { %6048 = vmatprep.mubr.msk.f32.mxu1 %vm1387_vm1, %v5566_v16  ;;  %v7940_v33 = vpop.f32.mrb[28].mxu0  ;;  %v5571_v16 = vsel %vm1184_vm5, 1.0, %v11139_v3  ;;  %vm1198_vm5 = vcmp.eq.s32.totalorder %v7780_v30, %v7471_v51  ;;  %v5586_v30 = vsel %vm1199_vm6, 1.0, %v11139_v3  ;;  %vm1213_vm6 = vcmp.eq.s32.totalorder %v7814_v54, %v7471_v51 }
 0x283   : > { %v7942_v14 = vpop.f32.mrb[29].mxu0 }
 0x285   : > { %6049 = vmatmul.mubr.msk.f32.gmra.mrb[4].mxu1 %vm1387_vm1, %v5567_v6 }
 0x286   : > { %6051 = vmatprep.mubr.msk.f32.mxu1 %vm1387_vm1, %v5568_v18  ;;  %v7952_v36 = vpop.f32.mrb[30].mxu0  ;;  %v5573_v18 = vsel %vm1186_vm7, 1.0, %v11139_v3  ;;  %vm1200_vm7 = vcmp.eq.s32.totalorder %v7784_v32, %v7471_v51  ;;  %v5588_v32 = vsel %vm1201_vm8, 1.0, %v11139_v3  ;;  %vm1215_vm8 = vcmp.eq.s32.totalorder %v7818_v57, %v7471_v51 }
 0x287   : > { %v7954_v2 = vpop.f32.mrb[31].mxu0 }
 0x289   : > { %6052 = vmatmul.mubr.msk.f32.gmra.mrb[6].mxu1 %vm1387_vm1, %v5569_v8 }
 0x28a   : > { %6054 = vmatprep.mubr.msk.f32.mxu1 %vm1387_vm1, %v5570_v34  ;;  %v7964_v40 = vpop.f32.mrb[32].mxu0  ;;  %v5575_v34 = vsel %vm1188_vm9, 1.0, %v11139_v3  ;;  %vm1202_vm9 = vcmp.eq.s32.totalorder %v7788_v37, %v7471_v51  ;;  %v5590_v37 = vsel %vm1203_vm10, 1.0, %v11139_v3  ;;  %vm1217_vm10 = vcmp.eq.s32.totalorder %v7822_v59, %v7471_v51 }
 0x28b   : > { %v7966_v63 = vpop.f32.mrb[33].mxu0 }
 0x28d   : > { %6055 = vmatmul.mubr.msk.f32.gmra.mrb[8].mxu1 %vm1387_vm1, %v5571_v16 }
 0x28e   : > { %6057 = vmatprep.mubr.msk.f32.mxu1 %vm1387_vm1, %v5572_v39  ;;  %v7976_v19 = vpop.f32.mrb[34].mxu0  ;;  %v5577_v39 = vsel %vm1190_vm11, 1.0, %v11139_v3  ;;  %vm1204_vm11 = vcmp.eq.s32.totalorder %v7792_v41, %v7471_v51  ;;  %v5592_v41 = vsel %vm1205_vm12, 1.0, %v11139_v3  ;;  %vm1219_vm12 = vcmp.eq.s32.totalorder %v7826_v61, %v7471_v51 }
 0x28f   : > { %v7978_v6 = vpop.f32.mrb[35].mxu0  ;;  %v5606_v59 = vsel %vm1219_vm12, 1.0, %v11139_v3 }
 0x291   : > { %6058 = vmatmul.mubr.msk.f32.gmra.mrb[10].mxu1 %vm1387_vm1, %v5573_v18 }
 0x292   : > { %6060 = vmatprep.mubr.msk.f32.mxu1 %vm1387_vm1, %v5574_v42  ;;  %v7988_v21 = vpop.f32.mrb[36].mxu0  ;;  %v5579_v42 = vsel %vm1192_vm13, 1.0, %v11139_v3  ;;  %vm1206_vm13 = vcmp.eq.s32.totalorder %v7796_v44, %v7471_v51  ;;  %v5594_v44 = vsel %vm1207_vm14, 1.0, %v11139_v3  ;;  %vm1221_vm14 = vcmp.eq.s32.totalorder %v7834_v1, %v7471_v51 }
 0x293   : > { %v7990_v8 = vpop.f32.mrb[37].mxu0  ;;  %v5608_v61 = vsel %vm1221_vm14, 1.0, %v11139_v3 }
 0x295   : > { %6061 = vmatmul.mubr.msk.f32.gmra.mrb[12].mxu1 %vm1387_vm1, %v5575_v34 }
 0x296   : > { %6063 = vmatprep.mubr.msk.f32.mxu1 %vm1387_vm1, %v5576_v20  ;;  %v8000_v23 = vpop.f32.mrb[38].mxu0  ;;  %v5581_v20 = vsel %vm1194_vm15, 1.0, %v11139_v3  ;;  %vm1208_vm15 = vcmp.eq.s32.totalorder %v7800_v46, %v7471_v51  ;;  %v5596_v46 = vsel %vm1209_vm2, 1.0, %v11139_v3  ;;  %vm1223_vm2 = vcmp.eq.s32.totalorder %v7842_v5, %v7471_v51  ;;  %v11149_v5 = vld [vmem:[#allocation34_spill] sm:$0xff] }
 0x297   : > { %v8002_v16 = vpop.f32.mrb[39].mxu0  ;;  %v5610_v1 = vsel %vm1223_vm2, 1.0, %v11139_v3 }
 0x299   : > { %6064 = vmatmul.mubr.msk.f32.gmra.mrb[14].mxu1 %vm1387_vm1, %v5577_v39 }
 0x29a   : > { %6066 = vmatprep.mubr.msk.f32.mxu1 %vm1387_vm1, %v5578_v22  ;;  %v8012_v25 = vpop.f32.mrb[40].mxu0  ;;  %v5583_v22 = vsel %vm1196_vm3, 1.0, %v11139_v3  ;;  %vm1210_vm3 = vcmp.eq.s32.totalorder %v7804_v48, %v7471_v51  ;;  %v5598_v48 = vsel %vm1211_vm4, 1.0, %v11139_v3 }
 0x29b   : > { %v8014_v18 = vpop.f32.mrb[41].mxu0 }
 0x29d   : > { %6067 = vmatmul.mubr.msk.f32.gmra.mrb[16].mxu1 %vm1387_vm1, %v5579_v42 }
 0x29e   : > { %6069 = vmatprep.mubr.msk.f32.mxu1 %vm1387_vm1, %v5580_v24  ;;  %v8024_v27 = vpop.f32.mrb[42].mxu0  ;;  %v5585_v24 = vsel %vm1198_vm5, 1.0, %v11139_v3  ;;  %vm1212_vm5 = vcmp.eq.s32.totalorder %v7808_v50, %v7471_v51  ;;  %v5600_v50 = vsel %vm1213_vm6, 1.0, %v11139_v3 }
 0x29f   : > { %v8026_v34 = vpop.f32.mrb[43].mxu0 }
 0x2a1   : > { %6070 = vmatmul.mubr.msk.f32.gmra.mrb[18].mxu1 %vm1387_vm1, %v5581_v20 }
 0x2a2   : > { %6072 = vmatprep.mubr.msk.f32.mxu1 %vm1387_vm1, %v5582_v26  ;;  %v8036_v29 = vpop.f32.mrb[44].mxu0  ;;  %v5587_v26 = vsel %vm1200_vm7, 1.0, %v11139_v3  ;;  %vm1214_vm7 = vcmp.eq.s32.totalorder %v7812_v53, %v7471_v51  ;;  %v5602_v53 = vsel %vm1215_vm8, 1.0, %v11139_v3 }
 0x2a3   : > { %v8038_v39 = vpop.f32.mrb[45].mxu0 }
 0x2a5   : > { %6073 = vmatmul.mubr.msk.f32.gmra.mrb[20].mxu1 %vm1387_vm1, %v5583_v22 }
 0x2a6   : > { %6075 = vmatprep.mubr.msk.f32.mxu1 %vm1387_vm1, %v5584_v28  ;;  %v8048_v31 = vpop.f32.mrb[46].mxu0  ;;  %v5589_v28 = vsel %vm1202_vm9, 1.0, %v11139_v3  ;;  %vm1216_vm9 = vcmp.eq.s32.totalorder %v7816_v55, %v7471_v51 }
 0x2a7   : > { %v8050_v42 = vpop.f32.mrb[47].mxu0  ;;  %v5603_v57 = vsel %vm1216_vm9, 1.0, %v11139_v3 }
 0x2a9   : > { %6076 = vmatmul.mubr.msk.f32.gmra.mrb[22].mxu1 %vm1387_vm1, %v5585_v24 }
 0x2aa   : > { %6078 = vmatprep.mubr.msk.f32.mxu1 %vm1387_vm1, %v5586_v30  ;;  %v8060_v35 = vpop.f32.mrb[48].mxu0  ;;  %v5591_v30 = vsel %vm1204_vm11, 1.0, %v11139_v3  ;;  %vm1218_vm11 = vcmp.eq.s32.totalorder %v7820_v58, %v7471_v51 }
 0x2ab   : > { %v8062_v20 = vpop.f32.mrb[49].mxu0  ;;  %v5605_v55 = vsel %vm1218_vm11, 1.0, %v11139_v3 }
 0x2ad   : > { %6079 = vmatmul.mubr.msk.f32.gmra.mrb[24].mxu1 %vm1387_vm1, %v5587_v26 }
 0x2ae   : > { %6081 = vmatprep.mubr.msk.f32.mxu1 %vm1387_vm1, %v5588_v32  ;;  %v8072_v38 = vpop.f32.mrb[50].mxu0  ;;  %v5593_v32 = vsel %vm1206_vm13, 1.0, %v11139_v3  ;;  %vm1220_vm13 = vcmp.eq.s32.totalorder %v7824_v60, %v7471_v51 }
 0x2af   : > { %v8074_v22 = vpop.f32.mrb[51].mxu0  ;;  %v5607_v58 = vsel %vm1220_vm13, 1.0, %v11139_v3 }
 0x2b1   : > { %6082 = vmatmul.mubr.msk.f32.gmra.mrb[26].mxu1 %vm1387_vm1, %v5589_v28 }
 0x2b2   : > { %6084 = vmatprep.mubr.msk.f32.mxu1 %vm1387_vm1, %v5590_v37  ;;  %v8084_v43 = vpop.f32.mrb[52].mxu0  ;;  %v5595_v37 = vsel %vm1208_vm15, 1.0, %v11139_v3  ;;  %vm1222_vm15 = vcmp.eq.s32.totalorder %v7832_v0, %v7471_v51  ;;  %v11148_v0 = vld [vmem:[#allocation35_spill] sm:$0xff] }
 0x2b3   : > { %v8086_v24 = vpop.f32.mrb[53].mxu0  ;;  %v5609_v60 = vsel %vm1222_vm15, 1.0, %v11139_v3  ;;  %vm1225_vm4 = vcmp.eq.s32.totalorder %v11148_v0, %v7471_v51  ;;  %v11156_v0 = vld [vmem:[#allocation51_spill] sm:$0xff] }
 0x2b4   : > { %vm1233_vm12 = vcmp.eq.s32.totalorder %v11156_v0, %v7471_v51  ;;  %v2003_v0 = vld [vmem:[%s7313_s26 + $0x130] sm:$0xff] }
 0x2b5   : > { %6085 = vmatmul.mubr.msk.f32.gmra.mrb[28].mxu1 %vm1387_vm1, %v5591_v30 }
 0x2b6   : > { %6087 = vmatprep.mubr.msk.f32.mxu1 %vm1387_vm1, %v5592_v41  ;;  %v8096_v45 = vpop.f32.mrb[54].mxu0  ;;  %v5597_v41 = vsel %vm1210_vm3, 1.0, %v11139_v3  ;;  %vm1224_vm3 = vcmp.eq.s32.totalorder %v7840_v4, %v7471_v51  ;;  %v11150_v4 = vld [vmem:[#allocation39_spill] sm:$0xff] }
 0x2b7   : > { %v8098_v26 = vpop.f32.mrb[55].mxu0  ;;  %vm1227_vm6 = vcmp.eq.s32.totalorder %v11150_v4, %v7471_v51  ;;  %v11158_v4 = vld [vmem:[#allocation55_spill] sm:$0xff] }
 0x2b8   : > { %vm1235_vm14 = vcmp.eq.s32.totalorder %v11158_v4, %v7471_v51  ;;  %v2008_v4 = vld [vmem:[%s7313_s26 + $0x158] sm:$0xff] }
 0x2b9   : > { %6088 = vmatmul.mubr.msk.f32.gmra.mrb[30].mxu1 %vm1387_vm1, %v5593_v32 }
 0x2ba   : > { %6090 = vmatprep.mubr.msk.f32.mxu1 %vm1387_vm1, %v5594_v44  ;;  %v8108_v47 = vpop.f32.mrb[56].mxu0  ;;  %v5599_v44 = vsel %vm1212_vm5, 1.0, %v11139_v3  ;;  %vm1226_vm5 = vcmp.eq.s32.totalorder %v11149_v5, %v7471_v51  ;;  %v11157_v5 = vld [vmem:[#allocation50_spill] sm:$0xff] }
 0x2bb   : > { %11140 = vst [vmem:[#allocation60_spill] sm:$0xff] %v8108_v47  ;;  %v8110_v28 = vpop.f32.mrb[57].mxu0  ;;  %vm1234_vm13 = vcmp.eq.s32.totalorder %v11157_v5, %v7471_v51  ;;  %v2006_v5 = vld [vmem:[%s7313_s26 + $0x148] sm:$0xff] }
 0x2bc   : > { %11141 = vst [vmem:[#allocation61_spill] sm:$0xff] %v8110_v28 }
 0x2bd   : > { %6091 = vmatmul.mubr.msk.f32.gmra.mrb[32].mxu1 %vm1387_vm1, %v5595_v37 }
 0x2be   : > { %6093 = vmatprep.mubr.msk.f32.mxu1 %vm1387_vm1, %v5596_v46  ;;  %v8120_v49 = vpop.f32.mrb[58].mxu0  ;;  %v5601_v46 = vsel %vm1214_vm7, 1.0, %v11139_v3 }
 0x2bf   : > { %11142 = vst [vmem:[#allocation62_spill] sm:$0xff] %v8120_v49  ;;  %v8122_v30 = vpop.f32.mrb[59].mxu0 }
 0x2c0   : > { %11143 = vst [vmem:[#allocation63_spill] sm:$0xff] %v8122_v30 }
 0x2c1   : > { %6094 = vmatmul.mubr.msk.f32.gmra.mrb[34].mxu1 %vm1387_vm1, %v5597_v41  ;;  %v5604_v41 = vsel %vm1217_vm10, 1.0, %v11139_v3 }
 0x2c2   : > { %6096 = vmatprep.mubr.msk.f32.mxu1 %vm1387_vm1, %v5598_v48  ;;  %v8132_v52 = vpop.f32.mrb[60].mxu0  ;;  %v5611_v48 = vsel %vm1224_vm3, 1.0, %v11139_v3 }
 0x2c3   : > { %11144 = vst [vmem:[#allocation64_spill] sm:$0xff] %v8132_v52  ;;  %v8134_v32 = vpop.f32.mrb[61].mxu0 }
 0x2c4   : > { %11145 = vst [vmem:[#allocation65_spill] sm:$0xff] %v8134_v32 }
 0x2c5   : > { %6097 = vmatmul.mubr.msk.f32.gmra.mrb[36].mxu1 %vm1387_vm1, %v5599_v44  ;;  %v5612_v44 = vsel %vm1225_vm4, 1.0, %v11139_v3  ;;  %vm5056_vm4 = vcmask 15360  }
 0x2c6   : > { %6099 = vmatprep.mubr.msk.f32.mxu1 %vm1387_vm1, %v5600_v50  ;;  %v8144_v54 = vpop.f32.mrb[62].mxu0  ;;  %v5613_v50 = vsel %vm1226_vm5, 1.0, %v11139_v3  ;;  %vm5121_vm5 = vcmask 23552  }
 0x2c7   : > { %11146 = vst [vmem:[#allocation66_spill] sm:$0xff] %v8144_v54  ;;  %v8146_v37 = vpop.f32.mrb[63].mxu0 }
 0x2c8   : > { %11147 = vst [vmem:[#allocation67_spill] sm:$0xff] %v8146_v37 }
 0x2c9   : > { %6100 = vmatmul.mubr.msk.f32.gmra.mrb[38].mxu1 %vm1387_vm1, %v5601_v46  ;;  %v11151_v46 = vld [vmem:[#allocation38_spill] sm:$0xff] }
 0x2ca   : > { %6102 = vmatprep.mubr.msk.f32.mxu1 %vm1387_vm1, %v5602_v53  ;;  %vm1228_vm7 = vcmp.eq.s32.totalorder %v11151_v46, %v7471_v51  ;;  %v5614_v53 = vsel %vm1227_vm6, 1.0, %v11139_v3  ;;  %v11159_v46 = vld [vmem:[#allocation54_spill] sm:$0xff]  ;;  %vm5186_vm6 = vcmask 31744  }
 0x2cb   : > { %vm1236_vm15 = vcmp.eq.s32.totalorder %v11159_v46, %v7471_v51  ;;  %v2010_v46 = vld [vmem:[%s7313_s26 + $0x168] sm:$0xff] }
 0x2cd   : > { %6103 = vmatmul.mubr.msk.f32.gmra.mrb[40].mxu1 %vm1387_vm1, %v5603_v57  ;;  %v11152_v57 = vld [vmem:[#allocation43_spill] sm:$0xff] }
 0x2ce   : > { %6105 = vmatprep.mubr.msk.f32.mxu1 %vm1387_vm1, %v5604_v41  ;;  %vm1229_vm8 = vcmp.eq.s32.totalorder %v11152_v57, %v7471_v51  ;;  %v5615_v41 = vsel %vm1228_vm7, 1.0, %v11139_v3  ;;  %v11160_v57 = vld [vmem:[#allocation59_spill] sm:$0xff] }
 0x2cf   : > { %vm1237_vm2 = vcmp.eq.s32.totalorder %v11160_v57, %v7471_v51  ;;  %v2012_v57 = vld [vmem:[%s7313_s26 + $0x178] sm:$0xff] }
 0x2d1   : > { %6106 = vmatmul.mubr.msk.f32.gmra.mrb[42].mxu1 %vm1387_vm1, %v5605_v55  ;;  %v11153_v55 = vld [vmem:[#allocation42_spill] sm:$0xff] }
 0x2d2   : > { %6108 = vmatprep.mubr.msk.f32.mxu1 %vm1387_vm1, %v5606_v59  ;;  %vm1230_vm9 = vcmp.eq.s32.totalorder %v11153_v55, %v7471_v51  ;;  %v5616_v59 = vsel %vm1229_vm8, 1.0, %v11139_v3  ;;  %v11161_v55 = vld [vmem:[#allocation58_spill] sm:$0xff] }
 0x2d3   : > { %vm1238_vm3 = vcmp.eq.s32.totalorder %v11161_v55, %v7471_v51  ;;  %v2014_v55 = vld [vmem:[%s7313_s26 + $0x188] sm:$0xff] }
 0x2d5   : > { %6109 = vmatmul.mubr.msk.f32.gmra.mrb[44].mxu1 %vm1387_vm1, %v5607_v58  ;;  %v11154_v58 = vld [vmem:[#allocation47_spill] sm:$0xff] }
 0x2d6   : > { %6111 = vmatprep.mubr.msk.f32.mxu1 %vm1387_vm1, %v5608_v61  ;;  %vm1231_vm10 = vcmp.eq.s32.totalorder %v11154_v58, %v7471_v51  ;;  %v5617_v61 = vsel %vm1230_vm9, 1.0, %v11139_v3  ;;  %v1999_v58 = vld [vmem:[%s7313_s26 + $0x110] sm:$0xff] }
 0x2d9   : > { %6112 = vmatmul.mubr.msk.f32.gmra.mrb[46].mxu1 %vm1387_vm1, %v5609_v60  ;;  %v11155_v60 = vld [vmem:[#allocation46_spill] sm:$0xff] }
 0x2da   : > { %6114 = vmatprep.mubr.msk.f32.mxu1 %vm1387_vm1, %v5610_v1  ;;  %vm1232_vm11 = vcmp.eq.s32.totalorder %v11155_v60, %v7471_v51  ;;  %v5618_v1 = vsel %vm1231_vm10, 1.0, %v11139_v3  ;;  %v2000_v60 = vld [vmem:[%s7313_s26 + $0x118] sm:$0xff]  ;;  %v2001_v51 = vld [vmem:[%s7313_s26 + $0x120] sm:$0xff] }
 0x2dd   : > { %6115 = vmatmul.mubr.msk.f32.gmra.mrb[48].mxu1 %vm1387_vm1, %v5611_v48  ;;  %v5619_v48 = vsel %vm1232_vm11, 1.0, %v11139_v3 }
 0x2de   : > { %6117 = vmatprep.mubr.msk.f32.mxu1 %vm1387_vm1, %v5612_v44  ;;  %v5620_v44 = vsel %vm1233_vm12, 1.0, %v11139_v3 }
 0x2e1   : > { %6118 = vmatmul.mubr.msk.f32.gmra.mrb[50].mxu1 %vm1387_vm1, %v5613_v50  ;;  %v5621_v50 = vsel %vm1234_vm13, 1.0, %v11139_v3 }
 0x2e2   : > { %6120 = vmatprep.mubr.msk.f32.mxu1 %vm1387_vm1, %v5614_v53  ;;  %v5622_v53 = vsel %vm1235_vm14, 1.0, %v11139_v3 }
 0x2e5   : > { %6121 = vmatmul.mubr.msk.f32.gmra.mrb[52].mxu1 %vm1387_vm1, %v5615_v41  ;;  %v5623_v41 = vsel %vm1236_vm15, 1.0, %v11139_v3 }
 0x2e6   : > { %6123 = vmatprep.mubr.msk.f32.mxu1 %vm1387_vm1, %v5616_v59  ;;  %v5624_v59 = vsel %vm1237_vm2, 1.0, %v11139_v3 }
 0x2e9   : > { %6124 = vmatmul.mubr.msk.f32.gmra.mrb[54].mxu1 %vm1387_vm1, %v5617_v61  ;;  %v5625_v61 = vsel %vm1238_vm3, 1.0, %v11139_v3  ;;  %v2004_v3 = vld [vmem:[%s7313_s26 + $0x138] sm:$0xff] }
 0x2ea   : > { %6126 = vmatprep.mubr.msk.f32.mxu1 %vm1387_vm1, %v5618_v1  ;;  %v2002_v1 = vld [vmem:[%s7313_s26 + $0x128] sm:$0xff] }
 0x2ed   : > { %6127 = vmatmul.mubr.msk.f32.gmra.mrb[56].mxu1 %vm1387_vm1, %v5619_v48  ;;  %v2005_v48 = vld [vmem:[%s7313_s26 + $0x140] sm:$0xff] }
 0x2ee   : > { %6129 = vmatprep.mubr.msk.f32.mxu1 %vm1387_vm1, %v5620_v44  ;;  %v2007_v44 = vld [vmem:[%s7313_s26 + $0x150] sm:$0xff] }
 0x2f1   : > { %6130 = vmatmul.mubr.msk.f32.gmra.mrb[58].mxu1 %vm1387_vm1, %v5621_v50  ;;  %v2009_v50 = vld [vmem:[%s7313_s26 + $0x160] sm:$0xff] }
 0x2f2   : > { %6132 = vmatprep.mubr.msk.f32.mxu1 %vm1387_vm1, %v5622_v53  ;;  %v2011_v53 = vld [vmem:[%s7313_s26 + $0x170] sm:$0xff] }
 0x2f5   : > { %6133 = vmatmul.mubr.msk.f32.gmra.mrb[60].mxu1 %vm1387_vm1, %v5623_v41  ;;  %v2013_v41 = vld [vmem:[%s7313_s26 + $0x180] sm:$0xff] }
 0x2f6   : > { %6135 = vmatprep.mubr.msk.f32.mxu1 %vm1387_vm1, %v5624_v59  ;;  %v2015_v59 = vld [vmem:[%s7313_s26 + $0x190] sm:$0xff] }
 0x2f9   : > { %6136 = vmatmul.mubr.msk.f32.gmra.mrb[62].mxu1 %vm1387_vm1, %v5625_v61  ;;  %v2017_v61 = vld [vmem:[%s7313_s26 + $0x1a0] sm:$0xff] }
 0x2fa   : > { %6191 = vmatprep.mubr.msk.f32.mxu1 %vm2030_vm0, %v1999_v58  ;;  %v2016_v58 = vld [vmem:[%s7313_s26 + $0x198] sm:$0xff] }
 0x2fd   : > { %6192 = vmatmul.mubr.msk.f32.vlgmr.msra.gmra.mrb[34].mxu1 %vm2030_vm0, %v2000_v60  ;;  %v2018_v60 = vld [vmem:[%s7313_s26 + $0x1a8] sm:$0xff] }
 0x2fe   : > { %6194 = vmatprep.mubr.msk.f32.mxu1 %vm2030_vm0, %v2001_v51  ;;  %v2019_v51 = vld [vmem:[%s7313_s26 + $0x1b0] sm:$0xff] }
 0x301   : > { %6195 = vmatmul.mubr.msk.f32.gmra.mrb[36].mxu1 %vm2030_vm0, %v2002_v1  ;;  %v2020_v1 = vld [vmem:[%s7313_s26 + $0x1b8] sm:$0xff] }
 0x302   : > { %6197 = vmatprep.mubr.msk.f32.mxu1 %vm2030_vm0, %v2003_v0  ;;  %v2021_v0 = vld [vmem:[%s7313_s26 + $0x1c0] sm:$0xff] }
 0x305   : > { %6198 = vmatmul.mubr.msk.f32.gmra.mrb[38].mxu1 %vm2030_vm0, %v2004_v3  ;;  %v2022_v3 = vld [vmem:[%s7313_s26 + $0x1c8] sm:$0xff] }
 0x306   : > { %6200 = vmatprep.mubr.msk.f32.mxu1 %vm2030_vm0, %v2005_v48  ;;  %v2023_v48 = vld [vmem:[%s7313_s26 + $0x1d0] sm:$0xff] }
 0x309   : > { %6201 = vmatmul.mubr.msk.f32.gmra.mrb[40].mxu1 %vm2030_vm0, %v2006_v5  ;;  %v2024_v5 = vld [vmem:[%s7313_s26 + $0x1d8] sm:$0xff] }
 0x30a   : > { %6203 = vmatprep.mubr.msk.f32.mxu1 %vm2030_vm0, %v2007_v44  ;;  %v2025_v44 = vld [vmem:[%s7313_s26 + $0x1e0] sm:$0xff] }
 0x30d   : > { %6204 = vmatmul.mubr.msk.f32.gmra.mrb[42].mxu1 %vm2030_vm0, %v2008_v4  ;;  %v2026_v4 = vld [vmem:[%s7313_s26 + $0x1e8] sm:$0xff] }
 0x30e   : > { %6206 = vmatprep.mubr.msk.f32.mxu1 %vm2030_vm0, %v2009_v50  ;;  %v2027_v50 = vld [vmem:[%s7313_s26 + $0x1f0] sm:$0xff] }
 0x311   : > { %6207 = vmatmul.mubr.msk.f32.gmra.mrb[44].mxu1 %vm2030_vm0, %v2010_v46  ;;  %v2028_v46 = vld [vmem:[%s7313_s26 + $0x1f8] sm:$0xff] }
 0x312   : > { %6209 = vmatprep.mubr.msk.f32.mxu1 %vm2030_vm0, %v2011_v53 }
 0x315   : > { %6210 = vmatmul.mubr.msk.f32.gmra.mrb[46].mxu1 %vm2030_vm0, %v2012_v57  ;;  %v8304_v57 = vld [vmem:[#allocation11] ss:$0 sm:$0xff] }
 0x316   : > { %6212 = vmatprep.mubr.msk.f32.mxu1 %vm2030_vm0, %v2013_v41  ;;  %v11162_v41 = vld [vmem:[#allocation28_spill] sm:$0xff] }
 0x319   : > { %6213 = vmatmul.mubr.msk.f32.gmra.mrb[48].mxu1 %vm2030_vm0, %v2014_v55 }
 0x31a   : > { %6215 = vmatprep.mubr.msk.f32.mxu1 %vm2030_vm0, %v2015_v59 }
 0x31d   : > { %6216 = vmatmul.mubr.msk.f32.gmra.mrb[50].mxu1 %vm2030_vm0, %v2016_v58  ;;  %v11163_v58 = vld [vmem:[#allocation29_spill] sm:$0xff] }
 0x31e   : > { %6218 = vmatprep.mubr.msk.f32.mxu1 %vm2030_vm0, %v2017_v61 }
 0x321   : > { %6219 = vmatmul.mubr.msk.f32.gmra.mrb[52].mxu1 %vm2030_vm0, %v2018_v60 }
 0x322   : > { %6221 = vmatprep.mubr.msk.f32.mxu1 %vm2030_vm0, %v2019_v51 }
 0x325   : > { %6222 = vmatmul.mubr.msk.f32.gmra.mrb[54].mxu1 %vm2030_vm0, %v2020_v1 }
 0x326   : > { %6224 = vmatprep.mubr.msk.f32.mxu1 %vm2030_vm0, %v2021_v0 }
 0x329   : > { %6225 = vmatmul.mubr.msk.f32.gmra.mrb[56].mxu1 %vm2030_vm0, %v2022_v3  ;;  %v11164_v3 = vld [vmem:[#allocation30_spill] sm:$0xff] }
 0x32a   : > { %6227 = vmatprep.mubr.msk.f32.mxu1 %vm2030_vm0, %v2023_v48 }
 0x32d   : > { %6228 = vmatmul.mubr.msk.f32.gmra.mrb[58].mxu1 %vm2030_vm0, %v2024_v5 }
 0x32e   : > { %6230 = vmatprep.mubr.msk.f32.mxu1 %vm2030_vm0, %v2025_v44  ;;  %v8311_v44 = vld [vmem:[#allocation13] ss:$0 sm:$0xff] }
 0x331   : > { %6231 = vmatmul.mubr.msk.f32.gmra.mrb[60].mxu1 %vm2030_vm0, %v2026_v4 }
 0x332   : > { %6233 = vmatprep.mubr.msk.f32.mxu1 %vm2030_vm0, %v2027_v50  ;;  %v11165_v50 = vld [vmem:[#allocation31_spill] sm:$0xff] }
 0x335   : > { %6234 = vmatmul.mubr.msk.f32.gmra.mrb[62].mxu1 %vm2030_vm0, %v2028_v46 }
 0x350   : > { %v6044_v53 = vpop.f32.mrb[0].mxu1 }
 0x351   : > { %v2872_v55 = vadd.f32 %v11162_v41, %v6044_v53  ;;  %v1646_v59 = vpop.f32.mrb[1].mxu1 }
 0x352   : > { %v2867_v61 = vadd.f32 %v11163_v58, %v1646_v59 }
 0x353   : > { %v3257_v60 = vadd.f32 %v8304_v57, %v2872_v55 }
 0x354   : > { %v3256_v51 = vadd.f32 %v8304_v57, %v2867_v61  ;;  %v6047_v1 = vpop.f32.mrb[2].mxu1 }
 0x355   : > { %v3321_v0 = vmul.f32 0.01, %v3257_v60  ;;  %v2882_v48 = vadd.f32 %v11164_v3, %v6047_v1  ;;  %v1656_v5 = vpop.f32.mrb[3].mxu1  ;;  %v11167_v1 = vld [vmem:[#allocation32_spill] sm:$0xff]  ;;  %v11168_v3 = vld [vmem:[#allocation33_spill] sm:$0xff] }
 0x356   : > { %v3320_v4 = vmul.f32 0.01, %v3256_v51  ;;  %v2877_v46 = vadd.f32 %v11165_v50, %v1656_v5 }
 0x357   : > { %v3385_v37 = vmax.f32 %v3257_v60, %v3321_v0  ;;  %v3259_v53 = vadd.f32 %v8304_v57, %v2882_v48 }
 0x358   : > { %v8315_v41 = vmax.f32 %v3256_v51, %v3320_v4  ;;  %v3258_v59 = vadd.f32 %v8304_v57, %v2877_v46  ;;  %v6050_v55 = vpop.f32.mrb[4].mxu1 }
 0x359   : > { %3449 = vst.msk [vmem:[%s8319_s30 + $0x8] sm:$0xff] %vm1387_vm1, %v3385_v37  ;;  %v8324_v58 = vmul.f32 %v8311_v44, %v3385_v37  ;;  %v3323_v61 = vmul.f32 0.01, %v3259_v53  ;;  %v2892_v60 = vadd.f32 %v11167_v1, %v6050_v55  ;;  %v1666_v0 = vpop.f32.mrb[5].mxu1 }
 0x35a   : > { %3448 = vst.msk [vmem:[%s8319_s30] sm:$0xff] %vm1387_vm1, %v8315_v41  ;;  %v3322_v51 = vmul.f32 0.01, %v3258_v59  ;;  %v2887_v48 = vadd.f32 %v11168_v3, %v1666_v0  ;;  %v11170_v3 = vld [vmem:[#allocation37_spill] sm:$0xff] }
 0x35b   : > { %11166 = vst [vmem:[#allocation35_spill] sm:$0xff] %v8324_v58  ;;  %v8331_v5 = vmax.f32 %v3259_v53, %v3323_v61  ;;  %v3261_v4 = vadd.f32 %v8304_v57, %v2892_v60  ;;  %3841 = vrot.lane.b32.xlu0 %v8324_v58, %s6938_s27  ;;  %v3586_v37 = vsel %vm2030_vm0, %v8324_v58, 0.0  ;;  %v11169_v61 = vld [vmem:[#allocation36_spill] sm:$0xff] }
 0x35c   : > { %v8338_v50 = vmax.f32 %v3258_v59, %v3322_v51  ;;  %v3260_v46 = vadd.f32 %v8304_v57, %v2887_v48  ;;  %3587 = vadd.xlane.f32.xlu1 %v3586_v37  ;;  %v6053_v55 = vpop.f32.mrb[6].mxu1 }
 0x35d   : > { %3451 = vst.msk [vmem:[%s8319_s30 + $0x18] sm:$0xff] %vm1387_vm1, %v8331_v5  ;;  %v3325_v53 = vmul.f32 0.01, %v3261_v4  ;;  %v2902_v1 = vadd.f32 %v11169_v61, %v6053_v55  ;;  %v1676_v60 = vpop.f32.mrb[7].mxu1  ;;  %v11171_v61 = vld [vmem:[#allocation40_spill] sm:$0xff] }
 0x35e   : > { %3450 = vst.msk [vmem:[%s8319_s30 + $0x10] sm:$0xff] %vm1387_vm1, %v8338_v50  ;;  %v3324_v0 = vmul.f32 0.01, %v3260_v46  ;;  %v2897_v59 = vadd.f32 %v11170_v3, %v1676_v60 }
 0x35f   : > { %v8349_v51 = vmax.f32 %v3261_v4, %v3325_v53  ;;  %v3263_v48 = vadd.f32 %v8304_v57, %v2902_v1  ;;  %v11172_v53 = vld [vmem:[#allocation41_spill] sm:$0xff] }
 0x360   : > { %v8352_v37 = vmax.f32 %v3260_v46, %v3324_v0  ;;  %v3262_v58 = vadd.f32 %v8304_v57, %v2897_v59  ;;  %v6056_v54 = vpop.f32.mrb[8].mxu1 }
 0x361   : > { %3453 = vst.msk [vmem:[%s8319_s30 + $0x28] sm:$0xff] %vm1387_vm1, %v8349_v51  ;;  %v3327_v55 = vmul.f32 0.01, %v3263_v48  ;;  %v2912_v32 = vadd.f32 %v11171_v61, %v6056_v54  ;;  %v1686_v52 = vpop.f32.mrb[9].mxu1  ;;  %v11173_v61 = vld [vmem:[#allocation44_spill] sm:$0xff] }
 0x362   : > { %3452 = vst.msk [vmem:[%s8319_s30 + $0x20] sm:$0xff] %vm1387_vm1, %v8352_v37  ;;  %v3326_v4 = vmul.f32 0.01, %v3262_v58  ;;  %v2907_v1 = vadd.f32 %v11172_v53, %v1686_v52 }
 0x363   : > { %v8363_v60 = vmax.f32 %v3263_v48, %v3327_v55  ;;  %v3265_v46 = vadd.f32 %v8304_v57, %v2912_v32  ;;  %v11174_v48 = vld [vmem:[#allocation45_spill] sm:$0xff] }
 0x364   : > { %v8366_v0 = vmax.f32 %v3262_v58, %v3326_v4  ;;  %v3264_v3 = vadd.f32 %v8304_v57, %v2907_v1  ;;  %v6059_v59 = vpop.f32.mrb[10].mxu1 }
 0x365   : > { %3455 = vst.msk [vmem:[%s8319_s30 + $0x38] sm:$0xff] %vm1387_vm1, %v8363_v60  ;;  %v3329_v54 = vmul.f32 0.01, %v3265_v46  ;;  %v2922_v30 = vadd.f32 %v11173_v61, %v6059_v59  ;;  %v1696_v49 = vpop.f32.mrb[11].mxu1  ;;  %v11176_v61 = vld [vmem:[#allocation48_spill] sm:$0xff] }
 0x366   : > { %3454 = vst.msk [vmem:[%s8319_s30 + $0x30] sm:$0xff] %vm1387_vm1, %v8366_v0  ;;  %v3328_v52 = vmul.f32 0.01, %v3264_v3  ;;  %v2917_v32 = vadd.f32 %v11174_v48, %v1696_v49 }
 0x367   : > { %v8377_v55 = vmax.f32 %v3265_v46, %v3329_v54  ;;  %v3267_v58 = vadd.f32 %v8304_v57, %v2922_v30  ;;  %v11177_v46 = vld [vmem:[#allocation49_spill] sm:$0xff] }
 0x368   : > { %v8380_v4 = vmax.f32 %v3264_v3, %v3328_v52  ;;  %v3266_v53 = vadd.f32 %v8304_v57, %v2917_v32  ;;  %v6062_v1 = vpop.f32.mrb[12].mxu1  ;;  %v8393_v3 = vmul.f32 %v8311_v44, %v8315_v41 }
 0x369   : > { %3457 = vst.msk [vmem:[%s8319_s30 + $0x48] sm:$0xff] %vm1387_vm1, %v8377_v55  ;;  %v3331_v59 = vmul.f32 0.01, %v3267_v58  ;;  %v2932_v28 = vadd.f32 %v11176_v61, %v6062_v1  ;;  %v1706_v47 = vpop.f32.mrb[13].mxu1 }
 0x36a   : > { %11175 = vst [vmem:[#allocation34_spill] sm:$0xff] %v8380_v4  ;;  %3456 = vst.msk [vmem:[%s8319_s30 + $0x40] sm:$0xff] %vm1387_vm1, %v8380_v4  ;;  %v3330_v49 = vmul.f32 0.01, %v3266_v53  ;;  %v2927_v30 = vadd.f32 %v11177_v46, %v1706_v47  ;;  %v11181_v4 = vld [vmem:[#allocation52_spill] sm:$0xff] }
 0x36b   : > { %11178 = vst [vmem:[#allocation39_spill] sm:$0xff] %v8393_v3  ;;  %v8395_v54 = vmax.f32 %v3267_v58, %v3331_v59  ;;  %v3269_v52 = vadd.f32 %v8304_v57, %v2932_v28  ;;  %v11182_v58 = vld [vmem:[#allocation53_spill] sm:$0xff]  ;;  %v8413_v59 = vmul.f32 %v8311_v44, %v8331_v5 }
 0x36c   : > { %v8398_v48 = vmax.f32 %v3266_v53, %v3330_v49  ;;  %v3268_v32 = vadd.f32 %v8304_v57, %v2927_v30  ;;  %v6065_v1 = vpop.f32.mrb[14].mxu1 }
 0x36d   : > { %11179 = vst [vmem:[#allocation38_spill] sm:$0xff] %v8395_v54  ;;  %3459 = vst.msk [vmem:[%s8319_s30 + $0x58] sm:$0xff] %vm1387_vm1, %v8395_v54  ;;  %v3333_v61 = vmul.f32 0.01, %v3269_v52  ;;  %v2942_v47 = vadd.f32 %v11181_v4, %v6065_v1  ;;  %3839 = vrot.lane.b32.xlu1 %v8393_v3, %s6938_s27  ;;  %v1716_v41 = vpop.f32.mrb[15].mxu1  ;;  %v11185_v54 = vld [vmem:[#allocation56_spill] sm:$0xff] }
 0x36e   : > { %11180 = vst [vmem:[#allocation43_spill] sm:$0xff] %v8398_v48  ;;  %3458 = vst.msk [vmem:[%s8319_s30 + $0x50] sm:$0xff] %vm1387_vm1, %v8398_v48  ;;  %v3332_v28 = vmul.f32 0.01, %v3268_v32  ;;  %v2937_v53 = vadd.f32 %v11182_v58, %v1716_v41 }
 0x36f   : > { %11183 = vst [vmem:[#allocation42_spill] sm:$0xff] %v8413_v59  ;;  %v8415_v49 = vmax.f32 %v3269_v52, %v3333_v61  ;;  %v3271_v46 = vadd.f32 %v8304_v57, %v2942_v47  ;;  %v8433_v47 = vmul.f32 %v8311_v44, %v8338_v50 }
 0x370   : > { %v8418_v4 = vmax.f32 %v3268_v32, %v3332_v28  ;;  %v3270_v30 = vadd.f32 %v8304_v57, %v2937_v53  ;;  %v6068_v1 = vpop.f32.mrb[16].mxu1  ;;  %v11186_v32 = vld [vmem:[#allocation57_spill] sm:$0xff] }
 0x371   : > { %3461 = vst.msk [vmem:[%s8319_s30 + $0x68] sm:$0xff] %vm1387_vm1, %v8415_v49  ;;  %v3335_v48 = vmul.f32 0.01, %v3271_v46  ;;  %v2952_v41 = vadd.f32 %v11185_v54, %v6068_v1  ;;  %3845 = vrot.lane.b32.xlu1 %v8413_v59, %s6938_s27  ;;  %v1726_v5 = vpop.f32.mrb[17].mxu1  ;;  %11187 = vst [vmem:[#allocation46_spill] sm:$0xff] %v8433_v47 }
 0x372   : > { %11184 = vst [vmem:[#allocation47_spill] sm:$0xff] %v8418_v4  ;;  %3460 = vst.msk [vmem:[%s8319_s30 + $0x60] sm:$0xff] %vm1387_vm1, %v8418_v4  ;;  %v3334_v52 = vmul.f32 0.01, %v3270_v30  ;;  %v2947_v61 = vadd.f32 %v11186_v32, %v1726_v5 }
 0x373   : > { %v8435_v28 = vmax.f32 %v3271_v46, %v3335_v48  ;;  %v3273_v58 = vadd.f32 %v8304_v57, %v2952_v41 }
 0x374   : > { %v8438_v54 = vmax.f32 %v3270_v30, %v3334_v52  ;;  %v3272_v53 = vadd.f32 %v8304_v57, %v2947_v61  ;;  %v6071_v1 = vpop.f32.mrb[18].mxu1  ;;  %v8453_v30 = vmul.f32 %v8311_v44, %v8349_v51 }
 0x375   : > { %3463 = vst.msk [vmem:[%s8319_s30 + $0x78] sm:$0xff] %vm1387_vm1, %v8435_v28  ;;  %v3337_v4 = vmul.f32 0.01, %v3273_v58  ;;  %v2962_v5 = vadd.f32 %v7900_v62, %v6071_v1  ;;  %3843 = vrot.lane.b32.xlu1 %v8433_v47, %s6938_s27  ;;  %v1736_v50 = vpop.f32.mrb[19].mxu1 }
 0x376   : > { %3462 = vst.msk [vmem:[%s8319_s30 + $0x70] sm:$0xff] %vm1387_vm1, %v8438_v54  ;;  %v3336_v48 = vmul.f32 0.01, %v3272_v53  ;;  %v2957_v46 = vadd.f32 %v7902_v13, %v1736_v50  ;;  %11188 = vst [vmem:[#allocation51_spill] sm:$0xff] %v8453_v30 }
 0x377   : > { %v8455_v41 = vmax.f32 %v3273_v58, %v3337_v4  ;;  %v3275_v52 = vadd.f32 %v8304_v57, %v2962_v5  ;;  %v3583_v4 = vsel %vm2030_vm0, %v8393_v3, 0.0 }
 0x378   : > { %v8458_v62 = vmax.f32 %v3272_v53, %v3336_v48  ;;  %v3274_v32 = vadd.f32 %v8304_v57, %v2957_v46  ;;  %v6074_v61 = vpop.f32.mrb[20].mxu1 }
 0x379   : > { %3465 = vst.msk [vmem:[%s8319_s30 + $0x88] sm:$0xff] %vm1387_vm1, %v8455_v41  ;;  %v3339_v1 = vmul.f32 0.01, %v3275_v52  ;;  %v2972_v13 = vadd.f32 %v7904_v9, %v6074_v61  ;;  %3849 = vrot.lane.b32.xlu1 %v8453_v30, %s6938_s27  ;;  %v1746_v51 = vpop.f32.mrb[21].mxu1 }
 0x37a   : > { %11189 = vst [vmem:[#allocation50_spill] sm:$0xff] %v8458_v62  ;;  %3464 = vst.msk [vmem:[%s8319_s30 + $0x80] sm:$0xff] %vm1387_vm1, %v8458_v62  ;;  %v3338_v58 = vmul.f32 0.01, %v3274_v32  ;;  %v2967_v53 = vadd.f32 %v7906_v7, %v1746_v51  ;;  %3584 = vadd.xlane.f32.xlu0 %v3583_v4  ;;  %v3592_v7 = vsel %vm2030_vm0, %v8413_v59, 0.0 }
 0x37b   : > { %v8473_v5 = vmax.f32 %v3275_v52, %v3339_v1  ;;  %v3277_v50 = vadd.f32 %v8304_v57, %v2972_v13 }
 0x37c   : > { %v8476_v9 = vmax.f32 %v3274_v32, %v3338_v58  ;;  %v3276_v48 = vadd.f32 %v8304_v57, %v2967_v53  ;;  %v6077_v46 = vpop.f32.mrb[22].mxu1 }
 0x37d   : > { %3467 = vst.msk [vmem:[%s8319_s30 + $0x98] sm:$0xff] %vm1387_vm1, %v8473_v5  ;;  %v3341_v61 = vmul.f32 0.01, %v3277_v50  ;;  %v2982_v3 = vadd.f32 %v7908_v10, %v6077_v46  ;;  %v1756_v62 = vpop.f32.mrb[23].mxu1 }
 0x37e   : > { %3466 = vst.msk [vmem:[%s8319_s30 + $0x90] sm:$0xff] %vm1387_vm1, %v8476_v9  ;;  %v3340_v52 = vmul.f32 0.01, %v3276_v48  ;;  %v2977_v32 = vadd.f32 %v7910_v11, %v1756_v62  ;;  %3593 = vadd.xlane.f32.xlu0 %v3592_v7  ;;  %v3589_v11 = vsel %vm2030_vm0, %v8433_v47, 0.0 }
 0x37f   : > { %v8489_v1 = vmax.f32 %v3277_v50, %v3341_v61  ;;  %v3279_v13 = vadd.f32 %v8304_v57, %v2982_v3 }
 0x380   : > { %v8492_v51 = vmax.f32 %v3276_v48, %v3340_v52  ;;  %v3278_v10 = vadd.f32 %v8304_v57, %v2977_v32  ;;  %v6080_v4 = vpop.f32.mrb[24].mxu1 }
 0x381   : > { %3469 = vst.msk [vmem:[%s8319_s30 + $0xa8] sm:$0xff] %vm1387_vm1, %v8489_v1  ;;  %v3343_v58 = vmul.f32 0.01, %v3279_v13  ;;  %v2992_v53 = vadd.f32 %v7916_v56, %v6080_v4  ;;  %v1766_v46 = vpop.f32.mrb[25].mxu1 }
 0x382   : > { %3468 = vst.msk [vmem:[%s8319_s30 + $0xa0] sm:$0xff] %vm1387_vm1, %v8492_v51  ;;  %v3342_v3 = vmul.f32 0.01, %v3278_v10  ;;  %v2987_v62 = vadd.f32 %v7918_v15, %v1766_v46  ;;  %3590 = vadd.xlane.f32.xlu0 %v3589_v11  ;;  %v3598_v15 = vsel %vm2030_vm0, %v8453_v30, 0.0 }
 0x383   : > { %v8505_v50 = vmax.f32 %v3279_v13, %v3343_v58  ;;  %v3281_v48 = vadd.f32 %v8304_v57, %v2992_v53 }
 0x384   : > { %v8508_v61 = vmax.f32 %v3278_v10, %v3342_v3  ;;  %v3280_v56 = vadd.f32 %v8304_v57, %v2987_v62  ;;  %v6083_v7 = vpop.f32.mrb[26].mxu1 }
 0x385   : > { %3471 = vst.msk [vmem:[%s8319_s30 + $0xb8] sm:$0xff] %vm1387_vm1, %v8505_v50  ;;  %v3345_v52 = vmul.f32 0.01, %v3281_v48  ;;  %v3002_v32 = vadd.f32 %v7928_v12, %v6083_v7  ;;  %v1776_v4 = vpop.f32.mrb[27].mxu1 }
 0x386   : > { %3470 = vst.msk [vmem:[%s8319_s30 + $0xb0] sm:$0xff] %vm1387_vm1, %v8508_v61  ;;  %v3344_v13 = vmul.f32 0.01, %v3280_v56  ;;  %v2997_v10 = vadd.f32 %v7930_v17, %v1776_v4  ;;  %3599 = vadd.xlane.f32.xlu0 %v3598_v15 }
 0x387   : > { %v8521_v58 = vmax.f32 %v3281_v48, %v3345_v52  ;;  %v3283_v53 = vadd.f32 %v8304_v57, %v3002_v32 }
 0x388   : > { %v8524_v46 = vmax.f32 %v3280_v56, %v3344_v13  ;;  %v3282_v12 = vadd.f32 %v8304_v57, %v2997_v10  ;;  %v6086_v11 = vpop.f32.mrb[28].mxu1 }
 0x389   : > { %3473 = vst.msk [vmem:[%s8319_s30 + $0xc8] sm:$0xff] %vm1387_vm1, %v8521_v58  ;;  %v3347_v3 = vmul.f32 0.01, %v3283_v53  ;;  %v3012_v62 = vadd.f32 %v7940_v33, %v6086_v11  ;;  %v1786_v7 = vpop.f32.mrb[29].mxu1 }
 0x38a   : > { %3472 = vst.msk [vmem:[%s8319_s30 + $0xc0] sm:$0xff] %vm1387_vm1, %v8524_v46  ;;  %v3346_v17 = vmul.f32 0.01, %v3282_v12  ;;  %v3007_v48 = vadd.f32 %v7942_v14, %v1786_v7 }
 0x38b   : > { %v8535_v52 = vmax.f32 %v3283_v53, %v3347_v3  ;;  %v3285_v56 = vadd.f32 %v8304_v57, %v3012_v62 }
 0x38c   : > { %v8538_v32 = vmax.f32 %v3282_v12, %v3346_v17  ;;  %v3284_v4 = vadd.f32 %v8304_v57, %v3007_v48  ;;  %v6089_v15 = vpop.f32.mrb[30].mxu1 }
 0x38d   : > { %3475 = vst.msk [vmem:[%s8319_s30 + $0xd8] sm:$0xff] %vm1387_vm1, %v8535_v52  ;;  %v3349_v33 = vmul.f32 0.01, %v3285_v56  ;;  %v3022_v13 = vadd.f32 %v7952_v36, %v6089_v15  ;;  %v1796_v10 = vpop.f32.mrb[31].mxu1 }
 0x38e   : > { %3474 = vst.msk [vmem:[%s8319_s30 + $0xd0] sm:$0xff] %vm1387_vm1, %v8538_v32  ;;  %v3348_v14 = vmul.f32 0.01, %v3284_v4  ;;  %v3017_v53 = vadd.f32 %v7954_v2, %v1796_v10 }
 0x38f   : > { %v8549_v11 = vmax.f32 %v3285_v56, %v3349_v33  ;;  %v3287_v12 = vadd.f32 %v8304_v57, %v3022_v13 }
 0x390   : > { %v8552_v3 = vmax.f32 %v3284_v4, %v3348_v14  ;;  %v3286_v62 = vadd.f32 %v8304_v57, %v3017_v53  ;;  %v6092_v7 = vpop.f32.mrb[32].mxu1 }
 0x391   : > { %3477 = vst.msk [vmem:[%s8319_s30 + $0xe8] sm:$0xff] %vm1387_vm1, %v8549_v11  ;;  %v3351_v36 = vmul.f32 0.01, %v3287_v12  ;;  %v3032_v17 = vadd.f32 %v7964_v40, %v6092_v7  ;;  %v1806_v48 = vpop.f32.mrb[33].mxu1  ;;  %v8603_v7 = vmul.f32 %v8311_v44, %v8366_v0 }
 0x392   : > { %3476 = vst.msk [vmem:[%s8319_s30 + $0xe0] sm:$0xff] %vm1387_vm1, %v8552_v3  ;;  %v3350_v2 = vmul.f32 0.01, %v3286_v62  ;;  %v3027_v56 = vadd.f32 %v7966_v63, %v1806_v48  ;;  %v8579_v63 = vmul.f32 %v8311_v44, %v8352_v37 }
 0x393   : > { %v8563_v4 = vmax.f32 %v3287_v12, %v3351_v36  ;;  %v3289_v15 = vadd.f32 %v8304_v57, %v3032_v17  ;;  %11192 = vst [vmem:[#allocation59_spill] sm:$0xff] %v8603_v7 }
 0x394   : > { %v8566_v33 = vmax.f32 %v3286_v62, %v3350_v2  ;;  %v3288_v13 = vadd.f32 %v8304_v57, %v3027_v56  ;;  %11190 = vst [vmem:[#allocation55_spill] sm:$0xff] %v8579_v63  ;;  %v3595_v12 = vsel %vm2030_vm0, %v8579_v63, 0.0  ;;  %v8595_v62 = vmul.f32 %v8311_v44, %v8363_v60 }
 0x395   : > { %3479 = vst.msk [vmem:[%s8319_s30 + $0xf8] sm:$0xff] %vm1387_vm1, %v8563_v4  ;;  %v3353_v40 = vmul.f32 0.01, %v3289_v15  ;;  %v3601_v60 = vsel %vm2030_vm0, %v8603_v7, 0.0 }
 0x396   : > { %3478 = vst.msk [vmem:[%s8319_s30 + $0xf0] sm:$0xff] %vm1387_vm1, %v8566_v33  ;;  %v3352_v10 = vmul.f32 0.01, %v3288_v13  ;;  %11191 = vst [vmem:[#allocation54_spill] sm:$0xff] %v8595_v62  ;;  %v3604_v37 = vsel %vm2030_vm0, %v8595_v62, 0.0 }
 0x397   : > { %v8575_v14 = vmax.f32 %v3289_v15, %v3353_v40 }
 0x398   : > { %v8581_v53 = vmax.f32 %v3288_v13, %v3352_v10 }
 0x399   : > { %3481 = vst.msk [vmem:[%s8319_s30 + $0x108] sm:$0xff] %vm1387_vm1, %v8575_v14 }
 0x39a   : > { %3480 = vst.msk [vmem:[%s8319_s30 + $0x100] sm:$0xff] %vm1387_vm1, %v8581_v53 }
 0x39c   : > { %3847 = vrot.lane.b32.xlu0 %v8579_v63, %s6938_s27 }
 0x39d   : > { %3596 = vadd.xlane.f32.xlu1 %v3595_v12 }
 0x3ae   : > { %3853 = vrot.lane.b32.xlu1 %v8595_v62, %s6938_s27 }
 0x3bb   : > { %3605 = vadd.xlane.f32.xlu0 %v3604_v37 }
 0x3d0   : > { %v6193_v36 = vpop.f32.mrb[34].mxu1 }
 0x3d1   : > { %v6392_v17 = vadd.f32 %v7976_v19, %v6193_v36  ;;  %3851 = vrot.lane.b32.xlu0 %v8603_v7, %s6938_s27  ;;  %v2459_v48 = vpop.f32.mrb[35].mxu1 }
 0x3d2   : > { %v6393_v2 = vadd.f32 %v7978_v6, %v2459_v48  ;;  %3602 = vadd.xlane.f32.xlu1 %v3601_v60 }
 0x3d3   : > { %v3291_v56 = vadd.f32 %v6392_v17, %v8304_v57 }
 0x3d4   : > { %v3290_v15 = vadd.f32 %v6393_v2, %v8304_v57  ;;  %v6196_v0 = vpop.f32.mrb[36].mxu1 }
 0x3d5   : > { %v3355_v13 = vmul.f32 0.01, %v3291_v56  ;;  %v6394_v19 = vadd.f32 %v7988_v21, %v6196_v0  ;;  %v2469_v40 = vpop.f32.mrb[37].mxu1 }
 0x3d6   : > { %v3354_v10 = vmul.f32 0.01, %v3290_v15  ;;  %v6395_v12 = vadd.f32 %v7990_v8, %v2469_v40 }
 0x3d7   : > { %v8615_v37 = vmax.f32 %v3291_v56, %v3355_v13  ;;  %v3293_v36 = vadd.f32 %v6394_v19, %v8304_v57 }
 0x3d8   : > { %v8618_v6 = vmax.f32 %v3290_v15, %v3354_v10  ;;  %v3292_v17 = vadd.f32 %v6395_v12, %v8304_v57  ;;  %v6199_v48 = vpop.f32.mrb[38].mxu1 }
 0x3d9   : > { %3483 = vst.msk [vmem:[%s8319_s30 + $0x118] sm:$0xff] %vm1387_vm1, %v8615_v37  ;;  %v3357_v60 = vmul.f32 0.01, %v3293_v36  ;;  %v6396_v21 = vadd.f32 %v8000_v23, %v6199_v48  ;;  %v2479_v2 = vpop.f32.mrb[39].mxu1 }
 0x3da   : > { %3482 = vst.msk [vmem:[%s8319_s30 + $0x110] sm:$0xff] %vm1387_vm1, %v8618_v6  ;;  %v3356_v8 = vmul.f32 0.01, %v3292_v17  ;;  %v6397_v56 = vadd.f32 %v8002_v16, %v2479_v2 }
 0x3db   : > { %v8629_v0 = vmax.f32 %v3293_v36, %v3357_v60  ;;  %v3295_v15 = vadd.f32 %v6396_v21, %v8304_v57 }
 0x3dc   : > { %v8632_v13 = vmax.f32 %v3292_v17, %v3356_v8  ;;  %v3294_v19 = vadd.f32 %v6397_v56, %v8304_v57  ;;  %v6202_v40 = vpop.f32.mrb[40].mxu1 }
 0x3dd   : > { %3485 = vst.msk [vmem:[%s8319_s30 + $0x128] sm:$0xff] %vm1387_vm1, %v8629_v0  ;;  %v3359_v23 = vmul.f32 0.01, %v3295_v15  ;;  %v6398_v10 = vadd.f32 %v8012_v25, %v6202_v40  ;;  %v2489_v12 = vpop.f32.mrb[41].mxu1  ;;  %v8651_v25 = vmul.f32 %v8311_v44, %v8377_v55 }
 0x3de   : > { %3484 = vst.msk [vmem:[%s8319_s30 + $0x120] sm:$0xff] %vm1387_vm1, %v8632_v13  ;;  %v3358_v16 = vmul.f32 0.01, %v3294_v19  ;;  %v6399_v36 = vadd.f32 %v8014_v18, %v2489_v12 }
 0x3df   : > { %v8643_v17 = vmax.f32 %v3295_v15, %v3359_v23  ;;  %v3297_v48 = vadd.f32 %v6398_v10, %v8304_v57  ;;  %11193 = vst [vmem:[#allocation58_spill] sm:$0xff] %v8651_v25 }
 0x3e0   : > { %v8646_v60 = vmax.f32 %v3294_v19, %v3358_v16  ;;  %v3296_v21 = vadd.f32 %v6399_v36, %v8304_v57  ;;  %v6205_v2 = vpop.f32.mrb[42].mxu1 }
 0x3e1   : > { %3487 = vst.msk [vmem:[%s8319_s30 + $0x138] sm:$0xff] %vm1387_vm1, %v8643_v17  ;;  %v3361_v8 = vmul.f32 0.01, %v3297_v48  ;;  %v6400_v18 = vadd.f32 %v8024_v27, %v6205_v2  ;;  %v2499_v56 = vpop.f32.mrb[43].mxu1 }
 0x3e2   : > { %3486 = vst.msk [vmem:[%s8319_s30 + $0x130] sm:$0xff] %vm1387_vm1, %v8646_v60  ;;  %v3360_v15 = vmul.f32 0.01, %v3296_v21  ;;  %v6401_v19 = vadd.f32 %v8026_v34, %v2499_v56 }
 0x3e3   : > { %v8661_v40 = vmax.f32 %v3297_v48, %v3361_v8  ;;  %v3299_v23 = vadd.f32 %v6400_v18, %v8304_v57  ;;  %3857 = vrot.lane.b32.xlu1 %v8651_v25, %s6938_s27 }
 0x3e4   : > { %v8666_v55 = vmax.f32 %v3296_v21, %v3360_v15  ;;  %v3298_v10 = vadd.f32 %v6401_v19, %v8304_v57  ;;  %v6208_v27 = vpop.f32.mrb[44].mxu1 }
 0x3e5   : > { %3489 = vst.msk [vmem:[%s8319_s30 + $0x148] sm:$0xff] %vm1387_vm1, %v8661_v40  ;;  %v3363_v12 = vmul.f32 0.01, %v3299_v23  ;;  %v6402_v34 = vadd.f32 %v8036_v29, %v6208_v27  ;;  %v2509_v16 = vpop.f32.mrb[45].mxu1 }
 0x3e6   : > { %3488 = vst.msk [vmem:[%s8319_s30 + $0x140] sm:$0xff] %vm1387_vm1, %v8666_v55  ;;  %v3362_v36 = vmul.f32 0.01, %v3298_v10  ;;  %v6403_v48 = vadd.f32 %v8038_v39, %v2509_v16 }
 0x3e7   : > { %v8677_v2 = vmax.f32 %v3299_v23, %v3363_v12  ;;  %v3301_v21 = vadd.f32 %v6402_v34, %v8304_v57 }
 0x3e8   : > { %v8680_v8 = vmax.f32 %v3298_v10, %v3362_v36  ;;  %v3300_v18 = vadd.f32 %v6403_v48, %v8304_v57  ;;  %v6211_v56 = vpop.f32.mrb[46].mxu1 }
 0x3e9   : > { %3491 = vst.msk [vmem:[%s8319_s30 + $0x158] sm:$0xff] %vm1387_vm1, %v8677_v2  ;;  %v3365_v29 = vmul.f32 0.01, %v3301_v21  ;;  %v6404_v15 = vadd.f32 %v8048_v31, %v6211_v56  ;;  %v2519_v19 = vpop.f32.mrb[47].mxu1 }
 0x3ea   : > { %3490 = vst.msk [vmem:[%s8319_s30 + $0x150] sm:$0xff] %vm1387_vm1, %v8680_v8  ;;  %v3364_v39 = vmul.f32 0.01, %v3300_v18  ;;  %v6405_v23 = vadd.f32 %v8050_v42, %v2519_v19 }
 0x3eb   : > { %v8691_v27 = vmax.f32 %v3301_v21, %v3365_v29  ;;  %v3303_v10 = vadd.f32 %v6404_v15, %v8304_v57  ;;  %v3610_v29 = vsel %vm2030_vm0, %v8651_v25, 0.0  ;;  %v11197_v25 = vld [vmem:[#allocation34_spill] sm:$0xff] }
 0x3ec   : > { %v8694_v12 = vmax.f32 %v3300_v18, %v3364_v39  ;;  %v3302_v34 = vadd.f32 %v6405_v23, %v8304_v57  ;;  %v6214_v16 = vpop.f32.mrb[48].mxu1 }
 0x3ed   : > { %3493 = vst.msk [vmem:[%s8319_s30 + $0x168] sm:$0xff] %vm1387_vm1, %v8691_v27  ;;  %v3367_v31 = vmul.f32 0.01, %v3303_v10  ;;  %v6406_v36 = vadd.f32 %v8060_v35, %v6214_v16  ;;  %v2529_v48 = vpop.f32.mrb[49].mxu1 }
 0x3ee   : > { %3492 = vst.msk [vmem:[%s8319_s30 + $0x160] sm:$0xff] %vm1387_vm1, %v8694_v12  ;;  %v3366_v42 = vmul.f32 0.01, %v3302_v34  ;;  %v6407_v21 = vadd.f32 %v8062_v20, %v2529_v48 }
 0x3ef   : > { %v8705_v18 = vmax.f32 %v3303_v10, %v3367_v31  ;;  %v3305_v56 = vadd.f32 %v6406_v36, %v8304_v57 }
 0x3f0   : > { %v8710_v15 = vmax.f32 %v3302_v34, %v3366_v42  ;;  %v3304_v35 = vadd.f32 %v6407_v21, %v8304_v57  ;;  %3611 = vadd.xlane.f32.xlu0 %v3610_v29  ;;  %v6217_v19 = vpop.f32.mrb[50].mxu1 }
 0x3f1   : > { %3495 = vst.msk [vmem:[%s8319_s30 + $0x178] sm:$0xff] %vm1387_vm1, %v8705_v18  ;;  %v3369_v39 = vmul.f32 0.01, %v3305_v56  ;;  %v6408_v20 = vadd.f32 %v8072_v38, %v6217_v19  ;;  %v2539_v23 = vpop.f32.mrb[51].mxu1 }
 0x3f2   : > { %3494 = vst.msk [vmem:[%s8319_s30 + $0x170] sm:$0xff] %vm1387_vm1, %v8710_v15  ;;  %v3368_v10 = vmul.f32 0.01, %v3304_v35  ;;  %v6409_v34 = vadd.f32 %v8074_v22, %v2539_v23 }
 0x3f3   : > { %v8721_v16 = vmax.f32 %v3305_v56, %v3369_v39  ;;  %v3307_v31 = vadd.f32 %v6408_v20, %v8304_v57 }
 0x3f4   : > { %v8724_v36 = vmax.f32 %v3304_v35, %v3368_v10  ;;  %v3306_v48 = vadd.f32 %v6409_v34, %v8304_v57  ;;  %v6220_v42 = vpop.f32.mrb[52].mxu1 }
 0x3f5   : > { %3497 = vst.msk [vmem:[%s8319_s30 + $0x188] sm:$0xff] %vm1387_vm1, %v8721_v16  ;;  %v3371_v38 = vmul.f32 0.01, %v3307_v31  ;;  %v6410_v21 = vadd.f32 %v8084_v43, %v6220_v42  ;;  %v2549_v29 = vpop.f32.mrb[53].mxu1 }
 0x3f6   : > { %3496 = vst.msk [vmem:[%s8319_s30 + $0x180] sm:$0xff] %vm1387_vm1, %v8724_v36  ;;  %v3370_v22 = vmul.f32 0.01, %v3306_v48  ;;  %v6411_v56 = vadd.f32 %v8086_v24, %v2549_v29 }
 0x3f7   : > { %v8735_v19 = vmax.f32 %v3307_v31, %v3371_v38  ;;  %v3309_v35 = vadd.f32 %v6410_v21, %v8304_v57 }
 0x3f8   : > { %v8738_v39 = vmax.f32 %v3306_v48, %v3370_v22  ;;  %v3308_v20 = vadd.f32 %v6411_v56, %v8304_v57  ;;  %v6223_v23 = vpop.f32.mrb[54].mxu1  ;;  %v11194_v22 = vld [vmem:[#allocation60_spill] sm:$0xff] }
 0x3f9   : > { %3499 = vst.msk [vmem:[%s8319_s30 + $0x198] sm:$0xff] %vm1387_vm1, %v8735_v19  ;;  %v3373_v43 = vmul.f32 0.01, %v3309_v35  ;;  %v6412_v10 = vadd.f32 %v8096_v45, %v6223_v23  ;;  %v2559_v34 = vpop.f32.mrb[55].mxu1 }
 0x3fa   : > { %3498 = vst.msk [vmem:[%s8319_s30 + $0x190] sm:$0xff] %vm1387_vm1, %v8738_v39  ;;  %v3372_v24 = vmul.f32 0.01, %v3308_v20  ;;  %v6413_v31 = vadd.f32 %v8098_v26, %v2559_v34 }
 0x3fb   : > { %v8749_v42 = vmax.f32 %v3309_v35, %v3373_v43  ;;  %v3311_v48 = vadd.f32 %v6412_v10, %v8304_v57  ;;  %v11195_v35 = vld [vmem:[#allocation61_spill] sm:$0xff] }
 0x3fc   : > { %v8752_v38 = vmax.f32 %v3308_v20, %v3372_v24  ;;  %v3310_v21 = vadd.f32 %v6413_v31, %v8304_v57  ;;  %v6226_v29 = vpop.f32.mrb[56].mxu1 }
 0x3fd   : > { %3501 = vst.msk [vmem:[%s8319_s30 + $0x1a8] sm:$0xff] %vm1387_vm1, %v8749_v42  ;;  %v3375_v45 = vmul.f32 0.01, %v3311_v48  ;;  %v6414_v56 = vadd.f32 %v11194_v22, %v6226_v29  ;;  %v2569_v23 = vpop.f32.mrb[57].mxu1  ;;  %v11196_v22 = vld [vmem:[#allocation62_spill] sm:$0xff] }
 0x3fe   : > { %3500 = vst.msk [vmem:[%s8319_s30 + $0x1a0] sm:$0xff] %vm1387_vm1, %v8752_v38  ;;  %v3374_v26 = vmul.f32 0.01, %v3310_v21  ;;  %v6415_v43 = vadd.f32 %v11195_v35, %v2569_v23 }
 0x3ff   : > { %v8763_v10 = vmax.f32 %v3311_v48, %v3375_v45  ;;  %v3313_v20 = vadd.f32 %v6414_v56, %v8304_v57  ;;  %v8775_v48 = vmul.f32 %v8311_v44, %v11197_v25  ;;  %v11199_v45 = vld [vmem:[#allocation63_spill] sm:$0xff] }
 0x400   : > { %v8766_v34 = vmax.f32 %v3310_v21, %v3374_v26  ;;  %v3312_v24 = vadd.f32 %v6415_v43, %v8304_v57  ;;  %v6229_v31 = vpop.f32.mrb[58].mxu1 }
 0x401   : > { %3503 = vst.msk [vmem:[%s8319_s30 + $0x1b8] sm:$0xff] %vm1387_vm1, %v8763_v10  ;;  %v3377_v29 = vmul.f32 0.01, %v3313_v20  ;;  %v6416_v7 = vadd.f32 %v11196_v22, %v6229_v31  ;;  %v2579_v63 = vpop.f32.mrb[59].mxu1  ;;  %11198 = vst [vmem:[#allocation28_spill] sm:$0xff] %v8775_v48  ;;  %v11200_v22 = vld [vmem:[#allocation64_spill] sm:$0xff] }
 0x402   : > { %3502 = vst.msk [vmem:[%s8319_s30 + $0x1b0] sm:$0xff] %vm1387_vm1, %v8766_v34  ;;  %v3376_v21 = vmul.f32 0.01, %v3312_v24  ;;  %v6417_v56 = vadd.f32 %v11199_v45, %v2579_v63 }
 0x403   : > { %v8781_v23 = vmax.f32 %v3313_v20, %v3377_v29  ;;  %v3315_v26 = vadd.f32 %v6416_v7, %v8304_v57  ;;  %v11201_v20 = vld [vmem:[#allocation65_spill] sm:$0xff] }
 0x404   : > { %v8784_v35 = vmax.f32 %v3312_v24, %v3376_v21  ;;  %v3314_v43 = vadd.f32 %v6417_v56, %v8304_v57  ;;  %v6232_v31 = vpop.f32.mrb[60].mxu1  ;;  %v3607_v24 = vsel %vm2030_vm0, %v8775_v48, 0.0 }
 0x405   : > { %3505 = vst.msk [vmem:[%s8319_s30 + $0x1c8] sm:$0xff] %vm1387_vm1, %v8781_v23  ;;  %v3379_v25 = vmul.f32 0.01, %v3315_v26  ;;  %v6418_v62 = vadd.f32 %v11200_v22, %v6232_v31  ;;  %v2589_v30 = vpop.f32.mrb[61].mxu1  ;;  %v11202_v22 = vld [vmem:[#allocation66_spill] sm:$0xff] }
 0x406   : > { %3504 = vst.msk [vmem:[%s8319_s30 + $0x1c0] sm:$0xff] %vm1387_vm1, %v8784_v35  ;;  %v3378_v63 = vmul.f32 0.01, %v3314_v43  ;;  %v6419_v7 = vadd.f32 %v11201_v20, %v2589_v30  ;;  %3855 = vrot.lane.b32.xlu0 %v8775_v48, %s6938_s27 }
 0x407   : > { %v8799_v29 = vmax.f32 %v3315_v26, %v3379_v25  ;;  %v3317_v21 = vadd.f32 %v6418_v62, %v8304_v57  ;;  %3608 = vadd.xlane.f32.xlu1 %v3607_v24  ;;  %v11203_v25 = vld [vmem:[#allocation67_spill] sm:$0xff] }
 0x408   : > { %v8802_v45 = vmax.f32 %v3314_v43, %v3378_v63  ;;  %v3316_v56 = vadd.f32 %v6419_v7, %v8304_v57  ;;  %v6235_v31 = vpop.f32.mrb[62].mxu1 }
 0x409   : > { %3507 = vst.msk [vmem:[%s8319_s30 + $0x1d8] sm:$0xff] %vm1387_vm1, %v8799_v29  ;;  %v3381_v30 = vmul.f32 0.01, %v3317_v21  ;;  %v6420_v20 = vadd.f32 %v11202_v22, %v6235_v31  ;;  %v2599_v26 = vpop.f32.mrb[63].mxu1 }
 0x40a   : > { %3506 = vst.msk [vmem:[%s8319_s30 + $0x1d0] sm:$0xff] %vm1387_vm1, %v8802_v45  ;;  %v3380_v62 = vmul.f32 0.01, %v3316_v56  ;;  %v6421_v43 = vadd.f32 %v11203_v25, %v2599_v26  ;;  %v8853_v26 = vmul.f32 %v8311_v44, %v8415_v49  ;;  %v11206_v25 = vld [vmem:[#allocation47_spill] sm:$0xff]  ;;  %v8869_v49 = vmul.f32 %v8311_v44, %v8435_v28 }
 0x40b   : > { %v8813_v63 = vmax.f32 %v3317_v21, %v3381_v30  ;;  %v3319_v7 = vadd.f32 %v6420_v20, %v8304_v57  ;;  %v11204_v21 = vld [vmem:[#allocation38_spill] sm:$0xff]  ;;  %v11205_v30 = vld [vmem:[#allocation43_spill] sm:$0xff]  ;;  %v8885_v28 = vmul.f32 %v8311_v44, %v8455_v41  ;;  %v8901_v41 = vmul.f32 %v8311_v44, %v8473_v5 }
 0x40c   : > { %v8816_v24 = vmax.f32 %v3316_v56, %v3380_v62  ;;  %v3318_v48 = vadd.f32 %v6421_v43, %v8304_v57  ;;  %v8837_v57 = vmul.f32 %v8311_v44, %v11204_v21  ;;  %v3622_v62 = vsel %vm2030_vm0, %v8853_v26, 0.0 }
 0x40d   : > { %3509 = vst.msk [vmem:[%s8319_s30 + $0x1e8] sm:$0xff] %vm1387_vm1, %v8813_v63  ;;  %v3383_v31 = vmul.f32 0.01, %v3319_v7  ;;  %v8861_v43 = vmul.f32 %v8311_v44, %v11206_v25  ;;  %v8909_v25 = vmul.f32 %v8311_v44, %v8476_v9  ;;  %v8917_v5 = vmul.f32 %v8311_v44, %v8489_v1 }
 0x40e   : > { %3508 = vst.msk [vmem:[%s8319_s30 + $0x1e0] sm:$0xff] %vm1387_vm1, %v8816_v24  ;;  %v3382_v22 = vmul.f32 0.01, %v3318_v48  ;;  %v3616_v56 = vsel %vm2030_vm0, %v8837_v57, 0.0  ;;  %v8925_v9 = vmul.f32 %v8311_v44, %v8492_v51  ;;  %v8933_v1 = vmul.f32 %v8311_v44, %v8505_v50 }
 0x40f   : > { %v8825_v59 = vmax.f32 %v3319_v7, %v3383_v31  ;;  %v3619_v7 = vsel %vm2030_vm0, %v8861_v43, 0.0  ;;  %v3628_v31 = vsel %vm2030_vm0, %v8869_v49, 0.0  ;;  %11209 = vst [vmem:[#allocation30_spill] sm:$0xff] %v8909_v25  ;;  %v8941_v51 = vmul.f32 %v8311_v44, %v8508_v61 }
 0x410   : > { %v8827_v47 = vmax.f32 %v3318_v48, %v3382_v22  ;;  %v8845_v48 = vmul.f32 %v8311_v44, %v11205_v30  ;;  %v8877_v22 = vmul.f32 %v8311_v44, %v8438_v54  ;;  %v11207_v54 = vld [vmem:[#allocation50_spill] sm:$0xff]  ;;  %11210 = vst [vmem:[#allocation31_spill] sm:$0xff] %v8925_v9  ;;  %v8949_v50 = vmul.f32 %v8311_v44, %v8521_v58 }
 0x411   : > { %3511 = vst.msk [vmem:[%s8319_s30 + $0x1f8] sm:$0xff] %vm1387_vm1, %v8825_v59  ;;  %v8893_v30 = vmul.f32 %v8311_v44, %v11207_v54  ;;  %11211 = vst [vmem:[#allocation32_spill] sm:$0xff] %v8941_v51  ;;  %v3649_v54 = vsel %vm2030_vm0, %v8941_v51, 0.0  ;;  %v8957_v61 = vmul.f32 %v8311_v44, %v8524_v46  ;;  %v8965_v58 = vmul.f32 %v8311_v44, %v8535_v52 }
 0x412   : > { %3510 = vst.msk [vmem:[%s8319_s30 + $0x1f0] sm:$0xff] %vm1387_vm1, %v8827_v47  ;;  %v3613_v20 = vsel %vm2030_vm0, %v8845_v48, 0.0  ;;  %v3625_v21 = vsel %vm2030_vm0, %v8877_v22, 0.0  ;;  %v8973_v46 = vmul.f32 %v8311_v44, %v8538_v32  ;;  %v8991_v32 = vmul.f32 %v8311_v44, %v8581_v53 }
 0x413   : > { %11208 = vst [vmem:[#allocation29_spill] sm:$0xff] %v8893_v30  ;;  %11212 = vst [vmem:[#allocation33_spill] sm:$0xff] %v8957_v61  ;;  %vm4991_vm1 = vcmask 7168  }
 0x414   : > { %11213 = vst [vmem:[#allocation36_spill] sm:$0xff] %v8973_v46  ;;  %v3661_v52 = vsel %vm2030_vm0, %v8973_v46, 0.0  ;;  %11216 = vst [vmem:[#allocation41_spill] sm:$0xff] %v8991_v32 }
 0x418   : > { %3861 = vrot.lane.b32.xlu1 %v8837_v57, %s6938_s27 }
 0x425   : > { %3617 = vadd.xlane.f32.xlu0 %v3616_v56  ;;  %v3634_v56 = vsel %vm2030_vm0, %v8885_v28, 0.0 }
 0x43b   : > { %3859 = vrot.lane.b32.xlu0 %v8845_v48, %s6938_s27 }
 0x43c   : > { %3614 = vadd.xlane.f32.xlu1 %v3613_v20  ;;  %v3631_v20 = vsel %vm2030_vm0, %v8893_v30, 0.0 }
 0x44d   : > { %3865 = vrot.lane.b32.xlu1 %v8853_v26, %s6938_s27 }
 0x45a   : > { %3623 = vadd.xlane.f32.xlu0 %v3622_v62  ;;  %v3640_v62 = vsel %vm2030_vm0, %v8901_v41, 0.0 }
 0x470   : > { %3863 = vrot.lane.b32.xlu0 %v8861_v43, %s6938_s27 }
 0x471   : > { %3620 = vadd.xlane.f32.xlu1 %v3619_v7  ;;  %v3637_v7 = vsel %vm2030_vm0, %v8909_v25, 0.0 }
 0x482   : > { %3869 = vrot.lane.b32.xlu1 %v8869_v49, %s6938_s27 }
 0x48f   : > { %3629 = vadd.xlane.f32.xlu0 %v3628_v31  ;;  %v3646_v31 = vsel %vm2030_vm0, %v8917_v5, 0.0 }
 0x4a5   : > { %3867 = vrot.lane.b32.xlu0 %v8877_v22, %s6938_s27 }
 0x4a6   : > { %3626 = vadd.xlane.f32.xlu1 %v3625_v21  ;;  %v3643_v21 = vsel %vm2030_vm0, %v8925_v9, 0.0 }
 0x4b7   : > { %3873 = vrot.lane.b32.xlu1 %v8885_v28, %s6938_s27 }
 0x4c4   : > { %3635 = vadd.xlane.f32.xlu0 %v3634_v56  ;;  %v3652_v56 = vsel %vm2030_vm0, %v8933_v1, 0.0 }
 0x4da   : > { %3871 = vrot.lane.b32.xlu0 %v8893_v30, %s6938_s27 }
 0x4db   : > { %3632 = vadd.xlane.f32.xlu1 %v3631_v20  ;;  %v3658_v20 = vsel %vm2030_vm0, %v8949_v50, 0.0 }
 0x4ec   : > { %3877 = vrot.lane.b32.xlu1 %v8901_v41, %s6938_s27 }
 0x4f9   : > { %3641 = vadd.xlane.f32.xlu0 %v3640_v62  ;;  %v3655_v62 = vsel %vm2030_vm0, %v8957_v61, 0.0 }
 0x50f   : > { %3875 = vrot.lane.b32.xlu0 %v8909_v25, %s6938_s27 }
 0x510   : > { %3638 = vadd.xlane.f32.xlu1 %v3637_v7  ;;  %v3664_v7 = vsel %vm2030_vm0, %v8965_v58, 0.0 }
 0x521   : > { %3881 = vrot.lane.b32.xlu1 %v8917_v5, %s6938_s27 }
 0x52e   : > { %3647 = vadd.xlane.f32.xlu0 %v3646_v31  ;;  %v8977_v31 = vmul.f32 %v8311_v44, %v8552_v3 }
 0x530   : > { %11214 = vst [vmem:[#allocation37_spill] sm:$0xff] %v8977_v31 }
 0x544   : > { %3879 = vrot.lane.b32.xlu0 %v8925_v9, %s6938_s27 }
 0x545   : > { %3644 = vadd.xlane.f32.xlu1 %v3643_v21  ;;  %v8985_v21 = vmul.f32 %v8311_v44, %v8566_v33  ;;  %v8999_v33 = vmul.f32 %v8311_v44, %v8549_v11 }
 0x547   : > { %11215 = vst [vmem:[#allocation40_spill] sm:$0xff] %v8985_v21  ;;  %v3673_v3 = vsel %vm2030_vm0, %v8985_v21, 0.0  ;;  %v3670_v53 = vsel %vm2030_vm0, %v8999_v33, 0.0 }
 0x556   : > { %3885 = vrot.lane.b32.xlu1 %v8933_v1, %s6938_s27 }
 0x563   : > { %3653 = vadd.xlane.f32.xlu0 %v3652_v56  ;;  %v3667_v56 = vsel %vm2030_vm0, %v8977_v31, 0.0 }
 0x579   : > { %3883 = vrot.lane.b32.xlu0 %v8941_v51, %s6938_s27 }
 0x57a   : > { %3650 = vadd.xlane.f32.xlu1 %v3649_v54  ;;  %v3679_v54 = vsel %vm2030_vm0, %v8991_v32, 0.0 }
 0x58b   : > { %3889 = vrot.lane.b32.xlu1 %v8949_v50, %s6938_s27 }
 0x598   : > { %3659 = vadd.xlane.f32.xlu0 %v3658_v20  ;;  %v9003_v20 = vmul.f32 %v8311_v44, %v8563_v4 }
 0x59a   : > { %v3676_v11 = vsel %vm2030_vm0, %v9003_v20, 0.0 }
 0x5ae   : > { %3887 = vrot.lane.b32.xlu0 %v8957_v61, %s6938_s27 }
 0x5af   : > { %3656 = vadd.xlane.f32.xlu1 %v3655_v62  ;;  %v9011_v62 = vmul.f32 %v8311_v44, %v8575_v14  ;;  %v9033_v14 = vld [vmem:[#allocation13] ss:$0 sm:$0xff] }
 0x5b1   : > { %11217 = vst [vmem:[#allocation44_spill] sm:$0xff] %v9011_v62  ;;  %v3682_v4 = vsel %vm2030_vm0, %v9011_v62, 0.0 }
 0x5c0   : > { %3893 = vrot.lane.b32.xlu1 %v8965_v58, %s6938_s27 }
 0x5cd   : > { %3665 = vadd.xlane.f32.xlu0 %v3664_v7  ;;  %v9023_v7 = vmul.f32 %v8311_v44, %v8615_v37  ;;  %v9043_v37 = vmul.f32 %v9033_v14, %v8629_v0  ;;  %v9059_v0 = vmul.f32 %v9033_v14, %v8643_v17  ;;  %v9075_v17 = vmul.f32 %v9033_v14, %v8661_v40 }
 0x5ce   : > { %v9091_v40 = vmul.f32 %v9033_v14, %v8677_v2  ;;  %v9107_v2 = vmul.f32 %v9033_v14, %v8691_v27  ;;  %v9123_v27 = vmul.f32 %v9033_v14, %v8705_v18  ;;  %v9139_v18 = vmul.f32 %v9033_v14, %v8721_v16 }
 0x5cf   : > { %11218 = vst [vmem:[#allocation45_spill] sm:$0xff] %v9023_v7  ;;  %11220 = vst [vmem:[#allocation49_spill] sm:$0xff] %v9043_v37  ;;  %v9157_v16 = vmul.f32 %v9033_v14, %v8735_v19 }
 0x5d0   : > { %11222 = vst [vmem:[#allocation53_spill] sm:$0xff] %v9059_v0  ;;  %11224 = vst [vmem:[#allocation57_spill] sm:$0xff] %v9075_v17 }
 0x5d1   : > { %11226 = vst [vmem:[#allocation61_spill] sm:$0xff] %v9091_v40  ;;  %11228 = vst [vmem:[#allocation34_spill] sm:$0xff] %v9107_v2 }
 0x5d2   : > { %11230 = vst [vmem:[#allocation64_spill] sm:$0xff] %v9123_v27  ;;  %11232 = vst [vmem:[#allocation66_spill] sm:$0xff] %v9139_v18 }
 0x5d3   : > { %11235 = vst [vmem:[#allocation43_spill] sm:$0xff] %v9157_v16 }
 0x5e3   : > { %3891 = vrot.lane.b32.xlu0 %v8973_v46, %s6938_s27 }
 0x5e4   : > { %3662 = vadd.xlane.f32.xlu1 %v3661_v52  ;;  %v9037_v52 = vmul.f32 %v9033_v14, %v8618_v6  ;;  %v9053_v6 = vmul.f32 %v9033_v14, %v8632_v13  ;;  %v9069_v13 = vmul.f32 %v9033_v14, %v8646_v60  ;;  %v9085_v60 = vmul.f32 %v9033_v14, %v8666_v55 }
 0x5e5   : > { %v9101_v55 = vmul.f32 %v9033_v14, %v8680_v8  ;;  %v9117_v8 = vmul.f32 %v9033_v14, %v8694_v12  ;;  %v9133_v12 = vmul.f32 %v9033_v14, %v8710_v15  ;;  %v9149_v15 = vmul.f32 %v9033_v14, %v8724_v36  ;;  %v9165_v36 = vpop.permute.xlu0 %3841 }
 0x5e6   : > { %11219 = vst [vmem:[#allocation48_spill] sm:$0xff] %v9037_v52  ;;  %v3685_v44 = vsel %vm2030_vm0, %v9037_v52, 0.0  ;;  %11221 = vst [vmem:[#allocation52_spill] sm:$0xff] %v9053_v6 }
 0x5e7   : > { %11223 = vst [vmem:[#allocation56_spill] sm:$0xff] %v9069_v13  ;;  %11225 = vst [vmem:[#allocation60_spill] sm:$0xff] %v9085_v60 }
 0x5e8   : > { %3668 = vadd.xlane.f32.xlu1 %v3667_v56  ;;  %v3688_v56 = vsel %vm2030_vm0, %v9023_v7, 0.0  ;;  %11227 = vst [vmem:[#allocation62_spill] sm:$0xff] %v9101_v55  ;;  %11229 = vst [vmem:[#allocation63_spill] sm:$0xff] %v9117_v8 }
 0x5e9   : > { %11231 = vst [vmem:[#allocation65_spill] sm:$0xff] %v9133_v12  ;;  %11233 = vst [vmem:[#allocation67_spill] sm:$0xff] %v9149_v15 }
 0x5ec   : > { %3674 = vadd.xlane.f32.xlu1 %v3673_v3  ;;  %v3691_v3 = vsel %vm2030_vm0, %v9053_v6, 0.0 }
 0x5f0   : > { %3680 = vadd.xlane.f32.xlu1 %v3679_v54  ;;  %v3694_v54 = vsel %vm2030_vm0, %v9043_v37, 0.0 }
 0x601   : > { %3897 = vrot.lane.b32.xlu1 %v8999_v33, %s6938_s27 }
 0x602   : > { %3671 = vadd.xlane.f32.xlu0 %v3670_v53  ;;  %v3697_v53 = vsel %vm2030_vm0, %v9069_v13, 0.0 }
 0x605   : > { %3901 = vrot.lane.b32.xlu1 %v9003_v20, %s6938_s27 }
 0x606   : > { %3677 = vadd.xlane.f32.xlu0 %v3676_v11  ;;  %v3700_v11 = vsel %vm2030_vm0, %v9059_v0, 0.0 }
 0x609   : > { %3905 = vrot.lane.b32.xlu1 %v9011_v62, %s6938_s27 }
 0x60a   : > { %3683 = vadd.xlane.f32.xlu0 %v3682_v4  ;;  %v3703_v4 = vsel %vm2030_vm0, %v9085_v60, 0.0 }
 0x60d   : > { %3909 = vrot.lane.b32.xlu1 %v9023_v7, %s6938_s27  ;;  %v4034_v7 = vsel %vm2030_vm0, %v9165_v36, 0.0 }
 0x620   : > { %3895 = vrot.lane.b32.xlu0 %v8977_v31, %s6938_s27 }
 0x624   : > { %3899 = vrot.lane.b32.xlu0 %v8985_v21, %s6938_s27 }
 0x628   : > { %3903 = vrot.lane.b32.xlu0 %v8991_v32, %s6938_s27 }
 0x631   : > { %3686 = vadd.xlane.f32.xlu1 %v3685_v44  ;;  %v3706_v44 = vsel %vm2030_vm0, %v9075_v17, 0.0 }
 0x642   : > { %3913 = vrot.lane.b32.xlu1 %v9043_v37, %s6938_s27 }
 0x647   : > { %3689 = vadd.xlane.f32.xlu0 %v3688_v56  ;;  %v3709_v56 = vsel %vm2030_vm0, %v9101_v55, 0.0 }
 0x65d   : > { %3907 = vrot.lane.b32.xlu0 %v9037_v52, %s6938_s27  ;;  %v9265_v52 = vmul.f32 %v9033_v14, %v8781_v23 }
 0x65f   : > { %11256 = vst [vmem:[#allocation86_spill] sm:$0xff] %v9265_v52 }
 0x666   : > { %3692 = vadd.xlane.f32.xlu1 %v3691_v3  ;;  %v3712_v3 = vsel %vm2030_vm0, %v9091_v40, 0.0 }
 0x677   : > { %3917 = vrot.lane.b32.xlu1 %v9059_v0, %s6938_s27 }
 0x67c   : > { %3695 = vadd.xlane.f32.xlu0 %v3694_v54  ;;  %v3715_v54 = vsel %vm2030_vm0, %v9117_v8, 0.0 }
 0x692   : > { %3911 = vrot.lane.b32.xlu0 %v9053_v6, %s6938_s27 }
 0x69b   : > { %3698 = vadd.xlane.f32.xlu1 %v3697_v53  ;;  %v3718_v53 = vsel %vm2030_vm0, %v9107_v2, 0.0 }
 0x6ac   : > { %3921 = vrot.lane.b32.xlu1 %v9075_v17, %s6938_s27 }
 0x6b1   : > { %3701 = vadd.xlane.f32.xlu0 %v3700_v11  ;;  %v3721_v11 = vsel %vm2030_vm0, %v9133_v12, 0.0 }
 0x6c7   : > { %3915 = vrot.lane.b32.xlu0 %v9069_v13, %s6938_s27 }
 0x6d0   : > { %3704 = vadd.xlane.f32.xlu1 %v3703_v4  ;;  %v3724_v4 = vsel %vm2030_vm0, %v9123_v27, 0.0 }
 0x6e1   : > { %3925 = vrot.lane.b32.xlu1 %v9091_v40, %s6938_s27 }
 0x6e6   : > { %3707 = vadd.xlane.f32.xlu0 %v3706_v44  ;;  %v3727_v44 = vsel %vm2030_vm0, %v9149_v15, 0.0 }
 0x6fc   : > { %3919 = vrot.lane.b32.xlu0 %v9085_v60, %s6938_s27 }
 0x705   : > { %3710 = vadd.xlane.f32.xlu1 %v3709_v56  ;;  %v9153_v56 = vpop.xlane.xlu1 %3587 }
 0x706   : > { %11234 = vst [vmem:[#allocation38_spill] sm:$0xff] %v9153_v56 }
 0x716   : > { %3929 = vrot.lane.b32.xlu1 %v9107_v2, %s6938_s27 }
 0x71b   : > { %3713 = vadd.xlane.f32.xlu0 %v3712_v3  ;;  %v9159_v3 = vpop.permute.xlu1 %3839 }
 0x731   : > { %3923 = vrot.lane.b32.xlu0 %v9101_v55, %s6938_s27 }
 0x73a   : > { %3716 = vadd.xlane.f32.xlu1 %v3715_v54  ;;  %v3730_v54 = vsel %vm2030_vm0, %v9139_v18, 0.0 }
 0x74b   : > { %3933 = vrot.lane.b32.xlu1 %v9123_v27, %s6938_s27 }
 0x750   : > { %3719 = vadd.xlane.f32.xlu0 %v3718_v53  ;;  %v9171_v53 = vmul.f32 %v9033_v14, %v8738_v39  ;;  %v9187_v39 = vpop.xlane.xlu0 %3584 }
 0x751   : > { %11238 = vst [vmem:[#allocation68_spill] sm:$0xff] %v9187_v39 }
 0x752   : > { %11236 = vst [vmem:[#allocation47_spill] sm:$0xff] %v9171_v53  ;;  %v3733_v19 = vsel %vm2030_vm0, %v9171_v53, 0.0 }
 0x754   : > { %v9189_v56 = vpop.xlane.xlu0 %3593 }
 0x755   : > { %11239 = vst [vmem:[#allocation69_spill] sm:$0xff] %v9189_v56  ;;  %v9209_v56 = vmul.f32 %v9033_v14, %v8763_v10 }
 0x757   : > { %11244 = vst [vmem:[#allocation74_spill] sm:$0xff] %v9209_v56 }
 0x766   : > { %3927 = vrot.lane.b32.xlu0 %v9117_v8, %s6938_s27 }
 0x76f   : > { %3722 = vadd.xlane.f32.xlu1 %v3721_v11  ;;  %v9175_v11 = vpop.permute.xlu1 %3845 }
 0x780   : > { %3937 = vrot.lane.b32.xlu1 %v9139_v18, %s6938_s27 }
 0x785   : > { %3725 = vadd.xlane.f32.xlu0 %v3724_v4  ;;  %v9179_v4 = vmul.f32 %v9033_v14, %v8749_v42  ;;  %v9195_v42 = vmul.f32 %v9033_v14, %v8752_v38 }
 0x787   : > { %11237 = vst [vmem:[#allocation50_spill] sm:$0xff] %v9179_v4  ;;  %11240 = vst [vmem:[#allocation70_spill] sm:$0xff] %v9195_v42 }
 0x79b   : > { %3931 = vrot.lane.b32.xlu0 %v9133_v12, %s6938_s27  ;;  %v9201_v12 = vpop.xlane.xlu0 %3590 }
 0x79c   : > { %11241 = vst [vmem:[#allocation71_spill] sm:$0xff] %v9201_v12 }
 0x79f   : > { %v9203_v8 = vpop.xlane.xlu0 %3599 }
 0x7a0   : > { %11242 = vst [vmem:[#allocation72_spill] sm:$0xff] %v9203_v8 }
 0x7a3   : > { %v9213_v38 = vpop.permute.xlu0 %3847 }
 0x7a4   : > { %3728 = vadd.xlane.f32.xlu1 %v3727_v44  ;;  %v9181_v44 = vpop.permute.xlu1 %3843 }
 0x7a7   : > { %v9219_v12 = vpop.xlane.xlu0 %3605 }
 0x7a8   : > { %11245 = vst [vmem:[#allocation75_spill] sm:$0xff] %v9219_v12 }
 0x7b5   : > { %3941 = vrot.lane.b32.xlu1 %v9157_v16, %s6938_s27 }
 0x7ba   : > { %3731 = vadd.xlane.f32.xlu0 %v3730_v54  ;;  %v3736_v54 = vsel %vm2030_vm0, %v9157_v16, 0.0 }
 0x7d0   : > { %3935 = vrot.lane.b32.xlu0 %v9149_v15, %s6938_s27  ;;  %v9199_v15 = vpop.permute.xlu1 %3849 }
 0x7d9   : > { %3734 = vadd.xlane.f32.xlu1 %v3733_v19  ;;  %v3739_v19 = vsel %vm2030_vm0, %v9195_v42, 0.0 }
 0x7ea   : > { %3945 = vrot.lane.b32.xlu1 %v9179_v4, %s6938_s27 }
 0x7ef   : > { %3737 = vadd.xlane.f32.xlu0 %v3736_v54  ;;  %v9205_v54 = vpop.xlane.xlu1 %3596 }
 0x7f0   : > { %11243 = vst [vmem:[#allocation73_spill] sm:$0xff] %v9205_v54  ;;  %v9223_v54 = vpop.permute.xlu0 %3851 }
 0x7f3   : > { %v9215_v39 = vpop.permute.xlu1 %3853 }
 0x7f4   : > { %v9227_v10 = vpop.xlane.xlu0 %3611 }
 0x7f5   : > { %11247 = vst [vmem:[#allocation77_spill] sm:$0xff] %v9227_v10 }
 0x7f7   : > { %v9221_v8 = vpop.xlane.xlu1 %3602 }
 0x7f8   : > { %11246 = vst [vmem:[#allocation76_spill] sm:$0xff] %v9221_v8  ;;  %v9231_v60 = vpop.permute.xlu0 %3855 }
 0x7fc   : > { %v9235_v6 = vpop.xlane.xlu0 %3617 }
 0x7fd   : > { %11249 = vst [vmem:[#allocation79_spill] sm:$0xff] %v9235_v6 }
 0x800   : > { %v9245_v12 = vpop.permute.xlu0 %3859 }
 0x804   : > { %v9251_v8 = vpop.xlane.xlu0 %3623 }
 0x805   : > { %3939 = vrot.lane.b32.xlu0 %v9171_v53, %s6938_s27  ;;  %v9225_v53 = vpop.permute.xlu1 %3857  ;;  %11252 = vst [vmem:[#allocation82_spill] sm:$0xff] %v9251_v8 }
 0x809   : > { %v9229_v55 = vpop.xlane.xlu1 %3608 }
 0x80a   : > { %11248 = vst [vmem:[#allocation78_spill] sm:$0xff] %v9229_v55 }
 0x80d   : > { %v9233_v13 = vpop.permute.xlu1 %3861 }
 0x80e   : > { %3740 = vadd.xlane.f32.xlu1 %v3739_v19  ;;  %v3742_v19 = vsel %vm2030_vm0, %v9179_v4, 0.0 }
 0x811   : > { %v9237_v4 = vpop.xlane.xlu1 %3614 }
 0x812   : > { %11250 = vst [vmem:[#allocation80_spill] sm:$0xff] %v9237_v4  ;;  %v9255_v4 = vpop.permute.xlu0 %3863 }
 0x815   : > { %v9247_v10 = vpop.permute.xlu1 %3865 }
 0x819   : > { %v9253_v6 = vpop.xlane.xlu1 %3620 }
 0x81a   : > { %11253 = vst [vmem:[#allocation83_spill] sm:$0xff] %v9253_v6 }
 0x81d   : > { %v9257_v16 = vpop.permute.xlu1 %3869 }
 0x81f   : > { %3949 = vrot.lane.b32.xlu1 %v9209_v56, %s6938_s27 }
 0x824   : > { %3743 = vadd.xlane.f32.xlu0 %v3742_v19  ;;  %v9243_v19 = vmul.f32 %v9033_v14, %v8766_v34  ;;  %v9261_v34 = vpop.xlane.xlu1 %3626 }
 0x825   : > { %11255 = vst [vmem:[#allocation85_spill] sm:$0xff] %v9261_v34 }
 0x826   : > { %11251 = vst [vmem:[#allocation81_spill] sm:$0xff] %v9243_v19  ;;  %v3745_v55 = vsel %vm2030_vm0, %v9243_v19, 0.0 }
 0x828   : > { %v9269_v32 = vpop.permute.xlu1 %3873 }
 0x82c   : > { %v9275_v8 = vpop.xlane.xlu1 %3632 }
 0x82d   : > { %11258 = vst [vmem:[#allocation88_spill] sm:$0xff] %v9275_v8 }
 0x830   : > { %v9281_v6 = vpop.permute.xlu1 %3877 }
 0x834   : > { %v9285_v27 = vpop.xlane.xlu1 %3638 }
 0x835   : > { %11260 = vst [vmem:[#allocation90_spill] sm:$0xff] %v9285_v27 }
 0x838   : > { %v9289_v2 = vpop.permute.xlu1 %3881 }
 0x83a   : > { %3943 = vrot.lane.b32.xlu0 %v9195_v42, %s6938_s27  ;;  %v9259_v42 = vpop.xlane.xlu0 %3629 }
 0x83b   : > { %11254 = vst [vmem:[#allocation84_spill] sm:$0xff] %v9259_v42  ;;  %v3748_v42 = vsel %vm2030_vm0, %v9209_v56, 0.0 }
 0x83e   : > { %v9267_v18 = vpop.permute.xlu0 %3867 }
 0x843   : > { %3746 = vadd.xlane.f32.xlu1 %v3745_v55  ;;  %v9273_v55 = vpop.xlane.xlu0 %3635 }
 0x844   : > { %11257 = vst [vmem:[#allocation87_spill] sm:$0xff] %v9273_v55  ;;  %v9293_v55 = vpop.xlane.xlu1 %3644 }
 0x845   : > { %11262 = vst [vmem:[#allocation92_spill] sm:$0xff] %v9293_v55 }
 0x847   : > { %v9279_v34 = vpop.permute.xlu0 %3871 }
 0x848   : > { %v9299_v8 = vpop.permute.xlu1 %3885 }
 0x84b   : > { %v9283_v23 = vpop.xlane.xlu0 %3641 }
 0x84c   : > { %11259 = vst [vmem:[#allocation89_spill] sm:$0xff] %v9283_v23  ;;  %v9303_v23 = vmul.f32 %v9033_v14, %v8784_v35  ;;  %v9307_v56 = vpop.xlane.xlu1 %3650 }
 0x84d   : > { %11265 = vst [vmem:[#allocation95_spill] sm:$0xff] %v9307_v56 }
 0x84e   : > { %11263 = vst [vmem:[#allocation93_spill] sm:$0xff] %v9303_v23  ;;  %v3751_v55 = vsel %vm2030_vm0, %v9303_v23, 0.0 }
 0x84f   : > { %v9287_v21 = vpop.permute.xlu0 %3875 }
 0x853   : > { %v9291_v31 = vpop.xlane.xlu0 %3647 }
 0x854   : > { %3953 = vrot.lane.b32.xlu1 %v9265_v52, %s6938_s27  ;;  %11261 = vst [vmem:[#allocation91_spill] sm:$0xff] %v9291_v31  ;;  %v9311_v31 = vmul.f32 %v9033_v14, %v8802_v45  ;;  %v9327_v45 = vmul.f32 %v9033_v14, %v8827_v47 }
 0x856   : > { %11266 = vst [vmem:[#allocation96_spill] sm:$0xff] %v9311_v31  ;;  %v3757_v35 = vsel %vm2030_vm0, %v9311_v31, 0.0  ;;  %11268 = vst [vmem:[#allocation98_spill] sm:$0xff] %v9327_v45 }
 0x859   : > { %3749 = vadd.xlane.f32.xlu0 %v3748_v42  ;;  %v9297_v42 = vpop.permute.xlu0 %3879 }
 0x85d   : > { %v9305_v27 = vpop.xlane.xlu0 %3653 }
 0x85e   : > { %11264 = vst [vmem:[#allocation94_spill] sm:$0xff] %v9305_v27  ;;  %v9323_v27 = vpop.permute.xlu1 %3889 }
 0x861   : > { %v9319_v40 = vpop.permute.xlu0 %3883 }
 0x862   : > { %v9333_v46 = vpop.xlane.xlu1 %3656 }
 0x863   : > { %11270 = vst [vmem:[#allocation100_spill] sm:$0xff] %v9333_v46 }
 0x865   : > { %v9329_v56 = vpop.xlane.xlu0 %3659 }
 0x866   : > { %11269 = vst [vmem:[#allocation99_spill] sm:$0xff] %v9329_v56  ;;  %v9339_v61 = vpop.permute.xlu1 %3893  ;;  %v3754_v56 = vsel %vm2030_vm0, %v9265_v52, 0.0 }
 0x869   : > { %v9337_v17 = vpop.permute.xlu0 %3887 }
 0x86a   : > { %v9343_v47 = vpop.xlane.xlu1 %3662 }
 0x86b   : > { %11272 = vst [vmem:[#allocation102_spill] sm:$0xff] %v9343_v47  ;;  %v9363_v47 = vmul.f32 %v9033_v14, %v8813_v63 }
 0x86d   : > { %11277 = vst [vmem:[#allocation107_spill] sm:$0xff] %v9363_v47  ;;  %v3766_v30 = vsel %vm2030_vm0, %v9363_v47, 0.0 }
 0x86e   : > { %v9349_v46 = vpop.xlane.xlu1 %3668 }
 0x86f   : > { %3947 = vrot.lane.b32.xlu0 %v9243_v19, %s6938_s27  ;;  %v9317_v19 = vmul.f32 %v9033_v14, %v8816_v24  ;;  %v3769_v24 = vsel %vm2030_vm0, %v9327_v45, 0.0  ;;  %11273 = vst [vmem:[#allocation103_spill] sm:$0xff] %v9349_v46 }
 0x871   : > { %11267 = vst [vmem:[#allocation97_spill] sm:$0xff] %v9317_v19 }
 0x878   : > { %3752 = vadd.xlane.f32.xlu1 %v3751_v55  ;;  %v3763_v55 = vsel %vm2030_vm0, %v9317_v19, 0.0 }
 0x87c   : > { %3758 = vadd.xlane.f32.xlu1 %v3757_v35  ;;  %v9341_v35 = vpop.xlane.xlu0 %3665 }
 0x87d   : > { %11271 = vst [vmem:[#allocation101_spill] sm:$0xff] %v9341_v35  ;;  %v9359_v35 = vpop.xlane.xlu1 %3674 }
 0x87e   : > { %11276 = vst [vmem:[#allocation106_spill] sm:$0xff] %v9359_v35 }
 0x880   : > { %3764 = vadd.xlane.f32.xlu1 %v3763_v55  ;;  %v9347_v0 = vpop.permute.xlu0 %3891  ;;  %v9353_v55 = vmul.f32 %v9033_v14, %v8799_v29  ;;  %v9371_v29 = vmul.f32 %v9033_v14, %v8825_v59 }
 0x881   : > { %v9373_v46 = vpop.xlane.xlu1 %3680 }
 0x882   : > { %11274 = vst [vmem:[#allocation104_spill] sm:$0xff] %v9353_v55  ;;  %11279 = vst [vmem:[#allocation109_spill] sm:$0xff] %v9371_v29  ;;  %v3760_v62 = vsel %vm2030_vm0, %v9353_v55, 0.0 }
 0x883   : > { %11280 = vst [vmem:[#allocation110_spill] sm:$0xff] %v9373_v46 }
 0x884   : > { %3770 = vadd.xlane.f32.xlu1 %v3769_v24  ;;  %v9355_v24 = vpop.xlane.xlu0 %3671 }
 0x885   : > { %11275 = vst [vmem:[#allocation105_spill] sm:$0xff] %v9355_v24  ;;  %v9379_v35 = vpop.permute.xlu1 %3897 }
 0x88e   : > { %3755 = vadd.xlane.f32.xlu0 %v3754_v56  ;;  %v9365_v56 = vpop.xlane.xlu0 %3677 }
 0x88f   : > { %11278 = vst [vmem:[#allocation108_spill] sm:$0xff] %v9365_v56  ;;  %v9385_v56 = vpop.permute.xlu1 %3901 }
 0x892   : > { %v9377_v24 = vpop.xlane.xlu0 %3683 }
 0x893   : > { %11281 = vst [vmem:[#allocation111_spill] sm:$0xff] %v9377_v24  ;;  %v9389_v59 = vpop.permute.xlu1 %3905 }
 0x895   : > { %3957 = vrot.lane.b32.xlu1 %v9353_v55, %s6938_s27 }
 0x896   : > { %v9383_v63 = vpop.permute.xlu0 %3895 }
 0x897   : > { %v9393_v46 = vpop.permute.xlu1 %3909 }
 0x899   : > { %3961 = vrot.lane.b32.xlu1 %v9363_v47, %s6938_s27 }
 0x89a   : > { %v9387_v52 = vpop.permute.xlu0 %3899 }
 0x89b   : > { %v9397_v24 = vpop.xlane.xlu1 %3686 }
 0x89c   : > { %11283 = vst [vmem:[#allocation113_spill] sm:$0xff] %v9397_v24 }
 0x89d   : > { %3965 = vrot.lane.b32.xlu1 %v9371_v29, %s6938_s27 }
 0x89e   : > { %v9391_v14 = vpop.permute.xlu0 %3903 }
 0x89f   : > { %v9401_v9 = vpop.permute.xlu1 %3913 }
 0x8a2   : > { %v9395_v51 = vpop.xlane.xlu0 %3689 }
 0x8a3   : > { %11282 = vst [vmem:[#allocation112_spill] sm:$0xff] %v9395_v51  ;;  %v9407_v25 = vpop.xlane.xlu1 %3692  ;;  %v4043_v51 = vsel %vm2030_vm0, %v9213_v38, 0.0 }
 0x8a4   : > { %3951 = vrot.lane.b32.xlu0 %v9303_v23, %s6938_s27  ;;  %11285 = vst [vmem:[#allocation115_spill] sm:$0xff] %v9407_v25 }
 0x8a6   : > { %v9399_v37 = vpop.permute.xlu0 %3907 }
 0x8aa   : > { %v9403_v23 = vpop.xlane.xlu0 %3695 }
 0x8ab   : > { %11284 = vst [vmem:[#allocation114_spill] sm:$0xff] %v9403_v23  ;;  %v9417_v23 = vpop.permute.xlu1 %3917 }
 0x8ae   : > { %v9413_v24 = vpop.permute.xlu0 %3911 }
 0x8af   : > { %v9425_v38 = vpop.xlane.xlu1 %3698 }
 0x8b0   : > { %11287 = vst [vmem:[#allocation117_spill] sm:$0xff] %v9425_v38  ;;  %v11356_v38 = vld [vmem:[#allocation30_spill] sm:$0xff] }
 0x8b2   : > { %v9421_v36 = vpop.xlane.xlu0 %3701 }
 0x8b3   : > { %11286 = vst [vmem:[#allocation116_spill] sm:$0xff] %v9421_v36  ;;  %v9431_v47 = vpop.permute.xlu1 %3921  ;;  %v4073_v36 = vsel %vm2030_vm0, %v9267_v18, 0.0 }
 0x8b6   : > { %v3916_v25 = vpop.permute.xlu0 %3915 }
 0x8c1   : > { %4035 = vadd.xlane.f32.xlu1 %v4034_v7  ;;  %v4049_v7 = vsel %vm2030_vm0, %v9223_v54, 0.0  ;;  %v9433_v54 = vpop.xlane.xlu0 %3707 }
 0x8c2   : > { %11288 = vst [vmem:[#allocation118_spill] sm:$0xff] %v9433_v54 }
 0x8c3   : > { %3761 = vadd.xlane.f32.xlu0 %v3760_v62  ;;  %v3772_v62 = vsel %vm2030_vm0, %v9371_v29, 0.0 }
 0x8c5   : > { %4044 = vadd.xlane.f32.xlu1 %v4043_v51  ;;  %v4055_v51 = vsel %vm2030_vm0, %v9231_v60, 0.0  ;;  %v3920_v60 = vpop.permute.xlu0 %3919 }
 0x8c7   : > { %3767 = vadd.xlane.f32.xlu0 %v3766_v30  ;;  %v4061_v30 = vsel %vm2030_vm0, %v9245_v12, 0.0  ;;  %v4079_v12 = vsel %vm2030_vm0, %v9279_v34, 0.0 }
 0x8c9   : > { %4050 = vadd.xlane.f32.xlu1 %v4049_v7  ;;  %v4067_v7 = vsel %vm2030_vm0, %v9255_v4, 0.0  ;;  %v4085_v4 = vsel %vm2030_vm0, %v9287_v21, 0.0 }
 0x8cb   : > { %3773 = vadd.xlane.f32.xlu0 %v3772_v62  ;;  %v9437_v62 = vpop.xlane.xlu1 %3704 }
 0x8cc   : > { %11289 = vst [vmem:[#allocation119_spill] sm:$0xff] %v9437_v62 }
 0x8cd   : > { %4056 = vadd.xlane.f32.xlu1 %v4055_v51 }
 0x8cf   : > { %v9441_v51 = vpop.permute.xlu1 %3925 }
 0x8d1   : > { %4062 = vadd.xlane.f32.xlu1 %v4061_v30  ;;  %v9445_v30 = vpop.xlane.xlu0 %3713 }
 0x8d2   : > { %11290 = vst [vmem:[#allocation120_spill] sm:$0xff] %v9445_v30 }
 0x8d3   : > { %v9447_v54 = vpop.xlane.xlu1 %3710 }
 0x8d4   : > { %11291 = vst [vmem:[#allocation121_spill] sm:$0xff] %v9447_v54 }
 0x8d5   : > { %4068 = vadd.xlane.f32.xlu1 %v4067_v7  ;;  %v3924_v18 = vpop.permute.xlu0 %3923 }
 0x8d7   : > { %v9457_v34 = vpop.permute.xlu1 %3929 }
 0x8d9   : > { %4074 = vadd.xlane.f32.xlu1 %v4073_v36  ;;  %v4091_v36 = vsel %vm2030_vm0, %v9297_v42, 0.0  ;;  %v9459_v7 = vpop.xlane.xlu0 %3719  ;;  %v4103_v42 = vsel %vm2030_vm0, %v9337_v17, 0.0  ;;  %v4121_v17 = vsel %vm2030_vm0, %v9387_v52, 0.0  ;;  %v4139_v52 = vsel %vm2030_vm0, %v9413_v24, 0.0 }
 0x8da   : > { %11292 = vst [vmem:[#allocation122_spill] sm:$0xff] %v9459_v7 }
 0x8db   : > { %v9465_v21 = vpop.xlane.xlu1 %3716 }
 0x8dc   : > { %11293 = vst [vmem:[#allocation123_spill] sm:$0xff] %v9465_v21 }
 0x8dd   : > { %4080 = vadd.xlane.f32.xlu1 %v4079_v12  ;;  %v4097_v12 = vsel %vm2030_vm0, %v9319_v40, 0.0 }
 0x8df   : > { %v9469_v30 = vpop.permute.xlu1 %3933 }
 0x8e1   : > { %3955 = vrot.lane.b32.xlu0 %v9311_v31, %s6938_s27  ;;  %4086 = vadd.xlane.f32.xlu1 %v4085_v4  ;;  %v3928_v4 = vpop.permute.xlu0 %3927 }
 0x8e3   : > { %v9475_v40 = vpop.xlane.xlu1 %3722 }
 0x8e4   : > { %11295 = vst [vmem:[#allocation125_spill] sm:$0xff] %v9475_v40 }
 0x8e5   : > { %3959 = vrot.lane.b32.xlu0 %v9317_v19, %s6938_s27  ;;  %4092 = vadd.xlane.f32.xlu1 %v4091_v36  ;;  %v4109_v36 = vsel %vm2030_vm0, %v9347_v0, 0.0  ;;  %v9473_v7 = vpop.xlane.xlu0 %3725  ;;  %v4127_v0 = vsel %vm2030_vm0, %v9391_v14, 0.0 }
 0x8e6   : > { %11294 = vst [vmem:[#allocation124_spill] sm:$0xff] %v9473_v7  ;;  %v4133_v7 = vsel %vm2030_vm0, %v9399_v37, 0.0 }
 0x8e9   : > { %3963 = vrot.lane.b32.xlu0 %v9327_v45, %s6938_s27  ;;  %4098 = vadd.xlane.f32.xlu1 %v4097_v12  ;;  %v4115_v12 = vsel %vm2030_vm0, %v9383_v63, 0.0  ;;  %v3932_v21 = vpop.permute.xlu0 %3931 }
 0x8ed   : > { %4104 = vadd.xlane.f32.xlu1 %v4103_v42  ;;  %v9481_v42 = vpop.permute.xlu1 %3937  ;;  %v9483_v54 = vpop.xlane.xlu0 %3731 }
 0x8ee   : > { %11296 = vst [vmem:[#allocation126_spill] sm:$0xff] %v9483_v54  ;;  %v4031_v54 = vsel %vm2030_vm0, %v9159_v3, 0.0  ;;  %v4040_v3 = vsel %vm2030_vm0, %v9175_v11, 0.0  ;;  %v4169_v11 = vsel %vm2030_vm0, %v3932_v21, 0.0 }
 0x8f1   : > { %4110 = vadd.xlane.f32.xlu1 %v4109_v36  ;;  %v9487_v36 = vpop.xlane.xlu1 %3728  ;;  %v3936_v63 = vpop.permute.xlu0 %3935 }
 0x8f2   : > { %11297 = vst [vmem:[#allocation127_spill] sm:$0xff] %v9487_v36  ;;  %v4151_v36 = vsel %vm2030_vm0, %v3920_v60, 0.0  ;;  %v4163_v60 = vsel %vm2030_vm0, %v3928_v4, 0.0  ;;  %v4175_v4 = vsel %vm2030_vm0, %v3936_v63, 0.0 }
 0x8f5   : > { %4116 = vadd.xlane.f32.xlu1 %v4115_v12  ;;  %v9491_v12 = vpop.permute.xlu1 %3941 }
 0x8f9   : > { %4122 = vadd.xlane.f32.xlu1 %v4121_v17  ;;  %v9495_v17 = vpop.xlane.xlu0 %3737  ;;  %v9499_v14 = vpop.xlane.xlu1 %3734 }
 0x8fa   : > { %11298 = vst [vmem:[#allocation128_spill] sm:$0xff] %v9495_v17  ;;  %11299 = vst [vmem:[#allocation129_spill] sm:$0xff] %v9499_v14  ;;  %v11353_v14 = vld [vmem:[#allocation44_spill] sm:$0xff] }
 0x8fd   : > { %4128 = vadd.xlane.f32.xlu1 %v4127_v0  ;;  %v4145_v0 = vsel %vm2030_vm0, %v3916_v25, 0.0  ;;  %v3940_v37 = vpop.permute.xlu0 %3939  ;;  %v9505_v24 = vpop.permute.xlu1 %3945 }
 0x901   : > { %4134 = vadd.xlane.f32.xlu1 %v4133_v7  ;;  %v4037_v7 = vsel %vm2030_vm0, %v9181_v44, 0.0  ;;  %v9512_v25 = vpop.xlane.xlu1 %3740  ;;  %v4046_v44 = vsel %vm2030_vm0, %v9199_v15, 0.0 }
 0x902   : > { %11301 = vst [vmem:[#allocation131_spill] sm:$0xff] %v9512_v25  ;;  %v11352_v25 = vld [vmem:[#allocation29_spill] sm:$0xff] }
 0x905   : > { %4140 = vadd.xlane.f32.xlu1 %v4139_v52  ;;  %v9507_v52 = vpop.xlane.xlu0 %3743 }
 0x906   : > { %11300 = vst [vmem:[#allocation130_spill] sm:$0xff] %v9507_v52 }
 0x908   : > { %4032 = vadd.xlane.f32.xlu0 %v4031_v54  ;;  %v4157_v54 = vsel %vm2030_vm0, %v3924_v18, 0.0 }
 0x909   : > { %4146 = vadd.xlane.f32.xlu1 %v4145_v0  ;;  %v4052_v0 = vsel %vm2030_vm0, %v9215_v39, 0.0  ;;  %v4064_v39 = vsel %vm2030_vm0, %v9233_v13, 0.0  ;;  %v4076_v13 = vsel %vm2030_vm0, %v9257_v16, 0.0  ;;  %v4094_v16 = vsel %vm2030_vm0, %v9289_v2, 0.0 }
 0x90c   : > { %4038 = vadd.xlane.f32.xlu0 %v4037_v7  ;;  %v9519_v7 = vpop.permute.xlu1 %3949 }
 0x90d   : > { %4152 = vadd.xlane.f32.xlu1 %v4151_v36  ;;  %v3944_v36 = vpop.permute.xlu0 %3943 }
 0x910   : > { %4041 = vadd.xlane.f32.xlu0 %v4040_v3  ;;  %v4058_v3 = vsel %vm2030_vm0, %v9225_v53, 0.0  ;;  %v9526_v15 = vpop.xlane.xlu1 %3746  ;;  %v4070_v53 = vsel %vm2030_vm0, %v9247_v10, 0.0 }
 0x911   : > { %4158 = vadd.xlane.f32.xlu1 %v4157_v54  ;;  %v9522_v18 = vpop.xlane.xlu0 %3749  ;;  %11303 = vst [vmem:[#allocation133_spill] sm:$0xff] %v9526_v15 }
 0x912   : > { %11302 = vst [vmem:[#allocation132_spill] sm:$0xff] %v9522_v18  ;;  %v11344_v18 = vld [vmem:[#allocation28_spill] sm:$0xff] }
 0x914   : > { %4047 = vadd.xlane.f32.xlu0 %v4046_v44  ;;  %v4181_v44 = vsel %vm2030_vm0, %v3940_v37, 0.0  ;;  %v9532_v21 = vpop.permute.xlu1 %3953 }
 0x915   : > { %4164 = vadd.xlane.f32.xlu1 %v4163_v60  ;;  %v3948_v54 = vpop.permute.xlu0 %3947 }
 0x916   : > { %v4193_v37 = vsel %vm2030_vm0, %v3948_v54, 0.0  ;;  %v4100_v54 = vsel %vm2030_vm0, %v9299_v8, 0.0  ;;  %v4124_v8 = vsel %vm2030_vm0, %v9385_v56, 0.0 }
 0x918   : > { %4053 = vadd.xlane.f32.xlu0 %v4052_v0  ;;  %v4187_v0 = vsel %vm2030_vm0, %v3944_v36, 0.0  ;;  %v9539_v63 = vpop.xlane.xlu1 %3752  ;;  %v4088_v36 = vsel %vm2030_vm0, %v9281_v6, 0.0  ;;  %v4112_v6 = vsel %vm2030_vm0, %v9339_v61, 0.0  ;;  %v4136_v61 = vsel %vm2030_vm0, %v9393_v46, 0.0 }
 0x919   : > { %4170 = vadd.xlane.f32.xlu1 %v4169_v11  ;;  %11305 = vst [vmem:[#allocation135_spill] sm:$0xff] %v9539_v63 }
 0x91b   : > { %v9534_v60 = vpop.xlane.xlu0 %3755 }
 0x91c   : > { %4059 = vadd.xlane.f32.xlu0 %v4058_v3  ;;  %11304 = vst [vmem:[#allocation134_spill] sm:$0xff] %v9534_v60  ;;  %v4082_v3 = vsel %vm2030_vm0, %v9269_v32, 0.0 }
 0x91d   : > { %4176 = vadd.xlane.f32.xlu1 %v4175_v4  ;;  %v9546_v4 = vpop.xlane.xlu1 %3758 }
 0x91e   : > { %11306 = vst [vmem:[#allocation136_spill] sm:$0xff] %v9546_v4 }
 0x91f   : > { %v3952_v11 = vpop.permute.xlu0 %3951 }
 0x920   : > { %4065 = vadd.xlane.f32.xlu0 %v4064_v39  ;;  %v4199_v10 = vsel %vm2030_vm0, %v3952_v11, 0.0 }
 0x921   : > { %4182 = vadd.xlane.f32.xlu1 %v4181_v44  ;;  %v9551_v39 = vpop.xlane.xlu1 %3764  ;;  %v4106_v44 = vsel %vm2030_vm0, %v9323_v27, 0.0 }
 0x922   : > { %11307 = vst [vmem:[#allocation137_spill] sm:$0xff] %v9551_v39 }
 0x924   : > { %4071 = vadd.xlane.f32.xlu0 %v4070_v53 }
 0x925   : > { %4188 = vadd.xlane.f32.xlu1 %v4187_v0  ;;  %v9557_v32 = vpop.xlane.xlu1 %3770  ;;  %v4118_v0 = vsel %vm2030_vm0, %v9379_v35, 0.0 }
 0x926   : > { %11308 = vst [vmem:[#allocation138_spill] sm:$0xff] %v9557_v32 }
 0x928   : > { %4077 = vadd.xlane.f32.xlu0 %v4076_v13 }
 0x929   : > { %4194 = vadd.xlane.f32.xlu1 %v4193_v37  ;;  %v3958_v53 = vpop.permute.xlu1 %3957  ;;  %v4130_v37 = vsel %vm2030_vm0, %v9389_v59, 0.0  ;;  %v4148_v59 = vsel %vm2030_vm0, %v9417_v23, 0.0 }
 0x92c   : > { %4083 = vadd.xlane.f32.xlu0 %v4082_v3  ;;  %v4142_v3 = vsel %vm2030_vm0, %v9401_v9, 0.0 }
 0x92d   : > { %4200 = vadd.xlane.f32.xlu1 %v4199_v10  ;;  %v3962_v2 = vpop.permute.xlu1 %3961 }
 0x930   : > { %4089 = vadd.xlane.f32.xlu0 %v4088_v36 }
 0x931   : > { %v3966_v13 = vpop.permute.xlu1 %3965 }
 0x934   : > { %4095 = vadd.xlane.f32.xlu0 %v4094_v16  ;;  %v4154_v16 = vsel %vm2030_vm0, %v9431_v47, 0.0  ;;  %v4166_v47 = vsel %vm2030_vm0, %v9457_v34, 0.0  ;;  %v4184_v34 = vsel %vm2030_vm0, %v9491_v12, 0.0  ;;  %v4202_v12 = vsel %vm2030_vm0, %v9532_v21, 0.0 }
 0x935   : > { %v4220_v21 = vsel %vm2030_vm0, %v3966_v13, 0.0 }
 0x938   : > { %4101 = vadd.xlane.f32.xlu0 %v4100_v54 }
 0x93c   : > { %4107 = vadd.xlane.f32.xlu0 %v4106_v44 }
 0x940   : > { %4113 = vadd.xlane.f32.xlu0 %v4112_v6  ;;  %v4160_v6 = vsel %vm2030_vm0, %v9441_v51, 0.0 }
 0x944   : > { %4119 = vadd.xlane.f32.xlu0 %v4118_v0 }
 0x948   : > { %4125 = vadd.xlane.f32.xlu0 %v4124_v8 }
 0x94c   : > { %4131 = vadd.xlane.f32.xlu0 %v4130_v37 }
 0x94e   : > { %v9569_v27 = vpop.xlane.xlu1 %4035 }
 0x94f   : > { %11309 = vst [vmem:[#allocation139_spill] sm:$0xff] %v9569_v27 }
 0x950   : > { %v9573_v11 = vpop.xlane.xlu0 %3761  ;;  %4137 = vadd.xlane.f32.xlu0 %v4136_v61 }
 0x951   : > { %11310 = vst [vmem:[#allocation140_spill] sm:$0xff] %v9573_v11  ;;  %v11342_v11 = vld [vmem:[#allocation59_spill] sm:$0xff] }
 0x952   : > { %v9575_v35 = vpop.xlane.xlu1 %4044 }
 0x953   : > { %11311 = vst [vmem:[#allocation141_spill] sm:$0xff] %v9575_v35 }
 0x954   : > { %v9579_v56 = vpop.xlane.xlu0 %3767  ;;  %4143 = vadd.xlane.f32.xlu0 %v4142_v3  ;;  %v4172_v3 = vsel %vm2030_vm0, %v9469_v30, 0.0  ;;  %v11321_v30 = vld [vmem:[#allocation39_spill] sm:$0xff] }
 0x955   : > { %11312 = vst [vmem:[#allocation142_spill] sm:$0xff] %v9579_v56 }
 0x956   : > { %v9581_v10 = vpop.xlane.xlu1 %4050 }
 0x957   : > { %11313 = vst [vmem:[#allocation143_spill] sm:$0xff] %v9581_v10  ;;  %v11404_v10 = vld [vmem:[#allocation107_spill] sm:$0xff] }
 0x958   : > { %v9585_v36 = vpop.xlane.xlu0 %3773  ;;  %4149 = vadd.xlane.f32.xlu0 %v4148_v59  ;;  %v4178_v59 = vsel %vm2030_vm0, %v9481_v42, 0.0  ;;  %v4196_v42 = vsel %vm2030_vm0, %v9519_v7, 0.0  ;;  %v11326_v7 = vld [vmem:[#allocation51_spill] sm:$0xff] }
 0x959   : > { %11314 = vst [vmem:[#allocation144_spill] sm:$0xff] %v9585_v36 }
 0x95a   : > { %v9587_v46 = vpop.xlane.xlu1 %4056 }
 0x95b   : > { %11315 = vst [vmem:[#allocation145_spill] sm:$0xff] %v9587_v46 }
 0x95c   : > { %v3956_v54 = vpop.permute.xlu0 %3955  ;;  %4155 = vadd.xlane.f32.xlu0 %v4154_v16 }
 0x95d   : > { %v4205_v9 = vsel %vm2030_vm0, %v3956_v54, 0.0  ;;  %v4190_v54 = vsel %vm2030_vm0, %v9505_v24, 0.0  ;;  %v11324_v24 = vld [vmem:[#allocation42_spill] sm:$0xff] }
 0x95e   : > { %4206 = vadd.xlane.f32.xlu1 %v4205_v9  ;;  %v9592_v44 = vpop.xlane.xlu1 %4062 }
 0x95f   : > { %11316 = vst [vmem:[#allocation146_spill] sm:$0xff] %v9592_v44 }
 0x960   : > { %v3960_v0 = vpop.permute.xlu0 %3959  ;;  %4161 = vadd.xlane.f32.xlu0 %v4160_v6 }
 0x961   : > { %v4211_v23 = vsel %vm2030_vm0, %v3960_v0, 0.0  ;;  %v11323_v0 = vld [vmem:[#allocation46_spill] sm:$0xff] }
 0x962   : > { %4212 = vadd.xlane.f32.xlu1 %v4211_v23  ;;  %v9597_v8 = vpop.xlane.xlu1 %4068  ;;  %v4208_v23 = vsel %vm2030_vm0, %v3958_v53, 0.0 }
 0x963   : > { %11317 = vst [vmem:[#allocation147_spill] sm:$0xff] %v9597_v8 }
 0x964   : > { %4167 = vadd.xlane.f32.xlu0 %v4166_v47  ;;  %v3964_v37 = vpop.permute.xlu0 %3963 }
 0x965   : > { %v4217_v61 = vsel %vm2030_vm0, %v3964_v37, 0.0  ;;  %v4214_v37 = vsel %vm2030_vm0, %v3962_v2, 0.0 }
 0x966   : > { %4218 = vadd.xlane.f32.xlu1 %v4217_v61  ;;  %v9604_v51 = vpop.xlane.xlu1 %4074 }
 0x967   : > { %11318 = vst [vmem:[#allocation148_spill] sm:$0xff] %v9604_v51 }
 0x968   : > { %4173 = vadd.xlane.f32.xlu0 %v4172_v3  ;;  %v11328_v3 = vld [vmem:[#allocation54_spill] sm:$0xff] }
 0x96a   : > { %v9608_v16 = vpop.xlane.xlu1 %4080 }
 0x96b   : > { %11319 = vst [vmem:[#allocation149_spill] sm:$0xff] %v9608_v16 }
 0x96c   : > { %4179 = vadd.xlane.f32.xlu0 %v4178_v59  ;;  %v11329_v59 = vld [vmem:[#allocation58_spill] sm:$0xff] }
 0x96e   : > { %v9614_v9 = vpop.xlane.xlu1 %4086 }
 0x96f   : > { %11320 = vst [vmem:[#allocation150_spill] sm:$0xff] %v9614_v9 }
 0x970   : > { %4185 = vadd.xlane.f32.xlu0 %v4184_v34 }
 0x972   : > { %v9620_v6 = vpop.xlane.xlu1 %4092 }
 0x973   : > { %11322 = vst [vmem:[#allocation39_spill] sm:$0xff] %v9620_v6 }
 0x974   : > { %4191 = vadd.xlane.f32.xlu0 %v4190_v54 }
 0x976   : > { %v9629_v47 = vpop.xlane.xlu1 %4098 }
 0x977   : > { %4223 = vrot.lane.b32.xlu1 %v11321_v30, %s6939_s8  ;;  %11325 = vst [vmem:[#allocation46_spill] sm:$0xff] %v9629_v47 }
 0x978   : > { %4197 = vadd.xlane.f32.xlu0 %v4196_v42 }
 0x97a   : > { %v9634_v61 = vpop.xlane.xlu1 %4104 }
 0x97b   : > { %4227 = vrot.lane.b32.xlu1 %v11323_v0, %s6939_s8  ;;  %11327 = vst [vmem:[#allocation42_spill] sm:$0xff] %v9634_v61 }
 0x97c   : > { %4203 = vadd.xlane.f32.xlu0 %v4202_v12  ;;  %v11336_v12 = vld [vmem:[#allocation35_spill] sm:$0xff] }
 0x97e   : > { %v9641_v53 = vpop.xlane.xlu1 %4110 }
 0x97f   : > { %4229 = vrot.lane.b32.xlu1 %v11324_v24, %s6939_s8  ;;  %11330 = vst [vmem:[#allocation51_spill] sm:$0xff] %v9641_v53 }
 0x980   : > { %4209 = vadd.xlane.f32.xlu0 %v4208_v23 }
 0x982   : > { %v9645_v34 = vpop.xlane.xlu1 %4116 }
 0x983   : > { %4233 = vrot.lane.b32.xlu1 %v11326_v7, %s6939_s8  ;;  %11331 = vst [vmem:[#allocation54_spill] sm:$0xff] %v9645_v34 }
 0x984   : > { %4215 = vadd.xlane.f32.xlu0 %v4214_v37 }
 0x986   : > { %v9653_v13 = vpop.xlane.xlu1 %4122 }
 0x987   : > { %4237 = vrot.lane.b32.xlu1 %v11328_v3, %s6939_s8  ;;  %11333 = vst [vmem:[#allocation151_spill] sm:$0xff] %v9653_v13 }
 0x988   : > { %4221 = vadd.xlane.f32.xlu0 %v4220_v21  ;;  %v11339_v21 = vld [vmem:[#allocation55_spill] sm:$0xff] }
 0x98a   : > { %v9663_v23 = vpop.xlane.xlu1 %4128 }
 0x98b   : > { %4241 = vrot.lane.b32.xlu1 %v11329_v59, %s6939_s8  ;;  %11337 = vst [vmem:[#allocation35_spill] sm:$0xff] %v9663_v23 }
 0x98e   : > { %v9673_v36 = vpop.xlane.xlu1 %4134 }
 0x98f   : > { %4245 = vrot.lane.b32.xlu1 %v8837_v57, %s6939_s8  ;;  %11340 = vst [vmem:[#allocation55_spill] sm:$0xff] %v9673_v36 }
 0x992   : > { %v9685_v52 = vpop.xlane.xlu1 %4140 }
 0x993   : > { %4249 = vrot.lane.b32.xlu1 %v8853_v26, %s6939_s8  ;;  %11345 = vst [vmem:[#allocation28_spill] sm:$0xff] %v9685_v52  ;;  %v11359_v52 = vld [vmem:[#allocation31_spill] sm:$0xff] }
 0x995   : > { %v9649_v2 = vpop.xlane.xlu0 %4032 }
 0x996   : > { %11332 = vst [vmem:[#allocation58_spill] sm:$0xff] %v9649_v2  ;;  %v9695_v32 = vpop.xlane.xlu1 %4146  ;;  %v11394_v2 = vld [vmem:[#allocation74_spill] sm:$0xff] }
 0x997   : > { %4253 = vrot.lane.b32.xlu1 %v8869_v49, %s6939_s8  ;;  %11347 = vst [vmem:[#allocation157_spill] sm:$0xff] %v9695_v32 }
 0x999   : > { %v9655_v54 = vpop.xlane.xlu0 %4038 }
 0x99a   : > { %11334 = vst [vmem:[#allocation152_spill] sm:$0xff] %v9655_v54  ;;  %v9707_v63 = vpop.xlane.xlu1 %4152 }
 0x99b   : > { %4257 = vrot.lane.b32.xlu1 %v8885_v28, %s6939_s8  ;;  %11350 = vst [vmem:[#allocation160_spill] sm:$0xff] %v9707_v63  ;;  %v11357_v63 = vld [vmem:[#allocation45_spill] sm:$0xff] }
 0x99d   : > { %v9659_v42 = vpop.xlane.xlu0 %4041 }
 0x99e   : > { %11335 = vst [vmem:[#allocation153_spill] sm:$0xff] %v9659_v42  ;;  %4225 = vrot.lane.b32.xlu0 %v11336_v12, %s6939_s8  ;;  %v9717_v40 = vpop.xlane.xlu1 %4158 }
 0x99f   : > { %4261 = vrot.lane.b32.xlu1 %v8901_v41, %s6939_s8  ;;  %11354 = vst [vmem:[#allocation29_spill] sm:$0xff] %v9717_v40  ;;  %v11363_v40 = vld [vmem:[#allocation32_spill] sm:$0xff] }
 0x9a1   : > { %v9667_v37 = vpop.xlane.xlu0 %4047 }
 0x9a2   : > { %11338 = vst [vmem:[#allocation154_spill] sm:$0xff] %v9667_v37  ;;  %4231 = vrot.lane.b32.xlu0 %v11339_v21, %s6939_s8  ;;  %v9729_v36 = vpop.xlane.xlu1 %4164  ;;  %v11383_v37 = vld [vmem:[#allocation66_spill] sm:$0xff] }
 0x9a3   : > { %4265 = vrot.lane.b32.xlu1 %v8917_v5, %s6939_s8  ;;  %11360 = vst [vmem:[#allocation45_spill] sm:$0xff] %v9729_v36  ;;  %v11368_v36 = vld [vmem:[#allocation57_spill] sm:$0xff] }
 0x9a5   : > { %v9675_v56 = vpop.xlane.xlu0 %4053 }
 0x9a6   : > { %11341 = vst [vmem:[#allocation155_spill] sm:$0xff] %v9675_v56  ;;  %4235 = vrot.lane.b32.xlu0 %v11342_v11, %s6939_s8 }
 0x9a7   : > { %4269 = vrot.lane.b32.xlu1 %v8933_v1, %s6939_s8 }
 0x9a9   : > { %v9681_v60 = vpop.xlane.xlu0 %4059 }
 0x9aa   : > { %11343 = vst [vmem:[#allocation59_spill] sm:$0xff] %v9681_v60  ;;  %4239 = vrot.lane.b32.xlu0 %v11344_v18, %s6939_s8 }
 0x9ab   : > { %4273 = vrot.lane.b32.xlu1 %v8949_v50, %s6939_s8 }
 0x9ad   : > { %v9689_v17 = vpop.xlane.xlu0 %4065 }
 0x9ae   : > { %11346 = vst [vmem:[#allocation156_spill] sm:$0xff] %v9689_v17  ;;  %4243 = vrot.lane.b32.xlu0 %v8845_v48, %s6939_s8  ;;  %v11372_v17 = vld [vmem:[#allocation61_spill] sm:$0xff] }
 0x9af   : > { %4277 = vrot.lane.b32.xlu1 %v8965_v58, %s6939_s8 }
 0x9b1   : > { %v9697_v39 = vpop.xlane.xlu0 %4071 }
 0x9b2   : > { %11348 = vst [vmem:[#allocation158_spill] sm:$0xff] %v9697_v39  ;;  %4247 = vrot.lane.b32.xlu0 %v8861_v43, %s6939_s8 }
 0x9b3   : > { %4281 = vrot.lane.b32.xlu1 %v8999_v33, %s6939_s8 }
 0x9b5   : > { %v9703_v4 = vpop.xlane.xlu0 %4077 }
 0x9b6   : > { %11349 = vst [vmem:[#allocation159_spill] sm:$0xff] %v9703_v4  ;;  %4251 = vrot.lane.b32.xlu0 %v8877_v22, %s6939_s8  ;;  %v9739_v4 = vpop.xlane.xlu1 %4170 }
 0x9b7   : > { %4285 = vrot.lane.b32.xlu1 %v9003_v20, %s6939_s8 }
 0x9b9   : > { %v9711_v15 = vpop.xlane.xlu0 %4083 }
 0x9ba   : > { %11351 = vst [vmem:[#allocation161_spill] sm:$0xff] %v9711_v15  ;;  %4255 = vrot.lane.b32.xlu0 %v11352_v25, %s6939_s8  ;;  %v11361_v15 = vld [vmem:[#allocation49_spill] sm:$0xff]  ;;  %v9751_v34 = vpop.xlane.xlu1 %4176 }
 0x9bb   : > { %4289 = vrot.lane.b32.xlu1 %v11353_v14, %s6939_s8  ;;  %11365 = vst [vmem:[#allocation49_spill] sm:$0xff] %v9739_v4  ;;  %v11374_v4 = vld [vmem:[#allocation37_spill] sm:$0xff] }
 0x9bd   : > { %v9719_v62 = vpop.xlane.xlu0 %4089 }
 0x9be   : > { %11355 = vst [vmem:[#allocation44_spill] sm:$0xff] %v9719_v62  ;;  %4259 = vrot.lane.b32.xlu0 %v11356_v38, %s6939_s8  ;;  %v11364_v62 = vld [vmem:[#allocation53_spill] sm:$0xff]  ;;  %v9761_v60 = vpop.xlane.xlu1 %4182 }
 0x9bf   : > { %4293 = vrot.lane.b32.xlu1 %v11357_v63, %s6939_s8 }
 0x9c1   : > { %v9725_v32 = vpop.xlane.xlu0 %4095 }
 0x9c2   : > { %11358 = vst [vmem:[#allocation30_spill] sm:$0xff] %v9725_v32  ;;  %4263 = vrot.lane.b32.xlu0 %v11359_v52, %s6939_s8  ;;  %v11367_v32 = vld [vmem:[#allocation33_spill] sm:$0xff]  ;;  %v9773_v47 = vpop.xlane.xlu1 %4188 }
 0x9c3   : > { %4297 = vrot.lane.b32.xlu1 %v11361_v15, %s6939_s8  ;;  %11371 = vst [vmem:[#allocation33_spill] sm:$0xff] %v9751_v34  ;;  %v11379_v34 = vld [vmem:[#allocation64_spill] sm:$0xff] }
 0x9c5   : > { %v9733_v23 = vpop.xlane.xlu0 %4101 }
 0x9c6   : > { %11362 = vst [vmem:[#allocation31_spill] sm:$0xff] %v9733_v23  ;;  %4267 = vrot.lane.b32.xlu0 %v11363_v40, %s6939_s8  ;;  %v11370_v23 = vld [vmem:[#allocation36_spill] sm:$0xff]  ;;  %v9783_v42 = vpop.xlane.xlu1 %4194 }
 0x9c7   : > { %4301 = vrot.lane.b32.xlu1 %v11364_v62, %s6939_s8  ;;  %11376 = vst [vmem:[#allocation36_spill] sm:$0xff] %v9761_v60  ;;  %v11385_v60 = vld [vmem:[#allocation48_spill] sm:$0xff]  ;;  %11387 = vst [vmem:[#allocation64_spill] sm:$0xff] %v9783_v42 }
 0x9c8   : > { %v11396_v42 = vld [vmem:[#allocation60_spill] sm:$0xff] }
 0x9c9   : > { %v9741_v13 = vpop.xlane.xlu0 %4107 }
 0x9ca   : > { %11366 = vst [vmem:[#allocation32_spill] sm:$0xff] %v9741_v13  ;;  %4271 = vrot.lane.b32.xlu0 %v11367_v32, %s6939_s8  ;;  %v11375_v13 = vld [vmem:[#allocation34_spill] sm:$0xff]  ;;  %v9795_v16 = vpop.xlane.xlu1 %4200 }
 0x9cb   : > { %4305 = vrot.lane.b32.xlu1 %v11368_v36, %s6939_s8  ;;  %11382 = vst [vmem:[#allocation34_spill] sm:$0xff] %v9773_v47  ;;  %v11390_v47 = vld [vmem:[#allocation50_spill] sm:$0xff]  ;;  %11393 = vst [vmem:[#allocation164_spill] sm:$0xff] %v9795_v16 }
 0x9cd   : > { %v9747_v39 = vpop.xlane.xlu0 %4113 }
 0x9ce   : > { %11369 = vst [vmem:[#allocation53_spill] sm:$0xff] %v9747_v39  ;;  %4275 = vrot.lane.b32.xlu0 %v11370_v23, %s6939_s8  ;;  %v11378_v39 = vld [vmem:[#allocation40_spill] sm:$0xff] }
 0x9cf   : > { %4309 = vrot.lane.b32.xlu1 %v11372_v17, %s6939_s8 }
 0x9d1   : > { %v9755_v53 = vpop.xlane.xlu0 %4119 }
 0x9d2   : > { %11373 = vst [vmem:[#allocation57_spill] sm:$0xff] %v9755_v53  ;;  %4279 = vrot.lane.b32.xlu0 %v11374_v4, %s6939_s8  ;;  %v11381_v53 = vld [vmem:[#allocation41_spill] sm:$0xff] }
 0x9d3   : > { %4313 = vrot.lane.b32.xlu1 %v11375_v13, %s6939_s8 }
 0x9d5   : > { %v9763_v61 = vpop.xlane.xlu0 %4125 }
 0x9d6   : > { %11377 = vst [vmem:[#allocation61_spill] sm:$0xff] %v9763_v61  ;;  %4283 = vrot.lane.b32.xlu0 %v11378_v39, %s6939_s8  ;;  %v11386_v61 = vld [vmem:[#allocation43_spill] sm:$0xff] }
 0x9d7   : > { %4317 = vrot.lane.b32.xlu1 %v11379_v34, %s6939_s8 }
 0x9d9   : > { %v9769_v56 = vpop.xlane.xlu0 %4131 }
 0x9da   : > { %11380 = vst [vmem:[#allocation37_spill] sm:$0xff] %v9769_v56  ;;  %4287 = vrot.lane.b32.xlu0 %v11381_v53, %s6939_s8  ;;  %v11389_v56 = vld [vmem:[#allocation52_spill] sm:$0xff] }
 0x9db   : > { %4321 = vrot.lane.b32.xlu1 %v11383_v37, %s6939_s8 }
 0x9dd   : > { %v9777_v6 = vpop.xlane.xlu0 %4137 }
 0x9de   : > { %11384 = vst [vmem:[#allocation40_spill] sm:$0xff] %v9777_v6  ;;  %4291 = vrot.lane.b32.xlu0 %v11385_v60, %s6939_s8  ;;  %v11392_v6 = vld [vmem:[#allocation56_spill] sm:$0xff] }
 0x9df   : > { %4325 = vrot.lane.b32.xlu1 %v11386_v61, %s6939_s8 }
 0x9e1   : > { %v9785_v9 = vpop.xlane.xlu0 %4143 }
 0x9e2   : > { %11388 = vst [vmem:[#allocation162_spill] sm:$0xff] %v9785_v9  ;;  %4295 = vrot.lane.b32.xlu0 %v11389_v56, %s6939_s8  ;;  %v11397_v9 = vld [vmem:[#allocation86_spill] sm:$0xff] }
 0x9e3   : > { %4329 = vrot.lane.b32.xlu1 %v11390_v47, %s6939_s8 }
 0x9e5   : > { %v9791_v54 = vpop.xlane.xlu0 %4149 }
 0x9e6   : > { %11391 = vst [vmem:[#allocation163_spill] sm:$0xff] %v9791_v54  ;;  %4299 = vrot.lane.b32.xlu0 %v11392_v6, %s6939_s8  ;;  %v11400_v54 = vld [vmem:[#allocation62_spill] sm:$0xff] }
 0x9e7   : > { %4333 = vrot.lane.b32.xlu1 %v11394_v2, %s6939_s8 }
 0x9e9   : > { %v9799_v51 = vpop.xlane.xlu0 %4155 }
 0x9ea   : > { %11395 = vst [vmem:[#allocation165_spill] sm:$0xff] %v9799_v51  ;;  %4303 = vrot.lane.b32.xlu0 %v11396_v42, %s6939_s8  ;;  %v11403_v51 = vld [vmem:[#allocation63_spill] sm:$0xff] }
 0x9eb   : > { %4337 = vrot.lane.b32.xlu1 %v11397_v9, %s6939_s8  ;;  %v9805_v8 = vpop.xlane.xlu1 %4206 }
 0x9ec   : > { %11398 = vst [vmem:[#allocation166_spill] sm:$0xff] %v9805_v8 }
 0x9ed   : > { %v9807_v44 = vpop.xlane.xlu0 %4161 }
 0x9ee   : > { %11399 = vst [vmem:[#allocation167_spill] sm:$0xff] %v9807_v44  ;;  %4307 = vrot.lane.b32.xlu0 %v11400_v54, %s6939_s8  ;;  %v11407_v44 = vld [vmem:[#allocation65_spill] sm:$0xff] }
 0x9ef   : > { %4341 = vrot.lane.b32.xlu1 %v9353_v55, %s6939_s8  ;;  %v9813_v16 = vpop.xlane.xlu1 %4212 }
 0x9f0   : > { %11401 = vst [vmem:[#allocation168_spill] sm:$0xff] %v9813_v16 }
 0x9f1   : > { %v9815_v46 = vpop.xlane.xlu0 %4167 }
 0x9f2   : > { %11402 = vst [vmem:[#allocation169_spill] sm:$0xff] %v9815_v46  ;;  %4311 = vrot.lane.b32.xlu0 %v11403_v51, %s6939_s8  ;;  %v11409_v46 = vld [vmem:[#allocation67_spill] sm:$0xff] }
 0x9f3   : > { %4345 = vrot.lane.b32.xlu1 %v11404_v10, %s6939_s8  ;;  %v9821_v35 = vpop.xlane.xlu1 %4218  ;;  %v11411_v10 = vld [vmem:[#allocation47_spill] sm:$0xff] }
 0x9f4   : > { %11405 = vst [vmem:[#allocation170_spill] sm:$0xff] %v9821_v35 }
 0x9f5   : > { %v9823_v8 = vpop.xlane.xlu0 %4173 }
 0x9f6   : > { %11406 = vst [vmem:[#allocation171_spill] sm:$0xff] %v9823_v8  ;;  %4315 = vrot.lane.b32.xlu0 %v11407_v44, %s6939_s8  ;;  %v11413_v44 = vld [vmem:[#allocation70_spill] sm:$0xff] }
 0x9f7   : > { %4349 = vrot.lane.b32.xlu1 %v9371_v29, %s6939_s8  ;;  %v4224_v27 = vpop.permute.xlu1 %4223 }
 0x9f9   : > { %v9829_v16 = vpop.xlane.xlu0 %4179 }
 0x9fa   : > { %11408 = vst [vmem:[#allocation172_spill] sm:$0xff] %v9829_v16  ;;  %4319 = vrot.lane.b32.xlu0 %v11409_v46, %s6939_s8  ;;  %v11415_v16 = vld [vmem:[#allocation81_spill] sm:$0xff] }
 0x9fb   : > { %v4228_v51 = vpop.permute.xlu1 %4227 }
 0x9fd   : > { %v9833_v55 = vpop.xlane.xlu0 %4185 }
 0x9fe   : > { %11410 = vst [vmem:[#allocation173_spill] sm:$0xff] %v9833_v55  ;;  %4323 = vrot.lane.b32.xlu0 %v11411_v10, %s6939_s8  ;;  %v11417_v55 = vld [vmem:[#allocation93_spill] sm:$0xff] }
 0x9ff   : > { %v4230_v35 = vpop.permute.xlu1 %4229 }
 0xa01   : > { %v9837_v8 = vpop.xlane.xlu0 %4191 }
 0xa02   : > { %11412 = vst [vmem:[#allocation174_spill] sm:$0xff] %v9837_v8  ;;  %4327 = vrot.lane.b32.xlu0 %v11413_v44, %s6939_s8 }
 0xa03   : > { %v4234_v54 = vpop.permute.xlu1 %4233 }
 0xa05   : > { %v9841_v29 = vpop.xlane.xlu0 %4197 }
 0xa06   : > { %11414 = vst [vmem:[#allocation175_spill] sm:$0xff] %v9841_v29  ;;  %4331 = vrot.lane.b32.xlu0 %v11415_v16, %s6939_s8 }
 0xa07   : > { %v4238_v9 = vpop.permute.xlu1 %4237 }
 0xa09   : > { %v9845_v46 = vpop.xlane.xlu0 %4203 }
 0xa0a   : > { %11416 = vst [vmem:[#allocation176_spill] sm:$0xff] %v9845_v46  ;;  %4335 = vrot.lane.b32.xlu0 %v11417_v55, %s6939_s8 }
 0xa0b   : > { %v9849_v42 = vpop.permute.xlu1 %4241 }
 0xa0d   : > { %v9851_v10 = vpop.xlane.xlu0 %4209 }
 0xa0e   : > { %11418 = vst [vmem:[#allocation177_spill] sm:$0xff] %v9851_v10  ;;  %4339 = vrot.lane.b32.xlu0 %v9311_v31, %s6939_s8 }
 0xa0f   : > { %v9855_v8 = vpop.permute.xlu1 %4245 }
 0xa11   : > { %v9857_v44 = vpop.xlane.xlu0 %4215 }
 0xa12   : > { %11419 = vst [vmem:[#allocation178_spill] sm:$0xff] %v9857_v44  ;;  %4343 = vrot.lane.b32.xlu0 %v9317_v19, %s6939_s8 }
 0xa13   : > { %v9861_v29 = vpop.permute.xlu1 %4249 }
 0xa15   : > { %v9863_v46 = vpop.xlane.xlu0 %4221 }
 0xa16   : > { %11420 = vst [vmem:[#allocation179_spill] sm:$0xff] %v9863_v46  ;;  %4347 = vrot.lane.b32.xlu0 %v9327_v45, %s6939_s8 }
 0xa17   : > { %v9867_v55 = vpop.permute.xlu1 %4253 }
 0xa19   : > { %v4226_v10 = vpop.permute.xlu0 %4225 }
 0xa1a   : > { %v4418_v16 = vsel %vm2030_vm0, %v4226_v10, 0.0 }
 0xa1b   : > { %4419 = vadd.xlane.f32.xlu1 %v4418_v16  ;;  %v9870_v31 = vpop.permute.xlu1 %4257 }
 0xa1d   : > { %v4232_v2 = vpop.permute.xlu0 %4231 }
 0xa1e   : > { %v4427_v44 = vsel %vm2030_vm0, %v4232_v2, 0.0 }
 0xa1f   : > { %4428 = vadd.xlane.f32.xlu1 %v4427_v44  ;;  %v9873_v19 = vpop.permute.xlu1 %4261 }
 0xa21   : > { %v4236_v6 = vpop.permute.xlu0 %4235 }
 0xa22   : > { %v4433_v46 = vsel %vm2030_vm0, %v4236_v6, 0.0  ;;  %v4415_v6 = vsel %vm2030_vm0, %v4224_v27, 0.0 }
 0xa23   : > { %4434 = vadd.xlane.f32.xlu1 %v4433_v46  ;;  %v9876_v45 = vpop.permute.xlu1 %4265 }
 0xa25   : > { %v4240_v47 = vpop.permute.xlu0 %4239 }
 0xa26   : > { %v4439_v56 = vsel %vm2030_vm0, %v4240_v47, 0.0 }
 0xa27   : > { %4440 = vadd.xlane.f32.xlu1 %v4439_v56  ;;  %v9880_v61 = vpop.permute.xlu1 %4269 }
 0xa29   : > { %v4244_v10 = vpop.permute.xlu0 %4243 }
 0xa2a   : > { %v4445_v16 = vsel %vm2030_vm0, %v4244_v10, 0.0 }
 0xa2b   : > { %4446 = vadd.xlane.f32.xlu1 %v4445_v16  ;;  %v9883_v37 = vpop.permute.xlu1 %4273  ;;  %v4421_v16 = vsel %vm2030_vm0, %v4228_v51, 0.0 }
 0xa2d   : > { %v4248_v2 = vpop.permute.xlu0 %4247 }
 0xa2e   : > { %v4451_v44 = vsel %vm2030_vm0, %v4248_v2, 0.0 }
 0xa2f   : > { %4452 = vadd.xlane.f32.xlu1 %v4451_v44  ;;  %v9888_v10 = vpop.permute.xlu1 %4277  ;;  %v4424_v44 = vsel %vm2030_vm0, %v4230_v35, 0.0 }
 0xa31   : > { %v4252_v60 = vpop.permute.xlu0 %4251 }
 0xa32   : > { %v4457_v46 = vsel %vm2030_vm0, %v4252_v60, 0.0 }
 0xa33   : > { %4458 = vadd.xlane.f32.xlu1 %v4457_v46  ;;  %v9893_v46 = vpop.permute.xlu1 %4281 }
 0xa35   : > { %v4256_v47 = vpop.permute.xlu0 %4255  ;;  %4416 = vadd.xlane.f32.xlu0 %v4415_v6  ;;  %v4430_v6 = vsel %vm2030_vm0, %v4234_v54, 0.0 }
 0xa36   : > { %v4463_v56 = vsel %vm2030_vm0, %v4256_v47, 0.0 }
 0xa37   : > { %4464 = vadd.xlane.f32.xlu1 %v4463_v56  ;;  %v9898_v56 = vpop.permute.xlu1 %4285 }
 0xa39   : > { %v4260_v53 = vpop.permute.xlu0 %4259  ;;  %4422 = vadd.xlane.f32.xlu0 %v4421_v16 }
 0xa3a   : > { %v4469_v2 = vsel %vm2030_vm0, %v4260_v53, 0.0  ;;  %v4436_v53 = vsel %vm2030_vm0, %v4238_v9, 0.0 }
 0xa3b   : > { %4470 = vadd.xlane.f32.xlu1 %v4469_v2  ;;  %v4442_v2 = vsel %vm2030_vm0, %v9849_v42, 0.0  ;;  %v9904_v54 = vpop.permute.xlu1 %4289  ;;  %v4454_v42 = vsel %vm2030_vm0, %v9861_v29, 0.0 }
 0xa3d   : > { %v4264_v60 = vpop.permute.xlu0 %4263  ;;  %4425 = vadd.xlane.f32.xlu0 %v4424_v44 }
 0xa3e   : > { %v4475_v27 = vsel %vm2030_vm0, %v4264_v60, 0.0 }
 0xa3f   : > { %4476 = vadd.xlane.f32.xlu1 %v4475_v27  ;;  %v4448_v27 = vsel %vm2030_vm0, %v9855_v8, 0.0 }
 0xa41   : > { %v4268_v47 = vpop.permute.xlu0 %4267  ;;  %4431 = vadd.xlane.f32.xlu0 %v4430_v6 }
 0xa42   : > { %v4481_v51 = vsel %vm2030_vm0, %v4268_v47, 0.0  ;;  %v9910_v47 = vpop.permute.xlu1 %4293 }
 0xa43   : > { %4482 = vadd.xlane.f32.xlu1 %v4481_v51 }
 0xa45   : > { %v4272_v16 = vpop.permute.xlu0 %4271  ;;  %4437 = vadd.xlane.f32.xlu0 %v4436_v53 }
 0xa46   : > { %v4487_v35 = vsel %vm2030_vm0, %v4272_v16, 0.0  ;;  %v4460_v16 = vsel %vm2030_vm0, %v9867_v55, 0.0  ;;  %v4298_v8 = vpop.permute.xlu1 %4297 }
 0xa47   : > { %4488 = vadd.xlane.f32.xlu1 %v4487_v35 }
 0xa49   : > { %v4276_v44 = vpop.permute.xlu0 %4275  ;;  %4443 = vadd.xlane.f32.xlu0 %v4442_v2 }
 0xa4a   : > { %v4493_v60 = vsel %vm2030_vm0, %v4276_v44, 0.0  ;;  %v4466_v44 = vsel %vm2030_vm0, %v9870_v31, 0.0 }
 0xa4b   : > { %4494 = vadd.xlane.f32.xlu1 %v4493_v60 }
 0xa4d   : > { %v4280_v6 = vpop.permute.xlu0 %4279  ;;  %4449 = vadd.xlane.f32.xlu0 %v4448_v27  ;;  %v4302_v27 = vpop.permute.xlu1 %4301 }
 0xa4e   : > { %v4499_v9 = vsel %vm2030_vm0, %v4280_v6, 0.0  ;;  %v4472_v6 = vsel %vm2030_vm0, %v9873_v19, 0.0 }
 0xa4f   : > { %4500 = vadd.xlane.f32.xlu1 %v4499_v9 }
 0xa51   : > { %v4284_v51 = vpop.permute.xlu0 %4283  ;;  %4455 = vadd.xlane.f32.xlu0 %v4454_v42  ;;  %v4478_v42 = vsel %vm2030_vm0, %v9876_v45, 0.0  ;;  %v4306_v31 = vpop.permute.xlu1 %4305 }
 0xa52   : > { %v4505_v53 = vsel %vm2030_vm0, %v4284_v51, 0.0 }
 0xa53   : > { %4506 = vadd.xlane.f32.xlu1 %v4505_v53 }
 0xa55   : > { %v4288_v35 = vpop.permute.xlu0 %4287  ;;  %4461 = vadd.xlane.f32.xlu0 %v4460_v16  ;;  %v4484_v16 = vsel %vm2030_vm0, %v9880_v61, 0.0 }
 0xa56   : > { %v4511_v2 = vsel %vm2030_vm0, %v4288_v35, 0.0 }
 0xa57   : > { %4512 = vadd.xlane.f32.xlu1 %v4511_v2  ;;  %v4310_v2 = vpop.permute.xlu1 %4309 }
 0xa59   : > { %v4292_v60 = vpop.permute.xlu0 %4291  ;;  %4467 = vadd.xlane.f32.xlu0 %v4466_v44  ;;  %v4490_v44 = vsel %vm2030_vm0, %v9883_v37, 0.0 }
 0xa5a   : > { %v4517_v29 = vsel %vm2030_vm0, %v4292_v60, 0.0 }
 0xa5b   : > { %4518 = vadd.xlane.f32.xlu1 %v4517_v29  ;;  %v4496_v29 = vsel %vm2030_vm0, %v9888_v10, 0.0  ;;  %v4314_v61 = vpop.permute.xlu1 %4313 }
 0xa5d   : > { %v4296_v9 = vpop.permute.xlu0 %4295  ;;  %4473 = vadd.xlane.f32.xlu0 %v4472_v6 }
 0xa5e   : > { %v4523_v55 = vsel %vm2030_vm0, %v4296_v9, 0.0 }
 0xa5f   : > { %4524 = vadd.xlane.f32.xlu1 %v4523_v55  ;;  %v4502_v55 = vsel %vm2030_vm0, %v9893_v46, 0.0 }
 0xa61   : > { %v4300_v51 = vpop.permute.xlu0 %4299  ;;  %4479 = vadd.xlane.f32.xlu0 %v4478_v42 }
 0xa62   : > { %v4529_v53 = vsel %vm2030_vm0, %v4300_v51, 0.0  ;;  %v4318_v51 = vpop.permute.xlu1 %4317 }
 0xa63   : > { %4530 = vadd.xlane.f32.xlu1 %v4529_v53  ;;  %v4508_v53 = vsel %vm2030_vm0, %v9898_v56, 0.0 }
 0xa65   : > { %v4304_v35 = vpop.permute.xlu0 %4303  ;;  %4485 = vadd.xlane.f32.xlu0 %v4484_v16 }
 0xa66   : > { %v4535_v19 = vsel %vm2030_vm0, %v4304_v35, 0.0  ;;  %v4514_v35 = vsel %vm2030_vm0, %v9904_v54, 0.0  ;;  %v4322_v46 = vpop.permute.xlu1 %4321 }
 0xa67   : > { %4536 = vadd.xlane.f32.xlu1 %v4535_v19 }
 0xa69   : > { %v4308_v60 = vpop.permute.xlu0 %4307  ;;  %4491 = vadd.xlane.f32.xlu0 %v4490_v44 }
 0xa6a   : > { %v4541_v45 = vsel %vm2030_vm0, %v4308_v60, 0.0  ;;  %v4520_v60 = vsel %vm2030_vm0, %v9910_v47, 0.0 }
 0xa6b   : > { %4542 = vadd.xlane.f32.xlu1 %v4541_v45 }
 0xa6d   : > { %v4312_v6 = vpop.permute.xlu0 %4311  ;;  %4497 = vadd.xlane.f32.xlu0 %v4496_v29  ;;  %v4326_v29 = vpop.permute.xlu1 %4325 }
 0xa6e   : > { %v4547_v9 = vsel %vm2030_vm0, %v4312_v6, 0.0  ;;  %v4526_v6 = vsel %vm2030_vm0, %v4298_v8, 0.0 }
 0xa6f   : > { %4548 = vadd.xlane.f32.xlu1 %v4547_v9 }
 0xa71   : > { %v4316_v42 = vpop.permute.xlu0 %4315  ;;  %4503 = vadd.xlane.f32.xlu0 %v4502_v55  ;;  %v4532_v55 = vsel %vm2030_vm0, %v4302_v27, 0.0 }
 0xa72   : > { %v4553_v37 = vsel %vm2030_vm0, %v4316_v42, 0.0 }
 0xa73   : > { %4554 = vadd.xlane.f32.xlu1 %v4553_v37  ;;  %v4330_v37 = vpop.permute.xlu1 %4329 }
 0xa75   : > { %v4320_v16 = vpop.permute.xlu0 %4319  ;;  %4509 = vadd.xlane.f32.xlu0 %v4508_v53  ;;  %v4538_v53 = vsel %vm2030_vm0, %v4306_v31, 0.0 }
 0xa76   : > { %v4559_v10 = vsel %vm2030_vm0, %v4320_v16, 0.0 }
 0xa77   : > { %4560 = vadd.xlane.f32.xlu1 %v4559_v10  ;;  %v4334_v8 = vpop.permute.xlu1 %4333 }
 0xa79   : > { %v4324_v19 = vpop.permute.xlu0 %4323  ;;  %4515 = vadd.xlane.f32.xlu0 %v4514_v35  ;;  %v4544_v35 = vsel %vm2030_vm0, %v4310_v2, 0.0  ;;  %v4568_v2 = vsel %vm2030_vm0, %v4326_v29, 0.0 }
 0xa7a   : > { %v4565_v44 = vsel %vm2030_vm0, %v4324_v19, 0.0 }
 0xa7b   : > { %4566 = vadd.xlane.f32.xlu1 %v4565_v44  ;;  %v4550_v44 = vsel %vm2030_vm0, %v4314_v61, 0.0 }
 0xa7d   : > { %v4328_v45 = vpop.permute.xlu0 %4327  ;;  %4521 = vadd.xlane.f32.xlu0 %v4520_v60 }
 0xa7e   : > { %v4571_v56 = vsel %vm2030_vm0, %v4328_v45, 0.0  ;;  %v4338_v45 = vpop.permute.xlu1 %4337 }
 0xa7f   : > { %4572 = vadd.xlane.f32.xlu1 %v4571_v56  ;;  %v4556_v56 = vsel %vm2030_vm0, %v4318_v51, 0.0 }
 0xa81   : > { %v4332_v9 = vpop.permute.xlu0 %4331  ;;  %4527 = vadd.xlane.f32.xlu0 %v4526_v6 }
 0xa82   : > { %v4577_v54 = vsel %vm2030_vm0, %v4332_v9, 0.0  ;;  %v4342_v6 = vpop.permute.xlu1 %4341  ;;  %v4562_v9 = vsel %vm2030_vm0, %v4322_v46, 0.0  ;;  %v4586_v46 = vsel %vm2030_vm0, %v4338_v45, 0.0  ;;  %v11431_v45 = vld [vmem:[#allocation52_spill] sm:$0xff] }
 0xa83   : > { %4578 = vadd.xlane.f32.xlu1 %v4577_v54 }
 0xa85   : > { %v4336_v42 = vpop.permute.xlu0 %4335  ;;  %4533 = vadd.xlane.f32.xlu0 %v4532_v55  ;;  %v4574_v55 = vsel %vm2030_vm0, %v4330_v37, 0.0  ;;  %v4592_v37 = vsel %vm2030_vm0, %v4342_v6, 0.0 }
 0xa86   : > { %v4583_v47 = vsel %vm2030_vm0, %v4336_v42, 0.0  ;;  %v4346_v54 = vpop.permute.xlu1 %4345  ;;  %v4580_v42 = vsel %vm2030_vm0, %v4334_v8, 0.0 }
 0xa87   : > { %4584 = vadd.xlane.f32.xlu1 %v4583_v47 }
 0xa89   : > { %v4340_v16 = vpop.permute.xlu0 %4339  ;;  %4539 = vadd.xlane.f32.xlu0 %v4538_v53 }
 0xa8a   : > { %v4589_v10 = vsel %vm2030_vm0, %v4340_v16, 0.0  ;;  %v4350_v61 = vpop.permute.xlu1 %4349 }
 0xa8b   : > { %4590 = vadd.xlane.f32.xlu1 %v4589_v10 }
 0xa8d   : > { %v4344_v19 = vpop.permute.xlu0 %4343  ;;  %4545 = vadd.xlane.f32.xlu0 %v4544_v35 }
 0xa8e   : > { %v4595_v27 = vsel %vm2030_vm0, %v4344_v19, 0.0  ;;  %v11423_v19 = vld [vmem:[#allocation41_spill] sm:$0xff] }
 0xa8f   : > { %4596 = vadd.xlane.f32.xlu1 %v4595_v27 }
 0xa91   : > { %v4348_v60 = vpop.permute.xlu0 %4347  ;;  %4551 = vadd.xlane.f32.xlu0 %v4550_v44  ;;  %v11427_v44 = vld [vmem:[#allocation48_spill] sm:$0xff] }
 0xa92   : > { %v4601_v31 = vsel %vm2030_vm0, %v4348_v60, 0.0 }
 0xa93   : > { %4602 = vadd.xlane.f32.xlu1 %v4601_v31  ;;  %v11432_v31 = vld [vmem:[#allocation50_spill] sm:$0xff] }
 0xa95   : > { %4557 = vadd.xlane.f32.xlu0 %v4556_v56 }
 0xa99   : > { %4563 = vadd.xlane.f32.xlu0 %v4562_v9  ;;  %v11435_v9 = vld [vmem:[#allocation56_spill] sm:$0xff] }
 0xa9d   : > { %4569 = vadd.xlane.f32.xlu0 %v4568_v2  ;;  %v11436_v2 = vld [vmem:[#allocation74_spill] sm:$0xff] }
 0xaa1   : > { %4575 = vadd.xlane.f32.xlu0 %v4574_v55 }
 0xaa4   : > { %4607 = vrot.lane.b32.xlu1 %v11321_v30, %s6940_s3 }
 0xaa5   : > { %4581 = vadd.xlane.f32.xlu0 %v4580_v42  ;;  %v11440_v42 = vld [vmem:[#allocation86_spill] sm:$0xff] }
 0xaa8   : > { %4611 = vrot.lane.b32.xlu1 %v11323_v0, %s6940_s3  ;;  %v9967_v51 = vpop.xlane.xlu1 %4419  ;;  %v4598_v0 = vsel %vm2030_vm0, %v4346_v54, 0.0 }
 0xaa9   : > { %4587 = vadd.xlane.f32.xlu0 %v4586_v46 }
 0xaac   : > { %4613 = vrot.lane.b32.xlu1 %v11324_v24, %s6940_s3  ;;  %v9972_v29 = vpop.xlane.xlu1 %4428  ;;  %v4604_v24 = vsel %vm2030_vm0, %v4350_v61, 0.0  ;;  %v11439_v61 = vld [vmem:[#allocation60_spill] sm:$0xff] }
 0xaad   : > { %4593 = vadd.xlane.f32.xlu0 %v4592_v37 }
 0xab0   : > { %4617 = vrot.lane.b32.xlu1 %v11326_v7, %s6940_s3  ;;  %v9977_v30 = vpop.xlane.xlu1 %4434 }
 0xab1   : > { %4599 = vadd.xlane.f32.xlu0 %v4598_v0  ;;  %v11443_v0 = vld [vmem:[#allocation62_spill] sm:$0xff] }
 0xab4   : > { %4621 = vrot.lane.b32.xlu1 %v11328_v3, %s6940_s3  ;;  %v9982_v47 = vpop.xlane.xlu1 %4440 }
 0xab5   : > { %4605 = vadd.xlane.f32.xlu0 %v4604_v24  ;;  %v11444_v24 = vld [vmem:[#allocation104_spill] sm:$0xff] }
 0xab8   : > { %4625 = vrot.lane.b32.xlu1 %v11329_v59, %s6940_s3  ;;  %v9987_v53 = vpop.xlane.xlu1 %4446 }
 0xabc   : > { %4629 = vrot.lane.b32.xlu1 %v8837_v57, %s6940_s3  ;;  %v9991_v7 = vpop.xlane.xlu1 %4452 }
 0xac0   : > { %4633 = vrot.lane.b32.xlu1 %v8853_v26, %s6940_s3  ;;  %v9995_v16 = vpop.xlane.xlu1 %4458 }
 0xac2   : > { %v9997_v3 = vpop.xlane.xlu0 %4416 }
 0xac4   : > { %4637 = vrot.lane.b32.xlu1 %v8869_v49, %s6940_s3  ;;  %v10001_v10 = vpop.xlane.xlu1 %4464 }
 0xac6   : > { %v10003_v59 = vpop.xlane.xlu0 %4422 }
 0xac8   : > { %4641 = vrot.lane.b32.xlu1 %v8885_v28, %s6940_s3  ;;  %v10007_v57 = vpop.xlane.xlu1 %4470 }
 0xaca   : > { %v10009_v8 = vpop.xlane.xlu0 %4425 }
 0xacb   : > { %4609 = vrot.lane.b32.xlu0 %v11336_v12, %s6940_s3 }
 0xacc   : > { %4645 = vrot.lane.b32.xlu1 %v8901_v41, %s6940_s3  ;;  %v10015_v26 = vpop.xlane.xlu1 %4476 }
 0xace   : > { %v10017_v49 = vpop.xlane.xlu0 %4431 }
 0xacf   : > { %4615 = vrot.lane.b32.xlu0 %v11339_v21, %s6940_s3 }
 0xad0   : > { %4649 = vrot.lane.b32.xlu1 %v8917_v5, %s6940_s3  ;;  %v10023_v28 = vpop.xlane.xlu1 %4482 }
 0xad2   : > { %v10025_v35 = vpop.xlane.xlu0 %4437 }
 0xad3   : > { %4619 = vrot.lane.b32.xlu0 %v11342_v11, %s6940_s3 }
 0xad4   : > { %4653 = vrot.lane.b32.xlu1 %v8933_v1, %s6940_s3  ;;  %v10031_v41 = vpop.xlane.xlu1 %4488 }
 0xad6   : > { %v10033_v12 = vpop.xlane.xlu0 %4443 }
 0xad7   : > { %4623 = vrot.lane.b32.xlu0 %v11344_v18, %s6940_s3 }
 0xad8   : > { %4657 = vrot.lane.b32.xlu1 %v8949_v50, %s6940_s3  ;;  %v10039_v5 = vpop.xlane.xlu1 %4494 }
 0xada   : > { %v10041_v21 = vpop.xlane.xlu0 %4449 }
 0xadb   : > { %4627 = vrot.lane.b32.xlu0 %v8845_v48, %s6940_s3 }
 0xadc   : > { %4661 = vrot.lane.b32.xlu1 %v8965_v58, %s6940_s3  ;;  %v10047_v1 = vpop.xlane.xlu1 %4500 }
 0xade   : > { %v10049_v11 = vpop.xlane.xlu0 %4455 }
 0xadf   : > { %4631 = vrot.lane.b32.xlu0 %v8861_v43, %s6940_s3 }
 0xae0   : > { %4665 = vrot.lane.b32.xlu1 %v8999_v33, %s6940_s3  ;;  %v10055_v50 = vpop.xlane.xlu1 %4506 }
 0xae2   : > { %v10057_v18 = vpop.xlane.xlu0 %4461 }
 0xae3   : > { %4635 = vrot.lane.b32.xlu0 %v8877_v22, %s6940_s3 }
 0xae4   : > { %4669 = vrot.lane.b32.xlu1 %v9003_v20, %s6940_s3  ;;  %v10063_v48 = vpop.xlane.xlu1 %4512 }
 0xae6   : > { %v10065_v58 = vpop.xlane.xlu0 %4467 }
 0xae7   : > { %4639 = vrot.lane.b32.xlu0 %v11352_v25, %s6940_s3 }
 0xae8   : > { %4673 = vrot.lane.b32.xlu1 %v11353_v14, %s6940_s3  ;;  %v10071_v43 = vpop.xlane.xlu1 %4518 }
 0xaea   : > { %v10073_v33 = vpop.xlane.xlu0 %4473 }
 0xaeb   : > { %4643 = vrot.lane.b32.xlu0 %v11356_v38, %s6940_s3 }
 0xaec   : > { %4677 = vrot.lane.b32.xlu1 %v11357_v63, %s6940_s3  ;;  %v10079_v22 = vpop.xlane.xlu1 %4524 }
 0xaee   : > { %v10081_v20 = vpop.xlane.xlu0 %4479 }
 0xaef   : > { %4647 = vrot.lane.b32.xlu0 %v11359_v52, %s6940_s3 }
 0xaf0   : > { %4681 = vrot.lane.b32.xlu1 %v11361_v15, %s6940_s3  ;;  %v10087_v14 = vpop.xlane.xlu1 %4530 }
 0xaf2   : > { %v10089_v25 = vpop.xlane.xlu0 %4485 }
 0xaf3   : > { %4651 = vrot.lane.b32.xlu0 %v11363_v40, %s6940_s3 }
 0xaf4   : > { %4685 = vrot.lane.b32.xlu1 %v11364_v62, %s6940_s3  ;;  %v10095_v38 = vpop.xlane.xlu1 %4536 }
 0xaf6   : > { %v10097_v63 = vpop.xlane.xlu0 %4491 }
 0xaf7   : > { %4655 = vrot.lane.b32.xlu0 %v11367_v32, %s6940_s3 }
 0xaf8   : > { %4689 = vrot.lane.b32.xlu1 %v11368_v36, %s6940_s3  ;;  %v10103_v52 = vpop.xlane.xlu1 %4542 }
 0xafa   : > { %v10105_v15 = vpop.xlane.xlu0 %4497 }
 0xafb   : > { %4659 = vrot.lane.b32.xlu0 %v11370_v23, %s6940_s3 }
 0xafc   : > { %4693 = vrot.lane.b32.xlu1 %v11372_v17, %s6940_s3  ;;  %v10111_v62 = vpop.xlane.xlu1 %4548 }
 0xafe   : > { %v10113_v40 = vpop.xlane.xlu0 %4503 }
 0xaff   : > { %4663 = vrot.lane.b32.xlu0 %v11374_v4, %s6940_s3  ;;  %v11424_v4 = vld [vmem:[#allocation66_spill] sm:$0xff] }
 0xb00   : > { %4697 = vrot.lane.b32.xlu1 %v11375_v13, %s6940_s3  ;;  %v10119_v32 = vpop.xlane.xlu1 %4554 }
 0xb02   : > { %v10121_v36 = vpop.xlane.xlu0 %4509 }
 0xb03   : > { %4667 = vrot.lane.b32.xlu0 %v11378_v39, %s6940_s3  ;;  %v11428_v39 = vld [vmem:[#allocation43_spill] sm:$0xff] }
 0xb04   : > { %4701 = vrot.lane.b32.xlu1 %v11379_v34, %s6940_s3  ;;  %v10127_v17 = vpop.xlane.xlu1 %4560 }
 0xb05   : > { %11421 = vst [vmem:[#allocation180_spill] sm:$0xff] %v10127_v17 }
 0xb06   : > { %v10129_v23 = vpop.xlane.xlu0 %4515 }
 0xb07   : > { %11422 = vst [vmem:[#allocation181_spill] sm:$0xff] %v10129_v23  ;;  %4671 = vrot.lane.b32.xlu0 %v11423_v19, %s6940_s3 }
 0xb08   : > { %4705 = vrot.lane.b32.xlu1 %v11424_v4, %s6940_s3  ;;  %v10135_v13 = vpop.xlane.xlu1 %4566 }
 0xb09   : > { %11425 = vst [vmem:[#allocation41_spill] sm:$0xff] %v10135_v13 }
 0xb0a   : > { %v10137_v27 = vpop.xlane.xlu0 %4521 }
 0xb0b   : > { %11426 = vst [vmem:[#allocation66_spill] sm:$0xff] %v10137_v27  ;;  %4675 = vrot.lane.b32.xlu0 %v11427_v44, %s6940_s3  ;;  %v11447_v44 = vld [vmem:[#allocation63_spill] sm:$0xff] }
 0xb0c   : > { %4709 = vrot.lane.b32.xlu1 %v11428_v39, %s6940_s3  ;;  %v10143_v34 = vpop.xlane.xlu1 %4572  ;;  %v11448_v39 = vld [vmem:[#allocation107_spill] sm:$0xff] }
 0xb0d   : > { %11429 = vst [vmem:[#allocation48_spill] sm:$0xff] %v10143_v34 }
 0xb0e   : > { %v10145_v60 = vpop.xlane.xlu0 %4527 }
 0xb0f   : > { %11430 = vst [vmem:[#allocation43_spill] sm:$0xff] %v10145_v60  ;;  %4679 = vrot.lane.b32.xlu0 %v11431_v45, %s6940_s3 }
 0xb10   : > { %4713 = vrot.lane.b32.xlu1 %v11432_v31, %s6940_s3  ;;  %v10151_v56 = vpop.xlane.xlu1 %4578 }
 0xb11   : > { %11433 = vst [vmem:[#allocation52_spill] sm:$0xff] %v10151_v56 }
 0xb12   : > { %v10153_v6 = vpop.xlane.xlu0 %4533 }
 0xb13   : > { %11434 = vst [vmem:[#allocation50_spill] sm:$0xff] %v10153_v6  ;;  %4683 = vrot.lane.b32.xlu0 %v11435_v9, %s6940_s3  ;;  %v11451_v9 = vld [vmem:[#allocation65_spill] sm:$0xff] }
 0xb14   : > { %4717 = vrot.lane.b32.xlu1 %v11436_v2, %s6940_s3  ;;  %v10159_v54 = vpop.xlane.xlu1 %4584  ;;  %v11452_v2 = vld [vmem:[#allocation109_spill] sm:$0xff] }
 0xb15   : > { %11437 = vst [vmem:[#allocation56_spill] sm:$0xff] %v10159_v54 }
 0xb16   : > { %v10161_v55 = vpop.xlane.xlu0 %4539 }
 0xb17   : > { %11438 = vst [vmem:[#allocation74_spill] sm:$0xff] %v10161_v55  ;;  %4687 = vrot.lane.b32.xlu0 %v11439_v61, %s6940_s3 }
 0xb18   : > { %4721 = vrot.lane.b32.xlu1 %v11440_v42, %s6940_s3  ;;  %v10167_v46 = vpop.xlane.xlu1 %4590 }
 0xb19   : > { %11441 = vst [vmem:[#allocation60_spill] sm:$0xff] %v10167_v46 }
 0xb1a   : > { %v10169_v37 = vpop.xlane.xlu0 %4545 }
 0xb1b   : > { %11442 = vst [vmem:[#allocation86_spill] sm:$0xff] %v10169_v37  ;;  %4691 = vrot.lane.b32.xlu0 %v11443_v0, %s6940_s3  ;;  %v11454_v0 = vld [vmem:[#allocation67_spill] sm:$0xff] }
 0xb1c   : > { %4725 = vrot.lane.b32.xlu1 %v11444_v24, %s6940_s3  ;;  %v10175_v19 = vpop.xlane.xlu1 %4596 }
 0xb1d   : > { %11445 = vst [vmem:[#allocation62_spill] sm:$0xff] %v10175_v19 }
 0xb1e   : > { %v10177_v4 = vpop.xlane.xlu0 %4551 }
 0xb1f   : > { %11446 = vst [vmem:[#allocation104_spill] sm:$0xff] %v10177_v4  ;;  %4695 = vrot.lane.b32.xlu0 %v11447_v44, %s6940_s3 }
 0xb20   : > { %4729 = vrot.lane.b32.xlu1 %v11448_v39, %s6940_s3  ;;  %v10183_v45 = vpop.xlane.xlu1 %4602  ;;  %v11456_v39 = vld [vmem:[#allocation47_spill] sm:$0xff] }
 0xb21   : > { %11449 = vst [vmem:[#allocation63_spill] sm:$0xff] %v10183_v45 }
 0xb22   : > { %v10185_v31 = vpop.xlane.xlu0 %4557 }
 0xb23   : > { %11450 = vst [vmem:[#allocation107_spill] sm:$0xff] %v10185_v31  ;;  %4699 = vrot.lane.b32.xlu0 %v11451_v9, %s6940_s3  ;;  %v11458_v9 = vld [vmem:[#allocation70_spill] sm:$0xff] }
 0xb24   : > { %4733 = vrot.lane.b32.xlu1 %v11452_v2, %s6940_s3  ;;  %v4608_v61 = vpop.permute.xlu1 %4607 }
 0xb26   : > { %v10191_v42 = vpop.xlane.xlu0 %4563 }
 0xb27   : > { %11453 = vst [vmem:[#allocation65_spill] sm:$0xff] %v10191_v42  ;;  %4703 = vrot.lane.b32.xlu0 %v11454_v0, %s6940_s3  ;;  %v11460_v42 = vld [vmem:[#allocation81_spill] sm:$0xff] }
 0xb28   : > { %v4612_v24 = vpop.permute.xlu1 %4611 }
 0xb2a   : > { %v10195_v44 = vpop.xlane.xlu0 %4569 }
 0xb2b   : > { %11455 = vst [vmem:[#allocation109_spill] sm:$0xff] %v10195_v44  ;;  %4707 = vrot.lane.b32.xlu0 %v11456_v39, %s6940_s3  ;;  %v11462_v44 = vld [vmem:[#allocation93_spill] sm:$0xff] }
 0xb2c   : > { %v4614_v45 = vpop.permute.xlu1 %4613 }
 0xb2e   : > { %v10199_v31 = vpop.xlane.xlu0 %4575 }
 0xb2f   : > { %11457 = vst [vmem:[#allocation67_spill] sm:$0xff] %v10199_v31  ;;  %4711 = vrot.lane.b32.xlu0 %v11458_v9, %s6940_s3  ;;  %v11464_v31 = vld [vmem:[#allocation96_spill] sm:$0xff] }
 0xb30   : > { %v4618_v4 = vpop.permute.xlu1 %4617 }
 0xb32   : > { %v10203_v2 = vpop.xlane.xlu0 %4581 }
 0xb33   : > { %11459 = vst [vmem:[#allocation47_spill] sm:$0xff] %v10203_v2  ;;  %4715 = vrot.lane.b32.xlu0 %v11460_v42, %s6940_s3  ;;  %v11466_v2 = vld [vmem:[#allocation97_spill] sm:$0xff] }
 0xb34   : > { %v4622_v19 = vpop.permute.xlu1 %4621 }
 0xb36   : > { %v10207_v0 = vpop.xlane.xlu0 %4587 }
 0xb37   : > { %11461 = vst [vmem:[#allocation70_spill] sm:$0xff] %v10207_v0  ;;  %4719 = vrot.lane.b32.xlu0 %v11462_v44, %s6940_s3  ;;  %v11468_v44 = vld [vmem:[#allocation98_spill] sm:$0xff] }
 0xb38   : > { %v10211_v37 = vpop.permute.xlu1 %4625 }
 0xb3a   : > { %v10213_v39 = vpop.xlane.xlu0 %4593 }
 0xb3b   : > { %11463 = vst [vmem:[#allocation81_spill] sm:$0xff] %v10213_v39  ;;  %4723 = vrot.lane.b32.xlu0 %v11464_v31, %s6940_s3 }
 0xb3c   : > { %v10217_v9 = vpop.permute.xlu1 %4629 }
 0xb3e   : > { %v10219_v46 = vpop.xlane.xlu0 %4599 }
 0xb3f   : > { %11465 = vst [vmem:[#allocation93_spill] sm:$0xff] %v10219_v46  ;;  %4727 = vrot.lane.b32.xlu0 %v11466_v2, %s6940_s3 }
 0xb40   : > { %v10223_v42 = vpop.permute.xlu1 %4633 }
 0xb42   : > { %v10225_v0 = vpop.xlane.xlu0 %4605 }
 0xb43   : > { %11467 = vst [vmem:[#allocation96_spill] sm:$0xff] %v10225_v0  ;;  %4731 = vrot.lane.b32.xlu0 %v11468_v44, %s6940_s3 }
 0xb44   : > { %v10229_v55 = vpop.permute.xlu1 %4637 }
 0xb46   : > { %v4610_v39 = vpop.permute.xlu0 %4609 }
 0xb47   : > { %v4802_v54 = vsel %vm2030_vm0, %v4610_v39, 0.0 }
 0xb48   : > { %4803 = vadd.xlane.f32.xlu1 %v4802_v54  ;;  %v10232_v31 = vpop.permute.xlu1 %4641 }
 0xb4a   : > { %v4616_v6 = vpop.permute.xlu0 %4615 }
 0xb4b   : > { %v4811_v46 = vsel %vm2030_vm0, %v4616_v6, 0.0 }
 0xb4c   : > { %4812 = vadd.xlane.f32.xlu1 %v4811_v46  ;;  %v10235_v2 = vpop.permute.xlu1 %4645 }
 0xb4e   : > { %v4620_v56 = vpop.permute.xlu0 %4619 }
 0xb4f   : > { %v4817_v0 = vsel %vm2030_vm0, %v4620_v56, 0.0 }
 0xb50   : > { %4818 = vadd.xlane.f32.xlu1 %v4817_v0  ;;  %v10238_v44 = vpop.permute.xlu1 %4649  ;;  %v4799_v0 = vsel %vm2030_vm0, %v4608_v61, 0.0 }
 0xb52   : > { %v4624_v60 = vpop.permute.xlu0 %4623 }
 0xb53   : > { %v4823_v34 = vsel %vm2030_vm0, %v4624_v60, 0.0 }
 0xb54   : > { %4824 = vadd.xlane.f32.xlu1 %v4823_v34  ;;  %v10242_v27 = vpop.permute.xlu1 %4653 }
 0xb56   : > { %v4628_v39 = vpop.permute.xlu0 %4627 }
 0xb57   : > { %v4829_v54 = vsel %vm2030_vm0, %v4628_v39, 0.0 }
 0xb58   : > { %4830 = vadd.xlane.f32.xlu1 %v4829_v54  ;;  %v10245_v23 = vpop.permute.xlu1 %4657  ;;  %v4805_v54 = vsel %vm2030_vm0, %v4612_v24, 0.0 }
 0xb5a   : > { %v4632_v6 = vpop.permute.xlu0 %4631 }
 0xb5b   : > { %v4835_v46 = vsel %vm2030_vm0, %v4632_v6, 0.0 }
 0xb5c   : > { %4836 = vadd.xlane.f32.xlu1 %v4835_v46  ;;  %v10250_v39 = vpop.permute.xlu1 %4661  ;;  %v4808_v46 = vsel %vm2030_vm0, %v4614_v45, 0.0 }
 0xb5e   : > { %v4636_v13 = vpop.permute.xlu0 %4635 }
 0xb5f   : > { %v4841_v56 = vsel %vm2030_vm0, %v4636_v13, 0.0 }
 0xb60   : > { %4842 = vadd.xlane.f32.xlu1 %v4841_v56  ;;  %v10255_v56 = vpop.permute.xlu1 %4665 }
 0xb62   : > { %v4640_v60 = vpop.permute.xlu0 %4639  ;;  %4800 = vadd.xlane.f32.xlu0 %v4799_v0  ;;  %v4814_v0 = vsel %vm2030_vm0, %v4618_v4, 0.0 }
 0xb63   : > { %v4847_v34 = vsel %vm2030_vm0, %v4640_v60, 0.0 }
 0xb64   : > { %4848 = vadd.xlane.f32.xlu1 %v4847_v34  ;;  %v10260_v34 = vpop.permute.xlu1 %4669 }
 0xb66   : > { %v4644_v17 = vpop.permute.xlu0 %4643  ;;  %4806 = vadd.xlane.f32.xlu0 %v4805_v54 }
 0xb67   : > { %v4853_v6 = vsel %vm2030_vm0, %v4644_v17, 0.0  ;;  %v4820_v17 = vsel %vm2030_vm0, %v4622_v19, 0.0 }
 0xb68   : > { %4854 = vadd.xlane.f32.xlu1 %v4853_v6  ;;  %v4826_v6 = vsel %vm2030_vm0, %v10211_v37, 0.0  ;;  %v10266_v4 = vpop.permute.xlu1 %4673  ;;  %v4838_v37 = vsel %vm2030_vm0, %v10223_v42, 0.0 }
 0xb6a   : > { %v4648_v13 = vpop.permute.xlu0 %4647  ;;  %4809 = vadd.xlane.f32.xlu0 %v4808_v46 }
 0xb6b   : > { %v4859_v61 = vsel %vm2030_vm0, %v4648_v13, 0.0 }
 0xb6c   : > { %4860 = vadd.xlane.f32.xlu1 %v4859_v61  ;;  %v4832_v61 = vsel %vm2030_vm0, %v10217_v9, 0.0 }
 0xb6e   : > { %v4652_v60 = vpop.permute.xlu0 %4651  ;;  %4815 = vadd.xlane.f32.xlu0 %v4814_v0 }
 0xb6f   : > { %v4865_v24 = vsel %vm2030_vm0, %v4652_v60, 0.0  ;;  %v10272_v60 = vpop.permute.xlu1 %4677 }
 0xb70   : > { %4866 = vadd.xlane.f32.xlu1 %v4865_v24 }
 0xb72   : > { %v4656_v54 = vpop.permute.xlu0 %4655  ;;  %4821 = vadd.xlane.f32.xlu0 %v4820_v17 }
 0xb73   : > { %v4871_v45 = vsel %vm2030_vm0, %v4656_v54, 0.0  ;;  %v4844_v54 = vsel %vm2030_vm0, %v10229_v55, 0.0  ;;  %v4682_v9 = vpop.permute.xlu1 %4681 }
 0xb74   : > { %4872 = vadd.xlane.f32.xlu1 %v4871_v45 }
 0xb76   : > { %v4660_v46 = vpop.permute.xlu0 %4659  ;;  %4827 = vadd.xlane.f32.xlu0 %v4826_v6 }
 0xb77   : > { %v4877_v13 = vsel %vm2030_vm0, %v4660_v46, 0.0  ;;  %v4850_v46 = vsel %vm2030_vm0, %v10232_v31, 0.0 }
 0xb78   : > { %4878 = vadd.xlane.f32.xlu1 %v4877_v13 }
 0xb7a   : > { %v4664_v0 = vpop.permute.xlu0 %4663  ;;  %4833 = vadd.xlane.f32.xlu0 %v4832_v61  ;;  %v4686_v61 = vpop.permute.xlu1 %4685 }
 0xb7b   : > { %v4883_v19 = vsel %vm2030_vm0, %v4664_v0, 0.0  ;;  %v4856_v0 = vsel %vm2030_vm0, %v10235_v2, 0.0 }
 0xb7c   : > { %4884 = vadd.xlane.f32.xlu1 %v4883_v19 }
 0xb7e   : > { %v4668_v24 = vpop.permute.xlu0 %4667  ;;  %4839 = vadd.xlane.f32.xlu0 %v4838_v37  ;;  %v4862_v37 = vsel %vm2030_vm0, %v10238_v44, 0.0  ;;  %v4690_v31 = vpop.permute.xlu1 %4689 }
 0xb7f   : > { %v4889_v17 = vsel %vm2030_vm0, %v4668_v24, 0.0 }
 0xb80   : > { %4890 = vadd.xlane.f32.xlu1 %v4889_v17 }
 0xb82   : > { %v4672_v45 = vpop.permute.xlu0 %4671  ;;  %4845 = vadd.xlane.f32.xlu0 %v4844_v54  ;;  %v4868_v54 = vsel %vm2030_vm0, %v10242_v27, 0.0 }
 0xb83   : > { %v4895_v6 = vsel %vm2030_vm0, %v4672_v45, 0.0 }
 0xb84   : > { %4896 = vadd.xlane.f32.xlu1 %v4895_v6  ;;  %v4694_v6 = vpop.permute.xlu1 %4693 }
 0xb86   : > { %v4676_v13 = vpop.permute.xlu0 %4675  ;;  %4851 = vadd.xlane.f32.xlu0 %v4850_v46  ;;  %v4874_v46 = vsel %vm2030_vm0, %v10245_v23, 0.0 }
 0xb87   : > { %v4901_v42 = vsel %vm2030_vm0, %v4676_v13, 0.0 }
 0xb88   : > { %4902 = vadd.xlane.f32.xlu1 %v4901_v42  ;;  %v4880_v42 = vsel %vm2030_vm0, %v10250_v39, 0.0  ;;  %v4698_v27 = vpop.permute.xlu1 %4697 }
 0xb8a   : > { %v4680_v19 = vpop.permute.xlu0 %4679  ;;  %4857 = vadd.xlane.f32.xlu0 %v4856_v0 }
 0xb8b   : > { %v4907_v55 = vsel %vm2030_vm0, %v4680_v19, 0.0 }
 0xb8c   : > { %4908 = vadd.xlane.f32.xlu1 %v4907_v55  ;;  %v4886_v55 = vsel %vm2030_vm0, %v10255_v56, 0.0 }
 0xb8e   : > { %v4684_v24 = vpop.permute.xlu0 %4683  ;;  %4863 = vadd.xlane.f32.xlu0 %v4862_v37 }
 0xb8f   : > { %v4913_v17 = vsel %vm2030_vm0, %v4684_v24, 0.0  ;;  %v4892_v24 = vsel %vm2030_vm0, %v10260_v34, 0.0 }
 0xb90   : > { %4914 = vadd.xlane.f32.xlu1 %v4913_v17  ;;  %v4702_v17 = vpop.permute.xlu1 %4701 }
 0xb92   : > { %v4688_v45 = vpop.permute.xlu0 %4687  ;;  %4869 = vadd.xlane.f32.xlu0 %v4868_v54 }
 0xb93   : > { %v4919_v2 = vsel %vm2030_vm0, %v4688_v45, 0.0  ;;  %v4898_v45 = vsel %vm2030_vm0, %v10266_v4, 0.0 }
 0xb94   : > { %4920 = vadd.xlane.f32.xlu1 %v4919_v2  ;;  %v4706_v56 = vpop.permute.xlu1 %4705 }
 0xb96   : > { %v4692_v13 = vpop.permute.xlu0 %4691  ;;  %4875 = vadd.xlane.f32.xlu0 %v4874_v46 }
 0xb97   : > { %v4925_v44 = vsel %vm2030_vm0, %v4692_v13, 0.0  ;;  %v4904_v13 = vsel %vm2030_vm0, %v10272_v60, 0.0 }
 0xb98   : > { %4926 = vadd.xlane.f32.xlu1 %v4925_v44 }
 0xb9a   : > { %v4696_v0 = vpop.permute.xlu0 %4695  ;;  %4881 = vadd.xlane.f32.xlu0 %v4880_v42  ;;  %v4910_v42 = vsel %vm2030_vm0, %v4682_v9, 0.0 }
 0xb9b   : > { %v4931_v19 = vsel %vm2030_vm0, %v4696_v0, 0.0  ;;  %v4710_v0 = vpop.permute.xlu1 %4709 }
 0xb9c   : > { %4932 = vadd.xlane.f32.xlu1 %v4931_v19 }
 0xb9e   : > { %v4700_v37 = vpop.permute.xlu0 %4699  ;;  %4887 = vadd.xlane.f32.xlu0 %v4886_v55  ;;  %v4916_v55 = vsel %vm2030_vm0, %v4686_v61, 0.0 }
 0xb9f   : > { %v4937_v23 = vsel %vm2030_vm0, %v4700_v37, 0.0 }
 0xba0   : > { %4938 = vadd.xlane.f32.xlu1 %v4937_v23  ;;  %v4714_v23 = vpop.permute.xlu1 %4713 }
 0xba2   : > { %v4704_v54 = vpop.permute.xlu0 %4703  ;;  %4893 = vadd.xlane.f32.xlu0 %v4892_v24  ;;  %v4922_v24 = vsel %vm2030_vm0, %v4690_v31, 0.0 }
 0xba3   : > { %v4943_v39 = vsel %vm2030_vm0, %v4704_v54, 0.0 }
 0xba4   : > { %4944 = vadd.xlane.f32.xlu1 %v4943_v39  ;;  %v4928_v39 = vsel %vm2030_vm0, %v4694_v6, 0.0 }
 0xba6   : > { %v4708_v2 = vpop.permute.xlu0 %4707  ;;  %4899 = vadd.xlane.f32.xlu0 %v4898_v45  ;;  %v4718_v45 = vpop.permute.xlu1 %4717 }
 0xba7   : > { %v4949_v46 = vsel %vm2030_vm0, %v4708_v2, 0.0 }
 0xba8   : > { %4950 = vadd.xlane.f32.xlu1 %v4949_v46  ;;  %v4934_v46 = vsel %vm2030_vm0, %v4698_v27, 0.0  ;;  %v4958_v27 = vsel %vm2030_vm0, %v4714_v23, 0.0 }
 0xbaa   : > { %v4712_v44 = vpop.permute.xlu0 %4711  ;;  %4905 = vadd.xlane.f32.xlu0 %v4904_v13 }
 0xbab   : > { %v4955_v34 = vsel %vm2030_vm0, %v4712_v44, 0.0  ;;  %v4722_v44 = vpop.permute.xlu1 %4721 }
 0xbac   : > { %4956 = vadd.xlane.f32.xlu1 %v4955_v34  ;;  %v4940_v34 = vsel %vm2030_vm0, %v4702_v17, 0.0  ;;  %v11469_v17 = vld [vmem:[#allocation139_spill] sm:$0xff] }
 0xbae   : > { %v4716_v19 = vpop.permute.xlu0 %4715  ;;  %4911 = vadd.xlane.f32.xlu0 %v4910_v42  ;;  %v4946_v42 = vsel %vm2030_vm0, %v4706_v56, 0.0 }
 0xbaf   : > { %v4961_v4 = vsel %vm2030_vm0, %v4716_v19, 0.0  ;;  %v4726_v6 = vpop.permute.xlu1 %4725  ;;  %v4952_v19 = vsel %vm2030_vm0, %v4710_v0, 0.0 }
 0xbb0   : > { %4962 = vadd.xlane.f32.xlu1 %v4961_v4 }
 0xbb2   : > { %v4720_v37 = vpop.permute.xlu0 %4719  ;;  %4917 = vadd.xlane.f32.xlu0 %v4916_v55  ;;  %v4964_v55 = vsel %vm2030_vm0, %v4718_v45, 0.0 }
 0xbb3   : > { %v4967_v60 = vsel %vm2030_vm0, %v4720_v37, 0.0  ;;  %v4730_v4 = vpop.permute.xlu1 %4729 }
 0xbb4   : > { %4968 = vadd.xlane.f32.xlu1 %v4967_v60  ;;  %v11470_v60 = vld [vmem:[#allocation38_spill] sm:$0xff] }
 0xbb5   : > { %v4993_v56 = vsel %vm4991_vm1, %v11470_v60, %v11469_v17 }
 0xbb6   : > { %v4724_v54 = vpop.permute.xlu0 %4723  ;;  %4923 = vadd.xlane.f32.xlu0 %v4922_v24  ;;  %v5058_v0 = vsel %vm5056_vm4, %v4993_v56, %v9967_v51  ;;  %v4970_v24 = vsel %vm2030_vm0, %v4722_v44, 0.0  ;;  %v11474_v44 = vld [vmem:[#allocation76_spill] sm:$0xff]  ;;  %v11477_v56 = vld [vmem:[#allocation146_spill] sm:$0xff] }
 0xbb7   : > { %v4973_v9 = vsel %vm2030_vm0, %v4724_v54, 0.0  ;;  %v4734_v37 = vpop.permute.xlu1 %4733 }
 0xbb8   : > { %4974 = vadd.xlane.f32.xlu1 %v4973_v9  ;;  %v11471_v9 = vld [vmem:[#allocation141_spill] sm:$0xff]  ;;  %v4988_v60 = vsel %vm2030_vm0, %v4734_v37, 0.0  ;;  %v11480_v37 = vld [vmem:[#allocation83_spill] sm:$0xff] }
 0xbba   : > { %v4728_v2 = vpop.permute.xlu0 %4727  ;;  %4929 = vadd.xlane.f32.xlu0 %v4928_v39  ;;  %v11472_v39 = vld [vmem:[#allocation73_spill] sm:$0xff] }
 0xbbb   : > { %v4979_v61 = vsel %vm2030_vm0, %v4728_v2, 0.0  ;;  %v4996_v45 = vsel %vm4991_vm1, %v11472_v39, %v11471_v9  ;;  %v4976_v2 = vsel %vm2030_vm0, %v4726_v6, 0.0 }
 0xbbc   : > { %4980 = vadd.xlane.f32.xlu1 %v4979_v61  ;;  %v5061_v51 = vsel %vm5056_vm4, %v4996_v45, %v9972_v29 }
 0xbbe   : > { %v4732_v13 = vpop.permute.xlu0 %4731  ;;  %4935 = vadd.xlane.f32.xlu0 %v4934_v46 }
 0xbbf   : > { %v4985_v31 = vsel %vm2030_vm0, %v4732_v13, 0.0  ;;  %v11473_v13 = vld [vmem:[#allocation143_spill] sm:$0xff] }
 0xbc0   : > { %4986 = vadd.xlane.f32.xlu1 %v4985_v31  ;;  %v4998_v31 = vsel %vm4991_vm1, %v11474_v44, %v11473_v13 }
 0xbc2   : > { %4941 = vadd.xlane.f32.xlu0 %v4940_v34  ;;  %v5063_v34 = vsel %vm5056_vm4, %v4998_v31, %v9977_v30  ;;  %v11483_v31 = vld [vmem:[#allocation58_spill] sm:$0xff] }
 0xbc6   : > { %4947 = vadd.xlane.f32.xlu0 %v4946_v42  ;;  %v4982_v42 = vsel %vm2030_vm0, %v4730_v4, 0.0 }
 0xbca   : > { %4953 = vadd.xlane.f32.xlu0 %v4952_v19  ;;  %v11475_v19 = vld [vmem:[#allocation145_spill] sm:$0xff] }
 0xbce   : > { %4959 = vadd.xlane.f32.xlu0 %v4958_v27  ;;  %v11476_v27 = vld [vmem:[#allocation78_spill] sm:$0xff] }
 0xbd2   : > { %4965 = vadd.xlane.f32.xlu0 %v4964_v55  ;;  %v5000_v55 = vsel %vm4991_vm1, %v11476_v27, %v11475_v19  ;;  %v11485_v19 = vld [vmem:[#allocation149_spill] sm:$0xff]  ;;  %v11486_v27 = vld [vmem:[#allocation88_spill] sm:$0xff] }
 0xbd3   : > { %v5065_v17 = vsel %vm5056_vm4, %v5000_v55, %v9982_v47  ;;  %v11479_v47 = vld [vmem:[#allocation147_spill] sm:$0xff]  ;;  %v5008_v55 = vsel %vm4991_vm1, %v11486_v27, %v11485_v19 }
 0xbd4   : > { %v5004_v39 = vsel %vm4991_vm1, %v11480_v37, %v11479_v47 }
 0xbd5   : > { %v4804_v54 = vpop.xlane.xlu1 %4803  ;;  %v5069_v45 = vsel %vm5056_vm4, %v5004_v39, %v9991_v7 }
 0xbd6   : > { %v5123_v23 = vsel %vm5121_vm5, %v5058_v0, %v4804_v54  ;;  %4971 = vadd.xlane.f32.xlu0 %v4970_v24  ;;  %v11478_v0 = vld [vmem:[#allocation80_spill] sm:$0xff] }
 0xbd7   : > { %5188 = vst.msk [vmem:[%s10333_s14 + $0x8] sm:$0xff] %vm5186_vm6, %v5123_v23  ;;  %v5002_v24 = vsel %vm4991_vm1, %v11478_v0, %v11477_v56 }
 0xbd8   : > { %v5067_v54 = vsel %vm5056_vm4, %v5002_v24, %v9987_v53  ;;  %v11481_v53 = vld [vmem:[#allocation148_spill] sm:$0xff]  ;;  %v11490_v24 = vld [vmem:[#allocation150_spill] sm:$0xff] }
 0xbd9   : > { %v4813_v61 = vpop.xlane.xlu1 %4812 }
 0xbda   : > { %v5126_v46 = vsel %vm5121_vm5, %v5061_v51, %v4813_v61  ;;  %4977 = vadd.xlane.f32.xlu0 %v4976_v2  ;;  %v11482_v61 = vld [vmem:[#allocation85_spill] sm:$0xff] }
 0xbdb   : > { %5191 = vst.msk [vmem:[%s10333_s14 + $0x20] sm:$0xff] %vm5186_vm6, %v5126_v46  ;;  %v5006_v46 = vsel %vm4991_vm1, %v11482_v61, %v11481_v53 }
 0xbdc   : > { %v5071_v13 = vsel %vm5056_vm4, %v5006_v46, %v9995_v16 }
 0xbdd   : > { %v4819_v29 = vpop.xlane.xlu1 %4818 }
 0xbde   : > { %v5128_v6 = vsel %vm5121_vm5, %v5063_v34, %v4819_v29  ;;  %4983 = vadd.xlane.f32.xlu0 %v4982_v42  ;;  %v11484_v34 = vld [vmem:[#allocation68_spill] sm:$0xff] }
 0xbdf   : > { %5193 = vst.msk [vmem:[%s10333_s14 + $0x30] sm:$0xff] %vm5186_vm6, %v5128_v6  ;;  %v4992_v42 = vsel %vm4991_vm1, %v11484_v34, %v11483_v31 }
 0xbe0   : > { %v5057_v29 = vsel %vm5056_vm4, %v4992_v42, %v9997_v3  ;;  %v11488_v3 = vld [vmem:[#allocation152_spill] sm:$0xff] }
 0xbe1   : > { %v4825_v30 = vpop.xlane.xlu1 %4824 }
 0xbe2   : > { %v5130_v4 = vsel %vm5121_vm5, %v5065_v17, %v4825_v30  ;;  %4989 = vadd.xlane.f32.xlu0 %v4988_v60  ;;  %v5073_v17 = vsel %vm5056_vm4, %v5008_v55, %v10001_v10  ;;  %v11489_v30 = vld [vmem:[#allocation71_spill] sm:$0xff] }
 0xbe3   : > { %5195 = vst.msk [vmem:[%s10333_s14 + $0x40] sm:$0xff] %vm5186_vm6, %v5130_v4  ;;  %v4994_v4 = vsel %vm4991_vm1, %v11489_v30, %v11488_v3 }
 0xbe4   : > { %v5059_v10 = vsel %vm5056_vm4, %v4994_v4, %v10003_v59 }
 0xbe5   : > { %v4831_v23 = vpop.xlane.xlu1 %4830 }
 0xbe6   : > { %v5132_v9 = vsel %vm5121_vm5, %v5067_v54, %v4831_v23  ;;  %v11491_v54 = vld [vmem:[#allocation90_spill] sm:$0xff] }
 0xbe7   : > { %5197 = vst.msk [vmem:[%s10333_s14 + $0x50] sm:$0xff] %vm5186_vm6, %v5132_v9  ;;  %v5010_v23 = vsel %vm4991_vm1, %v11491_v54, %v11490_v24 }
 0xbe9   : > { %v4837_v51 = vpop.xlane.xlu1 %4836 }
 0xbea   : > { %v5134_v2 = vsel %vm5121_vm5, %v5069_v45, %v4837_v51 }
 0xbeb   : > { %5199 = vst.msk [vmem:[%s10333_s14 + $0x60] sm:$0xff] %vm5186_vm6, %v5134_v2 }
 0xbed   : > { %v4843_v44 = vpop.xlane.xlu1 %4842 }
 0xbee   : > { %v5136_v7 = vsel %vm5121_vm5, %v5071_v13, %v4843_v44 }
 0xbef   : > { %5201 = vst.msk [vmem:[%s10333_s14 + $0x70] sm:$0xff] %vm5186_vm6, %v5136_v7  ;;  %v4801_v6 = vpop.xlane.xlu0 %4800 }
 0xbf0   : > { %v5122_v16 = vsel %vm5121_vm5, %v5057_v29, %v4801_v6 }
 0xbf1   : > { %5187 = vst.msk [vmem:[%s10333_s14] sm:$0xff] %vm5186_vm6, %v5122_v16  ;;  %v4849_v60 = vpop.xlane.xlu1 %4848 }
 0xbf2   : > { %v5138_v56 = vsel %vm5121_vm5, %v5073_v17, %v4849_v60 }
 0xbf3   : > { %5203 = vst.msk [vmem:[%s10333_s14 + $0x80] sm:$0xff] %vm5186_vm6, %v5138_v56  ;;  %v4807_v0 = vpop.xlane.xlu0 %4806 }
 0xbf4   : > { %v5124_v9 = vsel %vm5121_vm5, %v5059_v10, %v4807_v0 }
 0xbf5   : > { %6827 = shalt.err (!%p6824_p12)
}
 0xbf6   : > { %s6828_s16 = scalar_lea.hbm %s10408_s18, 8192  ;;  %s6832_s21 = scalar_lea.hbm %s11487_s15, 16384 }
 0xbf7   : > { %p6829_p8 = scmp.ne.s32.totalorder %s10408_s18, %s6828_s16  ;;  %p6833_p1 = scmp.lt.u32.totalorder %s10408_s18, %s11487_s15 }
 0xbf8   : > { %p6834_p6 = scmp.lt.u32.totalorder %s6832_s21, %s6828_s16  ;;  %p6836_p5 = scmp.lt.u32.totalorder %s6828_s16, %s10408_s18 }
 0xbf9   : > { %p6830_p10 = pnand %p6829_p8, %p11492_p2 }
 0xbfa   : > { %p6835_p3 = por %p6834_p6, %p6833_p1 }
 0xbfb   : > { %p6831_p11 = pneg %p6830_p10 }
 0xbfc   : > { %p6837_p4 = por %p6836_p5, %p6835_p3 }
 0xbfe   : > { %p6838_p0 = pnand %p6837_p4, %p6831_p11 }
 0xc00   : > { %6841 = shalt.err (!%p6838_p0)
}
 0xc01   : > { %s6942_s30 = smov 128   ;;  %s6943_s27 = smov 8   ;;  %v5075_v59 = vsel %vm5056_vm4, %v5010_v23, %v10007_v57  ;;  %5189 = vst.msk [vmem:[%s10333_s14 + $0x10] sm:$0xff] %vm5186_vm6, %v5124_v9  ;;  %v4855_v47 = vpop.xlane.xlu1 %4854  ;;  %v11493_v37 = vld [vmem:[#allocation153_spill] sm:$0xff]  ;;  %v4810_v53 = vpop.xlane.xlu0 %4809  ;;  %v11495_v61 = vld [vmem:[#allocation39_spill] sm:$0xff]  ;;  %v11496_v46 = vld [vmem:[#allocation92_spill] sm:$0xff] }
 0xc02   : > { %6508 = dma.vmem_to_hbm [thread:$0]  (%p11492_p2), %s10414_s17, 8192, %s10408_s18, %s5252_s1, %s6942_s30, %s6942_s30, %s6943_s27   ;;  %v11494_v39 = vld [vmem:[#allocation69_spill] sm:$0xff]  ;;  %v5140_v51 = vsel %vm5121_vm5, %v5075_v59, %v4855_v47  ;;  %v5012_v57 = vsel %vm4991_vm1, %v11496_v46, %v11495_v61  ;;  %v11497_v34 = vld [vmem:[#allocation154_spill] sm:$0xff]  ;;  %v11498_v42 = vld [vmem:[#allocation72_spill] sm:$0xff] }
 0xc03   : > { %v4995_v45 = vsel %vm4991_vm1, %v11494_v39, %v11493_v37  ;;  %5205 = vst.msk [vmem:[%s10333_s14 + $0x90] sm:$0xff] %vm5186_vm6, %v5140_v51  ;;  %v5077_v44 = vsel %vm5056_vm4, %v5012_v57, %v10015_v26  ;;  %v11499_v19 = vld [vmem:[#allocation46_spill] sm:$0xff]  ;;  %v11500_v27 = vld [vmem:[#allocation95_spill] sm:$0xff]  ;;  %v11504_v0 = vld [vmem:[#allocation100_spill] sm:$0xff]  ;;  %s5286_s8 = sshll.u32 %s10333_s14, 4  ;;  %s11623_s10 = sld [smem:[#allocation186_spill]]  ;;  %s10887_s8 = int_to_ptr.vmem [resolvable:$true] %s5286_s8 }
 0xc04   : > { %v5060_v2 = vsel %vm5056_vm4, %v4995_v45, %v10009_v8  ;;  %v4997_v8 = vsel %vm4991_vm1, %v11498_v42, %v11497_v34  ;;  %v5014_v26 = vsel %vm4991_vm1, %v11500_v27, %v11499_v19  ;;  %v11501_v60 = vld [vmem:[#allocation155_spill] sm:$0xff]  ;;  %v11503_v10 = vld [vmem:[#allocation42_spill] sm:$0xff]  ;;  %v11506_v59 = vld [vmem:[#allocation77_spill] sm:$0xff]  ;;  %s5257_s18 = scalar_lea.sflag [#allocation16], %s7291_s20  ;;  %s6842_s1 = scalar_lea.vmem %s10887_s8, 8192 }
 0xc05   : > { %v5125_v13 = vsel %vm5121_vm5, %v5060_v2, %v4810_v53  ;;  %v4861_v31 = vpop.xlane.xlu1 %4860  ;;  %v5062_v29 = vsel %vm5056_vm4, %v4997_v8, %v10017_v49  ;;  %v4816_v6 = vpop.xlane.xlu0 %4815  ;;  %v5079_v16 = vsel %vm5056_vm4, %v5014_v26, %v10023_v28  ;;  %v11502_v3 = vld [vmem:[#allocation75_spill] sm:$0xff]  ;;  %v5016_v28 = vsel %vm4991_vm1, %v11504_v0, %v11503_v10  ;;  %v11508_v51 = vld [vmem:[#allocation102_spill] sm:$0xff]  ;;  %v11509_v46 = vld [vmem:[#allocation156_spill] sm:$0xff]  ;;  %p6843_p13 = scmp.ne.s32.totalorder %s10887_s8, %s6842_s1  ;;  %s6944_s9 = smov [#allocation15]  }
 0xc06   : > { %5190 = vst.msk [vmem:[%s10333_s14 + $0x18] sm:$0xff] %vm5186_vm6, %v5125_v13  ;;  %v5142_v7 = vsel %vm5121_vm5, %v5077_v44, %v4861_v31  ;;  %v5127_v55 = vsel %vm5121_vm5, %v5062_v29, %v4816_v6  ;;  %v4999_v49 = vsel %vm4991_vm1, %v11502_v3, %v11501_v60  ;;  %v5081_v54 = vsel %vm5056_vm4, %v5016_v28, %v10031_v41  ;;  %v11505_v9 = vld [vmem:[#allocation59_spill] sm:$0xff]  ;;  %v11511_v34 = vld [vmem:[#allocation54_spill] sm:$0xff]  ;;  %s6846_s7 = sshll.u32 %s6944_s9, 4  ;;  %s6847_s7 = int_to_ptr.vmem [resolvable:$false] %s6846_s7 }
 0xc07   : > { %5207 = vst.msk [vmem:[%s10333_s14 + $0xa0] sm:$0xff] %vm5186_vm6, %v5142_v7  ;;  %5192 = vst.msk [vmem:[%s10333_s14 + $0x28] sm:$0xff] %vm5186_vm6, %v5127_v55  ;;  %v5064_v4 = vsel %vm5056_vm4, %v4999_v49, %v10025_v35  ;;  %v5001_v35 = vsel %vm4991_vm1, %v11506_v59, %v11505_v9  ;;  %v11507_v45 = vld [vmem:[#allocation51_spill] sm:$0xff]  ;;  %v11513_v6 = vld [vmem:[#allocation158_spill] sm:$0xff]  ;;  %p6844_p7 = pnand %p6843_p13, %p11492_p2  ;;  %p6849_p12 = scmp.lt.s32.totalorder %s10887_s8, %s6847_s7 }
 0xc08   : > { %v5066_v37 = vsel %vm5056_vm4, %v5001_v35, %v10033_v12  ;;  %v5018_v41 = vsel %vm4991_vm1, %v11508_v51, %v11507_v45  ;;  %v11510_v57 = vld [vmem:[#allocation79_spill] sm:$0xff]  ;;  %v11514_v19 = vld [vmem:[#allocation82_spill] sm:$0xff]  ;;  %v11521_v59 = vld [vmem:[#allocation161_spill] sm:$0xff] }
 0xc09   : > { %v4867_v17 = vpop.xlane.xlu1 %4866  ;;  %v4822_v56 = vpop.xlane.xlu0 %4821  ;;  %v5083_v53 = vsel %vm5056_vm4, %v5018_v41, %v10039_v5  ;;  %v5003_v12 = vsel %vm4991_vm1, %v11510_v57, %v11509_v46  ;;  %v11512_v42 = vld [vmem:[#allocation103_spill] sm:$0xff]  ;;  %v11524_v51 = vld [vmem:[#allocation113_spill] sm:$0xff]  ;;  %s10885_s12 = scalar_lea.hbm %s11623_s10, %s5831_s22  ;;  %p6845_p9 = pneg %p6844_p7 }
 0xc0a   : > { %v5144_v30 = vsel %vm5121_vm5, %v5079_v16, %v4867_v17  ;;  %v5129_v24 = vsel %vm5121_vm5, %v5064_v4, %v4822_v56  ;;  %v5068_v44 = vsel %vm5056_vm4, %v5003_v12, %v10041_v21  ;;  %v5020_v5 = vsel %vm4991_vm1, %v11512_v42, %v11511_v34  ;;  %v11515_v16 = vld [vmem:[#allocation151_spill] sm:$0xff]  ;;  %v11516_v17 = vld [vmem:[#allocation106_spill] sm:$0xff]  ;;  %v11518_v4 = vld [vmem:[#allocation84_spill] sm:$0xff]  ;;  %s6848_s22 = scalar_lea.vmem %s6847_s7, 16384 }
 0xc0b   : > { %5209 = vst.msk [vmem:[%s10333_s14 + $0xb0] sm:$0xff] %vm5186_vm6, %v5144_v30  ;;  %5194 = vst.msk [vmem:[%s10333_s14 + $0x38] sm:$0xff] %vm5186_vm6, %v5129_v24  ;;  %v5085_v7 = vsel %vm5056_vm4, %v5020_v5, %v10047_v1  ;;  %v5005_v21 = vsel %vm4991_vm1, %v11514_v19, %v11513_v6  ;;  %v5022_v1 = vsel %vm4991_vm1, %v11516_v17, %v11515_v16  ;;  %v11517_v30 = vld [vmem:[#allocation159_spill] sm:$0xff]  ;;  %v11520_v24 = vld [vmem:[#allocation110_spill] sm:$0xff]  ;;  %p6850_p8 = scmp.lt.s32.totalorder %s6848_s22, %s6842_s1 }
 0xc0c   : > { %v5070_v26 = vsel %vm5056_vm4, %v5005_v21, %v10049_v11  ;;  %v5087_v3 = vsel %vm5056_vm4, %v5022_v1, %v10055_v50  ;;  %v5007_v11 = vsel %vm4991_vm1, %v11518_v4, %v11517_v30  ;;  %v11519_v28 = vld [vmem:[#allocation35_spill] sm:$0xff]  ;;  %v11526_v46 = vld [vmem:[#allocation89_spill] sm:$0xff]  ;;  %v11534_v1 = vld [vmem:[#allocation94_spill] sm:$0xff] }
 0xc0d   : > { %v4873_v23 = vpop.xlane.xlu1 %4872  ;;  %v4828_v39 = vpop.xlane.xlu0 %4827  ;;  %v5072_v10 = vsel %vm5056_vm4, %v5007_v11, %v10057_v18  ;;  %v5024_v50 = vsel %vm4991_vm1, %v11520_v24, %v11519_v28  ;;  %v11522_v35 = vld [vmem:[#allocation87_spill] sm:$0xff]  ;;  %v11531_v21 = vld [vmem:[#allocation157_spill] sm:$0xff]  ;;  %v11535_v30 = vld [vmem:[#allocation160_spill] sm:$0xff]  ;;  %p6851_p10 = por %p6850_p8, %p6849_p12 }
 0xc0e   : > { %v5146_v47 = vsel %vm5121_vm5, %v5081_v54, %v4873_v23  ;;  %v5131_v2 = vsel %vm5121_vm5, %v5066_v37, %v4828_v39  ;;  %v5089_v23 = vsel %vm5056_vm4, %v5024_v50, %v10063_v48  ;;  %v5009_v18 = vsel %vm4991_vm1, %v11522_v35, %v11521_v59  ;;  %v11523_v45 = vld [vmem:[#allocation55_spill] sm:$0xff] }
 0xc0f   : > { %5211 = vst.msk [vmem:[%s10333_s14 + $0xc0] sm:$0xff] %vm5186_vm6, %v5146_v47  ;;  %5196 = vst.msk [vmem:[%s10333_s14 + $0x48] sm:$0xff] %vm5186_vm6, %v5131_v2  ;;  %v5074_v37 = vsel %vm5056_vm4, %v5009_v18, %v10065_v58  ;;  %v5026_v48 = vsel %vm4991_vm1, %v11524_v51, %v11523_v45  ;;  %v11533_v17 = vld [vmem:[#allocation31_spill] sm:$0xff]  ;;  %p6852_p11 = pnand %p6851_p10, %p6845_p9 }
 0xc10   : > { %v5091_v2 = vsel %vm5056_vm4, %v5026_v48, %v10071_v43  ;;  %v11536_v4 = vld [vmem:[#allocation119_spill] sm:$0xff]  ;;  %v11543_v48 = vld [vmem:[#allocation45_spill] sm:$0xff] }
 0xc11   : > { %v4879_v61 = vpop.xlane.xlu1 %4878  ;;  %v4834_v31 = vpop.xlane.xlu0 %4833  ;;  %v11538_v28 = vld [vmem:[#allocation99_spill] sm:$0xff] }
 0xc12   : > { %v5148_v13 = vsel %vm5121_vm5, %v5083_v53, %v4879_v61  ;;  %v5133_v8 = vsel %vm5121_vm5, %v5068_v44, %v4834_v31  ;;  %v11525_v61 = vld [vmem:[#allocation44_spill] sm:$0xff]  ;;  %v11528_v31 = vld [vmem:[#allocation115_spill] sm:$0xff] }
 0xc13   : > { %5213 = vst.msk [vmem:[%s10333_s14 + $0xd0] sm:$0xff] %vm5186_vm6, %v5148_v13  ;;  %5198 = vst.msk [vmem:[%s10333_s14 + $0x58] sm:$0xff] %vm5186_vm6, %v5133_v8  ;;  %v5011_v58 = vsel %vm4991_vm1, %v11526_v46, %v11525_v61  ;;  %v11527_v44 = vld [vmem:[#allocation28_spill] sm:$0xff]  ;;  %v11529_v8 = vld [vmem:[#allocation30_spill] sm:$0xff] }
 0xc14   : > { %v5076_v12 = vsel %vm5056_vm4, %v5011_v58, %v10073_v33  ;;  %v5028_v43 = vsel %vm4991_vm1, %v11528_v31, %v11527_v44  ;;  %v11545_v46 = vld [vmem:[#allocation57_spill] sm:$0xff] }
 0xc15   : > { %v4885_v29 = vpop.xlane.xlu1 %4884  ;;  %v4840_v55 = vpop.xlane.xlu0 %4839  ;;  %v5093_v42 = vsel %vm5056_vm4, %v5028_v43, %v10079_v22  ;;  %v11546_v58 = vld [vmem:[#allocation105_spill] sm:$0xff] }
 0xc16   : > { %v5150_v27 = vsel %vm5121_vm5, %v5085_v7, %v4885_v29  ;;  %v5135_v60 = vsel %vm5121_vm5, %v5070_v26, %v4840_v55  ;;  %v11530_v7 = vld [vmem:[#allocation91_spill] sm:$0xff]  ;;  %v11547_v44 = vld [vmem:[#allocation49_spill] sm:$0xff] }
 0xc17   : > { %5215 = vst.msk [vmem:[%s10333_s14 + $0xe0] sm:$0xff] %vm5186_vm6, %v5150_v27  ;;  %5200 = vst.msk [vmem:[%s10333_s14 + $0x68] sm:$0xff] %vm5186_vm6, %v5135_v60  ;;  %v5013_v33 = vsel %vm4991_vm1, %v11530_v7, %v11529_v8  ;;  %v11532_v27 = vld [vmem:[#allocation117_spill] sm:$0xff]  ;;  %v11550_v8 = vld [vmem:[#allocation108_spill] sm:$0xff] }
 0xc18   : > { %v5078_v6 = vsel %vm5056_vm4, %v5013_v33, %v10081_v20  ;;  %v5030_v22 = vsel %vm4991_vm1, %v11532_v27, %v11531_v21  ;;  %v5015_v20 = vsel %vm4991_vm1, %v11534_v1, %v11533_v17  ;;  %v11548_v31 = vld [vmem:[#allocation125_spill] sm:$0xff]  ;;  %v11553_v27 = vld [vmem:[#allocation180_spill] sm:$0xff] }
 0xc19   : > { %v4891_v49 = vpop.xlane.xlu1 %4890  ;;  %v4846_v0 = vpop.xlane.xlu0 %4845  ;;  %v5095_v55 = vsel %vm5056_vm4, %v5030_v22, %v10087_v14  ;;  %v5032_v14 = vsel %vm4991_vm1, %v11536_v4, %v11535_v30  ;;  %v11556_v1 = vld [vmem:[#allocation181_spill] sm:$0xff] }
 0xc1a   : > { %v5152_v56 = vsel %vm5121_vm5, %v5087_v3, %v4891_v49  ;;  %v5137_v54 = vsel %vm5121_vm5, %v5072_v10, %v4846_v0  ;;  %v5080_v3 = vsel %vm5056_vm4, %v5015_v20, %v10089_v25  ;;  %v11537_v0 = vld [vmem:[#allocation32_spill] sm:$0xff] }
 0xc1b   : > { %5217 = vst.msk [vmem:[%s10333_s14 + $0xf0] sm:$0xff] %vm5186_vm6, %v5152_v56  ;;  %5202 = vst.msk [vmem:[%s10333_s14 + $0x78] sm:$0xff] %vm5186_vm6, %v5137_v54  ;;  %v5097_v56 = vsel %vm5056_vm4, %v5032_v14, %v10095_v38  ;;  %v5017_v25 = vsel %vm4991_vm1, %v11538_v28, %v11537_v0  ;;  %v11559_v14 = vld [vmem:[#allocation41_spill] sm:$0xff]  ;;  %v11561_v0 = vld [vmem:[#allocation112_spill] sm:$0xff] }
 0xc1c   : > { %v5082_v50 = vsel %vm5056_vm4, %v5017_v25, %v10097_v63 }
 0xc1d   : > { %v4897_v9 = vpop.xlane.xlu1 %4896  ;;  %v4852_v39 = vpop.xlane.xlu0 %4851 }
 0xc1e   : > { %v5154_v47 = vsel %vm5121_vm5, %v5089_v23, %v4897_v9  ;;  %v5139_v41 = vsel %vm5121_vm5, %v5074_v37, %v4852_v39  ;;  %v11539_v23 = vld [vmem:[#allocation29_spill] sm:$0xff] }
 0xc1f   : > { %5219 = vst.msk [vmem:[%s10333_s14 + $0x100] sm:$0xff] %vm5186_vm6, %v5154_v47  ;;  %5204 = vst.msk [vmem:[%s10333_s14 + $0x88] sm:$0xff] %vm5186_vm6, %v5139_v41  ;;  %v11540_v9 = vld [vmem:[#allocation121_spill] sm:$0xff]  ;;  %v11544_v41 = vld [vmem:[#allocation123_spill] sm:$0xff] }
 0xc20   : > { %v5034_v38 = vsel %vm4991_vm1, %v11540_v9, %v11539_v23  ;;  %v11541_v47 = vld [vmem:[#allocation53_spill] sm:$0xff]  ;;  %v11563_v23 = vld [vmem:[#allocation34_spill] sm:$0xff]  ;;  %v11564_v9 = vld [vmem:[#allocation131_spill] sm:$0xff] }
 0xc21   : > { %v4903_v53 = vpop.xlane.xlu1 %4902  ;;  %v4858_v13 = vpop.xlane.xlu0 %4857  ;;  %v5099_v35 = vsel %vm5056_vm4, %v5034_v38, %v10103_v52  ;;  %v11542_v37 = vld [vmem:[#allocation101_spill] sm:$0xff]  ;;  %v5036_v52 = vsel %vm4991_vm1, %v11544_v41, %v11543_v48  ;;  %v5044_v38 = vsel %vm4991_vm1, %v11564_v9, %v11563_v23  ;;  %v11591_v23 = vld [vmem:[#allocation122_spill] sm:$0xff] }
 0xc22   : > { %v5156_v57 = vsel %vm5121_vm5, %v5091_v2, %v4903_v53  ;;  %v5141_v34 = vsel %vm5121_vm5, %v5076_v12, %v4858_v13  ;;  %v5019_v63 = vsel %vm4991_vm1, %v11542_v37, %v11541_v47  ;;  %v5101_v53 = vsel %vm5056_vm4, %v5036_v52, %v10111_v62  ;;  %v11566_v37 = vld [vmem:[#allocation162_spill] sm:$0xff]  ;;  %v11569_v52 = vld [vmem:[#allocation64_spill] sm:$0xff] }
 0xc23   : > { %5221 = vst.msk [vmem:[%s10333_s14 + $0x110] sm:$0xff] %vm5186_vm6, %v5156_v57  ;;  %5206 = vst.msk [vmem:[%s10333_s14 + $0x98] sm:$0xff] %vm5186_vm6, %v5141_v34  ;;  %v5084_v45 = vsel %vm5056_vm4, %v5019_v63, %v10105_v15  ;;  %v5021_v15 = vsel %vm4991_vm1, %v11546_v58, %v11545_v46  ;;  %v5038_v62 = vsel %vm4991_vm1, %v11548_v31, %v11547_v44  ;;  %v11567_v63 = vld [vmem:[#allocation114_spill] sm:$0xff]  ;;  %v11571_v46 = vld [vmem:[#allocation52_spill] sm:$0xff] }
 0xc24   : > { %v5086_v12 = vsel %vm5056_vm4, %v5021_v15, %v10113_v40  ;;  %v5103_v34 = vsel %vm5056_vm4, %v5038_v62, %v10119_v32  ;;  %v11574_v31 = vld [vmem:[#allocation50_spill] sm:$0xff] }
 0xc25   : > { %v4909_v5 = vpop.xlane.xlu1 %4908  ;;  %v4864_v19 = vpop.xlane.xlu0 %4863 }
 0xc26   : > { %v5158_v29 = vsel %vm5121_vm5, %v5093_v42, %v4909_v5  ;;  %v5143_v26 = vsel %vm5121_vm5, %v5078_v6, %v4864_v19  ;;  %v11549_v5 = vld [vmem:[#allocation61_spill] sm:$0xff]  ;;  %v11552_v19 = vld [vmem:[#allocation127_spill] sm:$0xff] }
 0xc27   : > { %5223 = vst.msk [vmem:[%s10333_s14 + $0x120] sm:$0xff] %vm5186_vm6, %v5158_v29  ;;  %5208 = vst.msk [vmem:[%s10333_s14 + $0xa8] sm:$0xff] %vm5186_vm6, %v5143_v26  ;;  %v5023_v40 = vsel %vm4991_vm1, %v11550_v8, %v11549_v5  ;;  %v11551_v6 = vld [vmem:[#allocation33_spill] sm:$0xff] }
 0xc28   : > { %v5088_v33 = vsel %vm5056_vm4, %v5023_v40, %v10121_v36  ;;  %v5040_v32 = vsel %vm4991_vm1, %v11552_v19, %v11551_v6  ;;  %v11577_v40 = vld [vmem:[#allocation56_spill] sm:$0xff]  ;;  %v11579_v6 = vld [vmem:[#allocation118_spill] sm:$0xff] }
 0xc29   : > { %v4915_v16 = vpop.xlane.xlu1 %4914  ;;  %v4870_v49 = vpop.xlane.xlu0 %4869  ;;  %v5105_v22 = vsel %vm5056_vm4, %v5040_v32, %v11553_v27 }
 0xc2a   : > { %v5160_v60 = vsel %vm5121_vm5, %v5095_v55, %v4915_v16  ;;  %v5145_v11 = vsel %vm5121_vm5, %v5080_v3, %v4870_v49  ;;  %v11554_v55 = vld [vmem:[#allocation37_spill] sm:$0xff]  ;;  %v11555_v16 = vld [vmem:[#allocation111_spill] sm:$0xff]  ;;  %v11557_v3 = vld [vmem:[#allocation36_spill] sm:$0xff] }
 0xc2b   : > { %5225 = vst.msk [vmem:[%s10333_s14 + $0x130] sm:$0xff] %vm5186_vm6, %v5160_v60  ;;  %5210 = vst.msk [vmem:[%s10333_s14 + $0xb8] sm:$0xff] %vm5186_vm6, %v5145_v11  ;;  %v5025_v36 = vsel %vm4991_vm1, %v11555_v16, %v11554_v55  ;;  %v11558_v49 = vld [vmem:[#allocation129_spill] sm:$0xff]  ;;  %v11582_v55 = vld [vmem:[#allocation136_spill] sm:$0xff] }
 0xc2c   : > { %v5090_v20 = vsel %vm5056_vm4, %v5025_v36, %v11556_v1  ;;  %v5042_v30 = vsel %vm4991_vm1, %v11558_v49, %v11557_v3  ;;  %v11585_v3 = vld [vmem:[#allocation120_spill] sm:$0xff] }
 0xc2d   : > { %v4921_v10 = vpop.xlane.xlu1 %4920  ;;  %v4876_v54 = vpop.xlane.xlu0 %4875  ;;  %v5107_v11 = vsel %vm5056_vm4, %v5042_v30, %v11559_v14 }
 0xc2e   : > { %v5162_v24 = vsel %vm5121_vm5, %v5097_v56, %v4921_v10  ;;  %v5147_v59 = vsel %vm5121_vm5, %v5082_v50, %v4876_v54  ;;  %v11560_v10 = vld [vmem:[#allocation40_spill] sm:$0xff] }
 0xc2f   : > { %5227 = vst.msk [vmem:[%s10333_s14 + $0x140] sm:$0xff] %vm5186_vm6, %v5162_v24  ;;  %5212 = vst.msk [vmem:[%s10333_s14 + $0xc8] sm:$0xff] %vm5186_vm6, %v5147_v59  ;;  %v5027_v28 = vsel %vm4991_vm1, %v11561_v0, %v11560_v10  ;;  %v11562_v24 = vld [vmem:[#allocation66_spill] sm:$0xff]  ;;  %v11588_v10 = vld [vmem:[#allocation137_spill] sm:$0xff] }
 0xc30   : > { %v5092_v50 = vsel %vm5056_vm4, %v5027_v28, %v11562_v24 }
 0xc31   : > { %v4927_v18 = vpop.xlane.xlu1 %4926  ;;  %v4882_v51 = vpop.xlane.xlu0 %4881 }
 0xc32   : > { %v5164_v39 = vsel %vm5121_vm5, %v5099_v35, %v4927_v18  ;;  %v5149_v2 = vsel %vm5121_vm5, %v5084_v45, %v4882_v51  ;;  %v11565_v35 = vld [vmem:[#allocation48_spill] sm:$0xff]  ;;  %v11568_v51 = vld [vmem:[#allocation43_spill] sm:$0xff] }
 0xc33   : > { %5229 = vst.msk [vmem:[%s10333_s14 + $0x150] sm:$0xff] %vm5186_vm6, %v5164_v39  ;;  %5214 = vst.msk [vmem:[%s10333_s14 + $0xd8] sm:$0xff] %vm5186_vm6, %v5149_v2  ;;  %v5109_v18 = vsel %vm5056_vm4, %v5044_v38, %v11565_v35  ;;  %v5029_v39 = vsel %vm4991_vm1, %v11567_v63, %v11566_v37  ;;  %v11570_v2 = vld [vmem:[#allocation133_spill] sm:$0xff]  ;;  %v11594_v37 = vld [vmem:[#allocation138_spill] sm:$0xff] }
 0xc34   : > { %v5094_v48 = vsel %vm5056_vm4, %v5029_v39, %v11568_v51 }
 0xc35   : > { %v4933_v61 = vpop.xlane.xlu1 %4932  ;;  %v4888_v13 = vpop.xlane.xlu0 %4887 }
 0xc36   : > { %v5166_v57 = vsel %vm5121_vm5, %v5101_v53, %v4933_v61  ;;  %v5151_v43 = vsel %vm5121_vm5, %v5086_v12, %v4888_v13  ;;  %v5046_v53 = vsel %vm4991_vm1, %v11570_v2, %v11569_v52  ;;  %v11573_v12 = vld [vmem:[#allocation116_spill] sm:$0xff] }
 0xc37   : > { %5231 = vst.msk [vmem:[%s10333_s14 + $0x160] sm:$0xff] %vm5186_vm6, %v5166_v57  ;;  %5216 = vst.msk [vmem:[%s10333_s14 + $0xe8] sm:$0xff] %vm5186_vm6, %v5151_v43  ;;  %v5111_v58 = vsel %vm5056_vm4, %v5046_v53, %v11571_v46  ;;  %v11572_v57 = vld [vmem:[#allocation163_spill] sm:$0xff]  ;;  %v11597_v52 = vld [vmem:[#allocation124_spill] sm:$0xff] }
 0xc38   : > { %v5031_v13 = vsel %vm4991_vm1, %v11573_v12, %v11572_v57  ;;  %v11599_v57 = vld [vmem:[#allocation172_spill] sm:$0xff]  ;;  %v11600_v12 = vld [vmem:[#allocation126_spill] sm:$0xff] }
 0xc39   : > { %v4939_v42 = vpop.xlane.xlu1 %4938  ;;  %v4894_v29 = vpop.xlane.xlu0 %4893  ;;  %v5096_v62 = vsel %vm5056_vm4, %v5031_v13, %v11574_v31  ;;  %v5041_v13 = vsel %vm4991_vm1, %v11600_v12, %v11599_v57 }
 0xc3a   : > { %v5168_v7 = vsel %vm5121_vm5, %v5103_v34, %v4939_v42  ;;  %v5153_v21 = vsel %vm5121_vm5, %v5088_v33, %v4894_v29  ;;  %v11575_v34 = vld [vmem:[#allocation164_spill] sm:$0xff]  ;;  %v11576_v42 = vld [vmem:[#allocation135_spill] sm:$0xff]  ;;  %v11578_v29 = vld [vmem:[#allocation165_spill] sm:$0xff] }
 0xc3b   : > { %5233 = vst.msk [vmem:[%s10333_s14 + $0x170] sm:$0xff] %vm5186_vm6, %v5168_v7  ;;  %5218 = vst.msk [vmem:[%s10333_s14 + $0xf8] sm:$0xff] %vm5186_vm6, %v5153_v21  ;;  %v5048_v5 = vsel %vm4991_vm1, %v11576_v42, %v11575_v34  ;;  %v5033_v19 = vsel %vm4991_vm1, %v11579_v6, %v11578_v29  ;;  %v11580_v21 = vld [vmem:[#allocation74_spill] sm:$0xff]  ;;  %v11602_v34 = vld [vmem:[#allocation173_spill] sm:$0xff] }
 0xc3c   : > { %v5113_v7 = vsel %vm5056_vm4, %v5048_v5, %v11577_v40  ;;  %v5098_v27 = vsel %vm5056_vm4, %v5033_v19, %v11580_v21  ;;  %v11603_v42 = vld [vmem:[#allocation128_spill] sm:$0xff]  ;;  %v11605_v29 = vld [vmem:[#allocation174_spill] sm:$0xff] }
 0xc3d   : > { %v4945_v26 = vpop.xlane.xlu1 %4944  ;;  %v4900_v60 = vpop.xlane.xlu0 %4899  ;;  %v5043_v5 = vsel %vm4991_vm1, %v11603_v42, %v11602_v34  ;;  %v11606_v6 = vld [vmem:[#allocation130_spill] sm:$0xff] }
 0xc3e   : > { %v5170_v17 = vsel %vm5121_vm5, %v5105_v22, %v4945_v26  ;;  %v5155_v4 = vsel %vm5121_vm5, %v5090_v20, %v4900_v60  ;;  %v11581_v26 = vld [vmem:[#allocation166_spill] sm:$0xff]  ;;  %v11584_v60 = vld [vmem:[#allocation167_spill] sm:$0xff]  ;;  %v5045_v19 = vsel %vm4991_vm1, %v11606_v6, %v11605_v29 }
 0xc3f   : > { %5235 = vst.msk [vmem:[%s10333_s14 + $0x180] sm:$0xff] %vm5186_vm6, %v5170_v17  ;;  %5220 = vst.msk [vmem:[%s10333_s14 + $0x108] sm:$0xff] %vm5186_vm6, %v5155_v4  ;;  %v5050_v16 = vsel %vm4991_vm1, %v11582_v55, %v11581_v26  ;;  %v11583_v17 = vld [vmem:[#allocation60_spill] sm:$0xff]  ;;  %v5035_v49 = vsel %vm4991_vm1, %v11585_v3, %v11584_v60  ;;  %v11586_v4 = vld [vmem:[#allocation86_spill] sm:$0xff] }
 0xc40   : > { %v5115_v1 = vsel %vm5056_vm4, %v5050_v16, %v11583_v17  ;;  %v5100_v14 = vsel %vm5056_vm4, %v5035_v49, %v11586_v4  ;;  %v11608_v26 = vld [vmem:[#allocation175_spill] sm:$0xff]  ;;  %v11609_v55 = vld [vmem:[#allocation132_spill] sm:$0xff]  ;;  %v11612_v3 = vld [vmem:[#allocation134_spill] sm:$0xff] }
 0xc41   : > { %v4951_v56 = vpop.xlane.xlu1 %4950  ;;  %v4906_v54 = vpop.xlane.xlu0 %4905  ;;  %v5047_v16 = vsel %vm4991_vm1, %v11609_v55, %v11608_v26  ;;  %v11611_v60 = vld [vmem:[#allocation176_spill] sm:$0xff] }
 0xc42   : > { %v5172_v25 = vsel %vm5121_vm5, %v5107_v11, %v4951_v56  ;;  %v5157_v59 = vsel %vm5121_vm5, %v5092_v50, %v4906_v54  ;;  %v11587_v56 = vld [vmem:[#allocation168_spill] sm:$0xff]  ;;  %v11590_v54 = vld [vmem:[#allocation169_spill] sm:$0xff]  ;;  %v5049_v49 = vsel %vm4991_vm1, %v11612_v3, %v11611_v60 }
 0xc43   : > { %5237 = vst.msk [vmem:[%s10333_s14 + $0x190] sm:$0xff] %vm5186_vm6, %v5172_v25  ;;  %5222 = vst.msk [vmem:[%s10333_s14 + $0x118] sm:$0xff] %vm5186_vm6, %v5157_v59  ;;  %v5052_v0 = vsel %vm4991_vm1, %v11588_v10, %v11587_v56  ;;  %v11589_v25 = vld [vmem:[#allocation62_spill] sm:$0xff]  ;;  %v5037_v9 = vsel %vm4991_vm1, %v11591_v23, %v11590_v54  ;;  %v11592_v59 = vld [vmem:[#allocation104_spill] sm:$0xff] }
 0xc44   : > { %v5117_v24 = vsel %vm5056_vm4, %v5052_v0, %v11589_v25  ;;  %v5102_v35 = vsel %vm5056_vm4, %v5037_v9, %v11592_v59  ;;  %v11614_v56 = vld [vmem:[#allocation177_spill] sm:$0xff]  ;;  %v11615_v10 = vld [vmem:[#allocation140_spill] sm:$0xff]  ;;  %v11617_v54 = vld [vmem:[#allocation178_spill] sm:$0xff] }
 0xc45   : > { %v4957_v47 = vpop.xlane.xlu1 %4956  ;;  %v4912_v41 = vpop.xlane.xlu0 %4911  ;;  %v5051_v0 = vsel %vm4991_vm1, %v11615_v10, %v11614_v56  ;;  %v11618_v23 = vld [vmem:[#allocation142_spill] sm:$0xff] }
 0xc46   : > { %v5174_v45 = vsel %vm5121_vm5, %v5109_v18, %v4957_v47  ;;  %v5159_v61 = vsel %vm5121_vm5, %v5094_v48, %v4912_v41  ;;  %v11593_v47 = vld [vmem:[#allocation170_spill] sm:$0xff]  ;;  %v11596_v41 = vld [vmem:[#allocation171_spill] sm:$0xff]  ;;  %v5053_v9 = vsel %vm4991_vm1, %v11618_v23, %v11617_v54 }
 0xc47   : > { %5239 = vst.msk [vmem:[%s10333_s14 + $0x1a0] sm:$0xff] %vm5186_vm6, %v5174_v45  ;;  %5224 = vst.msk [vmem:[%s10333_s14 + $0x128] sm:$0xff] %vm5186_vm6, %v5159_v61  ;;  %v5054_v63 = vsel %vm4991_vm1, %v11594_v37, %v11593_v47  ;;  %v11595_v45 = vld [vmem:[#allocation63_spill] sm:$0xff]  ;;  %v5039_v2 = vsel %vm4991_vm1, %v11597_v52, %v11596_v41  ;;  %v11621_v37 = vld [vmem:[#allocation144_spill] sm:$0xff] }
 0xc48   : > { %v5119_v51 = vsel %vm5056_vm4, %v5054_v63, %v11595_v45  ;;  %v11598_v61 = vld [vmem:[#allocation107_spill] sm:$0xff] }
 0xc49   : > { %v4963_v15 = vpop.xlane.xlu1 %4962  ;;  %v4918_v43 = vpop.xlane.xlu0 %4917  ;;  %v5104_v46 = vsel %vm5056_vm4, %v5039_v2, %v11598_v61  ;;  %v11620_v47 = vld [vmem:[#allocation179_spill] sm:$0xff] }
 0xc4a   : > { %v5176_v44 = vsel %vm5121_vm5, %v5111_v58, %v4963_v15  ;;  %v5161_v8 = vsel %vm5121_vm5, %v5096_v62, %v4918_v43  ;;  %v5055_v63 = vsel %vm4991_vm1, %v11621_v37, %v11620_v47 }
 0xc4b   : > { %5241 = vst.msk [vmem:[%s10333_s14 + $0x1b0] sm:$0xff] %vm5186_vm6, %v5176_v44  ;;  %5226 = vst.msk [vmem:[%s10333_s14 + $0x138] sm:$0xff] %vm5186_vm6, %v5161_v8  ;;  %v11601_v44 = vld [vmem:[#allocation65_spill] sm:$0xff] }
 0xc4c   : > { %v5106_v31 = vsel %vm5056_vm4, %v5041_v13, %v11601_v44  ;;  %v11604_v8 = vld [vmem:[#allocation109_spill] sm:$0xff] }
 0xc4d   : > { %v4969_v33 = vpop.xlane.xlu1 %4968  ;;  %v4924_v22 = vpop.xlane.xlu0 %4923  ;;  %v5108_v40 = vsel %vm5056_vm4, %v5043_v5, %v11604_v8 }
 0xc4e   : > { %v5178_v32 = vsel %vm5121_vm5, %v5113_v7, %v4969_v33  ;;  %v5163_v36 = vsel %vm5121_vm5, %v5098_v27, %v4924_v22 }
 0xc4f   : > { %5243 = vst.msk [vmem:[%s10333_s14 + $0x1c0] sm:$0xff] %vm5186_vm6, %v5178_v32  ;;  %5228 = vst.msk [vmem:[%s10333_s14 + $0x148] sm:$0xff] %vm5186_vm6, %v5163_v36  ;;  %v11607_v32 = vld [vmem:[#allocation67_spill] sm:$0xff] }
 0xc50   : > { %v5110_v21 = vsel %vm5056_vm4, %v5045_v19, %v11607_v32  ;;  %v11610_v36 = vld [vmem:[#allocation47_spill] sm:$0xff] }
 0xc51   : > { %v4975_v20 = vpop.xlane.xlu1 %4974  ;;  %v4930_v11 = vpop.xlane.xlu0 %4929  ;;  %v5112_v17 = vsel %vm5056_vm4, %v5047_v16, %v11610_v36 }
 0xc52   : > { %v5180_v30 = vsel %vm5121_vm5, %v5115_v1, %v4975_v20  ;;  %v5165_v28 = vsel %vm5121_vm5, %v5100_v14, %v4930_v11 }
 0xc53   : > { %5245 = vst.msk [vmem:[%s10333_s14 + $0x1d0] sm:$0xff] %vm5186_vm6, %v5180_v30  ;;  %5230 = vst.msk [vmem:[%s10333_s14 + $0x158] sm:$0xff] %vm5186_vm6, %v5165_v28  ;;  %v11613_v30 = vld [vmem:[#allocation70_spill] sm:$0xff]  ;;  %v11616_v28 = vld [vmem:[#allocation81_spill] sm:$0xff] }
 0xc54   : > { %v5114_v4 = vsel %vm5056_vm4, %v5049_v49, %v11613_v30  ;;  %v5116_v25 = vsel %vm5056_vm4, %v5051_v0, %v11616_v28 }
 0xc55   : > { %v4981_v50 = vpop.xlane.xlu1 %4980  ;;  %v4936_v18 = vpop.xlane.xlu0 %4935 }
 0xc56   : > { %v5182_v38 = vsel %vm5121_vm5, %v5117_v24, %v4981_v50  ;;  %v5167_v39 = vsel %vm5121_vm5, %v5102_v35, %v4936_v18 }
 0xc57   : > { %5247 = vst.msk [vmem:[%s10333_s14 + $0x1e0] sm:$0xff] %vm5186_vm6, %v5182_v38  ;;  %5232 = vst.msk [vmem:[%s10333_s14 + $0x168] sm:$0xff] %vm5186_vm6, %v5167_v39  ;;  %v11619_v38 = vld [vmem:[#allocation93_spill] sm:$0xff]  ;;  %v11622_v39 = vld [vmem:[#allocation96_spill] sm:$0xff] }
 0xc58   : > { %v5118_v59 = vsel %vm5056_vm4, %v5053_v9, %v11619_v38  ;;  %v5120_v45 = vsel %vm5056_vm4, %v5055_v63, %v11622_v39 }
 0xc59   : > { %v4987_v48 = vpop.xlane.xlu1 %4986  ;;  %v4942_v58 = vpop.xlane.xlu0 %4941 }
 0xc5a   : > { %v5184_v53 = vsel %vm5121_vm5, %v5119_v51, %v4987_v48  ;;  %v5169_v15 = vsel %vm5121_vm5, %v5104_v46, %v4942_v58 }
 0xc5b   : > { %5249 = vst.msk [vmem:[%s10333_s14 + $0x1f0] sm:$0xff] %vm5186_vm6, %v5184_v53  ;;  %5234 = vst.msk [vmem:[%s10333_s14 + $0x178] sm:$0xff] %vm5186_vm6, %v5169_v15 }
 0xc5d   : > { %v4948_v62 = vpop.xlane.xlu0 %4947 }
 0xc5e   : > { %v5171_v43 = vsel %vm5121_vm5, %v5106_v31, %v4948_v62 }
 0xc5f   : > { %5236 = vst.msk [vmem:[%s10333_s14 + $0x188] sm:$0xff] %vm5186_vm6, %v5171_v43 }
 0xc61   : > { %v4954_v7 = vpop.xlane.xlu0 %4953 }
 0xc62   : > { %v5173_v33 = vsel %vm5121_vm5, %v5108_v40, %v4954_v7 }
 0xc63   : > { %5238 = vst.msk [vmem:[%s10333_s14 + $0x198] sm:$0xff] %vm5186_vm6, %v5173_v33 }
 0xc65   : > { %v4960_v27 = vpop.xlane.xlu0 %4959 }
 0xc66   : > { %v5175_v22 = vsel %vm5121_vm5, %v5110_v21, %v4960_v27 }
 0xc67   : > { %5240 = vst.msk [vmem:[%s10333_s14 + $0x1a8] sm:$0xff] %vm5186_vm6, %v5175_v22 }
 0xc69   : > { %v4966_v1 = vpop.xlane.xlu0 %4965 }
 0xc6a   : > { %v5177_v20 = vsel %vm5121_vm5, %v5112_v17, %v4966_v1 }
 0xc6b   : > { %5242 = vst.msk [vmem:[%s10333_s14 + $0x1b8] sm:$0xff] %vm5186_vm6, %v5177_v20 }
 0xc6d   : > { %v4972_v14 = vpop.xlane.xlu0 %4971 }
 0xc6e   : > { %v5179_v11 = vsel %vm5121_vm5, %v5114_v4, %v4972_v14 }
 0xc6f   : > { %5244 = vst.msk [vmem:[%s10333_s14 + $0x1c8] sm:$0xff] %vm5186_vm6, %v5179_v11 }
 0xc71   : > { %v4978_v24 = vpop.xlane.xlu0 %4977 }
 0xc72   : > { %v5181_v50 = vsel %vm5121_vm5, %v5116_v25, %v4978_v24 }
 0xc73   : > { %5246 = vst.msk [vmem:[%s10333_s14 + $0x1d8] sm:$0xff] %vm5186_vm6, %v5181_v50 }
 0xc75   : > { %v4984_v35 = vpop.xlane.xlu0 %4983 }
 0xc76   : > { %v5183_v18 = vsel %vm5121_vm5, %v5118_v59, %v4984_v35 }
 0xc77   : > { %5248 = vst.msk [vmem:[%s10333_s14 + $0x1e8] sm:$0xff] %vm5186_vm6, %v5183_v18 }
 0xc79   : > { %v4990_v51 = vpop.xlane.xlu0 %4989 }
 0xc7a   : > { %v5185_v48 = vsel %vm5121_vm5, %v5120_v45, %v4990_v51 }
 0xc7b   : > { %5250 = vst.msk [vmem:[%s10333_s14 + $0x1f8] sm:$0xff] %vm5186_vm6, %v5185_v48 }
 0xc7c   : > { %6855 = shalt.err (!%p6852_p11)
}
 0xc7d   : > { %s6856_s14 = scalar_lea.hbm %s10885_s12, 8192  ;;  %s6860_s19 = scalar_lea.hbm %s11623_s10, 16384 }
 0xc7e   : > { %p6857_p1 = scmp.ne.s32.totalorder %s10885_s12, %s6856_s14  ;;  %p6861_p5 = scmp.lt.u32.totalorder %s10885_s12, %s11623_s10 }
 0xc7f   : > { %p6862_p4 = scmp.lt.u32.totalorder %s6860_s19, %s6856_s14  ;;  %p6864_p13 = scmp.lt.u32.totalorder %s6856_s14, %s10885_s12 }
 0xc80   : > { %p6858_p6 = pnand %p6857_p1, %p11492_p2 }
 0xc81   : > { %p6863_p0 = por %p6862_p4, %p6861_p5 }
 0xc82   : > { %p6859_p3 = pneg %p6858_p6 }
 0xc83   : > { %p6865_p7 = por %p6864_p13, %p6863_p0 }
 0xc85   : > { %p6866_p9 = pnand %p6865_p7, %p6859_p3 }
 0xc87   : > { %6869 = shalt.err (!%p6866_p9)
}
 0xc88   : > { %6509 = dma.vmem_to_hbm [thread:$0]  (%p11492_p2), %s10887_s8, 8192, %s10885_s12, %s5257_s18, %s6942_s30, %s6942_s30, %s6943_s27  }
 0xc89 PF: > { %s11624_s13 = sld [smem:[#allocation23_spill]]  ;;  %s11625_s21 = sld [smem:[#allocation25_spill]] }
 0xc8a   : > { %s11626_s26 = sld [smem:[#allocation24_spill]] }
 0xc8f   : > { %s5301_s11 = sand.u32 1, %s11624_s13   ;;  %p11627_p12 = scmp.ne.s32.totalorder %s11625_s21, 0 }
 0xc90   : > { %p11628_p8 = scmp.ge.s32.totalorder %s11626_s26, 2  ;;  %s5302_s3 = scalar_lea.sflag [#allocation4], %s5301_s11 }
 0xc92   : > { %p6536_p10 = pnand %p11628_p8, %p11627_p12 }
 0xc94   : > { %6903 = dma.done.wait (!%p6536_p10), %s5302_s3, 8192  }
 0xc95   : > { %6905 = vsyncadd (!%p6536_p10), %s5302_s3, 4294959104  ;;  %s5311_s25 = scalar_lea.sflag [#allocation16], %s5301_s11 }
 0xc96   : > { %6907 = dma.done.wait (!%p6536_p10), %s5311_s25, 8192  }
 0xc97   : > { %6909 = vsyncadd (!%p6536_p10), %s5311_s25, 4294959104  ;;  %s11629_s30 = sld [smem:[#allocation26_spill]]  ;;  %s11630_s20 = sld [smem:[#allocation27_spill]] }
 0xc98   : > { %s11631_s27 = smov %s6916_s28  ;;  %s11632_s28 = smov %s6920_s29 }
 0xc9d   : > { %p30_p2 = scmp.ge.s32.totalorder %s11629_s30, 4   ;;  %s11633_s29 = smov %s11630_s20 }
 0xc9f   :  { %32 = sbr.rel (!%p30_p2) target bundleno = 17 (0x11), region = 150 }
 0xca6   :  { %5316 = vsyncpa [#allocation3], 1 }
 0xca7   :  { %5318 = vsyncpa [#allocation3 + $0x1], 1 }
 0xca8   :  { %5319 = vsyncpa [#allocation6], 1 }
 0xca9   :  { %5321 = vsyncpa [#allocation6 + $0x1], 1 }
 0xcaa   :  { %5322 = vsyncpa [#allocation9], 1 }
 0xcab   :  { %5323 = vsyncpa [#allocation12], 1 }
 0xcac   :  { %5324 = vsyncpa [#allocation4], 1 }
 0xcad   :  { %5326 = vsyncpa [#allocation4 + $0x1], 1 }
 0xcae   :  { %5327 = vsyncpa [#allocation16], 1 }
 0xcaf   :  { %5329 = vsyncpa [#allocation16 + $0x1], 1 }

</bundles_post_ra>
